<compile_context>
chip_gen: v7x
topology: tpu7x:2x2x1
jax: 0.10.0
libtpu: 0.0.40
codegen_flags: <defaults>
</compile_context>

<pallas_src>
import math

import numpy as np
import jax
import jax.numpy as jnp
from jax.experimental import pallas as pl
from jax.experimental.pallas import tpu as pltpu

# ----------------------------- configuration -----------------------------
B = 2                            # batch
C_IN, IMG = 3, 16                # image channels / spatial size
HW1 = IMG * IMG                  # 256 positions before the transition pool
HW2 = (IMG // 2) ** 2            # 64 positions after the 2x2 average pool
PATCH_F = 32                     # 3*3*C_IN = 27 im2col features, padded to 32
G_STEM = 32                      # stem output channels
GROWTH = 16                      # dense-block growth rate
N_L1, N_L2 = 3, 4                # layers per dense block
C_TR = 64                        # transition output channels
IMG_FEAT = C_TR + N_L2 * GROWTH  # 128 (stand-in for DenseNet121's 1024)
CPAD = 128                       # lane padding of the dense-block buffers

SEQ, VOCAB = 8, 100
DB, HB = 32, 4                   # BERT hidden / heads
DH = DB // HB                    # 8
FB = 4 * DB                      # 128 BERT FFN dim

CLS_H1, CLS_H2, NUM_CLASSES = 512, 256, 2
LOGIT_PAD = 128                  # lane-dense logits slab width
ROW_PAD = 8                      # sublane padding of per-example feature rows
LN_EPS = 1e-12

_VMEM = pl.BlockSpec(memory_space=pltpu.MemorySpace.VMEM)


# ----------------------------- slab layouts -----------------------------
# (1, C) scale / shift / bias vectors: one f32 slab, one vector per row.
VEC_W = 512
VEC_ENTRIES = (
    ("img_stem_scale", G_STEM), ("img_stem_shift", G_STEM),
    *[(f"img_b1_{l}_{s}", CPAD) for l in range(N_L1) for s in ("scale", "shift")],
    ("img_tr_scale", CPAD), ("img_tr_shift", CPAD),
    *[(f"img_b2_{l}_{s}", CPAD) for l in range(N_L2) for s in ("scale", "shift")],
    ("img_bn5_scale", CPAD), ("img_bn5_shift", CPAD),
    ("bert_emb_ln_scale", DB), ("bert_emb_ln_shift", DB),
    ("bert_qkv_b", 3 * DB), ("bert_o_b", DB),
    ("bert_ln1_scale", DB), ("bert_ln1_shift", DB),
    ("bert_ff1_b", FB), ("bert_ff2_b", DB),
    ("bert_ln2_scale", DB), ("bert_ln2_shift", DB),
    ("cls_b1", CLS_H1), ("cls_b2", CLS_H2), ("cls_b3", LOGIT_PAD),
)
VEC_ROW = {name: i for i, (name, _) in enumerate(VEC_ENTRIES)}
VEC_WIDTH = {name: w for name, w in VEC_ENTRIES}
VEC_ROWS_PAD = -(-len(VEC_ENTRIES) // 8) * 8


def _build_mat_layout(entries):
    """Row-pack matrices into one slab; row offsets aligned to 16 sublanes."""
    layout, r = {}, 0
    for name, nr, nc in entries:
        layout[name] = (r, nr, nc)
        r += -(-nr // 16) * 16
    return layout, -(-r // 16) * 16


# bf16 weight slabs, grouped by lane width (each entry: rows, cols of the view
# the kernel reads; arrays narrower than that are zero-padded at pack time).
M128_ENTRIES = (
    ("img_stem_w", PATCH_F, G_STEM),
    ("dense_w", CPAD, (N_L1 + N_L2) * GROWTH),   # 7 conv1x1 weights, K padded
    ("img_tr_w", CPAD, C_TR),
    ("gpool", ROW_PAD, B * HW2),                 # const global-avg-pool matrix
    ("pos_emb", B * SEQ, DB),                    # pos+type emb, pre-tiled on B
    ("bert_qkv_w", DB, 3 * DB),
    ("bert_o_w", DB, DB),
    ("bert_ff1_w", DB, FB),
    ("bert_ff2_w", FB, DB),
    ("cls_sel", ROW_PAD, B * SEQ),               # const CLS-row selector
    ("cls_w3", CLS_H2, LOGIT_PAD),               # lane-padded logits proj
)
M256_ENTRIES = (
    ("pool2", HW2, HW1),                         # shared 2x2 avg-pool block
    ("cls_w2", CLS_H1, CLS_H2),
)
M512_ENTRIES = (
    ("cls_w1_img", IMG_FEAT, CLS_H1),
    ("cls_w1_bert", DB, CLS_H1),
)
M128_LAYOUT, M128_ROWS = _build_mat_layout(M128_ENTRIES)
M256_LAYOUT, M256_ROWS = _build_mat_layout(M256_ENTRIES)
M512_LAYOUT, M512_ROWS = _build_mat_layout(M512_ENTRIES)


# ----------------------------- constant matrices -----------------------------
def _make_pool2():
    """Shared [HW2, HW1] matrix: 2x2 average pool of one example as a matmul."""
    h2 = IMG // 2
    m = np.zeros((HW2, HW1), np.float32)
    for i in range(h2):
        for j in range(h2):
            r = i * h2 + j
            for di in range(2):
                for dj in range(2):
                    m[r, (2 * i + di) * IMG + (2 * j + dj)] = 0.25
    return m


def _make_gpool():
    """[ROW_PAD, B*HW2]: per-example global average pool (rows padded to 8)."""
    m = np.zeros((ROW_PAD, B * HW2), np.float32)
    for b in range(B):
        m[b, b * HW2:(b + 1) * HW2] = 1.0 / HW2
    return m


def _make_cls_sel():
    """[ROW_PAD, B*SEQ]: selects the CLS (position-0) row of each example."""
    m = np.zeros((ROW_PAD, B * SEQ), np.float32)
    for b in range(B):
        m[b, b * SEQ] = 1.0
    return m


# ----------------------------- parameters & packing -----------------------------
def init_params(key):
    """Synthetic weights with real (unpadded) shapes; pretrained ckpts N/A."""
    keys = iter(jax.random.split(key, 64))

    def w(shape):
        return jax.random.normal(next(keys), shape, jnp.float32) * 0.02

    p = {}
    p["img_stem_w"] = w((PATCH_F, G_STEM))
    p["img_stem_scale"] = jnp.ones((G_STEM,), jnp.float32)
    p["img_stem_shift"] = jnp.zeros((G_STEM,), jnp.float32)
    c = G_STEM
    for l in range(N_L1):
        p[f"img_b1_{l}_scale"] = jnp.ones((c,), jnp.float32)
        p[f"img_b1_{l}_shift"] = jnp.zeros((c,), jnp.float32)
        p[f"img_b1_{l}_w"] = w((c, GROWTH))
        c += GROWTH
    p["img_tr_scale"] = jnp.ones((c,), jnp.float32)
    p["img_tr_shift"] = jnp.zeros((c,), jnp.float32)
    p["img_tr_w"] = w((c, C_TR))
    c = C_TR
    for l in range(N_L2):
        p[f"img_b2_{l}_scale"] = jnp.ones((c,), jnp.float32)
        p[f"img_b2_{l}_shift"] = jnp.zeros((c,), jnp.float32)
        p[f"img_b2_{l}_w"] = w((c, GROWTH))
        c += GROWTH
    p["img_bn5_scale"] = jnp.ones((c,), jnp.float32)
    p["img_bn5_shift"] = jnp.zeros((c,), jnp.float32)

    p["bert_word_emb"] = w((VOCAB, DB))
    p["bert_pos_emb"] = w((SEQ, DB))
    p["bert_emb_ln_scale"] = jnp.ones((DB,), jnp.float32)
    p["bert_emb_ln_shift"] = jnp.zeros((DB,), jnp.float32)
    p["bert_qkv_w"] = w((DB, 3 * DB)); p["bert_qkv_b"] = jnp.zeros((3 * DB,), jnp.float32)
    p["bert_o_w"] = w((DB, DB)); p["bert_o_b"] = jnp.zeros((DB,), jnp.float32)
    p["bert_ln1_scale"] = jnp.ones((DB,), jnp.float32)
    p["bert_ln1_shift"] = jnp.zeros((DB,), jnp.float32)
    p["bert_ff1_w"] = w((DB, FB)); p["bert_ff1_b"] = jnp.zeros((FB,), jnp.float32)
    p["bert_ff2_w"] = w((FB, DB)); p["bert_ff2_b"] = jnp.zeros((DB,), jnp.float32)
    p["bert_ln2_scale"] = jnp.ones((DB,), jnp.float32)
    p["bert_ln2_shift"] = jnp.zeros((DB,), jnp.float32)

    p["cls_w1"] = w((IMG_FEAT + DB, CLS_H1)); p["cls_b1"] = jnp.zeros((CLS_H1,), jnp.float32)
    p["cls_w2"] = w((CLS_H1, CLS_H2)); p["cls_b2"] = jnp.zeros((CLS_H2,), jnp.float32)
    p["cls_w3"] = w((CLS_H2, NUM_CLASSES)); p["cls_b3"] = jnp.zeros((NUM_CLASSES,), jnp.float32)
    return p


def _pack_dense_w(p):
    """Column-pack the 7 dense-layer 1x1 conv weights, K zero-padded to 128."""
    w = np.zeros((CPAD, (N_L1 + N_L2) * GROWTH), np.float32)
    col = 0
    for l in range(N_L1):
        a = np.asarray(p[f"img_b1_{l}_w"], np.float32)
        w[:a.shape[0], col:col + GROWTH] = a
        col += GROWTH
    for l in range(N_L2):
        a = np.asarray(p[f"img_b2_{l}_w"], np.float32)
        w[:a.shape[0], col:col + GROWTH] = a
        col += GROWTH
    return w


def _pack_mat(layout, total_rows, width, arrays):
    slab = np.zeros((total_rows, width), np.float32)
    for name, (r0, _, _) in layout.items():
        a = np.asarray(arrays[name], np.float32)
        slab[r0:r0 + a.shape[0], :a.shape[1]] = a
    return jnp.asarray(slab).astype(jnp.bfloat16)


def pack_params(p):
    """Host-side one-time packing into 4 slabs (cuts kernel DMA count ~58 -> ~8)."""
    vec = np.zeros((VEC_ROWS_PAD, VEC_W), np.float32)
    for name, _ in VEC_ENTRIES:
        a = np.asarray(p[name], np.float32).reshape(-1)
        vec[VEC_ROW[name], :a.shape[0]] = a

    m128 = {
        "img_stem_w": p["img_stem_w"],
        "dense_w": _pack_dense_w(p),
        "img_tr_w": p["img_tr_w"],
        "gpool": _make_gpool(),
        "pos_emb": np.tile(np.asarray(p["bert_pos_emb"], np.float32), (B, 1)),
        "bert_qkv_w": p["bert_qkv_w"],
        "bert_o_w": p["bert_o_w"],
        "bert_ff1_w": p["bert_ff1_w"],
        "bert_ff2_w": p["bert_ff2_w"],
        "cls_sel": _make_cls_sel(),
        "cls_w3": p["cls_w3"],                         # lane-padded to 128 cols
    }
    m256 = {"pool2": _make_pool2(), "cls_w2": p["cls_w2"]}
    m512 = {"cls_w1_img": p["cls_w1"][:IMG_FEAT], "cls_w1_bert": p["cls_w1"][IMG_FEAT:]}

    return {
        "vec": jnp.asarray(vec),
        "m128": _pack_mat(M128_LAYOUT, M128_ROWS, 128, m128),
        "m256": _pack_mat(M256_LAYOUT, M256_ROWS, 256, m256),
        "m512": _pack_mat(M512_LAYOUT, M512_ROWS, 512, m512),
        "word_emb": p["bert_word_emb"],                # gathered XLA-side
    }


# ----------------------------- in-kernel helpers -----------------------------
def _mm(a, b):
    """MXU matmul: bf16 operands, f32 accumulation."""
    return jnp.dot(a.astype(jnp.bfloat16), b.astype(jnp.bfloat16),
                   preferred_element_type=jnp.float32)


def _layernorm(x, g, b):
    mu = jnp.mean(x, axis=-1, keepdims=True)
    var = jnp.mean(jnp.square(x - mu), axis=-1, keepdims=True)
    return (x - mu) * jax.lax.rsqrt(var + LN_EPS) * g + b


# ----------------------------- fused forward kernel -----------------------------
def _fused_forward_kernel(patches_ref, we_ref, mask_ref,
                          vec_ref, m128_ref, m256_ref, m512_ref,
                          out_ref, buf1, buf2):
    def V(name):                                  # (1, width) f32 vector row
        r = VEC_ROW[name]
        return vec_ref[r:r + 1, 0:VEC_WIDTH[name]]

    def M(ref, layout, name):                     # static sub-block of a slab
        r0, nr, nc = layout[name]
        return ref[r0:r0 + nr, 0:nc]

    M1 = lambda n: M(m128_ref, M128_LAYOUT, n)
    M2 = lambda n: M(m256_ref, M256_LAYOUT, n)
    M5 = lambda n: M(m512_ref, M512_LAYOUT, n)

    def dense_w(i):                               # i-th 1x1 conv weight [128,16]
        r0, _, _ = M128_LAYOUT["dense_w"]
        return m128_ref[r0:r0 + CPAD, i * GROWTH:(i + 1) * GROWTH]

    # zero the concat buffers so never-written lanes stay exactly 0
    buf1[...] = jnp.zeros_like(buf1)
    buf2[...] = jnp.zeros_like(buf2)

    # ================= DenseNet-style image branch =================
    # stem: 3x3 conv (im2col patches) -> BN -> ReLU            [B*HW1, 32]
    stem = _mm(patches_ref[...], M1("img_stem_w"))
    stem = jnp.maximum(stem * V("img_stem_scale") + V("img_stem_shift"), 0.0)
    buf1[:, 0:G_STEM] = stem

    c = G_STEM
    for l in range(N_L1):                         # dense block 1 (growth 16)
        y = jnp.maximum(buf1[...] * V(f"img_b1_{l}_scale")
                        + V(f"img_b1_{l}_shift"), 0.0)
        buf1[:, c:c + GROWTH] = _mm(y, dense_w(l))
        c += GROWTH

    # transition: BN-ReLU-conv1x1 -> per-example 2x2 avg pool (shared matrix)
    y = jnp.maximum(buf1[...] * V("img_tr_scale") + V("img_tr_shift"), 0.0)
    t = _mm(y, M1("img_tr_w"))                    # [B*HW1, 64]
    pool2 = M2("pool2")                           # bf16 [64, 256]
    for b in range(B):
        buf2[b * HW2:(b + 1) * HW2, 0:C_TR] = _mm(t[b * HW1:(b + 1) * HW1, :], pool2.T) \
            if False else _mm(pool2, t[b * HW1:(b + 1) * HW1, :])

    c = C_TR
    for l in range(N_L2):                         # dense block 2 (growth 16)
        y = jnp.maximum(buf2[...] * V(f"img_b2_{l}_scale")
                        + V(f"img_b2_{l}_shift"), 0.0)
        buf2[:, c:c + GROWTH] = _mm(y, dense_w(N_L1 + l))
        c += GROWTH

    # final BN -> ReLU -> global average pool: ONE [8,128]@[128,128] matmul
    feat = jnp.maximum(buf2[...] * V("img_bn5_scale") + V("img_bn5_shift"), 0.0)
    img_pooled = _mm(M1("gpool"), feat)           # [8, IMG_FEAT=128]

    # ================= BERT branch (1 synthetic encoder layer) =================
    # word embeddings gathered XLA-side; pos+type embeddings pre-tiled per batch
    e = we_ref[...] + M1("pos_emb").astype(jnp.float32)           # [B*S, DB]
    x2 = _layernorm(e, V("bert_emb_ln_scale"), V("bert_emb_ln_shift"))
    qkv = _mm(x2, M1("bert_qkv_w")) + V("bert_qkv_b")             # [B*S, 3*DB]

    def split_heads(x):                           # [B*S, DB] -> [B*HB, S, DH]
        parts = [x[b * SEQ:(b + 1) * SEQ, h * DH:(h + 1) * DH]
                 for b in range(B) for h in range(HB)]
        return jnp.concatenate(parts, axis=0).reshape(B * HB, SEQ, DH)

    q = split_heads(qkv[:, 0:DB])
    k = split_heads(qkv[:, DB:2 * DB])
    v = split_heads(qkv[:, 2 * DB:3 * DB])

    s = jnp.einsum("nqd,nkd->nqk", q, k,
                   preferred_element_type=jnp.float32) * (1.0 / math.sqrt(DH))
    s = s + mask_ref[...]                         # f32 additive mask [B*HB,1,S]
    m = jnp.max(s, axis=-1, keepdims=True)
    p = jnp.exp(s - m)
    denom = jnp.sum(p, axis=-1, keepdims=True)
    o = jnp.einsum("nqk,nkd->nqd", p, v, preferred_element_type=jnp.float32)
    o = o * pl.reciprocal(denom, approx=True)     # EUP slot

    ctx = jnp.concatenate(                         # back to [B*S, DB]
        [jnp.concatenate([o[b * HB + h] for h in range(HB)], axis=1)
         for b in range(B)], axis=0)
    attn = _mm(ctx, M1("bert_o_w")) + V("bert_o_b")
    h1 = _layernorm(x2 + attn, V("bert_ln1_scale"), V("bert_ln1_shift"))
    f1 = jax.nn.gelu(_mm(h1, M1("bert_ff1_w")) + V("bert_ff1_b"),
                     approximate=True)
    f2 = _mm(f1, M1("bert_ff2_w")) + V("bert_ff2_b")
    hb = _layernorm(h1 + f2, V("bert_ln2_scale"), V("bert_ln2_shift"))
    bert_cls = _mm(M1("cls_sel"), hb)             # [8, DB] CLS rows

    # ================= classifier head (dropout = identity, eval) =================
    h = (V("cls_b1") + _mm(img_pooled, M5("cls_w1_img"))
         + _mm(bert_cls, M5("cls_w1_bert")))
    h = jnp.maximum(h, 0.0)                                       # [8, 512]
    h = jnp.maximum(_mm(h, M2("cls_w2")) + V("cls_b2"), 0.0)      # [8, 256]
    out_ref[...] = _mm(h, M1("cls_w3")) + V("cls_b3")             # [8, 128]


# ----------------------------- wrapper -----------------------------
def _im2col3x3(img):
    """NCHW image -> [B*H*W, 9*C] patches for a 3x3 'same' convolution."""
    b, c, hgt, wid = img.shape
    xp = jnp.pad(img, ((0, 0), (0, 0), (1, 1), (1, 1)))
    cols = [xp[:, :, dy:dy + hgt, dx:dx + wid]
            for dy in range(3) for dx in range(3)]
    patches = jnp.concatenate(cols, axis=1)                       # [B, 9C, H, W]
    return patches.transpose(0, 2, 3, 1).reshape(b * hgt * wid, 9 * c)


def densenet121_bert_classifier(packed, input_ids, attention_mask, pixel_values):
    # Host/XLA-side INPUT prep only; everything else is one fused kernel.
    patches = _im2col3x3(pixel_values)                            # [B*HW1, 27]
    patches = jnp.pad(patches, ((0, 0), (0, PATCH_F - patches.shape[1])))
    we = packed["word_emb"][input_ids.reshape(-1)]                # XLA gather [B*S, DB]
    neg = (1.0 - attention_mask.astype(jnp.float32)) * -1e9       # [B, S]
    mask_bias = jnp.broadcast_to(neg[:, None, None, :],
                                 (B, HB, 1, SEQ)).reshape(B * HB, 1, SEQ)

    out = pl.pallas_call(
        _fused_forward_kernel,
        out_shape=jax.ShapeDtypeStruct((ROW_PAD, LOGIT_PAD), jnp.float32),
        in_specs=[_VMEM] * 7,
        out_specs=_VMEM,
        scratch_shapes=[pltpu.VMEM((B * HW1, CPAD), jnp.float32),   # dense block 1
                        pltpu.VMEM((B * HW2, CPAD), jnp.float32)],  # dense block 2
    )(patches, we, mask_bias,
      packed["vec"], packed["m128"], packed["m256"], packed["m512"])
    return out[:B, :NUM_CLASSES]


# ----------------------------- main -----------------------------
if __name__ == "__main__":
    key = jax.random.PRNGKey(0)
    k_param, k_pix, k_ids = jax.random.split(key, 3)

    params = init_params(k_param)
    packed = pack_params(params)

    pixel_values = jax.random.normal(k_pix, (B, C_IN, IMG, IMG), jnp.float32)
    input_ids = jax.random.randint(k_ids, (B, SEQ), 0, VOCAB, dtype=jnp.int32)
    attention_mask = jnp.array([[1] * SEQ,
                                [1] * 5 + [0] * 3], dtype=jnp.int32)

    fwd = jax.jit(densenet121_bert_classifier)
    logits = jax.block_until_ready(
        fwd(packed, input_ids, attention_mask, pixel_values))

    assert logits.shape == (B, NUM_CLASSES)
    assert bool(jnp.all(jnp.isfinite(logits)))
    print("KERNEL_OK")
</pallas_src>

<mosaic_0001>
module attributes {stable_mosaic.version = 11 : i64} {
  func.func @_fused_forward_kernel(%arg0: memref<512x32xf32, #tpu.memory_space<vmem>>, %arg1: memref<16x32xf32, #tpu.memory_space<vmem>>, %arg2: memref<8x1x8xf32, #tpu.memory_space<vmem>>, %arg3: memref<40x512xf32, #tpu.memory_space<vmem>>, %arg4: memref<816x128xbf16, #tpu.memory_space<vmem>>, %arg5: memref<576x256xbf16, #tpu.memory_space<vmem>>, %arg6: memref<160x512xbf16, #tpu.memory_space<vmem>>, %arg7: memref<8x128xf32, #tpu.memory_space<vmem>>, %arg8: memref<512x128xf32, #tpu.memory_space<vmem>>, %arg9: memref<128x128xf32, #tpu.memory_space<vmem>>) attributes {dimension_semantics = [], scalar_prefetch = 0 : i64, scratch_operands = 2 : i64, tpu.core_type = #tpu.core_type<tc>} {
    %cst = arith.constant 0.000000e+00 : f32
    %0 = vector.broadcast %cst : f32 to vector<512x128xf32>
    %c0 = arith.constant 0 : index
    %c0_0 = arith.constant 0 : index
    %1 = vector.load %arg8[%c0, %c0_0] : memref<512x128xf32, #tpu.memory_space<vmem>>, vector<512x128xf32>
    tpu.vector_store %arg8[%c0, %c0_0], %0 {strides = array<i32>} : memref<512x128xf32, #tpu.memory_space<vmem>>, vector<512x128xf32>,
    %cst_1 = arith.constant 0.000000e+00 : f32
    %2 = vector.broadcast %cst_1 : f32 to vector<128x128xf32>
    %c0_2 = arith.constant 0 : index
    %c0_3 = arith.constant 0 : index
    %3 = vector.load %arg9[%c0_2, %c0_3] : memref<128x128xf32, #tpu.memory_space<vmem>>, vector<128x128xf32>
    tpu.vector_store %arg9[%c0_2, %c0_3], %2 {strides = array<i32>} : memref<128x128xf32, #tpu.memory_space<vmem>>, vector<128x128xf32>,
    %c0_4 = arith.constant 0 : index
    %c0_5 = arith.constant 0 : index
    %4 = vector.load %arg0[%c0_4, %c0_5] : memref<512x32xf32, #tpu.memory_space<vmem>>, vector<512x32xf32>
    %c0_6 = arith.constant 0 : index
    %c0_7 = arith.constant 0 : index
    %5 = vector.load %arg4[%c0_6, %c0_7] : memref<816x128xbf16, #tpu.memory_space<vmem>>, vector<32x32xbf16>
    %6 = arith.truncf %4 : vector<512x32xf32> to vector<512x32xbf16>
    %cst_8 = arith.constant dense<0.000000e+00> : vector<512x32xf32>
    %7 = tpu.matmul %6, %5, %cst_8 {dimension_numbers = #tpu.dot_dimension_numbers<[1], [0], [0], [1], [0, 0, 1, 1], [], []>} : vector<512x32xbf16>, vector<32x32xbf16>, vector<512x32xf32> -> vector<512x32xf32>
    %c0_9 = arith.constant 0 : index
    %c0_10 = arith.constant 0 : index
    %8 = vector.load %arg3[%c0_9, %c0_10] : memref<40x512xf32, #tpu.memory_space<vmem>>, vector<1x32xf32>
    %9 = vector.broadcast %8 : vector<1x32xf32> to vector<512x32xf32>
    %10 = arith.mulf %7, %9 : vector<512x32xf32>
    %c1 = arith.constant 1 : index
    %c0_11 = arith.constant 0 : index
    %11 = vector.load %arg3[%c1, %c0_11] : memref<40x512xf32, #tpu.memory_space<vmem>>, vector<1x32xf32>
    %12 = vector.broadcast %11 : vector<1x32xf32> to vector<512x32xf32>
    %13 = arith.addf %10, %12 : vector<512x32xf32>
    %cst_12 = arith.constant 0.000000e+00 : f32
    %14 = vector.broadcast %cst_12 : f32 to vector<512x32xf32>
    %15 = arith.maximumf %13, %14 : vector<512x32xf32>
    %c0_13 = arith.constant 0 : index
    %c0_14 = arith.constant 0 : index
    %16 = vector.load %arg8[%c0_13, %c0_14] : memref<512x128xf32, #tpu.memory_space<vmem>>, vector<512x32xf32>
    tpu.vector_store %arg8[%c0_13, %c0_14], %15 {strides = array<i32>} : memref<512x128xf32, #tpu.memory_space<vmem>>, vector<512x32xf32>,
    %c0_15 = arith.constant 0 : index
    %c0_16 = arith.constant 0 : index
    %17 = vector.load %arg8[%c0_15, %c0_16] : memref<512x128xf32, #tpu.memory_space<vmem>>, vector<512x128xf32>
    %c2 = arith.constant 2 : index
    %c0_17 = arith.constant 0 : index
    %18 = vector.load %arg3[%c2, %c0_17] : memref<40x512xf32, #tpu.memory_space<vmem>>, vector<1x128xf32>
    %19 = vector.broadcast %18 : vector<1x128xf32> to vector<512x128xf32>
    %20 = arith.mulf %17, %19 : vector<512x128xf32>
    %c3 = arith.constant 3 : index
    %c0_18 = arith.constant 0 : index
    %21 = vector.load %arg3[%c3, %c0_18] : memref<40x512xf32, #tpu.memory_space<vmem>>, vector<1x128xf32>
    %22 = vector.broadcast %21 : vector<1x128xf32> to vector<512x128xf32>
    %23 = arith.addf %20, %22 : vector<512x128xf32>
    %cst_19 = arith.constant 0.000000e+00 : f32
    %24 = vector.broadcast %cst_19 : f32 to vector<512x128xf32>
    %25 = arith.maximumf %23, %24 : vector<512x128xf32>
    %c32 = arith.constant 32 : index
    %c0_20 = arith.constant 0 : index
    %26 = vector.load %arg4[%c32, %c0_20] : memref<816x128xbf16, #tpu.memory_space<vmem>>, vector<128x16xbf16>
    %27 = arith.truncf %25 : vector<512x128xf32> to vector<512x128xbf16>
    %cst_21 = arith.constant dense<0.000000e+00> : vector<512x16xf32>
    %28 = tpu.matmul %27, %26, %cst_21 {dimension_numbers = #tpu.dot_dimension_numbers<[1], [0], [0], [1], [0, 0, 1, 1], [], []>} : vector<512x128xbf16>, vector<128x16xbf16>, vector<512x16xf32> -> vector<512x16xf32>
    %c0_22 = arith.constant 0 : index
    %c32_23 = arith.constant 32 : index
    %29 = vector.load %arg8[%c0_22, %c32_23] : memref<512x128xf32, #tpu.memory_space<vmem>>, vector<512x16xf32>
    tpu.vector_store %arg8[%c0_22, %c32_23], %28 {strides = array<i32>} : memref<512x128xf32, #tpu.memory_space<vmem>>, vector<512x16xf32>,
    %c0_24 = arith.constant 0 : index
    %c0_25 = arith.constant 0 : index
    %30 = vector.load %arg8[%c0_24, %c0_25] : memref<512x128xf32, #tpu.memory_space<vmem>>, vector<512x128xf32>
    %c4 = arith.constant 4 : index
    %c0_26 = arith.constant 0 : index
    %31 = vector.load %arg3[%c4, %c0_26] : memref<40x512xf32, #tpu.memory_space<vmem>>, vector<1x128xf32>
    %32 = vector.broadcast %31 : vector<1x128xf32> to vector<512x128xf32>
    %33 = arith.mulf %30, %32 : vector<512x128xf32>
    %c5 = arith.constant 5 : index
    %c0_27 = arith.constant 0 : index
    %34 = vector.load %arg3[%c5, %c0_27] : memref<40x512xf32, #tpu.memory_space<vmem>>, vector<1x128xf32>
    %35 = vector.broadcast %34 : vector<1x128xf32> to vector<512x128xf32>
    %36 = arith.addf %33, %35 : vector<512x128xf32>
    %cst_28 = arith.constant 0.000000e+00 : f32
    %37 = vector.broadcast %cst_28 : f32 to vector<512x128xf32>
    %38 = arith.maximumf %36, %37 : vector<512x128xf32>
    %c32_29 = arith.constant 32 : index
    %c16 = arith.constant 16 : index
    %39 = vector.load %arg4[%c32_29, %c16] : memref<816x128xbf16, #tpu.memory_space<vmem>>, vector<128x16xbf16>
    %40 = arith.truncf %38 : vector<512x128xf32> to vector<512x128xbf16>
    %cst_30 = arith.constant dense<0.000000e+00> : vector<512x16xf32>
    %41 = tpu.matmul %40, %39, %cst_30 {dimension_numbers = #tpu.dot_dimension_numbers<[1], [0], [0], [1], [0, 0, 1, 1], [], []>} : vector<512x128xbf16>, vector<128x16xbf16>, vector<512x16xf32> -> vector<512x16xf32>
    %c0_31 = arith.constant 0 : index
    %c48 = arith.constant 48 : index
    %42 = vector.load %arg8[%c0_31, %c48] : memref<512x128xf32, #tpu.memory_space<vmem>>, vector<512x16xf32>
    tpu.vector_store %arg8[%c0_31, %c48], %41 {strides = array<i32>} : memref<512x128xf32, #tpu.memory_space<vmem>>, vector<512x16xf32>,
    %c0_32 = arith.constant 0 : index
    %c0_33 = arith.constant 0 : index
    %43 = vector.load %arg8[%c0_32, %c0_33] : memref<512x128xf32, #tpu.memory_space<vmem>>, vector<512x128xf32>
    %c6 = arith.constant 6 : index
    %c0_34 = arith.constant 0 : index
    %44 = vector.load %arg3[%c6, %c0_34] : memref<40x512xf32, #tpu.memory_space<vmem>>, vector<1x128xf32>
    %45 = vector.broadcast %44 : vector<1x128xf32> to vector<512x128xf32>
    %46 = arith.mulf %43, %45 : vector<512x128xf32>
    %c7 = arith.constant 7 : index
    %c0_35 = arith.constant 0 : index
    %47 = vector.load %arg3[%c7, %c0_35] : memref<40x512xf32, #tpu.memory_space<vmem>>, vector<1x128xf32>
    %48 = vector.broadcast %47 : vector<1x128xf32> to vector<512x128xf32>
    %49 = arith.addf %46, %48 : vector<512x128xf32>
    %cst_36 = arith.constant 0.000000e+00 : f32
    %50 = vector.broadcast %cst_36 : f32 to vector<512x128xf32>
    %51 = arith.maximumf %49, %50 : vector<512x128xf32>
    %c32_37 = arith.constant 32 : index
    %c32_38 = arith.constant 32 : index
    %52 = vector.load %arg4[%c32_37, %c32_38] : memref<816x128xbf16, #tpu.memory_space<vmem>>, vector<128x16xbf16>
    %53 = arith.truncf %51 : vector<512x128xf32> to vector<512x128xbf16>
    %cst_39 = arith.constant dense<0.000000e+00> : vector<512x16xf32>
    %54 = tpu.matmul %53, %52, %cst_39 {dimension_numbers = #tpu.dot_dimension_numbers<[1], [0], [0], [1], [0, 0, 1, 1], [], []>} : vector<512x128xbf16>, vector<128x16xbf16>, vector<512x16xf32> -> vector<512x16xf32>
    %c0_40 = arith.constant 0 : index
    %c64 = arith.constant 64 : index
    %55 = vector.load %arg8[%c0_40, %c64] : memref<512x128xf32, #tpu.memory_space<vmem>>, vector<512x16xf32>
    tpu.vector_store %arg8[%c0_40, %c64], %54 {strides = array<i32>} : memref<512x128xf32, #tpu.memory_space<vmem>>, vector<512x16xf32>,
    %c0_41 = arith.constant 0 : index
    %c0_42 = arith.constant 0 : index
    %56 = vector.load %arg8[%c0_41, %c0_42] : memref<512x128xf32, #tpu.memory_space<vmem>>, vector<512x128xf32>
    %c8 = arith.constant 8 : index
    %c0_43 = arith.constant 0 : index
    %57 = vector.load %arg3[%c8, %c0_43] : memref<40x512xf32, #tpu.memory_space<vmem>>, vector<1x128xf32>
    %58 = vector.broadcast %57 : vector<1x128xf32> to vector<512x128xf32>
    %59 = arith.mulf %56, %58 : vector<512x128xf32>
    %c9 = arith.constant 9 : index
    %c0_44 = arith.constant 0 : index
    %60 = vector.load %arg3[%c9, %c0_44] : memref<40x512xf32, #tpu.memory_space<vmem>>, vector<1x128xf32>
    %61 = vector.broadcast %60 : vector<1x128xf32> to vector<512x128xf32>
    %62 = arith.addf %59, %61 : vector<512x128xf32>
    %cst_45 = arith.constant 0.000000e+00 : f32
    %63 = vector.broadcast %cst_45 : f32 to vector<512x128xf32>
    %64 = arith.maximumf %62, %63 : vector<512x128xf32>
    %c160 = arith.constant 160 : index
    %c0_46 = arith.constant 0 : index
    %65 = vector.load %arg4[%c160, %c0_46] : memref<816x128xbf16, #tpu.memory_space<vmem>>, vector<128x64xbf16>
    %66 = arith.truncf %64 : vector<512x128xf32> to vector<512x128xbf16>
    %cst_47 = arith.constant dense<0.000000e+00> : vector<512x64xf32>
    %67 = tpu.matmul %66, %65, %cst_47 {dimension_numbers = #tpu.dot_dimension_numbers<[1], [0], [0], [1], [0, 0, 1, 1], [], []>} : vector<512x128xbf16>, vector<128x64xbf16>, vector<512x64xf32> -> vector<512x64xf32>
    %c0_48 = arith.constant 0 : index
    %c0_49 = arith.constant 0 : index
    %68 = vector.load %arg5[%c0_48, %c0_49] : memref<576x256xbf16, #tpu.memory_space<vmem>>, vector<64x256xbf16>
    %69 = vector.extract_strided_slice %67 {offsets = [0, 0], sizes = [256, 64], strides = [1, 1]} : vector<512x64xf32> to vector<256x64xf32>
    %70 = arith.truncf %69 : vector<256x64xf32> to vector<256x64xbf16>
    %cst_50 = arith.constant dense<0.000000e+00> : vector<64x64xf32>
    %71 = tpu.matmul %68, %70, %cst_50 {dimension_numbers = #tpu.dot_dimension_numbers<[1], [0], [0], [1], [0, 0, 1, 1], [], []>} : vector<64x256xbf16>, vector<256x64xbf16>, vector<64x64xf32> -> vector<64x64xf32>
    %c0_51 = arith.constant 0 : index
    %c0_52 = arith.constant 0 : index
    %72 = vector.load %arg9[%c0_51, %c0_52] : memref<128x128xf32, #tpu.memory_space<vmem>>, vector<64x64xf32>
    tpu.vector_store %arg9[%c0_51, %c0_52], %71 {strides = array<i32>} : memref<128x128xf32, #tpu.memory_space<vmem>>, vector<64x64xf32>,
    %73 = vector.extract_strided_slice %67 {offsets = [256, 0], sizes = [256, 64], strides = [1, 1]} : vector<512x64xf32> to vector<256x64xf32>
    %74 = arith.truncf %73 : vector<256x64xf32> to vector<256x64xbf16>
    %cst_53 = arith.constant dense<0.000000e+00> : vector<64x64xf32>
    %75 = tpu.matmul %68, %74, %cst_53 {dimension_numbers = #tpu.dot_dimension_numbers<[1], [0], [0], [1], [0, 0, 1, 1], [], []>} : vector<64x256xbf16>, vector<256x64xbf16>, vector<64x64xf32> -> vector<64x64xf32>
    %c64_54 = arith.constant 64 : index
    %c0_55 = arith.constant 0 : index
    %76 = vector.load %arg9[%c64_54, %c0_55] : memref<128x128xf32, #tpu.memory_space<vmem>>, vector<64x64xf32>
    tpu.vector_store %arg9[%c64_54, %c0_55], %75 {strides = array<i32>} : memref<128x128xf32, #tpu.memory_space<vmem>>, vector<64x64xf32>,
    %c0_56 = arith.constant 0 : index
    %c0_57 = arith.constant 0 : index
    %77 = vector.load %arg9[%c0_56, %c0_57] : memref<128x128xf32, #tpu.memory_space<vmem>>, vector<128x128xf32>
    %c10 = arith.constant 10 : index
    %c0_58 = arith.constant 0 : index
    %78 = vector.load %arg3[%c10, %c0_58] : memref<40x512xf32, #tpu.memory_space<vmem>>, vector<1x128xf32>
    %79 = vector.broadcast %78 : vector<1x128xf32> to vector<128x128xf32>
    %80 = arith.mulf %77, %79 : vector<128x128xf32>
    %c11 = arith.constant 11 : index
    %c0_59 = arith.constant 0 : index
    %81 = vector.load %arg3[%c11, %c0_59] : memref<40x512xf32, #tpu.memory_space<vmem>>, vector<1x128xf32>
    %82 = vector.broadcast %81 : vector<1x128xf32> to vector<128x128xf32>
    %83 = arith.addf %80, %82 : vector<128x128xf32>
    %cst_60 = arith.constant 0.000000e+00 : f32
    %84 = vector.broadcast %cst_60 : f32 to vector<128x128xf32>
    %85 = arith.maximumf %83, %84 : vector<128x128xf32>
    %c32_61 = arith.constant 32 : index
    %c48_62 = arith.constant 48 : index
    %86 = vector.load %arg4[%c32_61, %c48_62] : memref<816x128xbf16, #tpu.memory_space<vmem>>, vector<128x16xbf16>
    %87 = arith.truncf %85 : vector<128x128xf32> to vector<128x128xbf16>
    %cst_63 = arith.constant dense<0.000000e+00> : vector<128x16xf32>
    %88 = tpu.matmul %87, %86, %cst_63 {dimension_numbers = #tpu.dot_dimension_numbers<[1], [0], [0], [1], [0, 0, 1, 1], [], []>} : vector<128x128xbf16>, vector<128x16xbf16>, vector<128x16xf32> -> vector<128x16xf32>
    %c0_64 = arith.constant 0 : index
    %c64_65 = arith.constant 64 : index
    %89 = vector.load %arg9[%c0_64, %c64_65] : memref<128x128xf32, #tpu.memory_space<vmem>>, vector<128x16xf32>
    tpu.vector_store %arg9[%c0_64, %c64_65], %88 {strides = array<i32>} : memref<128x128xf32, #tpu.memory_space<vmem>>, vector<128x16xf32>,
    %c0_66 = arith.constant 0 : index
    %c0_67 = arith.constant 0 : index
    %90 = vector.load %arg9[%c0_66, %c0_67] : memref<128x128xf32, #tpu.memory_space<vmem>>, vector<128x128xf32>
    %c12 = arith.constant 12 : index
    %c0_68 = arith.constant 0 : index
    %91 = vector.load %arg3[%c12, %c0_68] : memref<40x512xf32, #tpu.memory_space<vmem>>, vector<1x128xf32>
    %92 = vector.broadcast %91 : vector<1x128xf32> to vector<128x128xf32>
    %93 = arith.mulf %90, %92 : vector<128x128xf32>
    %c13 = arith.constant 13 : index
    %c0_69 = arith.constant 0 : index
    %94 = vector.load %arg3[%c13, %c0_69] : memref<40x512xf32, #tpu.memory_space<vmem>>, vector<1x128xf32>
    %95 = vector.broadcast %94 : vector<1x128xf32> to vector<128x128xf32>
    %96 = arith.addf %93, %95 : vector<128x128xf32>
    %cst_70 = arith.constant 0.000000e+00 : f32
    %97 = vector.broadcast %cst_70 : f32 to vector<128x128xf32>
    %98 = arith.maximumf %96, %97 : vector<128x128xf32>
    %c32_71 = arith.constant 32 : index
    %c64_72 = arith.constant 64 : index
    %99 = vector.load %arg4[%c32_71, %c64_72] : memref<816x128xbf16, #tpu.memory_space<vmem>>, vector<128x16xbf16>
    %100 = arith.truncf %98 : vector<128x128xf32> to vector<128x128xbf16>
    %cst_73 = arith.constant dense<0.000000e+00> : vector<128x16xf32>
    %101 = tpu.matmul %100, %99, %cst_73 {dimension_numbers = #tpu.dot_dimension_numbers<[1], [0], [0], [1], [0, 0, 1, 1], [], []>} : vector<128x128xbf16>, vector<128x16xbf16>, vector<128x16xf32> -> vector<128x16xf32>
    %c0_74 = arith.constant 0 : index
    %c80 = arith.constant 80 : index
    %102 = vector.load %arg9[%c0_74, %c80] : memref<128x128xf32, #tpu.memory_space<vmem>>, vector<128x16xf32>
    tpu.vector_store %arg9[%c0_74, %c80], %101 {strides = array<i32>} : memref<128x128xf32, #tpu.memory_space<vmem>>, vector<128x16xf32>,
    %c0_75 = arith.constant 0 : index
    %c0_76 = arith.constant 0 : index
    %103 = vector.load %arg9[%c0_75, %c0_76] : memref<128x128xf32, #tpu.memory_space<vmem>>, vector<128x128xf32>
    %c14 = arith.constant 14 : index
    %c0_77 = arith.constant 0 : index
    %104 = vector.load %arg3[%c14, %c0_77] : memref<40x512xf32, #tpu.memory_space<vmem>>, vector<1x128xf32>
    %105 = vector.broadcast %104 : vector<1x128xf32> to vector<128x128xf32>
    %106 = arith.mulf %103, %105 : vector<128x128xf32>
    %c15 = arith.constant 15 : index
    %c0_78 = arith.constant 0 : index
    %107 = vector.load %arg3[%c15, %c0_78] : memref<40x512xf32, #tpu.memory_space<vmem>>, vector<1x128xf32>
    %108 = vector.broadcast %107 : vector<1x128xf32> to vector<128x128xf32>
    %109 = arith.addf %106, %108 : vector<128x128xf32>
    %cst_79 = arith.constant 0.000000e+00 : f32
    %110 = vector.broadcast %cst_79 : f32 to vector<128x128xf32>
    %111 = arith.maximumf %109, %110 : vector<128x128xf32>
    %c32_80 = arith.constant 32 : index
    %c80_81 = arith.constant 80 : index
    %112 = vector.load %arg4[%c32_80, %c80_81] : memref<816x128xbf16, #tpu.memory_space<vmem>>, vector<128x16xbf16>
    %113 = arith.truncf %111 : vector<128x128xf32> to vector<128x128xbf16>
    %cst_82 = arith.constant dense<0.000000e+00> : vector<128x16xf32>
    %114 = tpu.matmul %113, %112, %cst_82 {dimension_numbers = #tpu.dot_dimension_numbers<[1], [0], [0], [1], [0, 0, 1, 1], [], []>} : vector<128x128xbf16>, vector<128x16xbf16>, vector<128x16xf32> -> vector<128x16xf32>
    %c0_83 = arith.constant 0 : index
    %c96 = arith.constant 96 : index
    %115 = vector.load %arg9[%c0_83, %c96] : memref<128x128xf32, #tpu.memory_space<vmem>>, vector<128x16xf32>
    tpu.vector_store %arg9[%c0_83, %c96], %114 {strides = array<i32>} : memref<128x128xf32, #tpu.memory_space<vmem>>, vector<128x16xf32>,
    %c0_84 = arith.constant 0 : index
    %c0_85 = arith.constant 0 : index
    %116 = vector.load %arg9[%c0_84, %c0_85] : memref<128x128xf32, #tpu.memory_space<vmem>>, vector<128x128xf32>
    %c16_86 = arith.constant 16 : index
    %c0_87 = arith.constant 0 : index
    %117 = vector.load %arg3[%c16_86, %c0_87] : memref<40x512xf32, #tpu.memory_space<vmem>>, vector<1x128xf32>
    %118 = vector.broadcast %117 : vector<1x128xf32> to vector<128x128xf32>
    %119 = arith.mulf %116, %118 : vector<128x128xf32>
    %c17 = arith.constant 17 : index
    %c0_88 = arith.constant 0 : index
    %120 = vector.load %arg3[%c17, %c0_88] : memref<40x512xf32, #tpu.memory_space<vmem>>, vector<1x128xf32>
    %121 = vector.broadcast %120 : vector<1x128xf32> to vector<128x128xf32>
    %122 = arith.addf %119, %121 : vector<128x128xf32>
    %cst_89 = arith.constant 0.000000e+00 : f32
    %123 = vector.broadcast %cst_89 : f32 to vector<128x128xf32>
    %124 = arith.maximumf %122, %123 : vector<128x128xf32>
    %c32_90 = arith.constant 32 : index
    %c96_91 = arith.constant 96 : index
    %125 = vector.load %arg4[%c32_90, %c96_91] : memref<816x128xbf16, #tpu.memory_space<vmem>>, vector<128x16xbf16>
    %126 = arith.truncf %124 : vector<128x128xf32> to vector<128x128xbf16>
    %cst_92 = arith.constant dense<0.000000e+00> : vector<128x16xf32>
    %127 = tpu.matmul %126, %125, %cst_92 {dimension_numbers = #tpu.dot_dimension_numbers<[1], [0], [0], [1], [0, 0, 1, 1], [], []>} : vector<128x128xbf16>, vector<128x16xbf16>, vector<128x16xf32> -> vector<128x16xf32>
    %c0_93 = arith.constant 0 : index
    %c112 = arith.constant 112 : index
    %128 = vector.load %arg9[%c0_93, %c112] : memref<128x128xf32, #tpu.memory_space<vmem>>, vector<128x16xf32>
    tpu.vector_store %arg9[%c0_93, %c112], %127 {strides = array<i32>} : memref<128x128xf32, #tpu.memory_space<vmem>>, vector<128x16xf32>,
    %c0_94 = arith.constant 0 : index
    %c0_95 = arith.constant 0 : index
    %129 = vector.load %arg9[%c0_94, %c0_95] : memref<128x128xf32, #tpu.memory_space<vmem>>, vector<128x128xf32>
    %c18 = arith.constant 18 : index
    %c0_96 = arith.constant 0 : index
    %130 = vector.load %arg3[%c18, %c0_96] : memref<40x512xf32, #tpu.memory_space<vmem>>, vector<1x128xf32>
    %131 = vector.broadcast %130 : vector<1x128xf32> to vector<128x128xf32>
    %132 = arith.mulf %129, %131 : vector<128x128xf32>
    %c19 = arith.constant 19 : index
    %c0_97 = arith.constant 0 : index
    %133 = vector.load %arg3[%c19, %c0_97] : memref<40x512xf32, #tpu.memory_space<vmem>>, vector<1x128xf32>
    %134 = vector.broadcast %133 : vector<1x128xf32> to vector<128x128xf32>
    %135 = arith.addf %132, %134 : vector<128x128xf32>
    %cst_98 = arith.constant 0.000000e+00 : f32
    %136 = vector.broadcast %cst_98 : f32 to vector<128x128xf32>
    %137 = arith.maximumf %135, %136 : vector<128x128xf32>
    %c288 = arith.constant 288 : index
    %c0_99 = arith.constant 0 : index
    %138 = vector.load %arg4[%c288, %c0_99] : memref<816x128xbf16, #tpu.memory_space<vmem>>, vector<8x128xbf16>
    %139 = arith.truncf %137 : vector<128x128xf32> to vector<128x128xbf16>
    %cst_100 = arith.constant dense<0.000000e+00> : vector<8x128xf32>
    %140 = tpu.matmul %138, %139, %cst_100 {dimension_numbers = #tpu.dot_dimension_numbers<[1], [0], [0], [1], [0, 0, 1, 1], [], []>} : vector<8x128xbf16>, vector<128x128xbf16>, vector<8x128xf32> -> vector<8x128xf32>
    %c0_101 = arith.constant 0 : index
    %c0_102 = arith.constant 0 : index
    %141 = vector.load %arg1[%c0_101, %c0_102] : memref<16x32xf32, #tpu.memory_space<vmem>>, vector<16x32xf32>
    %c304 = arith.constant 304 : index
    %c0_103 = arith.constant 0 : index
    %142 = vector.load %arg4[%c304, %c0_103] : memref<816x128xbf16, #tpu.memory_space<vmem>>, vector<16x32xbf16>
    %143 = arith.extf %142 : vector<16x32xbf16> to vector<16x32xf32>
    %144 = arith.addf %141, %143 : vector<16x32xf32>
    %c20 = arith.constant 20 : index
    %c0_104 = arith.constant 0 : index
    %145 = vector.load %arg3[%c20, %c0_104] : memref<40x512xf32, #tpu.memory_space<vmem>>, vector<1x32xf32>
    %c21 = arith.constant 21 : index
    %c0_105 = arith.constant 0 : index
    %146 = vector.load %arg3[%c21, %c0_105] : memref<40x512xf32, #tpu.memory_space<vmem>>, vector<1x32xf32>
    %cst_106 = arith.constant dense<0.000000e+00> : vector<16xf32>
    %147 = vector.multi_reduction <add>, %144, %cst_106 [1] : vector<16x32xf32> to vector<16xf32>
    %148 = vector.shape_cast %147 : vector<16xf32> to vector<16x1xf32>
    %cst_107 = arith.constant 3.200000e+01 : f32
    %149 = vector.broadcast %cst_107 : f32 to vector<16x1xf32>
    %150 = arith.divf %148, %149 : vector<16x1xf32>
    %151 = vector.broadcast %150 : vector<16x1xf32> to vector<16x32xf32>
    %152 = arith.subf %144, %151 : vector<16x32xf32>
    %153 = arith.mulf %152, %152 : vector<16x32xf32>
    %cst_108 = arith.constant dense<0.000000e+00> : vector<16xf32>
    %154 = vector.multi_reduction <add>, %153, %cst_108 [1] : vector<16x32xf32> to vector<16xf32>
    %155 = vector.shape_cast %154 : vector<16xf32> to vector<16x1xf32>
    %cst_109 = arith.constant 3.200000e+01 : f32
    %156 = vector.broadcast %cst_109 : f32 to vector<16x1xf32>
    %157 = arith.divf %155, %156 : vector<16x1xf32>
    %158 = vector.broadcast %150 : vector<16x1xf32> to vector<16x32xf32>
    %159 = arith.subf %144, %158 : vector<16x32xf32>
    %cst_110 = arith.constant 9.99999996E-13 : f32
    %160 = vector.broadcast %cst_110 : f32 to vector<16x1xf32>
    %161 = arith.addf %157, %160 : vector<16x1xf32>
    %162 = math.rsqrt %161 : vector<16x1xf32>
    %163 = vector.broadcast %162 : vector<16x1xf32> to vector<16x32xf32>
    %164 = arith.mulf %159, %163 : vector<16x32xf32>
    %165 = vector.broadcast %145 : vector<1x32xf32> to vector<16x32xf32>
    %166 = arith.mulf %164, %165 : vector<16x32xf32>
    %167 = vector.broadcast %146 : vector<1x32xf32> to vector<16x32xf32>
    %168 = arith.addf %166, %167 : vector<16x32xf32>
    %c320 = arith.constant 320 : index
    %c0_111 = arith.constant 0 : index
    %169 = vector.load %arg4[%c320, %c0_111] : memref<816x128xbf16, #tpu.memory_space<vmem>>, vector<32x96xbf16>
    %170 = arith.truncf %168 : vector<16x32xf32> to vector<16x32xbf16>
    %cst_112 = arith.constant dense<0.000000e+00> : vector<16x96xf32>
    %171 = tpu.matmul %170, %169, %cst_112 {dimension_numbers = #tpu.dot_dimension_numbers<[1], [0], [0], [1], [0, 0, 1, 1], [], []>} : vector<16x32xbf16>, vector<32x96xbf16>, vector<16x96xf32> -> vector<16x96xf32>
    %c22 = arith.constant 22 : index
    %c0_113 = arith.constant 0 : index
    %172 = vector.load %arg3[%c22, %c0_113] : memref<40x512xf32, #tpu.memory_space<vmem>>, vector<1x96xf32>
    %173 = vector.broadcast %172 : vector<1x96xf32> to vector<16x96xf32>
    %174 = arith.addf %171, %173 : vector<16x96xf32>
    %175 = vector.extract_strided_slice %174 {offsets = [0, 0], sizes = [16, 32], strides = [1, 1]} : vector<16x96xf32> to vector<16x32xf32>
    %176 = vector.extract_strided_slice %175 {offsets = [0, 0], sizes = [8, 8], strides = [1, 1]} : vector<16x32xf32> to vector<8x8xf32>
    %177 = vector.extract_strided_slice %175 {offsets = [0, 8], sizes = [8, 8], strides = [1, 1]} : vector<16x32xf32> to vector<8x8xf32>
    %178 = vector.extract_strided_slice %175 {offsets = [0, 16], sizes = [8, 8], strides = [1, 1]} : vector<16x32xf32> to vector<8x8xf32>
    %179 = vector.extract_strided_slice %175 {offsets = [0, 24], sizes = [8, 8], strides = [1, 1]} : vector<16x32xf32> to vector<8x8xf32>
    %180 = vector.extract_strided_slice %175 {offsets = [8, 0], sizes = [8, 8], strides = [1, 1]} : vector<16x32xf32> to vector<8x8xf32>
    %181 = vector.extract_strided_slice %175 {offsets = [8, 8], sizes = [8, 8], strides = [1, 1]} : vector<16x32xf32> to vector<8x8xf32>
    %182 = vector.extract_strided_slice %175 {offsets = [8, 16], sizes = [8, 8], strides = [1, 1]} : vector<16x32xf32> to vector<8x8xf32>
    %183 = vector.extract_strided_slice %175 {offsets = [8, 24], sizes = [8, 8], strides = [1, 1]} : vector<16x32xf32> to vector<8x8xf32>
    %184 = tpu.concatenate %176, %177, %178, %179, %180, %181, %182, %183 in 0 : vector<8x8xf32>, vector<8x8xf32>, vector<8x8xf32>, vector<8x8xf32>, vector<8x8xf32>, vector<8x8xf32>, vector<8x8xf32>, vector<8x8xf32> -> vector<64x8xf32>
    %185 = vector.shape_cast %184 : vector<64x8xf32> to vector<8x8x8xf32>
    %186 = vector.extract_strided_slice %174 {offsets = [0, 32], sizes = [16, 32], strides = [1, 1]} : vector<16x96xf32> to vector<16x32xf32>
    %187 = vector.extract_strided_slice %186 {offsets = [0, 0], sizes = [8, 8], strides = [1, 1]} : vector<16x32xf32> to vector<8x8xf32>
    %188 = vector.extract_strided_slice %186 {offsets = [0, 8], sizes = [8, 8], strides = [1, 1]} : vector<16x32xf32> to vector<8x8xf32>
    %189 = vector.extract_strided_slice %186 {offsets = [0, 16], sizes = [8, 8], strides = [1, 1]} : vector<16x32xf32> to vector<8x8xf32>
    %190 = vector.extract_strided_slice %186 {offsets = [0, 24], sizes = [8, 8], strides = [1, 1]} : vector<16x32xf32> to vector<8x8xf32>
    %191 = vector.extract_strided_slice %186 {offsets = [8, 0], sizes = [8, 8], strides = [1, 1]} : vector<16x32xf32> to vector<8x8xf32>
    %192 = vector.extract_strided_slice %186 {offsets = [8, 8], sizes = [8, 8], strides = [1, 1]} : vector<16x32xf32> to vector<8x8xf32>
    %193 = vector.extract_strided_slice %186 {offsets = [8, 16], sizes = [8, 8], strides = [1, 1]} : vector<16x32xf32> to vector<8x8xf32>
    %194 = vector.extract_strided_slice %186 {offsets = [8, 24], sizes = [8, 8], strides = [1, 1]} : vector<16x32xf32> to vector<8x8xf32>
    %195 = tpu.concatenate %187, %188, %189, %190, %191, %192, %193, %194 in 0 : vector<8x8xf32>, vector<8x8xf32>, vector<8x8xf32>, vector<8x8xf32>, vector<8x8xf32>, vector<8x8xf32>, vector<8x8xf32>, vector<8x8xf32> -> vector<64x8xf32>
    %196 = vector.shape_cast %195 : vector<64x8xf32> to vector<8x8x8xf32>
    %197 = vector.extract_strided_slice %174 {offsets = [0, 64], sizes = [16, 32], strides = [1, 1]} : vector<16x96xf32> to vector<16x32xf32>
    %198 = vector.extract_strided_slice %197 {offsets = [0, 0], sizes = [8, 8], strides = [1, 1]} : vector<16x32xf32> to vector<8x8xf32>
    %199 = vector.extract_strided_slice %197 {offsets = [0, 8], sizes = [8, 8], strides = [1, 1]} : vector<16x32xf32> to vector<8x8xf32>
    %200 = vector.extract_strided_slice %197 {offsets = [0, 16], sizes = [8, 8], strides = [1, 1]} : vector<16x32xf32> to vector<8x8xf32>
    %201 = vector.extract_strided_slice %197 {offsets = [0, 24], sizes = [8, 8], strides = [1, 1]} : vector<16x32xf32> to vector<8x8xf32>
    %202 = vector.extract_strided_slice %197 {offsets = [8, 0], sizes = [8, 8], strides = [1, 1]} : vector<16x32xf32> to vector<8x8xf32>
    %203 = vector.extract_strided_slice %197 {offsets = [8, 8], sizes = [8, 8], strides = [1, 1]} : vector<16x32xf32> to vector<8x8xf32>
    %204 = vector.extract_strided_slice %197 {offsets = [8, 16], sizes = [8, 8], strides = [1, 1]} : vector<16x32xf32> to vector<8x8xf32>
    %205 = vector.extract_strided_slice %197 {offsets = [8, 24], sizes = [8, 8], strides = [1, 1]} : vector<16x32xf32> to vector<8x8xf32>
    %206 = tpu.concatenate %198, %199, %200, %201, %202, %203, %204, %205 in 0 : vector<8x8xf32>, vector<8x8xf32>, vector<8x8xf32>, vector<8x8xf32>, vector<8x8xf32>, vector<8x8xf32>, vector<8x8xf32>, vector<8x8xf32> -> vector<64x8xf32>
    %207 = vector.shape_cast %206 : vector<64x8xf32> to vector<8x8x8xf32>
    "tpu.trace_start"() <{level = 10 : i32, message = "nqd,nkd->nqk"}> : () -> ()
    %cst_114 = arith.constant dense<0.000000e+00> : vector<8x8x8xf32>
    %208 = tpu.matmul %185, %196, %cst_114 {dimension_numbers = #tpu.dot_dimension_numbers<[2], [2], [1], [1], [0, 0, 0, 1, 1, 1], [0], [0]>} : vector<8x8x8xf32>, vector<8x8x8xf32>, vector<8x8x8xf32> -> vector<8x8x8xf32>
    "tpu.trace_stop"() : () -> ()
    %cst_115 = arith.constant 0.353553385 : f32
    %209 = vector.broadcast %cst_115 : f32 to vector<8x8x8xf32>
    %210 = arith.mulf %208, %209 : vector<8x8x8xf32>
    %c0_116 = arith.constant 0 : index
    %c0_117 = arith.constant 0 : index
    %c0_118 = arith.constant 0 : index
    %211 = vector.load %arg2[%c0_116, %c0_117, %c0_118] : memref<8x1x8xf32, #tpu.memory_space<vmem>>, vector<8x1x8xf32>
    %212 = vector.broadcast %211 : vector<8x1x8xf32> to vector<8x8x8xf32>
    %213 = arith.addf %210, %212 : vector<8x8x8xf32>
    %cst_119 = arith.constant dense<0xFF800000> : vector<8x8xf32>
    %214 = vector.multi_reduction <maximumf>, %213, %cst_119 [2] : vector<8x8x8xf32> to vector<8x8xf32>
    %215 = vector.shape_cast %214 : vector<8x8xf32> to vector<8x8x1xf32>
    %216 = vector.broadcast %215 : vector<8x8x1xf32> to vector<8x8x8xf32>
    %217 = arith.subf %213, %216 : vector<8x8x8xf32>
    %218 = math.exp %217 : vector<8x8x8xf32>
    %cst_120 = arith.constant dense<0.000000e+00> : vector<8x8xf32>
    %219 = vector.multi_reduction <add>, %218, %cst_120 [2] : vector<8x8x8xf32> to vector<8x8xf32>
    %220 = vector.shape_cast %219 : vector<8x8xf32> to vector<8x8x1xf32>
    "tpu.trace_start"() <{level = 10 : i32, message = "nqk,nkd->nqd"}> : () -> ()
    %cst_121 = arith.constant dense<0.000000e+00> : vector<8x8x8xf32>
    %221 = tpu.matmul %218, %207, %cst_121 {dimension_numbers = #tpu.dot_dimension_numbers<[2], [1], [1], [2], [0, 0, 0, 1, 1, 2], [0], [0]>} : vector<8x8x8xf32>, vector<8x8x8xf32>, vector<8x8x8xf32> -> vector<8x8x8xf32>
    "tpu.trace_stop"() : () -> ()
    %222 = tpu.reciprocal %220 {approx = true} : vector<8x8x1xf32> -> vector<8x8x1xf32>
    %223 = vector.broadcast %222 : vector<8x8x1xf32> to vector<8x8x8xf32>
    %224 = arith.mulf %221, %223 : vector<8x8x8xf32>
    %225 = vector.extract_strided_slice %224 {offsets = [0, 0, 0], sizes = [1, 8, 8], strides = [1, 1, 1]} : vector<8x8x8xf32> to vector<1x8x8xf32>
    %226 = vector.shape_cast %225 : vector<1x8x8xf32> to vector<8x8xf32>
    %227 = vector.extract_strided_slice %224 {offsets = [1, 0, 0], sizes = [1, 8, 8], strides = [1, 1, 1]} : vector<8x8x8xf32> to vector<1x8x8xf32>
    %228 = vector.shape_cast %227 : vector<1x8x8xf32> to vector<8x8xf32>
    %229 = vector.extract_strided_slice %224 {offsets = [2, 0, 0], sizes = [1, 8, 8], strides = [1, 1, 1]} : vector<8x8x8xf32> to vector<1x8x8xf32>
    %230 = vector.shape_cast %229 : vector<1x8x8xf32> to vector<8x8xf32>
    %231 = vector.extract_strided_slice %224 {offsets = [3, 0, 0], sizes = [1, 8, 8], strides = [1, 1, 1]} : vector<8x8x8xf32> to vector<1x8x8xf32>
    %232 = vector.shape_cast %231 : vector<1x8x8xf32> to vector<8x8xf32>
    %233 = tpu.concatenate %226, %228, %230, %232 in 1 : vector<8x8xf32>, vector<8x8xf32>, vector<8x8xf32>, vector<8x8xf32> -> vector<8x32xf32>
    %234 = vector.extract_strided_slice %224 {offsets = [4, 0, 0], sizes = [1, 8, 8], strides = [1, 1, 1]} : vector<8x8x8xf32> to vector<1x8x8xf32>
    %235 = vector.shape_cast %234 : vector<1x8x8xf32> to vector<8x8xf32>
    %236 = vector.extract_strided_slice %224 {offsets = [5, 0, 0], sizes = [1, 8, 8], strides = [1, 1, 1]} : vector<8x8x8xf32> to vector<1x8x8xf32>
    %237 = vector.shape_cast %236 : vector<1x8x8xf32> to vector<8x8xf32>
    %238 = vector.extract_strided_slice %224 {offsets = [6, 0, 0], sizes = [1, 8, 8], strides = [1, 1, 1]} : vector<8x8x8xf32> to vector<1x8x8xf32>
    %239 = vector.shape_cast %238 : vector<1x8x8xf32> to vector<8x8xf32>
    %240 = vector.extract_strided_slice %224 {offsets = [7, 0, 0], sizes = [1, 8, 8], strides = [1, 1, 1]} : vector<8x8x8xf32> to vector<1x8x8xf32>
    %241 = vector.shape_cast %240 : vector<1x8x8xf32> to vector<8x8xf32>
    %242 = tpu.concatenate %235, %237, %239, %241 in 1 : vector<8x8xf32>, vector<8x8xf32>, vector<8x8xf32>, vector<8x8xf32> -> vector<8x32xf32>
    %243 = tpu.concatenate %233, %242 in 0 : vector<8x32xf32>, vector<8x32xf32> -> vector<16x32xf32>
    %c352 = arith.constant 352 : index
    %c0_122 = arith.constant 0 : index
    %244 = vector.load %arg4[%c352, %c0_122] : memref<816x128xbf16, #tpu.memory_space<vmem>>, vector<32x32xbf16>
    %245 = arith.truncf %243 : vector<16x32xf32> to vector<16x32xbf16>
    %cst_123 = arith.constant dense<0.000000e+00> : vector<16x32xf32>
    %246 = tpu.matmul %245, %244, %cst_123 {dimension_numbers = #tpu.dot_dimension_numbers<[1], [0], [0], [1], [0, 0, 1, 1], [], []>} : vector<16x32xbf16>, vector<32x32xbf16>, vector<16x32xf32> -> vector<16x32xf32>
    %c23 = arith.constant 23 : index
    %c0_124 = arith.constant 0 : index
    %247 = vector.load %arg3[%c23, %c0_124] : memref<40x512xf32, #tpu.memory_space<vmem>>, vector<1x32xf32>
    %248 = vector.broadcast %247 : vector<1x32xf32> to vector<16x32xf32>
    %249 = arith.addf %246, %248 : vector<16x32xf32>
    %250 = arith.addf %168, %249 : vector<16x32xf32>
    %c24 = arith.constant 24 : index
    %c0_125 = arith.constant 0 : index
    %251 = vector.load %arg3[%c24, %c0_125] : memref<40x512xf32, #tpu.memory_space<vmem>>, vector<1x32xf32>
    %c25 = arith.constant 25 : index
    %c0_126 = arith.constant 0 : index
    %252 = vector.load %arg3[%c25, %c0_126] : memref<40x512xf32, #tpu.memory_space<vmem>>, vector<1x32xf32>
    %cst_127 = arith.constant dense<0.000000e+00> : vector<16xf32>
    %253 = vector.multi_reduction <add>, %250, %cst_127 [1] : vector<16x32xf32> to vector<16xf32>
    %254 = vector.shape_cast %253 : vector<16xf32> to vector<16x1xf32>
    %cst_128 = arith.constant 3.200000e+01 : f32
    %255 = vector.broadcast %cst_128 : f32 to vector<16x1xf32>
    %256 = arith.divf %254, %255 : vector<16x1xf32>
    %257 = vector.broadcast %256 : vector<16x1xf32> to vector<16x32xf32>
    %258 = arith.subf %250, %257 : vector<16x32xf32>
    %259 = arith.mulf %258, %258 : vector<16x32xf32>
    %cst_129 = arith.constant dense<0.000000e+00> : vector<16xf32>
    %260 = vector.multi_reduction <add>, %259, %cst_129 [1] : vector<16x32xf32> to vector<16xf32>
    %261 = vector.shape_cast %260 : vector<16xf32> to vector<16x1xf32>
    %cst_130 = arith.constant 3.200000e+01 : f32
    %262 = vector.broadcast %cst_130 : f32 to vector<16x1xf32>
    %263 = arith.divf %261, %262 : vector<16x1xf32>
    %264 = vector.broadcast %256 : vector<16x1xf32> to vector<16x32xf32>
    %265 = arith.subf %250, %264 : vector<16x32xf32>
    %cst_131 = arith.constant 9.99999996E-13 : f32
    %266 = vector.broadcast %cst_131 : f32 to vector<16x1xf32>
    %267 = arith.addf %263, %266 : vector<16x1xf32>
    %268 = math.rsqrt %267 : vector<16x1xf32>
    %269 = vector.broadcast %268 : vector<16x1xf32> to vector<16x32xf32>
    %270 = arith.mulf %265, %269 : vector<16x32xf32>
    %271 = vector.broadcast %251 : vector<1x32xf32> to vector<16x32xf32>
    %272 = arith.mulf %270, %271 : vector<16x32xf32>
    %273 = vector.broadcast %252 : vector<1x32xf32> to vector<16x32xf32>
    %274 = arith.addf %272, %273 : vector<16x32xf32>
    %c384 = arith.constant 384 : index
    %c0_132 = arith.constant 0 : index
    %275 = vector.load %arg4[%c384, %c0_132] : memref<816x128xbf16, #tpu.memory_space<vmem>>, vector<32x128xbf16>
    %276 = arith.truncf %274 : vector<16x32xf32> to vector<16x32xbf16>
    %cst_133 = arith.constant dense<0.000000e+00> : vector<16x128xf32>
    %277 = tpu.matmul %276, %275, %cst_133 {dimension_numbers = #tpu.dot_dimension_numbers<[1], [0], [0], [1], [0, 0, 1, 1], [], []>} : vector<16x32xbf16>, vector<32x128xbf16>, vector<16x128xf32> -> vector<16x128xf32>
    %c26 = arith.constant 26 : index
    %c0_134 = arith.constant 0 : index
    %278 = vector.load %arg3[%c26, %c0_134] : memref<40x512xf32, #tpu.memory_space<vmem>>, vector<1x128xf32>
    %279 = vector.broadcast %278 : vector<1x128xf32> to vector<16x128xf32>
    %280 = arith.addf %277, %279 : vector<16x128xf32>
    %281 = arith.mulf %280, %280 : vector<16x128xf32>
    %282 = arith.mulf %280, %281 : vector<16x128xf32>
    %cst_135 = arith.constant 4.471500e-02 : f32
    %283 = vector.broadcast %cst_135 : f32 to vector<16x128xf32>
    %284 = arith.mulf %283, %282 : vector<16x128xf32>
    %285 = arith.addf %280, %284 : vector<16x128xf32>
    %cst_136 = arith.constant 0.797884583 : f32
    %286 = vector.broadcast %cst_136 : f32 to vector<16x128xf32>
    %287 = arith.mulf %286, %285 : vector<16x128xf32>
    %288 = math.tanh %287 : vector<16x128xf32>
    %cst_137 = arith.constant 1.000000e+00 : f32
    %289 = vector.broadcast %cst_137 : f32 to vector<16x128xf32>
    %290 = arith.addf %289, %288 : vector<16x128xf32>
    %cst_138 = arith.constant 5.000000e-01 : f32
    %291 = vector.broadcast %cst_138 : f32 to vector<16x128xf32>
    %292 = arith.mulf %291, %290 : vector<16x128xf32>
    %293 = arith.mulf %280, %292 : vector<16x128xf32>
    %c416 = arith.constant 416 : index
    %c0_139 = arith.constant 0 : index
    %294 = vector.load %arg4[%c416, %c0_139] : memref<816x128xbf16, #tpu.memory_space<vmem>>, vector<128x32xbf16>
    %295 = arith.truncf %293 : vector<16x128xf32> to vector<16x128xbf16>
    %cst_140 = arith.constant dense<0.000000e+00> : vector<16x32xf32>
    %296 = tpu.matmul %295, %294, %cst_140 {dimension_numbers = #tpu.dot_dimension_numbers<[1], [0], [0], [1], [0, 0, 1, 1], [], []>} : vector<16x128xbf16>, vector<128x32xbf16>, vector<16x32xf32> -> vector<16x32xf32>
    %c27 = arith.constant 27 : index
    %c0_141 = arith.constant 0 : index
    %297 = vector.load %arg3[%c27, %c0_141] : memref<40x512xf32, #tpu.memory_space<vmem>>, vector<1x32xf32>
    %298 = vector.broadcast %297 : vector<1x32xf32> to vector<16x32xf32>
    %299 = arith.addf %296, %298 : vector<16x32xf32>
    %300 = arith.addf %274, %299 : vector<16x32xf32>
    %c28 = arith.constant 28 : index
    %c0_142 = arith.constant 0 : index
    %301 = vector.load %arg3[%c28, %c0_142] : memref<40x512xf32, #tpu.memory_space<vmem>>, vector<1x32xf32>
    %c29 = arith.constant 29 : index
    %c0_143 = arith.constant 0 : index
    %302 = vector.load %arg3[%c29, %c0_143] : memref<40x512xf32, #tpu.memory_space<vmem>>, vector<1x32xf32>
    %cst_144 = arith.constant dense<0.000000e+00> : vector<16xf32>
    %303 = vector.multi_reduction <add>, %300, %cst_144 [1] : vector<16x32xf32> to vector<16xf32>
    %304 = vector.shape_cast %303 : vector<16xf32> to vector<16x1xf32>
    %cst_145 = arith.constant 3.200000e+01 : f32
    %305 = vector.broadcast %cst_145 : f32 to vector<16x1xf32>
    %306 = arith.divf %304, %305 : vector<16x1xf32>
    %307 = vector.broadcast %306 : vector<16x1xf32> to vector<16x32xf32>
    %308 = arith.subf %300, %307 : vector<16x32xf32>
    %309 = arith.mulf %308, %308 : vector<16x32xf32>
    %cst_146 = arith.constant dense<0.000000e+00> : vector<16xf32>
    %310 = vector.multi_reduction <add>, %309, %cst_146 [1] : vector<16x32xf32> to vector<16xf32>
    %311 = vector.shape_cast %310 : vector<16xf32> to vector<16x1xf32>
    %cst_147 = arith.constant 3.200000e+01 : f32
    %312 = vector.broadcast %cst_147 : f32 to vector<16x1xf32>
    %313 = arith.divf %311, %312 : vector<16x1xf32>
    %314 = vector.broadcast %306 : vector<16x1xf32> to vector<16x32xf32>
    %315 = arith.subf %300, %314 : vector<16x32xf32>
    %cst_148 = arith.constant 9.99999996E-13 : f32
    %316 = vector.broadcast %cst_148 : f32 to vector<16x1xf32>
    %317 = arith.addf %313, %316 : vector<16x1xf32>
    %318 = math.rsqrt %317 : vector<16x1xf32>
    %319 = vector.broadcast %318 : vector<16x1xf32> to vector<16x32xf32>
    %320 = arith.mulf %315, %319 : vector<16x32xf32>
    %321 = vector.broadcast %301 : vector<1x32xf32> to vector<16x32xf32>
    %322 = arith.mulf %320, %321 : vector<16x32xf32>
    %323 = vector.broadcast %302 : vector<1x32xf32> to vector<16x32xf32>
    %324 = arith.addf %322, %323 : vector<16x32xf32>
    %c544 = arith.constant 544 : index
    %c0_149 = arith.constant 0 : index
    %325 = vector.load %arg4[%c544, %c0_149] : memref<816x128xbf16, #tpu.memory_space<vmem>>, vector<8x16xbf16>
    %326 = arith.truncf %324 : vector<16x32xf32> to vector<16x32xbf16>
    %cst_150 = arith.constant dense<0.000000e+00> : vector<8x32xf32>
    %327 = tpu.matmul %325, %326, %cst_150 {dimension_numbers = #tpu.dot_dimension_numbers<[1], [0], [0], [1], [0, 0, 1, 1], [], []>} : vector<8x16xbf16>, vector<16x32xbf16>, vector<8x32xf32> -> vector<8x32xf32>
    %c30 = arith.constant 30 : index
    %c0_151 = arith.constant 0 : index
    %328 = vector.load %arg3[%c30, %c0_151] : memref<40x512xf32, #tpu.memory_space<vmem>>, vector<1x512xf32>
    %c0_152 = arith.constant 0 : index
    %c0_153 = arith.constant 0 : index
    %329 = vector.load %arg6[%c0_152, %c0_153] : memref<160x512xbf16, #tpu.memory_space<vmem>>, vector<128x512xbf16>
    %330 = arith.truncf %140 : vector<8x128xf32> to vector<8x128xbf16>
    %cst_154 = arith.constant dense<0.000000e+00> : vector<8x512xf32>
    %331 = tpu.matmul %330, %329, %cst_154 {dimension_numbers = #tpu.dot_dimension_numbers<[1], [0], [0], [1], [0, 0, 1, 1], [], []>} : vector<8x128xbf16>, vector<128x512xbf16>, vector<8x512xf32> -> vector<8x512xf32>
    %332 = vector.broadcast %328 : vector<1x512xf32> to vector<8x512xf32>
    %333 = arith.addf %332, %331 : vector<8x512xf32>
    %c128 = arith.constant 128 : index
    %c0_155 = arith.constant 0 : index
    %334 = vector.load %arg6[%c128, %c0_155] : memref<160x512xbf16, #tpu.memory_space<vmem>>, vector<32x512xbf16>
    %335 = arith.truncf %327 : vector<8x32xf32> to vector<8x32xbf16>
    %cst_156 = arith.constant dense<0.000000e+00> : vector<8x512xf32>
    %336 = tpu.matmul %335, %334, %cst_156 {dimension_numbers = #tpu.dot_dimension_numbers<[1], [0], [0], [1], [0, 0, 1, 1], [], []>} : vector<8x32xbf16>, vector<32x512xbf16>, vector<8x512xf32> -> vector<8x512xf32>
    %337 = arith.addf %333, %336 : vector<8x512xf32>
    %cst_157 = arith.constant 0.000000e+00 : f32
    %338 = vector.broadcast %cst_157 : f32 to vector<8x512xf32>
    %339 = arith.maximumf %337, %338 : vector<8x512xf32>
    %c64_158 = arith.constant 64 : index
    %c0_159 = arith.constant 0 : index
    %340 = vector.load %arg5[%c64_158, %c0_159] : memref<576x256xbf16, #tpu.memory_space<vmem>>, vector<512x256xbf16>
    %341 = arith.truncf %339 : vector<8x512xf32> to vector<8x512xbf16>
    %cst_160 = arith.constant dense<0.000000e+00> : vector<8x256xf32>
    %342 = tpu.matmul %341, %340, %cst_160 {dimension_numbers = #tpu.dot_dimension_numbers<[1], [0], [0], [1], [0, 0, 1, 1], [], []>} : vector<8x512xbf16>, vector<512x256xbf16>, vector<8x256xf32> -> vector<8x256xf32>
    %c31 = arith.constant 31 : index
    %c0_161 = arith.constant 0 : index
    %343 = vector.load %arg3[%c31, %c0_161] : memref<40x512xf32, #tpu.memory_space<vmem>>, vector<1x256xf32>
    %344 = vector.broadcast %343 : vector<1x256xf32> to vector<8x256xf32>
    %345 = arith.addf %342, %344 : vector<8x256xf32>
    %cst_162 = arith.constant 0.000000e+00 : f32
    %346 = vector.broadcast %cst_162 : f32 to vector<8x256xf32>
    %347 = arith.maximumf %345, %346 : vector<8x256xf32>
    %c560 = arith.constant 560 : index
    %c0_163 = arith.constant 0 : index
    %348 = vector.load %arg4[%c560, %c0_163] : memref<816x128xbf16, #tpu.memory_space<vmem>>, vector<256x128xbf16>
    %349 = arith.truncf %347 : vector<8x256xf32> to vector<8x256xbf16>
    %cst_164 = arith.constant dense<0.000000e+00> : vector<8x128xf32>
    %350 = tpu.matmul %349, %348, %cst_164 {dimension_numbers = #tpu.dot_dimension_numbers<[1], [0], [0], [1], [0, 0, 1, 1], [], []>} : vector<8x256xbf16>, vector<256x128xbf16>, vector<8x128xf32> -> vector<8x128xf32>
    %c32_165 = arith.constant 32 : index
    %c0_166 = arith.constant 0 : index
    %351 = vector.load %arg3[%c32_165, %c0_166] : memref<40x512xf32, #tpu.memory_space<vmem>>, vector<1x128xf32>
    %352 = vector.broadcast %351 : vector<1x128xf32> to vector<8x128xf32>
    %353 = arith.addf %350, %352 : vector<8x128xf32>
    %c0_167 = arith.constant 0 : index
    %c0_168 = arith.constant 0 : index
    %354 = vector.load %arg7[%c0_167, %c0_168] : memref<8x128xf32, #tpu.memory_space<vmem>>, vector<8x128xf32>
    tpu.vector_store %arg7[%c0_167, %c0_168], %353 {strides = array<i32>} : memref<8x128xf32, #tpu.memory_space<vmem>>, vector<8x128xf32>,
    return
  }
}

</mosaic_0001>

<bundles_post_ra>
// kernel: densenet121_bert_classifier.1
= control target key start
LH: loop header
LB: loop body
LE: loop exit
PB: predicated region body
PF: predicated region fallthrough
CT: control target
= control target key end

     0   :  { %vm219_vm0 = vcmask 261120   ;;  %v10843_v7 = vmov 0.0   ;;  %s10844_s22 = smov 112   ;;  %s10845_s15 = smov 32   ;;  %vm1762_vm1 = vcmask 392448   ;;  %vm2742_vm2 = vcmask 523648   ;;  %s13789_s4 = inlined_call_operand.vmem [shape: bf16[816,128], index: 4, kind: input, shape index: {}]   ;;  %s13790_s0 = inlined_call_operand.vmem [shape: f32[512,32], index: 0, kind: input, shape index: {}]   ;;  %s13791_s3 = inlined_call_operand.vmem [shape: f32[40,512], index: 3, kind: input, shape index: {}]   ;;  %s13792_s5 = inlined_call_operand.vmem [shape: bf16[576,256], index: 5, kind: input, shape index: {}]   ;;  %s13793_s1 = inlined_call_operand.vmem [shape: f32[16,32], index: 1, kind: input, shape index: {}]   ;;  %s13794_s2 = inlined_call_operand.vmem [shape: f32[8,1,8], index: 2, kind: input, shape index: {}]   ;;  %s13795_s6 = inlined_call_operand.vmem [shape: bf16[160,512], index: 6, kind: input, shape index: {}]   ;;  %s13796_s7 = inlined_call_operand.vmem [shape: f32[8,128], index: 7, kind: output, shape index: {}]  }
   0x1   :  { %v10527_v0 = vld [vmem:[%s13789_s4] sm:$0xff]   ;;  %v10903_v1 = vld [vmem:[%s13789_s4 + $0x8] sm:$0xff]   ;;  %v10920_v5 = vld [vmem:[%s13790_s0 + $0x10] sm:$0xff]  ;;  %29 = vst [vmem:[#allocation2 + $0x10] sm:$0xff] %v10843_v7  ;;  %s10846_s29 = smov 96   ;;  %s10848_s18 = smov 64  }
   0x2   :  { %9798 = vmatprep.subr.bf16.mxu0 %v10527_v0  ;;  %v10908_v2 = vld [vmem:[%s13790_s0] sm:$0xff]  ;;  %v10913_v3 = vld [vmem:[%s13790_s0 + $0x8] sm:$0xff]  ;;  %v10925_v6 = vld [vmem:[%s13790_s0 + $0x18] sm:$0xff]  ;;  %27 = vst [vmem:[#allocation2] sm:$0xff] %v10843_v7  ;;  %vm3722_vm3 = vcmask 654848   ;;  %s10849_s8 = smov 80  }
   0x3   :  { %9799 = vmatpush3.bf16.msra.mxu0 %v10527_v0  ;;  %v175_v4 = vpack.c.bf16 %v10913_v3, %v10908_v2  ;;  %28 = vst [vmem:[#allocation2 + $0x8] sm:$0xff] %v10843_v7  ;;  %30 = vst [vmem:[#allocation2 + $0x18] sm:$0xff] %v10843_v7  ;;  %v111_v8 = vld [vmem:[%s13790_s0 + $0x20] sm:$0xff]  ;;  %v112_v9 = vld [vmem:[%s13790_s0 + $0x28] sm:$0xff]  ;;  %v176_v10 = vpack.c.bf16 %v10925_v6, %v10920_v5  ;;  %vm4559_vm4 = vcmask 523264   ;;  %vm5303_vm5 = vcmask 786048  }
   0x4   :  { %31 = vst [vmem:[#allocation2 + $0x20] sm:$0xff] %v10843_v7  ;;  %32 = vst [vmem:[#allocation2 + $0x28] sm:$0xff] %v10843_v7  ;;  %9800 = vmatprep.subr.bf16.mxu0 %v10903_v1  ;;  %v177_v11 = vpack.c.bf16 %v112_v9, %v111_v8  ;;  %v113_v12 = vld [vmem:[%s13790_s0 + $0x30] sm:$0xff]  ;;  %v114_v13 = vld [vmem:[%s13790_s0 + $0x38] sm:$0xff]  ;;  %vm5635_vm6 = vcmask 917248   ;;  %vm10850_vm7 = vmmov 0  }
   0x5   :  { %33 = vst [vmem:[#allocation2 + $0x30] sm:$0xff] %v10843_v7  ;;  %34 = vst [vmem:[#allocation2 + $0x38] sm:$0xff] %v10843_v7  ;;  %9802 = vmatprep.mubr.msk.bf16.mxu0 %vm219_vm0, %v175_v4  ;;  %v115_v14 = vld [vmem:[%s13790_s0 + $0x40] sm:$0xff]  ;;  %v116_v15 = vld [vmem:[%s13790_s0 + $0x48] sm:$0xff]  ;;  %v178_v16 = vpack.c.bf16 %v114_v13, %v113_v12  ;;  %vm5967_vm8 = vcmask 1048448   ;;  %s10851_s28 = smov 120  }
   0x6   :  { %35 = vst [vmem:[#allocation2 + $0x40] sm:$0xff] %v10843_v7  ;;  %36 = vst [vmem:[#allocation2 + $0x48] sm:$0xff] %v10843_v7  ;;  %v179_v17 = vpack.c.bf16 %v116_v15, %v115_v14  ;;  %v117_v18 = vld [vmem:[%s13790_s0 + $0x50] sm:$0xff]  ;;  %v118_v19 = vld [vmem:[%s13790_s0 + $0x58] sm:$0xff]  ;;  %s10852_s30 = smov 104   ;;  %vm6218_vm9 = vcmask 64512  }
   0x7   :  { %37 = vst [vmem:[#allocation2 + $0x50] sm:$0xff] %v10843_v7  ;;  %38 = vst [vmem:[#allocation2 + $0x58] sm:$0xff] %v10843_v7  ;;  %9801 = vmatpush3.bf16.msra.mxu0 %v10903_v1  ;;  %v119_v20 = vld [vmem:[%s13790_s0 + $0x60] sm:$0xff]  ;;  %v120_v21 = vld [vmem:[%s13790_s0 + $0x68] sm:$0xff]  ;;  %v180_v22 = vpack.c.bf16 %v118_v19, %v117_v18  ;;  %s10855_s26 = smov 16   ;;  %vm7606_vm10 = vcmask 130048  }
   0x8   :  { %39 = vst [vmem:[#allocation2 + $0x60] sm:$0xff] %v10843_v7  ;;  %40 = vst [vmem:[#allocation2 + $0x68] sm:$0xff] %v10843_v7  ;;  %v181_v23 = vpack.c.bf16 %v120_v21, %v119_v20  ;;  %v10529_v24 = vld [vmem:[%s13789_s4 + $0x10] sm:$0xff]   ;;  %v122_v26 = vld [vmem:[%s13790_s0 + $0x78] sm:$0xff]  ;;  %vm7608_vm11 = vcmask 195584  }
   0x9   :  { %41 = vst [vmem:[#allocation2 + $0x70] sm:$0xff] %v10843_v7  ;;  %42 = vst [vmem:[#allocation2 + $0x78] sm:$0xff] %v10843_v7  ;;  %v121_v25 = vld [vmem:[%s13790_s0 + $0x70] sm:$0xff]  ;;  %v10530_v27 = vld [vmem:[%s13789_s4 + $0x18] sm:$0xff]   ;;  %9866 = vmatprep.subr.bf16.mxu0 %v10529_v24  ;;  %10464 = vmatprep.subr.bf16.mxu1 %v10529_v24 }
   0xa   :  { %43 = vst [vmem:[#allocation2 + $0x80] sm:$0xff] %v10843_v7  ;;  %44 = vst [vmem:[#allocation2 + $0x88] sm:$0xff] %v10843_v7  ;;  %9803 = vmatmul.mubr.msk.bf16.vlgmr.msra.gmra.mrb[0].mxu0 %vm219_vm0, %v176_v10  ;;  %v123_v28 = vld [vmem:[%s13790_s0 + $0x80] sm:$0xff]  ;;  %v124_v29 = vld [vmem:[%s13790_s0 + $0x88] sm:$0xff]  ;;  %10472 = vmatpush3.bf16.msra.mxu1 %v10529_v24  ;;  %v182_v30 = vpack.c.bf16 %v122_v26, %v121_v25 }
   0xb   :  { %45 = vst [vmem:[#allocation2 + $0x90] sm:$0xff] %v10843_v7  ;;  %46 = vst [vmem:[#allocation2 + $0x98] sm:$0xff] %v10843_v7  ;;  %9806 = vmatprep.mubr.msk.bf16.mxu0 %vm219_vm0, %v177_v11  ;;  %9867 = vmatpush3.bf16.msra.mxu0 %v10529_v24  ;;  %v183_v31 = vpack.c.bf16 %v124_v29, %v123_v28  ;;  %v125_v32 = vld [vmem:[%s13790_s0 + $0x90] sm:$0xff]  ;;  %v126_v33 = vld [vmem:[%s13790_s0 + $0x98] sm:$0xff] }
   0xc   :  { %47 = vst [vmem:[#allocation2 + $0xa0] sm:$0xff] %v10843_v7  ;;  %48 = vst [vmem:[#allocation2 + $0xa8] sm:$0xff] %v10843_v7  ;;  %9868 = vmatprep.subr.bf16.mxu0 %v10530_v27  ;;  %10465 = vmatprep.subr.bf16.mxu1 %v10530_v27  ;;  %v127_v34 = vld [vmem:[%s13790_s0 + $0xa0] sm:$0xff]  ;;  %v128_v35 = vld [vmem:[%s13790_s0 + $0xa8] sm:$0xff]  ;;  %v184_v36 = vpack.c.bf16 %v126_v33, %v125_v32 }
   0xd   :  { %49 = vst [vmem:[#allocation2 + $0xb0] sm:$0xff] %v10843_v7  ;;  %50 = vst [vmem:[#allocation2 + $0xb8] sm:$0xff] %v10843_v7  ;;  %v185_v37 = vpack.c.bf16 %v128_v35, %v127_v34  ;;  %v129_v38 = vld [vmem:[%s13790_s0 + $0xb0] sm:$0xff]  ;;  %v130_v39 = vld [vmem:[%s13790_s0 + $0xb8] sm:$0xff] }
   0xe   :  { %51 = vst [vmem:[#allocation2 + $0xc0] sm:$0xff] %v10843_v7  ;;  %52 = vst [vmem:[#allocation2 + $0xc8] sm:$0xff] %v10843_v7  ;;  %10473 = vmatpush3.bf16.msra.mxu1 %v10530_v27  ;;  %v131_v40 = vld [vmem:[%s13790_s0 + $0xc0] sm:$0xff]  ;;  %v132_v41 = vld [vmem:[%s13790_s0 + $0xc8] sm:$0xff]  ;;  %v186_v42 = vpack.c.bf16 %v130_v39, %v129_v38 }
   0xf   :  { %53 = vst [vmem:[#allocation2 + $0xd0] sm:$0xff] %v10843_v7  ;;  %54 = vst [vmem:[#allocation2 + $0xd8] sm:$0xff] %v10843_v7  ;;  %9869 = vmatpush3.bf16.msra.mxu0 %v10530_v27  ;;  %v187_v43 = vpack.c.bf16 %v132_v41, %v131_v40  ;;  %v133_v44 = vld [vmem:[%s13790_s0 + $0xd0] sm:$0xff]  ;;  %v134_v45 = vld [vmem:[%s13790_s0 + $0xd8] sm:$0xff] }
  0x10   :  { %55 = vst [vmem:[#allocation2 + $0xe0] sm:$0xff] %v10843_v7  ;;  %56 = vst [vmem:[#allocation2 + $0xe8] sm:$0xff] %v10843_v7  ;;  %v135_v46 = vld [vmem:[%s13790_s0 + $0xe0] sm:$0xff]  ;;  %v136_v47 = vld [vmem:[%s13790_s0 + $0xe8] sm:$0xff]  ;;  %v188_v48 = vpack.c.bf16 %v134_v45, %v133_v44 }
  0x11   :  { %57 = vst [vmem:[#allocation2 + $0xf0] sm:$0xff] %v10843_v7  ;;  %58 = vst [vmem:[#allocation2 + $0xf8] sm:$0xff] %v10843_v7  ;;  %v189_v49 = vpack.c.bf16 %v136_v47, %v135_v46  ;;  %v137_v50 = vld [vmem:[%s13790_s0 + $0xf0] sm:$0xff]  ;;  %v138_v51 = vld [vmem:[%s13790_s0 + $0xf8] sm:$0xff] }
  0x12   :  { %59 = vst [vmem:[#allocation2 + $0x100] sm:$0xff] %v10843_v7  ;;  %60 = vst [vmem:[#allocation2 + $0x108] sm:$0xff] %v10843_v7  ;;  %9807 = vmatmul.mubr.msk.bf16.gmra.mrb[4].mxu0 %vm219_vm0, %v178_v16  ;;  %v139_v52 = vld [vmem:[%s13790_s0 + $0x100] sm:$0xff]  ;;  %v140_v53 = vld [vmem:[%s13790_s0 + $0x108] sm:$0xff]  ;;  %v190_v54 = vpack.c.bf16 %v138_v51, %v137_v50 }
  0x13   :  { %61 = vst [vmem:[#allocation2 + $0x110] sm:$0xff] %v10843_v7  ;;  %62 = vst [vmem:[#allocation2 + $0x118] sm:$0xff] %v10843_v7  ;;  %9810 = vmatprep.mubr.msk.bf16.mxu0 %vm219_vm0, %v179_v17  ;;  %v191_v55 = vpack.c.bf16 %v140_v53, %v139_v52  ;;  %v141_v56 = vld [vmem:[%s13790_s0 + $0x110] sm:$0xff]  ;;  %v142_v57 = vld [vmem:[%s13790_s0 + $0x118] sm:$0xff] }
  0x14   :  { %63 = vst [vmem:[#allocation2 + $0x120] sm:$0xff] %v10843_v7  ;;  %64 = vst [vmem:[#allocation2 + $0x128] sm:$0xff] %v10843_v7  ;;  %v143_v58 = vld [vmem:[%s13790_s0 + $0x120] sm:$0xff]  ;;  %v144_v59 = vld [vmem:[%s13790_s0 + $0x128] sm:$0xff]  ;;  %v192_v60 = vpack.c.bf16 %v142_v57, %v141_v56 }
  0x15   :  { %65 = vst [vmem:[#allocation2 + $0x130] sm:$0xff] %v10843_v7  ;;  %66 = vst [vmem:[#allocation2 + $0x138] sm:$0xff] %v10843_v7  ;;  %v193_v61 = vpack.c.bf16 %v144_v59, %v143_v58  ;;  %v145_v62 = vld [vmem:[%s13790_s0 + $0x130] sm:$0xff]  ;;  %v146_v63 = vld [vmem:[%s13790_s0 + $0x138] sm:$0xff] }
  0x16   :  { %67 = vst [vmem:[#allocation2 + $0x140] sm:$0xff] %v10843_v7  ;;  %68 = vst [vmem:[#allocation2 + $0x148] sm:$0xff] %v10843_v7  ;;  %v147_v0 = vld [vmem:[%s13790_s0 + $0x140] sm:$0xff]  ;;  %v148_v1 = vld [vmem:[%s13790_s0 + $0x148] sm:$0xff]  ;;  %v194_v2 = vpack.c.bf16 %v146_v63, %v145_v62 }
  0x17   :  { %69 = vst [vmem:[#allocation2 + $0x150] sm:$0xff] %v10843_v7  ;;  %70 = vst [vmem:[#allocation2 + $0x158] sm:$0xff] %v10843_v7  ;;  %v195_v3 = vpack.c.bf16 %v148_v1, %v147_v0  ;;  %v149_v4 = vld [vmem:[%s13790_s0 + $0x150] sm:$0xff]  ;;  %v150_v5 = vld [vmem:[%s13790_s0 + $0x158] sm:$0xff] }
  0x18   :  { %71 = vst [vmem:[#allocation2 + $0x160] sm:$0xff] %v10843_v7  ;;  %72 = vst [vmem:[#allocation2 + $0x168] sm:$0xff] %v10843_v7  ;;  %v151_v6 = vld [vmem:[%s13790_s0 + $0x160] sm:$0xff]  ;;  %v152_v8 = vld [vmem:[%s13790_s0 + $0x168] sm:$0xff]  ;;  %v196_v9 = vpack.c.bf16 %v150_v5, %v149_v4 }
  0x19   :  { %73 = vst [vmem:[#allocation2 + $0x170] sm:$0xff] %v10843_v7  ;;  %74 = vst [vmem:[#allocation2 + $0x178] sm:$0xff] %v10843_v7  ;;  %v197_v10 = vpack.c.bf16 %v152_v8, %v151_v6  ;;  %v153_v11 = vld [vmem:[%s13790_s0 + $0x170] sm:$0xff]  ;;  %v154_v12 = vld [vmem:[%s13790_s0 + $0x178] sm:$0xff] }
  0x1a   :  { %75 = vst [vmem:[#allocation2 + $0x180] sm:$0xff] %v10843_v7  ;;  %76 = vst [vmem:[#allocation2 + $0x188] sm:$0xff] %v10843_v7  ;;  %9811 = vmatmul.mubr.msk.bf16.gmra.mrb[8].mxu0 %vm219_vm0, %v180_v22  ;;  %v155_v13 = vld [vmem:[%s13790_s0 + $0x180] sm:$0xff]  ;;  %v156_v14 = vld [vmem:[%s13790_s0 + $0x188] sm:$0xff]  ;;  %v198_v15 = vpack.c.bf16 %v154_v12, %v153_v11 }
  0x1b   :  { %77 = vst [vmem:[#allocation2 + $0x190] sm:$0xff] %v10843_v7  ;;  %78 = vst [vmem:[#allocation2 + $0x198] sm:$0xff] %v10843_v7  ;;  %9814 = vmatprep.mubr.msk.bf16.mxu0 %vm219_vm0, %v181_v23  ;;  %v10531_v16 = vld [vmem:[%s13789_s4 + $0x20] sm:$0xff]   ;;  %v199_v17 = vpack.c.bf16 %v156_v14, %v155_v13  ;;  %v10532_v18 = vld [vmem:[%s13789_s4 + $0x28] sm:$0xff]  }
  0x1c   :  { %79 = vst [vmem:[#allocation2 + $0x1a0] sm:$0xff] %v10843_v7  ;;  %80 = vst [vmem:[#allocation2 + $0x1a8] sm:$0xff] %v10843_v7  ;;  %9870 = vmatprep.subr.bf16.mxu0 %v10531_v16  ;;  %10466 = vmatprep.subr.bf16.mxu1 %v10531_v16  ;;  %v157_v19 = vld [vmem:[%s13790_s0 + $0x190] sm:$0xff]  ;;  %v158_v20 = vld [vmem:[%s13790_s0 + $0x198] sm:$0xff] }
  0x1d   :  { %81 = vst [vmem:[#allocation2 + $0x1b0] sm:$0xff] %v10843_v7  ;;  %82 = vst [vmem:[#allocation2 + $0x1b8] sm:$0xff] %v10843_v7  ;;  %9871 = vmatpush3.bf16.msra.mxu0 %v10531_v16  ;;  %10474 = vmatpush3.bf16.msra.mxu1 %v10531_v16  ;;  %v159_v21 = vld [vmem:[%s13790_s0 + $0x1a0] sm:$0xff]  ;;  %v160_v22 = vld [vmem:[%s13790_s0 + $0x1a8] sm:$0xff]  ;;  %v200_v23 = vpack.c.bf16 %v158_v20, %v157_v19 }
  0x1e   :  { %83 = vst [vmem:[#allocation2 + $0x1c0] sm:$0xff] %v10843_v7  ;;  %84 = vst [vmem:[#allocation2 + $0x1c8] sm:$0xff] %v10843_v7  ;;  %9872 = vmatprep.subr.bf16.mxu0 %v10532_v18  ;;  %10467 = vmatprep.subr.bf16.mxu1 %v10532_v18  ;;  %v10533_v24 = vld [vmem:[%s13789_s4 + $0x30] sm:$0xff]   ;;  %v201_v25 = vpack.c.bf16 %v160_v22, %v159_v21  ;;  %v10534_v26 = vld [vmem:[%s13789_s4 + $0x38] sm:$0xff]  }
  0x1f   :  { %85 = vst [vmem:[#allocation2 + $0x1d0] sm:$0xff] %v10843_v7  ;;  %86 = vst [vmem:[#allocation2 + $0x1d8] sm:$0xff] %v10843_v7  ;;  %v161_v27 = vld [vmem:[%s13790_s0 + $0x1b0] sm:$0xff]  ;;  %v162_v28 = vld [vmem:[%s13790_s0 + $0x1b8] sm:$0xff] }
  0x20   :  { %87 = vst [vmem:[#allocation2 + $0x1e0] sm:$0xff] %v10843_v7  ;;  %88 = vst [vmem:[#allocation2 + $0x1e8] sm:$0xff] %v10843_v7  ;;  %v163_v29 = vld [vmem:[%s13790_s0 + $0x1c0] sm:$0xff]  ;;  %v10536_v34 = vld [vmem:[%s13789_s4 + $0x48] sm:$0xff]  }
  0x21   :  { %89 = vst [vmem:[#allocation2 + $0x1f0] sm:$0xff] %v10843_v7  ;;  %90 = vst [vmem:[#allocation2 + $0x1f8] sm:$0xff] %v10843_v7  ;;  %9873 = vmatpush3.bf16.msra.mxu0 %v10532_v18  ;;  %10475 = vmatpush3.bf16.msra.mxu1 %v10532_v18  ;;  %v10535_v32 = vld [vmem:[%s13789_s4 + $0x40] sm:$0xff]   ;;  %v165_v35 = vld [vmem:[%s13790_s0 + $0x1d0] sm:$0xff] }
  0x22   :  { %91 = vst [vmem:[#allocation3] sm:$0xff] %v10843_v7  ;;  %92 = vst [vmem:[#allocation3 + $0x8] sm:$0xff] %v10843_v7  ;;  %9815 = vmatmul.mubr.msk.bf16.gmra.mrb[12].mxu0 %vm219_vm0, %v182_v30  ;;  %9874 = vmatprep.subr.bf16.mxu0 %v10533_v24  ;;  %v164_v30 = vld [vmem:[%s13790_s0 + $0x1c8] sm:$0xff]  ;;  %v169_v41 = vld [vmem:[%s13790_s0 + $0x1f0] sm:$0xff] }
  0x23   :  { %93 = vst [vmem:[#allocation3 + $0x10] sm:$0xff] %v10843_v7  ;;  %94 = vst [vmem:[#allocation3 + $0x18] sm:$0xff] %v10843_v7  ;;  %9818 = vmatprep.mubr.msk.bf16.mxu0 %vm219_vm0, %v183_v31  ;;  %10468 = vmatprep.subr.bf16.mxu1 %v10533_v24  ;;  %v202_v31 = vpack.c.bf16 %v162_v28, %v161_v27  ;;  %v203_v33 = vpack.c.bf16 %v164_v30, %v163_v29  ;;  %v168_v38 = vld [vmem:[%s13790_s0 + $0x1e8] sm:$0xff]  ;;  %v11253_v44 = vld [vmem:[%s13791_s3] ss:$0 sm:$0xff] }
  0x24   :  { %95 = vst [vmem:[#allocation3 + $0x20] sm:$0xff] %v10843_v7  ;;  %96 = vst [vmem:[#allocation3 + $0x28] sm:$0xff] %v10843_v7  ;;  %v11258_v46 = vld [vmem:[%s13791_s3 + $0x1] ss:$0 sm:$0xff] }
  0x25   :  { %97 = vst [vmem:[#allocation3 + $0x30] sm:$0xff] %v10843_v7  ;;  %98 = vst [vmem:[#allocation3 + $0x38] sm:$0xff] %v10843_v7  ;;  %9875 = vmatpush3.bf16.msra.mxu0 %v10533_v24  ;;  %10476 = vmatpush3.bf16.msra.mxu1 %v10533_v24 }
  0x26   :  { %99 = vst [vmem:[#allocation3 + $0x40] sm:$0xff] %v10843_v7  ;;  %100 = vst [vmem:[#allocation3 + $0x48] sm:$0xff] %v10843_v7  ;;  %9876 = vmatprep.subr.bf16.mxu0 %v10534_v26  ;;  %10469 = vmatprep.subr.bf16.mxu1 %v10534_v26 }
  0x27   :  { %101 = vst [vmem:[#allocation3 + $0x50] sm:$0xff] %v10843_v7  ;;  %102 = vst [vmem:[#allocation3 + $0x58] sm:$0xff] %v10843_v7 }
  0x28   :  { %103 = vst [vmem:[#allocation3 + $0x60] sm:$0xff] %v10843_v7  ;;  %104 = vst [vmem:[#allocation3 + $0x68] sm:$0xff] %v10843_v7 }
  0x29   :  { %105 = vst [vmem:[#allocation3 + $0x70] sm:$0xff] %v10843_v7  ;;  %106 = vst [vmem:[#allocation3 + $0x78] sm:$0xff] %v10843_v7  ;;  %9877 = vmatpush3.bf16.msra.mxu0 %v10534_v26  ;;  %10477 = vmatpush3.bf16.msra.mxu1 %v10534_v26 }
  0x2a   :  { %9819 = vmatmul.mubr.msk.bf16.gmra.mrb[16].mxu0 %vm219_vm0, %v184_v36  ;;  %9878 = vmatprep.subr.bf16.mxu0 %v10535_v32  ;;  %v166_v36 = vld [vmem:[%s13790_s0 + $0x1d8] sm:$0xff] }
  0x2b   :  { %9822 = vmatprep.mubr.msk.bf16.mxu0 %vm219_vm0, %v185_v37  ;;  %10470 = vmatprep.subr.bf16.mxu1 %v10535_v32  ;;  %v167_v37 = vld [vmem:[%s13790_s0 + $0x1e0] sm:$0xff]  ;;  %v204_v39 = vpack.c.bf16 %v166_v36, %v165_v35  ;;  %v10537_v36 = vld [vmem:[%s13789_s4 + $0x10] sm:$0xff]  }
  0x2c   :  { %v205_v40 = vpack.c.bf16 %v168_v38, %v167_v37  ;;  %v10539_v37 = vld [vmem:[%s13789_s4 + $0x20] sm:$0xff]   ;;  %2173 = vrot.lane.b32.xlu0 %v10537_v36, %s10844_s22 }
  0x2d   :  { %9879 = vmatpush3.bf16.msra.mxu0 %v10535_v32  ;;  %10478 = vmatpush3.bf16.msra.mxu1 %v10535_v32 }
  0x2e   :  { %9880 = vmatprep.subr.bf16.mxu0 %v10536_v34  ;;  %10471 = vmatprep.subr.bf16.mxu1 %v10536_v34 }
  0x2f   :  { %2177 = vrot.lane.b32.xlu1 %v10539_v37, %s10844_s22 }
  0x31   :  { %9881 = vmatpush3.bf16.msra.mxu0 %v10536_v34  ;;  %10479 = vmatpush3.bf16.msra.mxu1 %v10536_v34 }
  0x32   :  { %9823 = vmatmul.mubr.msk.bf16.gmra.mrb[20].mxu0 %vm219_vm0, %v186_v42  ;;  %v170_v42 = vld [vmem:[%s13790_s0 + $0x1f8] sm:$0xff]  ;;  %s10847_s0 = smov 48  }
  0x33   :  { %9826 = vmatprep.mubr.msk.bf16.mxu0 %vm219_vm0, %v187_v43  ;;  %v206_v43 = vpack.c.bf16 %v170_v42, %v169_v41 }
  0x3a   :  { %9827 = vmatmul.mubr.msk.bf16.gmra.mrb[24].mxu0 %vm219_vm0, %v188_v48 }
  0x3b   :  { %9830 = vmatprep.mubr.msk.bf16.mxu0 %vm219_vm0, %v189_v49 }
  0x42   :  { %9831 = vmatmul.mubr.msk.bf16.gmra.mrb[28].mxu0 %vm219_vm0, %v190_v54 }
  0x43   :  { %9834 = vmatprep.mubr.msk.bf16.mxu0 %vm219_vm0, %v191_v55 }
  0x4a   :  { %9835 = vmatmul.mubr.msk.bf16.gmra.mrb[32].mxu0 %vm219_vm0, %v192_v60 }
  0x4b   :  { %9838 = vmatprep.mubr.msk.bf16.mxu0 %vm219_vm0, %v193_v61 }
  0x52   :  { %9839 = vmatmul.mubr.msk.bf16.gmra.mrb[36].mxu0 %vm219_vm0, %v194_v2 }
  0x53   :  { %9842 = vmatprep.mubr.msk.bf16.mxu0 %vm219_vm0, %v195_v3 }
  0x5a   :  { %9843 = vmatmul.mubr.msk.bf16.gmra.mrb[40].mxu0 %vm219_vm0, %v196_v9  ;;  %v11281_v9 = vld [vmem:[%s13791_s3 + $0x2] ss:$0 sm:$0xff] }
  0x5b   :  { %9846 = vmatprep.mubr.msk.bf16.mxu0 %vm219_vm0, %v197_v10 }
  0x62   :  { %9847 = vmatmul.mubr.msk.bf16.gmra.mrb[44].mxu0 %vm219_vm0, %v198_v15 }
  0x63   :  { %9850 = vmatprep.mubr.msk.bf16.mxu0 %vm219_vm0, %v199_v17  ;;  %v11289_v17 = vld [vmem:[%s13791_s3 + $0x3] ss:$0 sm:$0xff] }
  0x6a   :  { %9851 = vmatmul.mubr.msk.bf16.gmra.mrb[48].mxu0 %vm219_vm0, %v200_v23 }
  0x6b   :  { %9854 = vmatprep.mubr.msk.bf16.mxu0 %vm219_vm0, %v201_v25 }
  0x72   :  { %9855 = vmatmul.mubr.msk.bf16.gmra.mrb[52].mxu0 %vm219_vm0, %v202_v31 }
  0x73   :  { %9858 = vmatprep.mubr.msk.bf16.mxu0 %vm219_vm0, %v203_v33 }
  0x7a   :  { %9859 = vmatmul.mubr.msk.bf16.gmra.mrb[56].mxu0 %vm219_vm0, %v204_v39 }
  0x7b   :  { %9862 = vmatprep.mubr.msk.bf16.mxu0 %vm219_vm0, %v205_v40 }
  0x82   :  { %9863 = vmatmul.mubr.msk.bf16.gmra.mrb[60].mxu0 %vm219_vm0, %v206_v43 }
  0xdd   :  { %v9804_v45 = vpop.f32.mrb[0].mxu0 }
  0xde   :  { %v608_v47 = vmul.f32 %v9804_v45, %v11253_v44  ;;  %v350_v48 = vpop.f32.mrb[1].mxu0  ;;  %v10538_v45 = vld [vmem:[%s13789_s4 + $0x18] sm:$0xff]  }
  0xdf   :  { %v606_v49 = vmul.f32 %v11253_v44, %v350_v48  ;;  %v9805_v50 = vpop.f32.mrb[2].mxu0  ;;  %2175 = vrot.lane.b32.xlu0 %v10538_v45, %s10844_s22 }
  0xe0   :  { %v673_v51 = vadd.f32 %v11258_v46, %v608_v47  ;;  %v609_v52 = vmul.f32 %v9805_v50, %v11253_v44  ;;  %v353_v53 = vpop.f32.mrb[3].mxu0  ;;  %v10540_v47 = vld [vmem:[%s13789_s4 + $0x28] sm:$0xff]  }
  0xe1   :  { %v671_v54 = vadd.f32 %v11258_v46, %v606_v49  ;;  %v607_v55 = vmul.f32 %v11253_v44, %v353_v53  ;;  %2179 = vrot.lane.b32.xlu1 %v10540_v47, %s10844_s22 }
  0xe2   :  { %v737_v56 = vmax.f32 %v673_v51, 0.0  ;;  %v674_v57 = vadd.f32 %v11258_v46, %v609_v52 }
  0xe3   :  { %v735_v58 = vmax.f32 %v671_v54, 0.0  ;;  %v672_v59 = vadd.f32 %v11258_v46, %v607_v55 }
  0xe4   :  { %801 = vst.msk [vmem:[#allocation2 + $0x10] sm:$0xff] %vm219_vm0, %v737_v56  ;;  %v738_v60 = vmax.f32 %v674_v57, 0.0 }
  0xe5   :  { %799 = vst.msk [vmem:[#allocation2] sm:$0xff] %vm219_vm0, %v735_v58  ;;  %v736_v61 = vmax.f32 %v672_v59, 0.0  ;;  %v9808_v62 = vpop.f32.mrb[4].mxu0 }
  0xe6   :  { %802 = vst.msk [vmem:[#allocation2 + $0x18] sm:$0xff] %vm219_vm0, %v738_v60  ;;  %v612_v63 = vmul.f32 %v9808_v62, %v11253_v44  ;;  %v366_v0 = vpop.f32.mrb[5].mxu0 }
  0xe7   :  { %800 = vst.msk [vmem:[#allocation2 + $0x8] sm:$0xff] %vm219_vm0, %v736_v61  ;;  %v610_v1 = vmul.f32 %v11253_v44, %v366_v0  ;;  %v9809_v2 = vpop.f32.mrb[6].mxu0 }
  0xe8   :  { %v677_v3 = vadd.f32 %v11258_v46, %v612_v63  ;;  %v613_v4 = vmul.f32 %v9809_v2, %v11253_v44  ;;  %v369_v5 = vpop.f32.mrb[7].mxu0 }
  0xe9   :  { %v675_v6 = vadd.f32 %v11258_v46, %v610_v1  ;;  %v611_v8 = vmul.f32 %v11253_v44, %v369_v5 }
  0xea   :  { %v741_v10 = vmax.f32 %v677_v3, 0.0  ;;  %v678_v11 = vadd.f32 %v11258_v46, %v613_v4  ;;  %v10541_v3 = vld [vmem:[%s13789_s4 + $0x30] sm:$0xff]   ;;  %v10542_v4 = vld [vmem:[%s13789_s4 + $0x38] sm:$0xff]  }
  0xeb   :  { %v739_v12 = vmax.f32 %v675_v6, 0.0  ;;  %v676_v13 = vadd.f32 %v11258_v46, %v611_v8  ;;  %v865_v14 = vld [vmem:[#allocation2 + $0x10] sm:$0xff]  ;;  %2181 = vrot.lane.b32.xlu0 %v10541_v3, %s10844_s22  ;;  %2183 = vrot.lane.b32.xlu1 %v10542_v4, %s10844_s22 }
  0xec   :  { %805 = vst.msk [vmem:[#allocation2 + $0x30] sm:$0xff] %vm219_vm0, %v741_v10  ;;  %v742_v15 = vmax.f32 %v678_v11, 0.0  ;;  %v863_v16 = vld [vmem:[#allocation2] sm:$0xff]  ;;  %v930_v18 = vmul.f32 %v11281_v9, %v865_v14 }
  0xed   :  { %803 = vst.msk [vmem:[#allocation2 + $0x20] sm:$0xff] %vm219_vm0, %v739_v12  ;;  %v740_v19 = vmax.f32 %v676_v13, 0.0  ;;  %v9812_v20 = vpop.f32.mrb[8].mxu0  ;;  %v928_v21 = vmul.f32 %v11281_v9, %v863_v16  ;;  %v866_v22 = vld [vmem:[#allocation2 + $0x18] sm:$0xff] }
  0xee   :  { %806 = vst.msk [vmem:[#allocation2 + $0x38] sm:$0xff] %vm219_vm0, %v742_v15  ;;  %v616_v23 = vmul.f32 %v9812_v20, %v11253_v44  ;;  %v382_v24 = vpop.f32.mrb[9].mxu0  ;;  %v864_v25 = vld [vmem:[#allocation2 + $0x8] sm:$0xff]  ;;  %v931_v26 = vmul.f32 %v11281_v9, %v866_v22  ;;  %v995_v34 = vadd.f32 %v11289_v17, %v930_v18 }
  0xef   :  { %804 = vst.msk [vmem:[#allocation2 + $0x28] sm:$0xff] %vm219_vm0, %v740_v19  ;;  %v614_v27 = vmul.f32 %v11253_v44, %v382_v24  ;;  %v9813_v28 = vpop.f32.mrb[10].mxu0  ;;  %v929_v29 = vmul.f32 %v11281_v9, %v864_v25  ;;  %v993_v30 = vadd.f32 %v11289_v17, %v928_v21 }
  0xf0   :  { %v681_v31 = vadd.f32 %v11258_v46, %v616_v23  ;;  %v617_v32 = vmul.f32 %v9813_v28, %v11253_v44  ;;  %v385_v33 = vpop.f32.mrb[11].mxu0  ;;  %v996_v35 = vadd.f32 %v11289_v17, %v931_v26  ;;  %v1059_v54 = vmax.f32 %v995_v34, 0.0 }
  0xf1   :  { %v679_v38 = vadd.f32 %v11258_v46, %v614_v27  ;;  %v615_v39 = vmul.f32 %v11253_v44, %v385_v33  ;;  %v994_v40 = vadd.f32 %v11289_v17, %v929_v29  ;;  %v1057_v50 = vmax.f32 %v993_v30, 0.0 }
  0xf2   :  { %v745_v41 = vmax.f32 %v681_v31, 0.0  ;;  %v682_v42 = vadd.f32 %v11258_v46, %v617_v32  ;;  %v1060_v43 = vmax.f32 %v996_v35, 0.0 }
  0xf3   :  { %v743_v48 = vmax.f32 %v679_v38, 0.0  ;;  %v680_v49 = vadd.f32 %v11258_v46, %v615_v39  ;;  %v1058_v51 = vmax.f32 %v994_v40, 0.0  ;;  %v869_v52 = vld [vmem:[#allocation2 + $0x30] sm:$0xff] }
  0xf4   :  { %809 = vst.msk [vmem:[#allocation2 + $0x50] sm:$0xff] %vm219_vm0, %v745_v41  ;;  %v746_v53 = vmax.f32 %v682_v42, 0.0  ;;  %v867_v55 = vld [vmem:[#allocation2 + $0x20] sm:$0xff]  ;;  %v934_v56 = vmul.f32 %v11281_v9, %v869_v52  ;;  %v1138_v0 = vpack.c.bf16 %v1060_v43, %v1059_v54 }
  0xf5   :  { %807 = vst.msk [vmem:[#allocation2 + $0x40] sm:$0xff] %vm219_vm0, %v743_v48  ;;  %v744_v57 = vmax.f32 %v680_v49, 0.0  ;;  %v9816_v58 = vpop.f32.mrb[12].mxu0  ;;  %v1137_v59 = vpack.c.bf16 %v1058_v51, %v1057_v50  ;;  %v932_v60 = vmul.f32 %v11281_v9, %v867_v55  ;;  %v870_v61 = vld [vmem:[#allocation2 + $0x38] sm:$0xff] }
  0xf6   :  { %810 = vst.msk [vmem:[#allocation2 + $0x58] sm:$0xff] %vm219_vm0, %v746_v53  ;;  %v620_v62 = vmul.f32 %v9816_v58, %v11253_v44  ;;  %v398_v63 = vpop.f32.mrb[13].mxu0  ;;  %v868_v1 = vld [vmem:[#allocation2 + $0x28] sm:$0xff]  ;;  %v935_v2 = vmul.f32 %v11281_v9, %v870_v61  ;;  %v999_v14 = vadd.f32 %v11289_v17, %v934_v56 }
  0xf7   :  { %808 = vst.msk [vmem:[#allocation2 + $0x48] sm:$0xff] %vm219_vm0, %v744_v57  ;;  %v618_v5 = vmul.f32 %v11253_v44, %v398_v63  ;;  %v9817_v6 = vpop.f32.mrb[14].mxu0  ;;  %9882 = vmatprep.mubr.bf16.mxu0 %v1137_v59  ;;  %v933_v8 = vmul.f32 %v11281_v9, %v868_v1  ;;  %v997_v10 = vadd.f32 %v11289_v17, %v932_v60 }
  0xf8   :  { %v685_v11 = vadd.f32 %v11258_v46, %v620_v62  ;;  %v621_v12 = vmul.f32 %v9817_v6, %v11253_v44  ;;  %v401_v13 = vpop.f32.mrb[15].mxu0  ;;  %9883 = vmatmul.mubr.bf16.vlgmr.msra.gmra.mrb[64].mxu0 %v1138_v0  ;;  %v1000_v15 = vadd.f32 %v11289_v17, %v935_v2  ;;  %v1063_v29 = vmax.f32 %v999_v14, 0.0 }
  0xf9   :  { %v683_v16 = vadd.f32 %v11258_v46, %v618_v5  ;;  %v619_v18 = vmul.f32 %v11253_v44, %v401_v13  ;;  %v998_v19 = vadd.f32 %v11289_v17, %v933_v8  ;;  %v1061_v25 = vmax.f32 %v997_v10, 0.0 }
  0xfa   :  { %v749_v20 = vmax.f32 %v685_v11, 0.0  ;;  %v686_v21 = vadd.f32 %v11258_v46, %v621_v12  ;;  %v1064_v22 = vmax.f32 %v1000_v15, 0.0 }
  0xfb   :  { %v747_v23 = vmax.f32 %v683_v16, 0.0  ;;  %v684_v24 = vadd.f32 %v11258_v46, %v619_v18  ;;  %v1062_v26 = vmax.f32 %v998_v19, 0.0  ;;  %v873_v27 = vld [vmem:[#allocation2 + $0x50] sm:$0xff] }
  0xfc   :  { %813 = vst.msk [vmem:[#allocation2 + $0x70] sm:$0xff] %vm219_vm0, %v749_v20  ;;  %v750_v28 = vmax.f32 %v686_v21, 0.0  ;;  %v871_v30 = vld [vmem:[#allocation2 + $0x40] sm:$0xff]  ;;  %v938_v31 = vmul.f32 %v11281_v9, %v873_v27  ;;  %v1140_v39 = vpack.c.bf16 %v1064_v22, %v1063_v29 }
  0xfd   :  { %811 = vst.msk [vmem:[#allocation2 + $0x60] sm:$0xff] %vm219_vm0, %v747_v23  ;;  %v748_v32 = vmax.f32 %v684_v24, 0.0  ;;  %v9820_v33 = vpop.f32.mrb[16].mxu0  ;;  %v1139_v34 = vpack.c.bf16 %v1062_v26, %v1061_v25  ;;  %v936_v35 = vmul.f32 %v11281_v9, %v871_v30  ;;  %v874_v36 = vld [vmem:[#allocation2 + $0x58] sm:$0xff] }
  0xfe   :  { %814 = vst.msk [vmem:[#allocation2 + $0x78] sm:$0xff] %vm219_vm0, %v750_v28  ;;  %v624_v37 = vmul.f32 %v9820_v33, %v11253_v44  ;;  %v414_v38 = vpop.f32.mrb[17].mxu0  ;;  %v872_v40 = vld [vmem:[#allocation2 + $0x48] sm:$0xff]  ;;  %v939_v41 = vmul.f32 %v11281_v9, %v874_v36  ;;  %v1003_v42 = vadd.f32 %v11289_v17, %v938_v31 }
  0xff   :  { %812 = vst.msk [vmem:[#allocation2 + $0x68] sm:$0xff] %vm219_vm0, %v748_v32  ;;  %v622_v43 = vmul.f32 %v11253_v44, %v414_v38  ;;  %v9821_v45 = vpop.f32.mrb[18].mxu0  ;;  %9886 = vmatprep.mubr.bf16.mxu0 %v1139_v34  ;;  %v937_v47 = vmul.f32 %v11281_v9, %v872_v40  ;;  %v1001_v48 = vadd.f32 %v11289_v17, %v936_v35 }
 0x100   :  { %v689_v49 = vadd.f32 %v11258_v46, %v624_v37  ;;  %v625_v50 = vmul.f32 %v9821_v45, %v11253_v44  ;;  %v417_v51 = vpop.f32.mrb[19].mxu0  ;;  %9887 = vmatmul.mubr.bf16.gmra.mrb[68].mxu0 %v1140_v39  ;;  %v1004_v52 = vadd.f32 %v11289_v17, %v939_v41  ;;  %v1067_v53 = vmax.f32 %v1003_v42, 0.0 }
 0x101   :  { %v687_v54 = vadd.f32 %v11258_v46, %v622_v43  ;;  %v623_v55 = vmul.f32 %v11253_v44, %v417_v51  ;;  %v1002_v56 = vadd.f32 %v11289_v17, %v937_v47  ;;  %v1065_v57 = vmax.f32 %v1001_v48, 0.0 }
 0x102   :  { %v753_v58 = vmax.f32 %v689_v49, 0.0  ;;  %v690_v59 = vadd.f32 %v11258_v46, %v625_v50  ;;  %v1068_v60 = vmax.f32 %v1004_v52, 0.0 }
 0x103   :  { %v751_v61 = vmax.f32 %v687_v54, 0.0  ;;  %v688_v62 = vadd.f32 %v11258_v46, %v623_v55  ;;  %v1066_v63 = vmax.f32 %v1002_v56, 0.0  ;;  %v877_v0 = vld [vmem:[#allocation2 + $0x70] sm:$0xff] }
 0x104   :  { %817 = vst.msk [vmem:[#allocation2 + $0x90] sm:$0xff] %vm219_vm0, %v753_v58  ;;  %v754_v1 = vmax.f32 %v690_v59, 0.0  ;;  %v1142_v2 = vpack.c.bf16 %v1068_v60, %v1067_v53  ;;  %v875_v3 = vld [vmem:[#allocation2 + $0x60] sm:$0xff]  ;;  %v942_v4 = vmul.f32 %v11281_v9, %v877_v0 }
 0x105   :  { %815 = vst.msk [vmem:[#allocation2 + $0x80] sm:$0xff] %vm219_vm0, %v751_v61  ;;  %v752_v5 = vmax.f32 %v688_v62, 0.0  ;;  %v1141_v6 = vpack.c.bf16 %v1066_v63, %v1065_v57  ;;  %v9824_v8 = vpop.f32.mrb[20].mxu0  ;;  %v940_v10 = vmul.f32 %v11281_v9, %v875_v3  ;;  %v878_v11 = vld [vmem:[#allocation2 + $0x78] sm:$0xff] }
 0x106   :  { %818 = vst.msk [vmem:[#allocation2 + $0x98] sm:$0xff] %vm219_vm0, %v754_v1  ;;  %v628_v12 = vmul.f32 %v9824_v8, %v11253_v44  ;;  %v430_v13 = vpop.f32.mrb[21].mxu0  ;;  %v876_v14 = vld [vmem:[#allocation2 + $0x68] sm:$0xff]  ;;  %v943_v15 = vmul.f32 %v11281_v9, %v878_v11  ;;  %v1007_v16 = vadd.f32 %v11289_v17, %v942_v4 }
 0x107   :  { %816 = vst.msk [vmem:[#allocation2 + $0x88] sm:$0xff] %vm219_vm0, %v752_v5  ;;  %9890 = vmatprep.mubr.bf16.mxu0 %v1141_v6  ;;  %v626_v18 = vmul.f32 %v11253_v44, %v430_v13  ;;  %v9825_v19 = vpop.f32.mrb[22].mxu0  ;;  %v941_v20 = vmul.f32 %v11281_v9, %v876_v14  ;;  %v1005_v21 = vadd.f32 %v11289_v17, %v940_v10 }
 0x108   :  { %9891 = vmatmul.mubr.bf16.gmra.mrb[72].mxu0 %v1142_v2  ;;  %v693_v22 = vadd.f32 %v11258_v46, %v628_v12  ;;  %v629_v23 = vmul.f32 %v9825_v19, %v11253_v44  ;;  %v433_v24 = vpop.f32.mrb[23].mxu0  ;;  %v1008_v25 = vadd.f32 %v11289_v17, %v943_v15  ;;  %v1071_v26 = vmax.f32 %v1007_v16, 0.0 }
 0x109   :  { %v691_v27 = vadd.f32 %v11258_v46, %v626_v18  ;;  %v627_v28 = vmul.f32 %v11253_v44, %v433_v24  ;;  %v1006_v29 = vadd.f32 %v11289_v17, %v941_v20  ;;  %v1069_v30 = vmax.f32 %v1005_v21, 0.0 }
 0x10a   :  { %v757_v31 = vmax.f32 %v693_v22, 0.0  ;;  %v694_v32 = vadd.f32 %v11258_v46, %v629_v23  ;;  %v1072_v33 = vmax.f32 %v1008_v25, 0.0 }
 0x10b   :  { %v755_v34 = vmax.f32 %v691_v27, 0.0  ;;  %v692_v35 = vadd.f32 %v11258_v46, %v627_v28  ;;  %v1070_v36 = vmax.f32 %v1006_v29, 0.0  ;;  %v881_v37 = vld [vmem:[#allocation2 + $0x90] sm:$0xff] }
 0x10c   :  { %821 = vst.msk [vmem:[#allocation2 + $0xb0] sm:$0xff] %vm219_vm0, %v757_v31  ;;  %v758_v38 = vmax.f32 %v694_v32, 0.0  ;;  %v1144_v39 = vpack.c.bf16 %v1072_v33, %v1071_v26  ;;  %v879_v40 = vld [vmem:[#allocation2 + $0x80] sm:$0xff]  ;;  %v946_v41 = vmul.f32 %v11281_v9, %v881_v37 }
 0x10d   :  { %819 = vst.msk [vmem:[#allocation2 + $0xa0] sm:$0xff] %vm219_vm0, %v755_v34  ;;  %v756_v42 = vmax.f32 %v692_v35, 0.0  ;;  %v1143_v43 = vpack.c.bf16 %v1070_v36, %v1069_v30  ;;  %v9828_v45 = vpop.f32.mrb[24].mxu0  ;;  %v944_v47 = vmul.f32 %v11281_v9, %v879_v40  ;;  %v882_v48 = vld [vmem:[#allocation2 + $0x98] sm:$0xff] }
 0x10e   :  { %822 = vst.msk [vmem:[#allocation2 + $0xb8] sm:$0xff] %vm219_vm0, %v758_v38  ;;  %v632_v49 = vmul.f32 %v9828_v45, %v11253_v44  ;;  %v446_v50 = vpop.f32.mrb[25].mxu0  ;;  %v880_v51 = vld [vmem:[#allocation2 + $0x88] sm:$0xff]  ;;  %v947_v52 = vmul.f32 %v11281_v9, %v882_v48  ;;  %v1011_v53 = vadd.f32 %v11289_v17, %v946_v41 }
 0x10f   :  { %820 = vst.msk [vmem:[#allocation2 + $0xa8] sm:$0xff] %vm219_vm0, %v756_v42  ;;  %9894 = vmatprep.mubr.bf16.mxu0 %v1143_v43  ;;  %v630_v54 = vmul.f32 %v11253_v44, %v446_v50  ;;  %v9829_v55 = vpop.f32.mrb[26].mxu0  ;;  %v945_v56 = vmul.f32 %v11281_v9, %v880_v51  ;;  %v1009_v57 = vadd.f32 %v11289_v17, %v944_v47 }
 0x110   :  { %9895 = vmatmul.mubr.bf16.gmra.mrb[76].mxu0 %v1144_v39  ;;  %v697_v58 = vadd.f32 %v11258_v46, %v632_v49  ;;  %v633_v59 = vmul.f32 %v9829_v55, %v11253_v44  ;;  %v449_v60 = vpop.f32.mrb[27].mxu0  ;;  %v1012_v61 = vadd.f32 %v11289_v17, %v947_v52  ;;  %v1075_v62 = vmax.f32 %v1011_v53, 0.0 }
 0x111   :  { %v695_v63 = vadd.f32 %v11258_v46, %v630_v54  ;;  %v631_v0 = vmul.f32 %v11253_v44, %v449_v60  ;;  %v1010_v1 = vadd.f32 %v11289_v17, %v945_v56  ;;  %v1073_v2 = vmax.f32 %v1009_v57, 0.0 }
 0x112   :  { %v761_v3 = vmax.f32 %v697_v58, 0.0  ;;  %v698_v4 = vadd.f32 %v11258_v46, %v633_v59  ;;  %v1076_v5 = vmax.f32 %v1012_v61, 0.0 }
 0x113   :  { %v759_v6 = vmax.f32 %v695_v63, 0.0  ;;  %v696_v8 = vadd.f32 %v11258_v46, %v631_v0  ;;  %v1074_v10 = vmax.f32 %v1010_v1, 0.0  ;;  %v885_v11 = vld [vmem:[#allocation2 + $0xb0] sm:$0xff] }
 0x114   :  { %825 = vst.msk [vmem:[#allocation2 + $0xd0] sm:$0xff] %vm219_vm0, %v761_v3  ;;  %v762_v12 = vmax.f32 %v698_v4, 0.0  ;;  %v1146_v13 = vpack.c.bf16 %v1076_v5, %v1075_v62  ;;  %v883_v14 = vld [vmem:[#allocation2 + $0xa0] sm:$0xff]  ;;  %v950_v15 = vmul.f32 %v11281_v9, %v885_v11 }
 0x115   :  { %823 = vst.msk [vmem:[#allocation2 + $0xc0] sm:$0xff] %vm219_vm0, %v759_v6  ;;  %v760_v16 = vmax.f32 %v696_v8, 0.0  ;;  %v1145_v18 = vpack.c.bf16 %v1074_v10, %v1073_v2  ;;  %v9832_v19 = vpop.f32.mrb[28].mxu0  ;;  %v948_v20 = vmul.f32 %v11281_v9, %v883_v14  ;;  %v886_v21 = vld [vmem:[#allocation2 + $0xb8] sm:$0xff] }
 0x116   :  { %826 = vst.msk [vmem:[#allocation2 + $0xd8] sm:$0xff] %vm219_vm0, %v762_v12  ;;  %v636_v22 = vmul.f32 %v9832_v19, %v11253_v44  ;;  %v462_v23 = vpop.f32.mrb[29].mxu0  ;;  %v884_v24 = vld [vmem:[#allocation2 + $0xa8] sm:$0xff]  ;;  %v951_v25 = vmul.f32 %v11281_v9, %v886_v21  ;;  %v1015_v26 = vadd.f32 %v11289_v17, %v950_v15 }
 0x117   :  { %824 = vst.msk [vmem:[#allocation2 + $0xc8] sm:$0xff] %vm219_vm0, %v760_v16  ;;  %9898 = vmatprep.mubr.bf16.mxu1 %v1145_v18  ;;  %v634_v27 = vmul.f32 %v11253_v44, %v462_v23  ;;  %v9833_v28 = vpop.f32.mrb[30].mxu0  ;;  %v949_v29 = vmul.f32 %v11281_v9, %v884_v24  ;;  %v1013_v30 = vadd.f32 %v11289_v17, %v948_v20 }
 0x118   :  { %9899 = vmatmul.mubr.bf16.vlgmr.msra.gmra.mrb[0].mxu1 %v1146_v13  ;;  %v701_v31 = vadd.f32 %v11258_v46, %v636_v22  ;;  %v637_v32 = vmul.f32 %v9833_v28, %v11253_v44  ;;  %v465_v33 = vpop.f32.mrb[31].mxu0  ;;  %v1016_v34 = vadd.f32 %v11289_v17, %v951_v25  ;;  %v1079_v35 = vmax.f32 %v1015_v26, 0.0 }
 0x119   :  { %v699_v36 = vadd.f32 %v11258_v46, %v634_v27  ;;  %v635_v37 = vmul.f32 %v11253_v44, %v465_v33  ;;  %v1014_v38 = vadd.f32 %v11289_v17, %v949_v29  ;;  %v1077_v39 = vmax.f32 %v1013_v30, 0.0 }
 0x11a   :  { %v765_v40 = vmax.f32 %v701_v31, 0.0  ;;  %v702_v41 = vadd.f32 %v11258_v46, %v637_v32  ;;  %v1080_v42 = vmax.f32 %v1016_v34, 0.0 }
 0x11b   :  { %v763_v43 = vmax.f32 %v699_v36, 0.0  ;;  %v700_v45 = vadd.f32 %v11258_v46, %v635_v37  ;;  %v1078_v47 = vmax.f32 %v1014_v38, 0.0  ;;  %v889_v48 = vld [vmem:[#allocation2 + $0xd0] sm:$0xff] }
 0x11c   :  { %829 = vst.msk [vmem:[#allocation2 + $0xf0] sm:$0xff] %vm219_vm0, %v765_v40  ;;  %v766_v49 = vmax.f32 %v702_v41, 0.0  ;;  %v1148_v50 = vpack.c.bf16 %v1080_v42, %v1079_v35  ;;  %v887_v51 = vld [vmem:[#allocation2 + $0xc0] sm:$0xff]  ;;  %v954_v52 = vmul.f32 %v11281_v9, %v889_v48 }
 0x11d   :  { %827 = vst.msk [vmem:[#allocation2 + $0xe0] sm:$0xff] %vm219_vm0, %v763_v43  ;;  %v764_v53 = vmax.f32 %v700_v45, 0.0  ;;  %v1147_v54 = vpack.c.bf16 %v1078_v47, %v1077_v39  ;;  %v952_v55 = vmul.f32 %v11281_v9, %v887_v51  ;;  %v890_v56 = vld [vmem:[#allocation2 + $0xd8] sm:$0xff]  ;;  %v9836_v57 = vpop.f32.mrb[32].mxu0 }
 0x11e   :  { %830 = vst.msk [vmem:[#allocation2 + $0xf8] sm:$0xff] %vm219_vm0, %v766_v49  ;;  %v888_v58 = vld [vmem:[#allocation2 + $0xc8] sm:$0xff]  ;;  %v955_v59 = vmul.f32 %v11281_v9, %v890_v56  ;;  %v1019_v60 = vadd.f32 %v11289_v17, %v954_v52  ;;  %v640_v61 = vmul.f32 %v9836_v57, %v11253_v44  ;;  %v478_v62 = vpop.f32.mrb[33].mxu0 }
 0x11f   :  { %828 = vst.msk [vmem:[#allocation2 + $0xe8] sm:$0xff] %vm219_vm0, %v764_v53  ;;  %9902 = vmatprep.mubr.bf16.mxu1 %v1147_v54  ;;  %v953_v63 = vmul.f32 %v11281_v9, %v888_v58  ;;  %v1017_v0 = vadd.f32 %v11289_v17, %v952_v55  ;;  %v638_v1 = vmul.f32 %v11253_v44, %v478_v62  ;;  %v9837_v2 = vpop.f32.mrb[34].mxu0 }
 0x120   :  { %9903 = vmatmul.mubr.bf16.gmra.mrb[4].mxu1 %v1148_v50  ;;  %v1020_v3 = vadd.f32 %v11289_v17, %v955_v59  ;;  %v1083_v4 = vmax.f32 %v1019_v60, 0.0  ;;  %v705_v5 = vadd.f32 %v11258_v46, %v640_v61  ;;  %v641_v6 = vmul.f32 %v9837_v2, %v11253_v44  ;;  %v481_v8 = vpop.f32.mrb[35].mxu0 }
 0x121   :  { %v1018_v10 = vadd.f32 %v11289_v17, %v953_v63  ;;  %v1081_v11 = vmax.f32 %v1017_v0, 0.0  ;;  %v703_v12 = vadd.f32 %v11258_v46, %v638_v1  ;;  %v639_v13 = vmul.f32 %v11253_v44, %v481_v8 }
 0x122   :  { %v1084_v14 = vmax.f32 %v1020_v3, 0.0  ;;  %v769_v15 = vmax.f32 %v705_v5, 0.0  ;;  %v706_v16 = vadd.f32 %v11258_v46, %v641_v6 }
 0x123   :  { %v1082_v18 = vmax.f32 %v1018_v10, 0.0  ;;  %v767_v19 = vmax.f32 %v703_v12, 0.0  ;;  %v893_v20 = vld [vmem:[#allocation2 + $0xf0] sm:$0xff]  ;;  %v704_v21 = vadd.f32 %v11258_v46, %v639_v13 }
 0x124   :  { %v1150_v22 = vpack.c.bf16 %v1084_v14, %v1083_v4  ;;  %833 = vst.msk [vmem:[#allocation2 + $0x110] sm:$0xff] %vm219_vm0, %v769_v15  ;;  %v891_v23 = vld [vmem:[#allocation2 + $0xe0] sm:$0xff]  ;;  %v770_v24 = vmax.f32 %v706_v16, 0.0  ;;  %v958_v25 = vmul.f32 %v11281_v9, %v893_v20 }
 0x125   :  { %v1149_v26 = vpack.c.bf16 %v1082_v18, %v1081_v11  ;;  %831 = vst.msk [vmem:[#allocation2 + $0x100] sm:$0xff] %vm219_vm0, %v767_v19  ;;  %v956_v27 = vmul.f32 %v11281_v9, %v891_v23  ;;  %v894_v28 = vld [vmem:[#allocation2 + $0xf8] sm:$0xff]  ;;  %v768_v29 = vmax.f32 %v704_v21, 0.0  ;;  %v9840_v30 = vpop.f32.mrb[36].mxu0 }
 0x126   :  { %v892_v31 = vld [vmem:[#allocation2 + $0xe8] sm:$0xff]  ;;  %834 = vst.msk [vmem:[#allocation2 + $0x118] sm:$0xff] %vm219_vm0, %v770_v24  ;;  %v959_v32 = vmul.f32 %v11281_v9, %v894_v28  ;;  %v1023_v33 = vadd.f32 %v11289_v17, %v958_v25  ;;  %v644_v34 = vmul.f32 %v9840_v30, %v11253_v44  ;;  %v494_v35 = vpop.f32.mrb[37].mxu0 }
 0x127   :  { %9906 = vmatprep.mubr.bf16.mxu1 %v1149_v26  ;;  %v957_v36 = vmul.f32 %v11281_v9, %v892_v31  ;;  %v1021_v37 = vadd.f32 %v11289_v17, %v956_v27  ;;  %832 = vst.msk [vmem:[#allocation2 + $0x108] sm:$0xff] %vm219_vm0, %v768_v29  ;;  %v642_v38 = vmul.f32 %v11253_v44, %v494_v35  ;;  %v9841_v39 = vpop.f32.mrb[38].mxu0 }
 0x128   :  { %9907 = vmatmul.mubr.bf16.gmra.mrb[8].mxu1 %v1150_v22  ;;  %v1024_v40 = vadd.f32 %v11289_v17, %v959_v32  ;;  %v1087_v41 = vmax.f32 %v1023_v33, 0.0  ;;  %v709_v42 = vadd.f32 %v11258_v46, %v644_v34  ;;  %v645_v43 = vmul.f32 %v9841_v39, %v11253_v44  ;;  %v497_v45 = vpop.f32.mrb[39].mxu0 }
 0x129   :  { %v1022_v47 = vadd.f32 %v11289_v17, %v957_v36  ;;  %v1085_v48 = vmax.f32 %v1021_v37, 0.0  ;;  %v707_v49 = vadd.f32 %v11258_v46, %v642_v38  ;;  %v643_v50 = vmul.f32 %v11253_v44, %v497_v45 }
 0x12a   :  { %v1088_v51 = vmax.f32 %v1024_v40, 0.0  ;;  %v773_v52 = vmax.f32 %v709_v42, 0.0  ;;  %v710_v53 = vadd.f32 %v11258_v46, %v645_v43 }
 0x12b   :  { %v1086_v54 = vmax.f32 %v1022_v47, 0.0  ;;  %v771_v55 = vmax.f32 %v707_v49, 0.0  ;;  %v708_v56 = vadd.f32 %v11258_v46, %v643_v50  ;;  %v897_v57 = vld [vmem:[#allocation2 + $0x110] sm:$0xff] }
 0x12c   :  { %v1152_v58 = vpack.c.bf16 %v1088_v51, %v1087_v41  ;;  %837 = vst.msk [vmem:[#allocation2 + $0x130] sm:$0xff] %vm219_vm0, %v773_v52  ;;  %v774_v59 = vmax.f32 %v710_v53, 0.0  ;;  %v895_v60 = vld [vmem:[#allocation2 + $0x100] sm:$0xff]  ;;  %v962_v61 = vmul.f32 %v11281_v9, %v897_v57 }
 0x12d   :  { %v1151_v62 = vpack.c.bf16 %v1086_v54, %v1085_v48  ;;  %835 = vst.msk [vmem:[#allocation2 + $0x120] sm:$0xff] %vm219_vm0, %v771_v55  ;;  %v772_v63 = vmax.f32 %v708_v56, 0.0  ;;  %v9844_v0 = vpop.f32.mrb[40].mxu0  ;;  %v960_v1 = vmul.f32 %v11281_v9, %v895_v60  ;;  %v898_v2 = vld [vmem:[#allocation2 + $0x118] sm:$0xff] }
 0x12e   :  { %838 = vst.msk [vmem:[#allocation2 + $0x138] sm:$0xff] %vm219_vm0, %v774_v59  ;;  %v648_v3 = vmul.f32 %v9844_v0, %v11253_v44  ;;  %v510_v4 = vpop.f32.mrb[41].mxu0  ;;  %v896_v5 = vld [vmem:[#allocation2 + $0x108] sm:$0xff]  ;;  %v963_v6 = vmul.f32 %v11281_v9, %v898_v2  ;;  %v1027_v8 = vadd.f32 %v11289_v17, %v962_v61 }
 0x12f   :  { %9910 = vmatprep.mubr.bf16.mxu1 %v1151_v62  ;;  %836 = vst.msk [vmem:[#allocation2 + $0x128] sm:$0xff] %vm219_vm0, %v772_v63  ;;  %v646_v10 = vmul.f32 %v11253_v44, %v510_v4  ;;  %v9845_v11 = vpop.f32.mrb[42].mxu0  ;;  %v961_v12 = vmul.f32 %v11281_v9, %v896_v5  ;;  %v1025_v13 = vadd.f32 %v11289_v17, %v960_v1 }
 0x130   :  { %9911 = vmatmul.mubr.bf16.gmra.mrb[12].mxu1 %v1152_v58  ;;  %v713_v14 = vadd.f32 %v11258_v46, %v648_v3  ;;  %v649_v15 = vmul.f32 %v9845_v11, %v11253_v44  ;;  %v513_v16 = vpop.f32.mrb[43].mxu0  ;;  %v1028_v18 = vadd.f32 %v11289_v17, %v963_v6  ;;  %v1091_v19 = vmax.f32 %v1027_v8, 0.0 }
 0x131   :  { %v711_v20 = vadd.f32 %v11258_v46, %v646_v10  ;;  %v647_v21 = vmul.f32 %v11253_v44, %v513_v16  ;;  %v1026_v22 = vadd.f32 %v11289_v17, %v961_v12  ;;  %v1089_v23 = vmax.f32 %v1025_v13, 0.0 }
 0x132   :  { %v777_v24 = vmax.f32 %v713_v14, 0.0  ;;  %v714_v25 = vadd.f32 %v11258_v46, %v649_v15  ;;  %v1092_v26 = vmax.f32 %v1028_v18, 0.0 }
 0x133   :  { %v775_v27 = vmax.f32 %v711_v20, 0.0  ;;  %v712_v28 = vadd.f32 %v11258_v46, %v647_v21  ;;  %v1090_v29 = vmax.f32 %v1026_v22, 0.0  ;;  %v901_v30 = vld [vmem:[#allocation2 + $0x130] sm:$0xff] }
 0x134   :  { %841 = vst.msk [vmem:[#allocation2 + $0x150] sm:$0xff] %vm219_vm0, %v777_v24  ;;  %v778_v31 = vmax.f32 %v714_v25, 0.0  ;;  %v1154_v32 = vpack.c.bf16 %v1092_v26, %v1091_v19  ;;  %v899_v33 = vld [vmem:[#allocation2 + $0x120] sm:$0xff]  ;;  %v966_v34 = vmul.f32 %v11281_v9, %v901_v30 }
 0x135   :  { %839 = vst.msk [vmem:[#allocation2 + $0x140] sm:$0xff] %vm219_vm0, %v775_v27  ;;  %v776_v35 = vmax.f32 %v712_v28, 0.0  ;;  %v9848_v36 = vpop.f32.mrb[44].mxu0  ;;  %v1153_v37 = vpack.c.bf16 %v1090_v29, %v1089_v23  ;;  %v964_v38 = vmul.f32 %v11281_v9, %v899_v33  ;;  %v902_v39 = vld [vmem:[#allocation2 + $0x138] sm:$0xff] }
 0x136   :  { %842 = vst.msk [vmem:[#allocation2 + $0x158] sm:$0xff] %vm219_vm0, %v778_v31  ;;  %v652_v40 = vmul.f32 %v9848_v36, %v11253_v44  ;;  %v526_v41 = vpop.f32.mrb[45].mxu0  ;;  %v900_v42 = vld [vmem:[#allocation2 + $0x128] sm:$0xff]  ;;  %v967_v43 = vmul.f32 %v11281_v9, %v902_v39  ;;  %v1031_v45 = vadd.f32 %v11289_v17, %v966_v34 }
 0x137   :  { %840 = vst.msk [vmem:[#allocation2 + $0x148] sm:$0xff] %vm219_vm0, %v776_v35  ;;  %v650_v47 = vmul.f32 %v11253_v44, %v526_v41  ;;  %v9849_v48 = vpop.f32.mrb[46].mxu0  ;;  %9914 = vmatprep.mubr.bf16.mxu1 %v1153_v37  ;;  %v965_v49 = vmul.f32 %v11281_v9, %v900_v42  ;;  %v1029_v50 = vadd.f32 %v11289_v17, %v964_v38 }
 0x138   :  { %v717_v51 = vadd.f32 %v11258_v46, %v652_v40  ;;  %v653_v52 = vmul.f32 %v9849_v48, %v11253_v44  ;;  %v529_v53 = vpop.f32.mrb[47].mxu0  ;;  %9915 = vmatmul.mubr.bf16.gmra.mrb[16].mxu1 %v1154_v32  ;;  %v1032_v54 = vadd.f32 %v11289_v17, %v967_v43  ;;  %v1095_v55 = vmax.f32 %v1031_v45, 0.0 }
 0x139   :  { %v715_v56 = vadd.f32 %v11258_v46, %v650_v47  ;;  %v651_v57 = vmul.f32 %v11253_v44, %v529_v53  ;;  %v1030_v58 = vadd.f32 %v11289_v17, %v965_v49  ;;  %v1093_v59 = vmax.f32 %v1029_v50, 0.0 }
 0x13a   :  { %v781_v60 = vmax.f32 %v717_v51, 0.0  ;;  %v718_v61 = vadd.f32 %v11258_v46, %v653_v52  ;;  %v1096_v62 = vmax.f32 %v1032_v54, 0.0 }
 0x13b   :  { %v779_v63 = vmax.f32 %v715_v56, 0.0  ;;  %v716_v0 = vadd.f32 %v11258_v46, %v651_v57  ;;  %v1094_v1 = vmax.f32 %v1030_v58, 0.0  ;;  %v905_v2 = vld [vmem:[#allocation2 + $0x150] sm:$0xff] }
 0x13c   :  { %845 = vst.msk [vmem:[#allocation2 + $0x170] sm:$0xff] %vm219_vm0, %v781_v60  ;;  %v782_v3 = vmax.f32 %v718_v61, 0.0  ;;  %v1156_v4 = vpack.c.bf16 %v1096_v62, %v1095_v55  ;;  %v903_v5 = vld [vmem:[#allocation2 + $0x140] sm:$0xff]  ;;  %v970_v6 = vmul.f32 %v11281_v9, %v905_v2 }
 0x13d   :  { %843 = vst.msk [vmem:[#allocation2 + $0x160] sm:$0xff] %vm219_vm0, %v779_v63  ;;  %v780_v8 = vmax.f32 %v716_v0, 0.0  ;;  %v9852_v10 = vpop.f32.mrb[48].mxu0  ;;  %v1155_v11 = vpack.c.bf16 %v1094_v1, %v1093_v59  ;;  %v968_v12 = vmul.f32 %v11281_v9, %v903_v5  ;;  %v906_v13 = vld [vmem:[#allocation2 + $0x158] sm:$0xff]  ;;  %v11550_v61 = vld [vmem:[%s13791_s3] ss:$0 sm:$0xff] }
 0x13e   :  { %846 = vst.msk [vmem:[#allocation2 + $0x178] sm:$0xff] %vm219_vm0, %v782_v3  ;;  %v656_v14 = vmul.f32 %v9852_v10, %v11253_v44  ;;  %v542_v15 = vpop.f32.mrb[49].mxu0  ;;  %v904_v16 = vld [vmem:[#allocation2 + $0x148] sm:$0xff]  ;;  %v971_v18 = vmul.f32 %v11281_v9, %v906_v13  ;;  %v1035_v19 = vadd.f32 %v11289_v17, %v970_v6  ;;  %v11557_v1 = vld [vmem:[%s13791_s3 + $0x1] ss:$0 sm:$0xff] }
 0x13f   :  { %844 = vst.msk [vmem:[#allocation2 + $0x168] sm:$0xff] %vm219_vm0, %v780_v8  ;;  %v654_v20 = vmul.f32 %v11253_v44, %v542_v15  ;;  %v9853_v21 = vpop.f32.mrb[50].mxu0  ;;  %9918 = vmatprep.mubr.bf16.mxu1 %v1155_v11  ;;  %v969_v22 = vmul.f32 %v11281_v9, %v904_v16  ;;  %v1033_v23 = vadd.f32 %v11289_v17, %v968_v12 }
 0x140   :  { %v721_v24 = vadd.f32 %v11258_v46, %v656_v14  ;;  %v657_v25 = vmul.f32 %v9853_v21, %v11253_v44  ;;  %v545_v26 = vpop.f32.mrb[51].mxu0  ;;  %9919 = vmatmul.mubr.bf16.gmra.mrb[20].mxu1 %v1156_v4  ;;  %v1036_v27 = vadd.f32 %v11289_v17, %v971_v18  ;;  %v1099_v28 = vmax.f32 %v1035_v19, 0.0 }
 0x141   :  { %v719_v29 = vadd.f32 %v11258_v46, %v654_v20  ;;  %v655_v30 = vmul.f32 %v11253_v44, %v545_v26  ;;  %v1034_v31 = vadd.f32 %v11289_v17, %v969_v22  ;;  %v1097_v32 = vmax.f32 %v1033_v23, 0.0 }
 0x142   :  { %v785_v33 = vmax.f32 %v721_v24, 0.0  ;;  %v722_v34 = vadd.f32 %v11258_v46, %v657_v25  ;;  %v1100_v35 = vmax.f32 %v1036_v27, 0.0 }
 0x143   :  { %v783_v36 = vmax.f32 %v719_v29, 0.0  ;;  %v720_v37 = vadd.f32 %v11258_v46, %v655_v30  ;;  %v1098_v38 = vmax.f32 %v1034_v31, 0.0  ;;  %v909_v39 = vld [vmem:[#allocation2 + $0x170] sm:$0xff]  ;;  %v11577_v31 = vld [vmem:[%s13791_s3 + $0x2] ss:$0 sm:$0xff] }
 0x144   :  { %849 = vst.msk [vmem:[#allocation2 + $0x190] sm:$0xff] %vm219_vm0, %v785_v33  ;;  %v786_v40 = vmax.f32 %v722_v34, 0.0  ;;  %v1158_v41 = vpack.c.bf16 %v1100_v35, %v1099_v28  ;;  %v907_v42 = vld [vmem:[#allocation2 + $0x160] sm:$0xff]  ;;  %v974_v43 = vmul.f32 %v11281_v9, %v909_v39 }
 0x145   :  { %847 = vst.msk [vmem:[#allocation2 + $0x180] sm:$0xff] %vm219_vm0, %v783_v36  ;;  %v784_v45 = vmax.f32 %v720_v37, 0.0  ;;  %v9856_v47 = vpop.f32.mrb[52].mxu0  ;;  %v1157_v48 = vpack.c.bf16 %v1098_v38, %v1097_v32  ;;  %v972_v49 = vmul.f32 %v11281_v9, %v907_v42  ;;  %v910_v50 = vld [vmem:[#allocation2 + $0x178] sm:$0xff]  ;;  %v11586_v36 = vld [vmem:[%s13791_s3 + $0x3] ss:$0 sm:$0xff] }
 0x146   :  { %850 = vst.msk [vmem:[#allocation2 + $0x198] sm:$0xff] %vm219_vm0, %v786_v40  ;;  %v660_v51 = vmul.f32 %v9856_v47, %v11253_v44  ;;  %v558_v52 = vpop.f32.mrb[53].mxu0  ;;  %v908_v53 = vld [vmem:[#allocation2 + $0x168] sm:$0xff]  ;;  %v975_v54 = vmul.f32 %v11281_v9, %v910_v50  ;;  %v1039_v55 = vadd.f32 %v11289_v17, %v974_v43 }
 0x147   :  { %848 = vst.msk [vmem:[#allocation2 + $0x188] sm:$0xff] %vm219_vm0, %v784_v45  ;;  %v658_v56 = vmul.f32 %v11253_v44, %v558_v52  ;;  %v9857_v57 = vpop.f32.mrb[54].mxu0  ;;  %9922 = vmatprep.mubr.bf16.mxu1 %v1157_v48  ;;  %v973_v58 = vmul.f32 %v11281_v9, %v908_v53  ;;  %v1037_v59 = vadd.f32 %v11289_v17, %v972_v49 }
 0x148   :  { %v725_v60 = vadd.f32 %v11258_v46, %v660_v51  ;;  %v661_v62 = vmul.f32 %v11550_v61, %v9857_v57  ;;  %v561_v63 = vpop.f32.mrb[55].mxu0  ;;  %9923 = vmatmul.mubr.bf16.gmra.mrb[24].mxu1 %v1158_v41  ;;  %v1040_v0 = vadd.f32 %v11289_v17, %v975_v54  ;;  %v1103_v44 = vmax.f32 %v1039_v55, 0.0 }
 0x149   :  { %v723_v2 = vadd.f32 %v11557_v1, %v658_v56  ;;  %v659_v46 = vmul.f32 %v11550_v61, %v561_v63  ;;  %v1038_v3 = vadd.f32 %v11289_v17, %v973_v58  ;;  %v1101_v4 = vmax.f32 %v1037_v59, 0.0 }
 0x14a   :  { %v789_v5 = vmax.f32 %v725_v60, 0.0  ;;  %v726_v6 = vadd.f32 %v11557_v1, %v661_v62  ;;  %v1104_v8 = vmax.f32 %v1040_v0, 0.0 }
 0x14b   :  { %v787_v10 = vmax.f32 %v723_v2, 0.0  ;;  %v724_v11 = vadd.f32 %v11557_v1, %v659_v46  ;;  %v1102_v12 = vmax.f32 %v1038_v3, 0.0  ;;  %v913_v13 = vld [vmem:[#allocation2 + $0x190] sm:$0xff] }
 0x14c   :  { %853 = vst.msk [vmem:[#allocation2 + $0x1b0] sm:$0xff] %vm219_vm0, %v789_v5  ;;  %v790_v14 = vmax.f32 %v726_v6, 0.0  ;;  %v1160_v15 = vpack.c.bf16 %v1104_v8, %v1103_v44  ;;  %v911_v16 = vld [vmem:[#allocation2 + $0x180] sm:$0xff]  ;;  %v978_v18 = vmul.f32 %v11281_v9, %v913_v13 }
 0x14d   :  { %851 = vst.msk [vmem:[#allocation2 + $0x1a0] sm:$0xff] %vm219_vm0, %v787_v10  ;;  %v788_v19 = vmax.f32 %v724_v11, 0.0  ;;  %v9860_v20 = vpop.f32.mrb[56].mxu0  ;;  %v1159_v21 = vpack.c.bf16 %v1102_v12, %v1101_v4  ;;  %v976_v22 = vmul.f32 %v11281_v9, %v911_v16  ;;  %v914_v23 = vld [vmem:[#allocation2 + $0x198] sm:$0xff] }
 0x14e   :  { %854 = vst.msk [vmem:[#allocation2 + $0x1b8] sm:$0xff] %vm219_vm0, %v790_v14  ;;  %v664_v24 = vmul.f32 %v11550_v61, %v9860_v20  ;;  %v574_v25 = vpop.f32.mrb[57].mxu0  ;;  %v912_v26 = vld [vmem:[#allocation2 + $0x188] sm:$0xff]  ;;  %v979_v27 = vmul.f32 %v11281_v9, %v914_v23  ;;  %v1043_v28 = vadd.f32 %v11289_v17, %v978_v18 }
 0x14f   :  { %852 = vst.msk [vmem:[#allocation2 + $0x1a8] sm:$0xff] %vm219_vm0, %v788_v19  ;;  %v662_v29 = vmul.f32 %v11550_v61, %v574_v25  ;;  %v9861_v30 = vpop.f32.mrb[58].mxu0  ;;  %9926 = vmatprep.mubr.bf16.mxu1 %v1159_v21  ;;  %v977_v32 = vmul.f32 %v11577_v31, %v912_v26  ;;  %v1041_v33 = vadd.f32 %v11289_v17, %v976_v22 }
 0x150   :  { %v729_v34 = vadd.f32 %v11557_v1, %v664_v24  ;;  %v665_v9 = vmul.f32 %v11550_v61, %v9861_v30  ;;  %v577_v35 = vpop.f32.mrb[59].mxu0  ;;  %9927 = vmatmul.mubr.bf16.gmra.mrb[28].mxu1 %v1160_v15  ;;  %v1044_v37 = vadd.f32 %v11586_v36, %v979_v27  ;;  %v1107_v38 = vmax.f32 %v1043_v28, 0.0 }
 0x151   :  { %v727_v39 = vadd.f32 %v11557_v1, %v662_v29  ;;  %v663_v40 = vmul.f32 %v11550_v61, %v577_v35  ;;  %v1042_v17 = vadd.f32 %v11586_v36, %v977_v32  ;;  %v1105_v41 = vmax.f32 %v1041_v33, 0.0 }
 0x152   :  { %v793_v42 = vmax.f32 %v729_v34, 0.0  ;;  %v730_v43 = vadd.f32 %v11557_v1, %v665_v9  ;;  %v1108_v45 = vmax.f32 %v1044_v37, 0.0 }
 0x153   :  { %v791_v47 = vmax.f32 %v727_v39, 0.0  ;;  %v728_v48 = vadd.f32 %v11557_v1, %v663_v40  ;;  %v1106_v49 = vmax.f32 %v1042_v17, 0.0  ;;  %v917_v50 = vld [vmem:[#allocation2 + $0x1b0] sm:$0xff] }
 0x154   :  { %857 = vst.msk [vmem:[#allocation2 + $0x1d0] sm:$0xff] %vm219_vm0, %v793_v42  ;;  %v794_v51 = vmax.f32 %v730_v43, 0.0  ;;  %v1162_v52 = vpack.c.bf16 %v1108_v45, %v1107_v38  ;;  %v915_v53 = vld [vmem:[#allocation2 + $0x1a0] sm:$0xff]  ;;  %v982_v54 = vmul.f32 %v11577_v31, %v917_v50 }
 0x155   :  { %855 = vst.msk [vmem:[#allocation2 + $0x1c0] sm:$0xff] %vm219_vm0, %v791_v47  ;;  %v792_v55 = vmax.f32 %v728_v48, 0.0  ;;  %v9864_v56 = vpop.f32.mrb[60].mxu0  ;;  %v1161_v57 = vpack.c.bf16 %v1106_v49, %v1105_v41  ;;  %v980_v58 = vmul.f32 %v11577_v31, %v915_v53  ;;  %v918_v59 = vld [vmem:[#allocation2 + $0x1b8] sm:$0xff] }
 0x156   :  { %858 = vst.msk [vmem:[#allocation2 + $0x1d8] sm:$0xff] %vm219_vm0, %v794_v51  ;;  %v668_v60 = vmul.f32 %v11550_v61, %v9864_v56  ;;  %v590_v62 = vpop.f32.mrb[61].mxu0  ;;  %v916_v63 = vld [vmem:[#allocation2 + $0x1a8] sm:$0xff]  ;;  %v983_v0 = vmul.f32 %v11577_v31, %v918_v59  ;;  %v1047_v44 = vadd.f32 %v11586_v36, %v982_v54 }
 0x157   :  { %856 = vst.msk [vmem:[#allocation2 + $0x1c8] sm:$0xff] %vm219_vm0, %v792_v55  ;;  %v666_v2 = vmul.f32 %v11550_v61, %v590_v62  ;;  %v9865_v46 = vpop.f32.mrb[62].mxu0  ;;  %9930 = vmatprep.mubr.bf16.mxu1 %v1161_v57  ;;  %v981_v3 = vmul.f32 %v11577_v31, %v916_v63  ;;  %v1045_v4 = vadd.f32 %v11586_v36, %v980_v58 }
 0x158   :  { %v733_v5 = vadd.f32 %v11557_v1, %v668_v60  ;;  %v669_v6 = vmul.f32 %v11550_v61, %v9865_v46  ;;  %v593_v8 = vpop.f32.mrb[63].mxu0  ;;  %9931 = vmatmul.mubr.bf16.gmra.mrb[32].mxu1 %v1162_v52  ;;  %v1048_v10 = vadd.f32 %v11586_v36, %v983_v0  ;;  %v1111_v11 = vmax.f32 %v1047_v44, 0.0  ;;  %v2174_v0 = vpop.permute.xlu0 %2173 }
 0x159   :  { %v731_v12 = vadd.f32 %v11557_v1, %v666_v2  ;;  %v667_v13 = vmul.f32 %v11550_v61, %v593_v8  ;;  %v1046_v14 = vadd.f32 %v11586_v36, %v981_v3  ;;  %v1109_v15 = vmax.f32 %v1045_v4, 0.0  ;;  %9946 = vmatprep.subr.bf16.mxu0 %v2174_v0 }
 0x15a   :  { %v797_v16 = vmax.f32 %v733_v5, 0.0  ;;  %v734_v18 = vadd.f32 %v11557_v1, %v669_v6  ;;  %v1112_v19 = vmax.f32 %v1048_v10, 0.0  ;;  %9947 = vmatpush3.bf16.msra.mxu0 %v2174_v0 }
 0x15b   :  { %v795_v20 = vmax.f32 %v731_v12, 0.0  ;;  %v732_v21 = vadd.f32 %v11557_v1, %v667_v13  ;;  %v1110_v22 = vmax.f32 %v1046_v14, 0.0  ;;  %v921_v23 = vld [vmem:[#allocation2 + $0x1d0] sm:$0xff]  ;;  %v10543_v13 = vld [vmem:[%s13789_s4 + $0x40] sm:$0xff]   ;;  %v10544_v14 = vld [vmem:[%s13789_s4 + $0x48] sm:$0xff]  }
 0x15c   :  { %861 = vst.msk [vmem:[#allocation2 + $0x1f0] sm:$0xff] %vm219_vm0, %v797_v16  ;;  %v798_v24 = vmax.f32 %v734_v18, 0.0  ;;  %v1164_v25 = vpack.c.bf16 %v1112_v19, %v1111_v11  ;;  %v919_v26 = vld [vmem:[#allocation2 + $0x1c0] sm:$0xff]  ;;  %v986_v27 = vmul.f32 %v11577_v31, %v921_v23  ;;  %v2176_v44 = vpop.permute.xlu0 %2175 }
 0x15d   :  { %859 = vst.msk [vmem:[#allocation2 + $0x1e0] sm:$0xff] %vm219_vm0, %v795_v20  ;;  %v796_v61 = vmax.f32 %v732_v21, 0.0  ;;  %v1163_v28 = vpack.c.bf16 %v1110_v22, %v1109_v15  ;;  %v984_v29 = vmul.f32 %v11577_v31, %v919_v26  ;;  %v922_v30 = vld [vmem:[#allocation2 + $0x1d8] sm:$0xff]  ;;  %9948 = vmatprep.subr.bf16.mxu0 %v2176_v44 }
 0x15e   :  { %862 = vst.msk [vmem:[#allocation2 + $0x1f8] sm:$0xff] %vm219_vm0, %v798_v24  ;;  %v920_v32 = vld [vmem:[#allocation2 + $0x1c8] sm:$0xff]  ;;  %v987_v1 = vmul.f32 %v11577_v31, %v922_v30  ;;  %v1051_v33 = vadd.f32 %v11586_v36, %v986_v27  ;;  %9949 = vmatpush3.bf16.msra.mxu0 %v2176_v44 }
 0x15f   :  { %860 = vst.msk [vmem:[#allocation2 + $0x1e8] sm:$0xff] %vm219_vm0, %v796_v61  ;;  %9934 = vmatprep.mubr.bf16.mxu1 %v1163_v28  ;;  %v985_v34 = vmul.f32 %v11577_v31, %v920_v32  ;;  %v1049_v9 = vadd.f32 %v11586_v36, %v984_v29 }
 0x160   :  { %9935 = vmatmul.mubr.bf16.gmra.mrb[36].mxu1 %v1164_v25  ;;  %v1052_v35 = vadd.f32 %v11586_v36, %v987_v1  ;;  %v1115_v37 = vmax.f32 %v1051_v33, 0.0 }
 0x161   :  { %v1050_v38 = vadd.f32 %v11586_v36, %v985_v34  ;;  %v1113_v39 = vmax.f32 %v1049_v9, 0.0 }
 0x162   :  { %v1116_v40 = vmax.f32 %v1052_v35, 0.0 }
 0x163   :  { %v1114_v17 = vmax.f32 %v1050_v38, 0.0  ;;  %v925_v41 = vld [vmem:[#allocation2 + $0x1f0] sm:$0xff] }
 0x164   :  { %v1166_v42 = vpack.c.bf16 %v1116_v40, %v1115_v37  ;;  %v923_v43 = vld [vmem:[#allocation2 + $0x1e0] sm:$0xff]  ;;  %v990_v45 = vmul.f32 %v11577_v31, %v925_v41 }
 0x165   :  { %v1165_v47 = vpack.c.bf16 %v1114_v17, %v1113_v39  ;;  %v988_v48 = vmul.f32 %v11577_v31, %v923_v43  ;;  %v926_v49 = vld [vmem:[#allocation2 + $0x1f8] sm:$0xff] }
 0x166   :  { %v924_v50 = vld [vmem:[#allocation2 + $0x1e8] sm:$0xff]  ;;  %v991_v51 = vmul.f32 %v11577_v31, %v926_v49  ;;  %v1055_v52 = vadd.f32 %v11586_v36, %v990_v45 }
 0x167   :  { %9938 = vmatprep.mubr.bf16.mxu1 %v1165_v47  ;;  %v989_v53 = vmul.f32 %v11577_v31, %v924_v50  ;;  %v1053_v54 = vadd.f32 %v11586_v36, %v988_v48  ;;  %v2178_v31 = vpop.permute.xlu1 %2177 }
 0x168   :  { %9939 = vmatmul.mubr.bf16.gmra.mrb[40].mxu1 %v1166_v42  ;;  %v1056_v55 = vadd.f32 %v11586_v36, %v991_v51  ;;  %v1119_v56 = vmax.f32 %v1055_v52, 0.0  ;;  %9950 = vmatprep.subr.bf16.mxu0 %v2178_v31 }
 0x169   :  { %v1054_v57 = vadd.f32 %v11586_v36, %v989_v53  ;;  %v1117_v58 = vmax.f32 %v1053_v54, 0.0  ;;  %9951 = vmatpush3.bf16.msra.mxu0 %v2178_v31  ;;  %v2182_v36 = vpop.permute.xlu0 %2181 }
 0x16a   :  { %v1120_v59 = vmax.f32 %v1056_v55, 0.0 }
 0x16b   :  { %v1118_v60 = vmax.f32 %v1054_v57, 0.0  ;;  %v2180_v2 = vpop.permute.xlu1 %2179 }
 0x16c   :  { %v1168_v62 = vpack.c.bf16 %v1120_v59, %v1119_v56  ;;  %9952 = vmatprep.subr.bf16.mxu0 %v2180_v2 }
 0x16d   :  { %v1167_v63 = vpack.c.bf16 %v1118_v60, %v1117_v58  ;;  %9953 = vmatpush3.bf16.msra.mxu0 %v2180_v2 }
 0x16e   :  { %9954 = vmatprep.subr.bf16.mxu0 %v2182_v36 }
 0x16f   :  { %9942 = vmatprep.mubr.bf16.mxu1 %v1167_v63  ;;  %v2184_v46 = vpop.permute.xlu1 %2183 }
 0x170   :  { %9943 = vmatmul.mubr.bf16.gmra.mrb[44].mxu1 %v1168_v62 }
 0x171   :  { %9955 = vmatpush3.bf16.msra.mxu0 %v2182_v36 }
 0x172   :  { %9956 = vmatprep.subr.bf16.mxu0 %v2184_v46 }
 0x175   :  { %9957 = vmatpush3.bf16.msra.mxu0 %v2184_v46 }
 0x1cb   :  { %v9884_v3 = vpop.f32.mrb[64].mxu0 }
 0x1cc   :  { %1574 = vrot.lane.b32.xlu0 %v9884_v3, %s10845_s15  ;;  %v1251_v4 = vpop.f32.mrb[65].mxu0 }
 0x1cd   :  { %v9885_v5 = vpop.f32.mrb[66].mxu0 }
 0x1ce   :  { %1576 = vrot.lane.b32.xlu1 %v9885_v5, %s10845_s15  ;;  %v1254_v6 = vpop.f32.mrb[67].mxu0 }
 0x1d0   :  { %1570 = vrot.lane.b32.xlu0 %v1251_v4, %s10845_s15 }
 0x1d2   :  { %1572 = vrot.lane.b32.xlu1 %v1254_v6, %s10845_s15 }
 0x1d3   :  { %v9888_v8 = vpop.f32.mrb[68].mxu0 }
 0x1d4   :  { %1582 = vrot.lane.b32.xlu0 %v9888_v8, %s10845_s15  ;;  %v1267_v10 = vpop.f32.mrb[69].mxu0 }
 0x1d5   :  { %v9889_v11 = vpop.f32.mrb[70].mxu0 }
 0x1d6   :  { %1584 = vrot.lane.b32.xlu1 %v9889_v11, %s10845_s15  ;;  %v1270_v12 = vpop.f32.mrb[71].mxu0 }
 0x1d8   :  { %1578 = vrot.lane.b32.xlu0 %v1267_v10, %s10845_s15 }
 0x1da   :  { %1580 = vrot.lane.b32.xlu1 %v1270_v12, %s10845_s15 }
 0x1db   :  { %v9892_v15 = vpop.f32.mrb[72].mxu0 }
 0x1dc   :  { %2185 = vrot.lane.b32.xlu0 %v10543_v13, %s10844_s22  ;;  %v1283_v16 = vpop.f32.mrb[73].mxu0 }
 0x1dd   :  { %v9893_v18 = vpop.f32.mrb[74].mxu0 }
 0x1de   :  { %2187 = vrot.lane.b32.xlu1 %v10544_v14, %s10844_s22  ;;  %v1286_v19 = vpop.f32.mrb[75].mxu0  ;;  %v11710_v14 = vld [vmem:[%s13791_s3 + $0x4] ss:$0 sm:$0xff] }
 0x1e0   :  { %1586 = vrot.lane.b32.xlu0 %v1283_v16, %s10845_s15 }
 0x1e2   :  { %1588 = vrot.lane.b32.xlu1 %v1286_v19, %s10845_s15 }
 0x1e3   :  { %v9896_v20 = vpop.f32.mrb[76].mxu0 }
 0x1e4   :  { %1590 = vrot.lane.b32.xlu0 %v9892_v15, %s10845_s15  ;;  %v1299_v21 = vpop.f32.mrb[77].mxu0 }
 0x1e5   :  { %v9897_v22 = vpop.f32.mrb[78].mxu0 }
 0x1e6   :  { %1592 = vrot.lane.b32.xlu1 %v9893_v18, %s10845_s15  ;;  %v1302_v23 = vpop.f32.mrb[79].mxu0 }
 0x1e8   :  { %1594 = vrot.lane.b32.xlu0 %v1299_v21, %s10845_s15 }
 0x1ea   :  { %1596 = vrot.lane.b32.xlu1 %v1302_v23, %s10845_s15 }
 0x1eb   :  { %v9900_v24 = vpop.f32.mrb[0].mxu1 }
 0x1ec   :  { %v1315_v25 = vpop.f32.mrb[1].mxu1  ;;  %1598 = vrot.lane.b32.xlu0 %v9896_v20, %s10845_s15 }
 0x1ed   :  { %v9901_v26 = vpop.f32.mrb[2].mxu1 }
 0x1ee   :  { %v1318_v27 = vpop.f32.mrb[3].mxu1  ;;  %1600 = vrot.lane.b32.xlu1 %v9897_v22, %s10845_s15 }
 0x1f0   :  { %1602 = vrot.lane.b32.xlu0 %v1315_v25, %s10845_s15  ;;  %v11722_v25 = vld [vmem:[%s13791_s3 + $0x5] ss:$0 sm:$0xff] }
 0x1f2   :  { %1604 = vrot.lane.b32.xlu1 %v1318_v27, %s10845_s15 }
 0x1f3   :  { %v9904_v61 = vpop.f32.mrb[4].mxu1 }
 0x1f4   :  { %1606 = vrot.lane.b32.xlu0 %v9900_v24, %s10845_s15  ;;  %v1331_v28 = vpop.f32.mrb[5].mxu1 }
 0x1f5   :  { %v9905_v29 = vpop.f32.mrb[6].mxu1 }
 0x1f6   :  { %1608 = vrot.lane.b32.xlu1 %v9901_v26, %s10845_s15  ;;  %v1334_v30 = vpop.f32.mrb[7].mxu1 }
 0x1f8   :  { %1610 = vrot.lane.b32.xlu0 %v1331_v28, %s10845_s15 }
 0x1fa   :  { %1612 = vrot.lane.b32.xlu1 %v1334_v30, %s10845_s15 }
 0x1fb   :  { %v9908_v32 = vpop.f32.mrb[8].mxu1 }
 0x1fc   :  { %1614 = vrot.lane.b32.xlu0 %v9904_v61, %s10845_s15  ;;  %v1347_v1 = vpop.f32.mrb[9].mxu1 }
 0x1fd   :  { %v9909_v33 = vpop.f32.mrb[10].mxu1 }
 0x1fe   :  { %1616 = vrot.lane.b32.xlu1 %v9905_v29, %s10845_s15  ;;  %v1350_v34 = vpop.f32.mrb[11].mxu1 }
 0x200   :  { %1618 = vrot.lane.b32.xlu0 %v1347_v1, %s10845_s15 }
 0x202   :  { %1620 = vrot.lane.b32.xlu1 %v1350_v34, %s10845_s15 }
 0x203   :  { %v9912_v9 = vpop.f32.mrb[12].mxu1 }
 0x204   :  { %1622 = vrot.lane.b32.xlu0 %v9908_v32, %s10845_s15  ;;  %v1363_v35 = vpop.f32.mrb[13].mxu1 }
 0x205   :  { %v9913_v37 = vpop.f32.mrb[14].mxu1 }
 0x206   :  { %1624 = vrot.lane.b32.xlu1 %v9909_v33, %s10845_s15  ;;  %v1366_v38 = vpop.f32.mrb[15].mxu1 }
 0x208   :  { %1626 = vrot.lane.b32.xlu0 %v1363_v35, %s10845_s15 }
 0x20a   :  { %1628 = vrot.lane.b32.xlu1 %v1366_v38, %s10845_s15  ;;  %v10545_v38 = vld [vmem:[%s13789_s4 + $0x10] sm:$0xff]  }
 0x20b   :  { %v9916_v39 = vpop.f32.mrb[16].mxu1 }
 0x20c   :  { %1630 = vrot.lane.b32.xlu0 %v9912_v9, %s10845_s15  ;;  %v1379_v40 = vpop.f32.mrb[17].mxu1 }
 0x20d   :  { %v9917_v17 = vpop.f32.mrb[18].mxu1 }
 0x20e   :  { %1632 = vrot.lane.b32.xlu1 %v9913_v37, %s10845_s15  ;;  %v1382_v41 = vpop.f32.mrb[19].mxu1 }
 0x210   :  { %1634 = vrot.lane.b32.xlu0 %v1379_v40, %s10845_s15 }
 0x212   :  { %1636 = vrot.lane.b32.xlu1 %v1382_v41, %s10845_s15 }
 0x213   :  { %v9920_v42 = vpop.f32.mrb[20].mxu1 }
 0x214   :  { %1638 = vrot.lane.b32.xlu0 %v9916_v39, %s10845_s15  ;;  %v1395_v43 = vpop.f32.mrb[21].mxu1  ;;  %v10546_v39 = vld [vmem:[%s13789_s4 + $0x18] sm:$0xff]  }
 0x215   :  { %v9921_v45 = vpop.f32.mrb[22].mxu1 }
 0x216   :  { %1640 = vrot.lane.b32.xlu1 %v9917_v17, %s10845_s15  ;;  %v1398_v47 = vpop.f32.mrb[23].mxu1 }
 0x218   :  { %1642 = vrot.lane.b32.xlu0 %v1395_v43, %s10845_s15 }
 0x21a   :  { %1644 = vrot.lane.b32.xlu1 %v1398_v47, %s10845_s15  ;;  %v10547_v47 = vld [vmem:[%s13789_s4 + $0x20] sm:$0xff]  }
 0x21b   :  { %v9924_v48 = vpop.f32.mrb[24].mxu1 }
 0x21c   :  { %1646 = vrot.lane.b32.xlu0 %v9920_v42, %s10845_s15  ;;  %v1411_v49 = vpop.f32.mrb[25].mxu1 }
 0x21d   :  { %v9925_v50 = vpop.f32.mrb[26].mxu1 }
 0x21e   :  { %1648 = vrot.lane.b32.xlu1 %v9921_v45, %s10845_s15  ;;  %v1414_v51 = vpop.f32.mrb[27].mxu1 }
 0x220   :  { %1650 = vrot.lane.b32.xlu0 %v1411_v49, %s10845_s15 }
 0x222   :  { %1652 = vrot.lane.b32.xlu1 %v1414_v51, %s10845_s15 }
 0x223   :  { %v9928_v52 = vpop.f32.mrb[28].mxu1 }
 0x224   :  { %1654 = vrot.lane.b32.xlu0 %v9924_v48, %s10845_s15  ;;  %v1427_v53 = vpop.f32.mrb[29].mxu1 }
 0x225   :  { %v9929_v54 = vpop.f32.mrb[30].mxu1 }
 0x226   :  { %1656 = vrot.lane.b32.xlu1 %v9925_v50, %s10845_s15  ;;  %v1430_v55 = vpop.f32.mrb[31].mxu1  ;;  %v10548_v50 = vld [vmem:[%s13789_s4 + $0x28] sm:$0xff]  }
 0x228   :  { %1658 = vrot.lane.b32.xlu0 %v1427_v53, %s10845_s15 }
 0x22a   :  { %1660 = vrot.lane.b32.xlu1 %v1430_v55, %s10845_s15 }
 0x22b   :  { %v9932_v56 = vpop.f32.mrb[32].mxu1 }
 0x22c   :  { %1662 = vrot.lane.b32.xlu0 %v9928_v52, %s10845_s15  ;;  %v1443_v57 = vpop.f32.mrb[33].mxu1 }
 0x22d   :  { %v9933_v58 = vpop.f32.mrb[34].mxu1 }
 0x22e   :  { %1664 = vrot.lane.b32.xlu1 %v9929_v54, %s10845_s15  ;;  %v1446_v59 = vpop.f32.mrb[35].mxu1 }
 0x230   :  { %1666 = vrot.lane.b32.xlu0 %v1443_v57, %s10845_s15 }
 0x232   :  { %1668 = vrot.lane.b32.xlu1 %v1446_v59, %s10845_s15 }
 0x233   :  { %v9936_v60 = vpop.f32.mrb[36].mxu1 }
 0x234   :  { %1670 = vrot.lane.b32.xlu0 %v9932_v56, %s10845_s15  ;;  %v1459_v62 = vpop.f32.mrb[37].mxu1 }
 0x235   :  { %v9937_v63 = vpop.f32.mrb[38].mxu1 }
 0x236   :  { %1672 = vrot.lane.b32.xlu1 %v9933_v58, %s10845_s15  ;;  %v1462_v0 = vpop.f32.mrb[39].mxu1  ;;  %v10549_v58 = vld [vmem:[%s13789_s4 + $0x30] sm:$0xff]  }
 0x238   :  { %1674 = vrot.lane.b32.xlu0 %v1459_v62, %s10845_s15 }
 0x23a   :  { %1676 = vrot.lane.b32.xlu1 %v1462_v0, %s10845_s15 }
 0x23b   :  { %v9940_v44 = vpop.f32.mrb[40].mxu1 }
 0x23c   :  { %1678 = vrot.lane.b32.xlu0 %v9936_v60, %s10845_s15  ;;  %v1475_v31 = vpop.f32.mrb[41].mxu1  ;;  %v10550_v60 = vld [vmem:[%s13789_s4 + $0x38] sm:$0xff]  }
 0x23d   :  { %v9941_v2 = vpop.f32.mrb[42].mxu1 }
 0x23e   :  { %v1575_v36 = vpop.permute.xlu0 %1574  ;;  %1680 = vrot.lane.b32.xlu1 %v9937_v63, %s10845_s15  ;;  %v1478_v46 = vpop.f32.mrb[43].mxu1 }
 0x23f   :  { %1765 = vst.msk [vmem:[#allocation2 + $0x10] sm:$0xff] %vm1762_vm1, %v1575_v36 }
 0x240   :  { %v1577_v3 = vpop.permute.xlu1 %1576  ;;  %1682 = vrot.lane.b32.xlu0 %v1475_v31, %s10845_s15 }
 0x241   :  { %1766 = vst.msk [vmem:[#allocation2 + $0x18] sm:$0xff] %vm1762_vm1, %v1577_v3 }
 0x242   :  { %v1571_v4 = vpop.permute.xlu0 %1570  ;;  %1684 = vrot.lane.b32.xlu1 %v1478_v46, %s10845_s15 }
 0x243   :  { %1763 = vst.msk [vmem:[#allocation2] sm:$0xff] %vm1762_vm1, %v1571_v4  ;;  %v9944_v5 = vpop.f32.mrb[44].mxu1 }
 0x244   :  { %v1573_v6 = vpop.permute.xlu1 %1572  ;;  %1686 = vrot.lane.b32.xlu0 %v9940_v44, %s10845_s15  ;;  %v1491_v8 = vpop.f32.mrb[45].mxu1 }
 0x245   :  { %1764 = vst.msk [vmem:[#allocation2 + $0x8] sm:$0xff] %vm1762_vm1, %v1573_v6  ;;  %v9945_v10 = vpop.f32.mrb[46].mxu1 }
 0x246   :  { %v1583_v11 = vpop.permute.xlu0 %1582  ;;  %1688 = vrot.lane.b32.xlu1 %v9941_v2, %s10845_s15  ;;  %v1494_v12 = vpop.f32.mrb[47].mxu1  ;;  %v1829_v15 = vld [vmem:[#allocation2 + $0x10] sm:$0xff] }
 0x247   :  { %1769 = vst.msk [vmem:[#allocation2 + $0x30] sm:$0xff] %vm1762_vm1, %v1583_v11  ;;  %v1894_v22 = vmul.f32 %v11710_v14, %v1829_v15 }
 0x248   :  { %v1585_v13 = vpop.permute.xlu1 %1584  ;;  %v1830_v16 = vld [vmem:[#allocation2 + $0x18] sm:$0xff]  ;;  %1690 = vrot.lane.b32.xlu0 %v1491_v8, %s10845_s15 }
 0x249   :  { %1770 = vst.msk [vmem:[#allocation2 + $0x38] sm:$0xff] %vm1762_vm1, %v1585_v13  ;;  %v1895_v18 = vmul.f32 %v11710_v14, %v1830_v16  ;;  %v1959_v30 = vadd.f32 %v11722_v25, %v1894_v22 }
 0x24a   :  { %v1579_v19 = vpop.permute.xlu0 %1578  ;;  %v1827_v20 = vld [vmem:[#allocation2] sm:$0xff]  ;;  %1692 = vrot.lane.b32.xlu1 %v1494_v12, %s10845_s15 }
 0x24b   :  { %1767 = vst.msk [vmem:[#allocation2 + $0x20] sm:$0xff] %vm1762_vm1, %v1579_v19  ;;  %v1892_v21 = vmul.f32 %v11710_v14, %v1827_v20  ;;  %v1960_v61 = vadd.f32 %v11722_v25, %v1895_v18  ;;  %v2023_v42 = vmax.f32 %v1959_v30, 0.0 }
 0x24c   :  { %v1581_v23 = vpop.permute.xlu1 %1580  ;;  %v1828_v24 = vld [vmem:[#allocation2 + $0x8] sm:$0xff]  ;;  %1694 = vrot.lane.b32.xlu0 %v9944_v5, %s10845_s15 }
 0x24d   :  { %1768 = vst.msk [vmem:[#allocation2 + $0x28] sm:$0xff] %vm1762_vm1, %v1581_v23  ;;  %v1893_v26 = vmul.f32 %v11710_v14, %v1828_v24  ;;  %v1957_v27 = vadd.f32 %v11722_v25, %v1892_v21  ;;  %v2024_v35 = vmax.f32 %v1960_v61, 0.0 }
 0x24e   :  { %v2186_v28 = vpop.permute.xlu0 %2185  ;;  %1696 = vrot.lane.b32.xlu1 %v9945_v10, %s10845_s15  ;;  %v1833_v1 = vld [vmem:[#allocation2 + $0x30] sm:$0xff] }
 0x24f   :  { %9958 = vmatprep.subr.bf16.mxu0 %v2186_v28  ;;  %v1958_v29 = vadd.f32 %v11722_v25, %v1893_v26  ;;  %v2021_v34 = vmax.f32 %v1957_v27, 0.0  ;;  %v1898_v45 = vmul.f32 %v11710_v14, %v1833_v1  ;;  %v2102_v51 = vpack.c.bf16 %v2024_v35, %v2023_v42 }
 0x250   :  { %9959 = vmatpush3.bf16.msra.mxu0 %v2186_v28  ;;  %v2188_v32 = vpop.permute.xlu1 %2187  ;;  %v1834_v33 = vld [vmem:[#allocation2 + $0x38] sm:$0xff]  ;;  %3153 = vrot.lane.b32.xlu0 %v10545_v38, %s10846_s29 }
 0x251   :  { %9960 = vmatprep.subr.bf16.mxu0 %v2188_v32  ;;  %v2022_v9 = vmax.f32 %v1958_v29, 0.0  ;;  %v1899_v37 = vmul.f32 %v11710_v14, %v1834_v33  ;;  %v1963_v57 = vadd.f32 %v11722_v25, %v1898_v45 }
 0x252   :  { %v1587_v40 = vpop.permute.xlu0 %1586  ;;  %v1831_v17 = vld [vmem:[#allocation2 + $0x20] sm:$0xff]  ;;  %3155 = vrot.lane.b32.xlu1 %v10546_v39, %s10846_s29 }
 0x253   :  { %1771 = vst.msk [vmem:[#allocation2 + $0x40] sm:$0xff] %vm1762_vm1, %v1587_v40  ;;  %v2101_v41 = vpack.c.bf16 %v2022_v9, %v2021_v34  ;;  %v1896_v43 = vmul.f32 %v11710_v14, %v1831_v17  ;;  %v1964_v54 = vadd.f32 %v11722_v25, %v1899_v37  ;;  %v2027_v36 = vmax.f32 %v1963_v57, 0.0 }
 0x254   :  { %9961 = vmatpush3.bf16.msra.mxu0 %v2188_v32  ;;  %v1589_v48 = vpop.permute.xlu1 %1588  ;;  %v1832_v49 = vld [vmem:[#allocation2 + $0x28] sm:$0xff]  ;;  %3157 = vrot.lane.b32.xlu0 %v10547_v47, %s10846_s29 }
 0x255   :  { %1772 = vst.msk [vmem:[#allocation2 + $0x48] sm:$0xff] %vm1762_vm1, %v1589_v48  ;;  %9962 = vmatprep.mubr.bf16.mxu0 %v2101_v41  ;;  %v1897_v52 = vmul.f32 %v11710_v14, %v1832_v49  ;;  %v1961_v53 = vadd.f32 %v11722_v25, %v1896_v43  ;;  %v2028_v0 = vmax.f32 %v1964_v54, 0.0 }
 0x256   :  { %v1591_v55 = vpop.permute.xlu0 %1590  ;;  %3159 = vrot.lane.b32.xlu1 %v10548_v50, %s10846_s29 }
 0x257   :  { %1773 = vst.msk [vmem:[#allocation2 + $0x50] sm:$0xff] %vm1762_vm1, %v1591_v55  ;;  %9963 = vmatmul.mubr.bf16.vlgmr.msra.gmra.mrb[80].mxu0 %v2102_v51  ;;  %v1962_v56 = vadd.f32 %v11722_v25, %v1897_v52  ;;  %v2025_v62 = vmax.f32 %v1961_v53, 0.0  ;;  %v2104_v5 = vpack.c.bf16 %v2028_v0, %v2027_v36 }
 0x258   :  { %v1593_v59 = vpop.permute.xlu1 %1592  ;;  %3161 = vrot.lane.b32.xlu0 %v10549_v58, %s10846_s29 }
 0x259   :  { %1774 = vst.msk [vmem:[#allocation2 + $0x58] sm:$0xff] %vm1762_vm1, %v1593_v59  ;;  %v2026_v63 = vmax.f32 %v1962_v56, 0.0 }
 0x25a   :  { %v1595_v44 = vpop.permute.xlu0 %1594  ;;  %v1835_v31 = vld [vmem:[#allocation2 + $0x40] sm:$0xff]  ;;  %3163 = vrot.lane.b32.xlu1 %v10550_v60, %s10846_s29 }
 0x25b   :  { %1775 = vst.msk [vmem:[#allocation2 + $0x60] sm:$0xff] %vm1762_vm1, %v1595_v44  ;;  %v2103_v2 = vpack.c.bf16 %v2026_v63, %v2025_v62  ;;  %v1900_v46 = vmul.f32 %v11710_v14, %v1835_v31 }
 0x25c   :  { %v1597_v3 = vpop.permute.xlu1 %1596  ;;  %v1836_v4 = vld [vmem:[#allocation2 + $0x48] sm:$0xff] }
 0x25d   :  { %1776 = vst.msk [vmem:[#allocation2 + $0x68] sm:$0xff] %vm1762_vm1, %v1597_v3  ;;  %9966 = vmatprep.mubr.bf16.mxu0 %v2103_v2  ;;  %v1901_v6 = vmul.f32 %v11710_v14, %v1836_v4  ;;  %v1965_v8 = vadd.f32 %v11722_v25, %v1900_v46 }
 0x25e   :  { %v1599_v10 = vpop.permute.xlu0 %1598  ;;  %v1837_v11 = vld [vmem:[#allocation2 + $0x50] sm:$0xff] }
 0x25f   :  { %1777 = vst.msk [vmem:[#allocation2 + $0x70] sm:$0xff] %vm1762_vm1, %v1599_v10  ;;  %9967 = vmatmul.mubr.bf16.gmra.mrb[84].mxu0 %v2104_v5  ;;  %v1966_v12 = vadd.f32 %v11722_v25, %v1901_v6  ;;  %v1902_v13 = vmul.f32 %v11710_v14, %v1837_v11  ;;  %v2029_v18 = vmax.f32 %v1965_v8, 0.0 }
 0x260   :  { %v1601_v15 = vpop.permute.xlu1 %1600  ;;  %v1838_v16 = vld [vmem:[#allocation2 + $0x58] sm:$0xff] }
 0x261   :  { %1778 = vst.msk [vmem:[#allocation2 + $0x78] sm:$0xff] %vm1762_vm1, %v1601_v15  ;;  %v2030_v19 = vmax.f32 %v1966_v12, 0.0  ;;  %v1903_v20 = vmul.f32 %v11710_v14, %v1838_v16  ;;  %v1967_v21 = vadd.f32 %v11722_v25, %v1902_v13 }
 0x262   :  { %v1603_v22 = vpop.permute.xlu0 %1602  ;;  %v1839_v23 = vld [vmem:[#allocation2 + $0x60] sm:$0xff] }
 0x263   :  { %1779 = vst.msk [vmem:[#allocation2 + $0x80] sm:$0xff] %vm1762_vm1, %v1603_v22  ;;  %v2105_v24 = vpack.c.bf16 %v2030_v19, %v2029_v18  ;;  %v1968_v26 = vadd.f32 %v11722_v25, %v1903_v20  ;;  %v1904_v27 = vmul.f32 %v11710_v14, %v1839_v23  ;;  %v2031_v29 = vmax.f32 %v1967_v21, 0.0 }
 0x264   :  { %v1605_v61 = vpop.permute.xlu1 %1604  ;;  %v1840_v28 = vld [vmem:[#allocation2 + $0x68] sm:$0xff] }
 0x265   :  { %1780 = vst.msk [vmem:[#allocation2 + $0x88] sm:$0xff] %vm1762_vm1, %v1605_v61  ;;  %9970 = vmatprep.mubr.bf16.mxu0 %v2105_v24  ;;  %v2032_v30 = vmax.f32 %v1968_v26, 0.0  ;;  %v1905_v32 = vmul.f32 %v11710_v14, %v1840_v28  ;;  %v1969_v1 = vadd.f32 %v11722_v25, %v1904_v27 }
 0x266   :  { %v1607_v33 = vpop.permute.xlu0 %1606  ;;  %v1841_v34 = vld [vmem:[#allocation2 + $0x70] sm:$0xff] }
 0x267   :  { %1781 = vst.msk [vmem:[#allocation2 + $0x90] sm:$0xff] %vm1762_vm1, %v1607_v33  ;;  %v2106_v9 = vpack.c.bf16 %v2032_v30, %v2031_v29  ;;  %v1970_v35 = vadd.f32 %v11722_v25, %v1905_v32  ;;  %v1906_v37 = vmul.f32 %v11710_v14, %v1841_v34  ;;  %v2033_v40 = vmax.f32 %v1969_v1, 0.0 }
 0x268   :  { %v1609_v38 = vpop.permute.xlu1 %1608  ;;  %v1842_v39 = vld [vmem:[#allocation2 + $0x78] sm:$0xff] }
 0x269   :  { %1782 = vst.msk [vmem:[#allocation2 + $0x98] sm:$0xff] %vm1762_vm1, %v1609_v38  ;;  %9971 = vmatmul.mubr.bf16.gmra.mrb[88].mxu0 %v2106_v9  ;;  %v2034_v17 = vmax.f32 %v1970_v35, 0.0  ;;  %v1907_v41 = vmul.f32 %v11710_v14, %v1842_v39  ;;  %v1971_v42 = vadd.f32 %v11722_v25, %v1906_v37 }
 0x26a   :  { %v1611_v43 = vpop.permute.xlu0 %1610  ;;  %v1843_v45 = vld [vmem:[#allocation2 + $0x80] sm:$0xff] }
 0x26b   :  { %1783 = vst.msk [vmem:[#allocation2 + $0xa0] sm:$0xff] %vm1762_vm1, %v1611_v43  ;;  %v2107_v47 = vpack.c.bf16 %v2034_v17, %v2033_v40  ;;  %v1972_v48 = vadd.f32 %v11722_v25, %v1907_v41  ;;  %v1908_v49 = vmul.f32 %v11710_v14, %v1843_v45  ;;  %v2035_v52 = vmax.f32 %v1971_v42, 0.0 }
 0x26c   :  { %v1613_v50 = vpop.permute.xlu1 %1612  ;;  %v1844_v51 = vld [vmem:[#allocation2 + $0x88] sm:$0xff] }
 0x26d   :  { %9974 = vmatprep.mubr.bf16.mxu0 %v2107_v47  ;;  %1784 = vst.msk [vmem:[#allocation2 + $0xa8] sm:$0xff] %vm1762_vm1, %v1613_v50  ;;  %v2036_v53 = vmax.f32 %v1972_v48, 0.0  ;;  %v1909_v54 = vmul.f32 %v11710_v14, %v1844_v51  ;;  %v1973_v55 = vadd.f32 %v11722_v25, %v1908_v49 }
 0x26e   :  { %v1615_v56 = vpop.permute.xlu0 %1614  ;;  %v1845_v57 = vld [vmem:[#allocation2 + $0x90] sm:$0xff] }
 0x26f   :  { %1785 = vst.msk [vmem:[#allocation2 + $0xb0] sm:$0xff] %vm1762_vm1, %v1615_v56  ;;  %v2108_v58 = vpack.c.bf16 %v2036_v53, %v2035_v52  ;;  %v1974_v59 = vadd.f32 %v11722_v25, %v1909_v54  ;;  %v1910_v60 = vmul.f32 %v11710_v14, %v1845_v57  ;;  %v2037_v0 = vmax.f32 %v1973_v55, 0.0 }
 0x270   :  { %v1617_v62 = vpop.permute.xlu1 %1616  ;;  %v1846_v63 = vld [vmem:[#allocation2 + $0x98] sm:$0xff] }
 0x271   :  { %9975 = vmatmul.mubr.bf16.gmra.mrb[92].mxu0 %v2108_v58  ;;  %1786 = vst.msk [vmem:[#allocation2 + $0xb8] sm:$0xff] %vm1762_vm1, %v1617_v62  ;;  %v2038_v44 = vmax.f32 %v1974_v59, 0.0  ;;  %v1911_v31 = vmul.f32 %v11710_v14, %v1846_v63  ;;  %v1975_v2 = vadd.f32 %v11722_v25, %v1910_v60 }
 0x272   :  { %v1619_v36 = vpop.permute.xlu0 %1618  ;;  %v1847_v46 = vld [vmem:[#allocation2 + $0xa0] sm:$0xff] }
 0x273   :  { %1787 = vst.msk [vmem:[#allocation2 + $0xc0] sm:$0xff] %vm1762_vm1, %v1619_v36  ;;  %v2109_v3 = vpack.c.bf16 %v2038_v44, %v2037_v0  ;;  %v1976_v4 = vadd.f32 %v11722_v25, %v1911_v31  ;;  %v1912_v5 = vmul.f32 %v11710_v14, %v1847_v46  ;;  %v2039_v10 = vmax.f32 %v1975_v2, 0.0 }
 0x274   :  { %v1621_v6 = vpop.permute.xlu1 %1620  ;;  %v1848_v8 = vld [vmem:[#allocation2 + $0xa8] sm:$0xff] }
 0x275   :  { %9978 = vmatprep.mubr.bf16.mxu0 %v2109_v3  ;;  %1788 = vst.msk [vmem:[#allocation2 + $0xc8] sm:$0xff] %vm1762_vm1, %v1621_v6  ;;  %v2040_v11 = vmax.f32 %v1976_v4, 0.0  ;;  %v1913_v12 = vmul.f32 %v11710_v14, %v1848_v8  ;;  %v1977_v13 = vadd.f32 %v11722_v25, %v1912_v5 }
 0x276   :  { %v1623_v15 = vpop.permute.xlu0 %1622  ;;  %v1849_v16 = vld [vmem:[#allocation2 + $0xb0] sm:$0xff] }
 0x277   :  { %1789 = vst.msk [vmem:[#allocation2 + $0xd0] sm:$0xff] %vm1762_vm1, %v1623_v15  ;;  %v2110_v18 = vpack.c.bf16 %v2040_v11, %v2039_v10  ;;  %v1978_v19 = vadd.f32 %v11722_v25, %v1913_v12  ;;  %v1914_v20 = vmul.f32 %v11710_v14, %v1849_v16  ;;  %v2041_v23 = vmax.f32 %v1977_v13, 0.0 }
 0x278   :  { %v1625_v21 = vpop.permute.xlu1 %1624  ;;  %v1850_v22 = vld [vmem:[#allocation2 + $0xb8] sm:$0xff] }
 0x279   :  { %9979 = vmatmul.mubr.bf16.gmra.mrb[96].mxu0 %v2110_v18  ;;  %1790 = vst.msk [vmem:[#allocation2 + $0xd8] sm:$0xff] %vm1762_vm1, %v1625_v21  ;;  %v2042_v24 = vmax.f32 %v1978_v19, 0.0  ;;  %v1915_v26 = vmul.f32 %v11710_v14, %v1850_v22  ;;  %v1979_v27 = vadd.f32 %v11722_v25, %v1914_v20 }
 0x27a   :  { %v1627_v61 = vpop.permute.xlu0 %1626  ;;  %v1851_v28 = vld [vmem:[#allocation2 + $0xc0] sm:$0xff] }
 0x27b   :  { %1791 = vst.msk [vmem:[#allocation2 + $0xe0] sm:$0xff] %vm1762_vm1, %v1627_v61  ;;  %v2111_v29 = vpack.c.bf16 %v2042_v24, %v2041_v23  ;;  %v1980_v30 = vadd.f32 %v11722_v25, %v1915_v26  ;;  %v1916_v32 = vmul.f32 %v11710_v14, %v1851_v28  ;;  %v2043_v34 = vmax.f32 %v1979_v27, 0.0 }
 0x27c   :  { %v1629_v1 = vpop.permute.xlu1 %1628  ;;  %v1852_v33 = vld [vmem:[#allocation2 + $0xc8] sm:$0xff] }
 0x27d   :  { %1792 = vst.msk [vmem:[#allocation2 + $0xe8] sm:$0xff] %vm1762_vm1, %v1629_v1  ;;  %9982 = vmatprep.mubr.bf16.mxu0 %v2111_v29  ;;  %v2044_v9 = vmax.f32 %v1980_v30, 0.0  ;;  %v1917_v35 = vmul.f32 %v11710_v14, %v1852_v33  ;;  %v1981_v37 = vadd.f32 %v11722_v25, %v1916_v32 }
 0x27e   :  { %v1631_v38 = vpop.permute.xlu0 %1630  ;;  %v1853_v39 = vld [vmem:[#allocation2 + $0xd0] sm:$0xff] }
 0x27f   :  { %1793 = vst.msk [vmem:[#allocation2 + $0xf0] sm:$0xff] %vm1762_vm1, %v1631_v38  ;;  %v2112_v40 = vpack.c.bf16 %v2044_v9, %v2043_v34  ;;  %v1982_v17 = vadd.f32 %v11722_v25, %v1917_v35  ;;  %v1918_v41 = vmul.f32 %v11710_v14, %v1853_v39  ;;  %v2045_v45 = vmax.f32 %v1981_v37, 0.0 }
 0x280   :  { %v1633_v42 = vpop.permute.xlu1 %1632  ;;  %v1854_v43 = vld [vmem:[#allocation2 + $0xd8] sm:$0xff] }
 0x281   :  { %1794 = vst.msk [vmem:[#allocation2 + $0xf8] sm:$0xff] %vm1762_vm1, %v1633_v42  ;;  %9983 = vmatmul.mubr.bf16.gmra.mrb[100].mxu0 %v2112_v40  ;;  %v2046_v47 = vmax.f32 %v1982_v17, 0.0  ;;  %v1919_v48 = vmul.f32 %v11710_v14, %v1854_v43  ;;  %v1983_v49 = vadd.f32 %v11722_v25, %v1918_v41 }
 0x282   :  { %v1855_v50 = vld [vmem:[#allocation2 + $0xe0] sm:$0xff]  ;;  %v1635_v51 = vpop.permute.xlu0 %1634 }
 0x283   :  { %v2113_v52 = vpack.c.bf16 %v2046_v47, %v2045_v45  ;;  %v1984_v53 = vadd.f32 %v11722_v25, %v1919_v48  ;;  %v1920_v54 = vmul.f32 %v11710_v14, %v1855_v50  ;;  %1795 = vst.msk [vmem:[#allocation2 + $0x100] sm:$0xff] %vm1762_vm1, %v1635_v51  ;;  %v2047_v57 = vmax.f32 %v1983_v49, 0.0 }
 0x284   :  { %v1856_v55 = vld [vmem:[#allocation2 + $0xe8] sm:$0xff]  ;;  %v1637_v56 = vpop.permute.xlu1 %1636 }
 0x285   :  { %9986 = vmatprep.mubr.bf16.mxu0 %v2113_v52  ;;  %v2048_v58 = vmax.f32 %v1984_v53, 0.0  ;;  %v1921_v59 = vmul.f32 %v11710_v14, %v1856_v55  ;;  %v1985_v60 = vadd.f32 %v11722_v25, %v1920_v54  ;;  %1796 = vst.msk [vmem:[#allocation2 + $0x108] sm:$0xff] %vm1762_vm1, %v1637_v56 }
 0x286   :  { %v1857_v62 = vld [vmem:[#allocation2 + $0xf0] sm:$0xff]  ;;  %v1639_v63 = vpop.permute.xlu0 %1638 }
 0x287   :  { %v2114_v0 = vpack.c.bf16 %v2048_v58, %v2047_v57  ;;  %v1986_v44 = vadd.f32 %v11722_v25, %v1921_v59  ;;  %v1922_v31 = vmul.f32 %v11710_v14, %v1857_v62  ;;  %1797 = vst.msk [vmem:[#allocation2 + $0x110] sm:$0xff] %vm1762_vm1, %v1639_v63  ;;  %v2049_v46 = vmax.f32 %v1985_v60, 0.0 }
 0x288   :  { %v1858_v2 = vld [vmem:[#allocation2 + $0xf8] sm:$0xff]  ;;  %v1641_v36 = vpop.permute.xlu1 %1640 }
 0x289   :  { %9987 = vmatmul.mubr.bf16.gmra.mrb[104].mxu0 %v2114_v0  ;;  %v2050_v3 = vmax.f32 %v1986_v44, 0.0  ;;  %v1923_v4 = vmul.f32 %v11710_v14, %v1858_v2  ;;  %v1987_v5 = vadd.f32 %v11722_v25, %v1922_v31  ;;  %1798 = vst.msk [vmem:[#allocation2 + $0x118] sm:$0xff] %vm1762_vm1, %v1641_v36 }
 0x28a   :  { %v1643_v6 = vpop.permute.xlu0 %1642  ;;  %v1859_v8 = vld [vmem:[#allocation2 + $0x100] sm:$0xff] }
 0x28b   :  { %v2115_v10 = vpack.c.bf16 %v2050_v3, %v2049_v46  ;;  %v1988_v11 = vadd.f32 %v11722_v25, %v1923_v4  ;;  %1799 = vst.msk [vmem:[#allocation2 + $0x120] sm:$0xff] %vm1762_vm1, %v1643_v6  ;;  %v1924_v12 = vmul.f32 %v11710_v14, %v1859_v8  ;;  %v2051_v16 = vmax.f32 %v1987_v5, 0.0 }
 0x28c   :  { %v1645_v13 = vpop.permute.xlu1 %1644  ;;  %v1860_v15 = vld [vmem:[#allocation2 + $0x108] sm:$0xff] }
 0x28d   :  { %9990 = vmatprep.mubr.bf16.mxu0 %v2115_v10  ;;  %v2052_v18 = vmax.f32 %v1988_v11, 0.0  ;;  %1800 = vst.msk [vmem:[#allocation2 + $0x128] sm:$0xff] %vm1762_vm1, %v1645_v13  ;;  %v1925_v19 = vmul.f32 %v11710_v14, %v1860_v15  ;;  %v1989_v20 = vadd.f32 %v11722_v25, %v1924_v12 }
 0x28e   :  { %v1647_v21 = vpop.permute.xlu0 %1646  ;;  %v1861_v22 = vld [vmem:[#allocation2 + $0x110] sm:$0xff] }
 0x28f   :  { %v2116_v23 = vpack.c.bf16 %v2052_v18, %v2051_v16  ;;  %1801 = vst.msk [vmem:[#allocation2 + $0x130] sm:$0xff] %vm1762_vm1, %v1647_v21  ;;  %v1990_v24 = vadd.f32 %v11722_v25, %v1925_v19  ;;  %v2053_v26 = vmax.f32 %v1989_v20, 0.0  ;;  %v1926_v27 = vmul.f32 %v11710_v14, %v1861_v22 }
 0x290   :  { %v1649_v61 = vpop.permute.xlu1 %1648  ;;  %v1862_v28 = vld [vmem:[#allocation2 + $0x118] sm:$0xff] }
 0x291   :  { %9991 = vmatmul.mubr.bf16.gmra.mrb[108].mxu0 %v2116_v23  ;;  %1802 = vst.msk [vmem:[#allocation2 + $0x138] sm:$0xff] %vm1762_vm1, %v1649_v61  ;;  %v2054_v29 = vmax.f32 %v1990_v24, 0.0  ;;  %v1927_v30 = vmul.f32 %v11710_v14, %v1862_v28  ;;  %v1991_v32 = vadd.f32 %v11722_v25, %v1926_v27 }
 0x292   :  { %v1651_v1 = vpop.permute.xlu0 %1650  ;;  %v1863_v33 = vld [vmem:[#allocation2 + $0x120] sm:$0xff] }
 0x293   :  { %1803 = vst.msk [vmem:[#allocation2 + $0x140] sm:$0xff] %vm1762_vm1, %v1651_v1  ;;  %v2117_v34 = vpack.c.bf16 %v2054_v29, %v2053_v26  ;;  %v1992_v9 = vadd.f32 %v11722_v25, %v1927_v30  ;;  %v2055_v35 = vmax.f32 %v1991_v32, 0.0  ;;  %v1928_v37 = vmul.f32 %v11710_v14, %v1863_v33 }
 0x294   :  { %v1653_v38 = vpop.permute.xlu1 %1652  ;;  %v1864_v39 = vld [vmem:[#allocation2 + $0x128] sm:$0xff] }
 0x295   :  { %1804 = vst.msk [vmem:[#allocation2 + $0x148] sm:$0xff] %vm1762_vm1, %v1653_v38  ;;  %9994 = vmatprep.mubr.bf16.mxu0 %v2117_v34  ;;  %v2056_v40 = vmax.f32 %v1992_v9, 0.0  ;;  %v1929_v17 = vmul.f32 %v11710_v14, %v1864_v39  ;;  %v1993_v41 = vadd.f32 %v11722_v25, %v1928_v37 }
 0x296   :  { %v1655_v42 = vpop.permute.xlu0 %1654  ;;  %v1865_v43 = vld [vmem:[#allocation2 + $0x130] sm:$0xff] }
 0x297   :  { %1805 = vst.msk [vmem:[#allocation2 + $0x150] sm:$0xff] %vm1762_vm1, %v1655_v42  ;;  %v2118_v45 = vpack.c.bf16 %v2056_v40, %v2055_v35  ;;  %v1994_v47 = vadd.f32 %v11722_v25, %v1929_v17  ;;  %v2057_v48 = vmax.f32 %v1993_v41, 0.0  ;;  %v1930_v49 = vmul.f32 %v11710_v14, %v1865_v43 }
 0x298   :  { %v1657_v50 = vpop.permute.xlu1 %1656  ;;  %v1866_v51 = vld [vmem:[#allocation2 + $0x138] sm:$0xff] }
 0x299   :  { %1806 = vst.msk [vmem:[#allocation2 + $0x158] sm:$0xff] %vm1762_vm1, %v1657_v50  ;;  %9995 = vmatmul.mubr.bf16.gmra.mrb[112].mxu0 %v2118_v45  ;;  %v2058_v52 = vmax.f32 %v1994_v47, 0.0  ;;  %v1931_v53 = vmul.f32 %v11710_v14, %v1866_v51  ;;  %v1995_v54 = vadd.f32 %v11722_v25, %v1930_v49 }
 0x29a   :  { %v1659_v55 = vpop.permute.xlu0 %1658  ;;  %v1867_v56 = vld [vmem:[#allocation2 + $0x140] sm:$0xff] }
 0x29b   :  { %1807 = vst.msk [vmem:[#allocation2 + $0x160] sm:$0xff] %vm1762_vm1, %v1659_v55  ;;  %v2119_v57 = vpack.c.bf16 %v2058_v52, %v2057_v48  ;;  %v1996_v58 = vadd.f32 %v11722_v25, %v1931_v53  ;;  %v2059_v59 = vmax.f32 %v1995_v54, 0.0  ;;  %v1932_v60 = vmul.f32 %v11710_v14, %v1867_v56 }
 0x29c   :  { %v1661_v62 = vpop.permute.xlu1 %1660  ;;  %v1868_v63 = vld [vmem:[#allocation2 + $0x148] sm:$0xff] }
 0x29d   :  { %1808 = vst.msk [vmem:[#allocation2 + $0x168] sm:$0xff] %vm1762_vm1, %v1661_v62  ;;  %9998 = vmatprep.mubr.bf16.mxu0 %v2119_v57  ;;  %v2060_v0 = vmax.f32 %v1996_v58, 0.0  ;;  %v1933_v44 = vmul.f32 %v11710_v14, %v1868_v63  ;;  %v1997_v31 = vadd.f32 %v11722_v25, %v1932_v60 }
 0x29e   :  { %v1663_v2 = vpop.permute.xlu0 %1662  ;;  %v1869_v36 = vld [vmem:[#allocation2 + $0x150] sm:$0xff] }
 0x29f   :  { %1809 = vst.msk [vmem:[#allocation2 + $0x170] sm:$0xff] %vm1762_vm1, %v1663_v2  ;;  %v2120_v46 = vpack.c.bf16 %v2060_v0, %v2059_v59  ;;  %v1998_v3 = vadd.f32 %v11722_v25, %v1933_v44  ;;  %v2061_v4 = vmax.f32 %v1997_v31, 0.0  ;;  %v1934_v5 = vmul.f32 %v11710_v14, %v1869_v36 }
 0x2a0   :  { %v1665_v6 = vpop.permute.xlu1 %1664  ;;  %v1870_v8 = vld [vmem:[#allocation2 + $0x158] sm:$0xff] }
 0x2a1   :  { %1810 = vst.msk [vmem:[#allocation2 + $0x178] sm:$0xff] %vm1762_vm1, %v1665_v6  ;;  %9999 = vmatmul.mubr.bf16.gmra.mrb[116].mxu0 %v2120_v46  ;;  %v2062_v10 = vmax.f32 %v1998_v3, 0.0  ;;  %v1935_v11 = vmul.f32 %v11710_v14, %v1870_v8  ;;  %v1999_v12 = vadd.f32 %v11722_v25, %v1934_v5 }
 0x2a2   :  { %v1667_v13 = vpop.permute.xlu0 %1666  ;;  %v1871_v15 = vld [vmem:[#allocation2 + $0x160] sm:$0xff] }
 0x2a3   :  { %1811 = vst.msk [vmem:[#allocation2 + $0x180] sm:$0xff] %vm1762_vm1, %v1667_v13  ;;  %v2121_v16 = vpack.c.bf16 %v2062_v10, %v2061_v4  ;;  %v2000_v18 = vadd.f32 %v11722_v25, %v1935_v11  ;;  %v2063_v19 = vmax.f32 %v1999_v12, 0.0  ;;  %v1936_v20 = vmul.f32 %v11710_v14, %v1871_v15 }
 0x2a4   :  { %v1669_v21 = vpop.permute.xlu1 %1668  ;;  %v1872_v22 = vld [vmem:[#allocation2 + $0x168] sm:$0xff] }
 0x2a5   :  { %1812 = vst.msk [vmem:[#allocation2 + $0x188] sm:$0xff] %vm1762_vm1, %v1669_v21  ;;  %10002 = vmatprep.mubr.bf16.mxu0 %v2121_v16  ;;  %v2064_v23 = vmax.f32 %v2000_v18, 0.0  ;;  %v1937_v24 = vmul.f32 %v11710_v14, %v1872_v22  ;;  %v2001_v26 = vadd.f32 %v11722_v25, %v1936_v20 }
 0x2a6   :  { %v1671_v27 = vpop.permute.xlu0 %1670  ;;  %v1873_v61 = vld [vmem:[#allocation2 + $0x170] sm:$0xff] }
 0x2a7   :  { %1813 = vst.msk [vmem:[#allocation2 + $0x190] sm:$0xff] %vm1762_vm1, %v1671_v27  ;;  %v2122_v28 = vpack.c.bf16 %v2064_v23, %v2063_v19  ;;  %v2002_v29 = vadd.f32 %v11722_v25, %v1937_v24  ;;  %v2065_v30 = vmax.f32 %v2001_v26, 0.0  ;;  %v1938_v32 = vmul.f32 %v11710_v14, %v1873_v61 }
 0x2a8   :  { %v1673_v1 = vpop.permute.xlu1 %1672  ;;  %v1874_v33 = vld [vmem:[#allocation2 + $0x178] sm:$0xff] }
 0x2a9   :  { %1814 = vst.msk [vmem:[#allocation2 + $0x198] sm:$0xff] %vm1762_vm1, %v1673_v1  ;;  %10003 = vmatmul.mubr.bf16.gmra.mrb[120].mxu0 %v2122_v28  ;;  %v2066_v34 = vmax.f32 %v2002_v29, 0.0  ;;  %v1939_v9 = vmul.f32 %v11710_v14, %v1874_v33  ;;  %v2003_v35 = vadd.f32 %v11722_v25, %v1938_v32 }
 0x2aa   :  { %v1675_v37 = vpop.permute.xlu0 %1674  ;;  %v1875_v38 = vld [vmem:[#allocation2 + $0x180] sm:$0xff] }
 0x2ab   :  { %1815 = vst.msk [vmem:[#allocation2 + $0x1a0] sm:$0xff] %vm1762_vm1, %v1675_v37  ;;  %v2123_v39 = vpack.c.bf16 %v2066_v34, %v2065_v30  ;;  %v2004_v40 = vadd.f32 %v11722_v25, %v1939_v9  ;;  %v2067_v17 = vmax.f32 %v2003_v35, 0.0  ;;  %v1940_v41 = vmul.f32 %v11710_v14, %v1875_v38 }
 0x2ac   :  { %v1677_v42 = vpop.permute.xlu1 %1676  ;;  %v1876_v43 = vld [vmem:[#allocation2 + $0x188] sm:$0xff] }
 0x2ad   :  { %1816 = vst.msk [vmem:[#allocation2 + $0x1a8] sm:$0xff] %vm1762_vm1, %v1677_v42  ;;  %10006 = vmatprep.mubr.bf16.mxu0 %v2123_v39  ;;  %v2068_v45 = vmax.f32 %v2004_v40, 0.0  ;;  %v1941_v47 = vmul.f32 %v11710_v14, %v1876_v43  ;;  %v2005_v48 = vadd.f32 %v11722_v25, %v1940_v41 }
 0x2ae   :  { %v1679_v49 = vpop.permute.xlu0 %1678  ;;  %v1877_v50 = vld [vmem:[#allocation2 + $0x190] sm:$0xff] }
 0x2af   :  { %1817 = vst.msk [vmem:[#allocation2 + $0x1b0] sm:$0xff] %vm1762_vm1, %v1679_v49  ;;  %v2124_v51 = vpack.c.bf16 %v2068_v45, %v2067_v17  ;;  %v2006_v52 = vadd.f32 %v11722_v25, %v1941_v47  ;;  %v2069_v53 = vmax.f32 %v2005_v48, 0.0  ;;  %v1942_v54 = vmul.f32 %v11710_v14, %v1877_v50 }
 0x2b0   :  { %v1681_v55 = vpop.permute.xlu1 %1680  ;;  %v1878_v56 = vld [vmem:[#allocation2 + $0x198] sm:$0xff] }
 0x2b1   :  { %1818 = vst.msk [vmem:[#allocation2 + $0x1b8] sm:$0xff] %vm1762_vm1, %v1681_v55  ;;  %10007 = vmatmul.mubr.bf16.gmra.mrb[124].mxu0 %v2124_v51  ;;  %v2070_v57 = vmax.f32 %v2006_v52, 0.0  ;;  %v1943_v58 = vmul.f32 %v11710_v14, %v1878_v56  ;;  %v2007_v59 = vadd.f32 %v11722_v25, %v1942_v54 }
 0x2b2   :  { %v1683_v60 = vpop.permute.xlu0 %1682  ;;  %v1879_v62 = vld [vmem:[#allocation2 + $0x1a0] sm:$0xff] }
 0x2b3   :  { %1819 = vst.msk [vmem:[#allocation2 + $0x1c0] sm:$0xff] %vm1762_vm1, %v1683_v60  ;;  %v2125_v63 = vpack.c.bf16 %v2070_v57, %v2069_v53  ;;  %v2008_v0 = vadd.f32 %v11722_v25, %v1943_v58  ;;  %v2071_v44 = vmax.f32 %v2007_v59, 0.0  ;;  %v1944_v31 = vmul.f32 %v11710_v14, %v1879_v62 }
 0x2b4   :  { %v1685_v2 = vpop.permute.xlu1 %1684  ;;  %v1880_v36 = vld [vmem:[#allocation2 + $0x1a8] sm:$0xff] }
 0x2b5   :  { %1820 = vst.msk [vmem:[#allocation2 + $0x1c8] sm:$0xff] %vm1762_vm1, %v1685_v2  ;;  %10010 = vmatprep.mubr.bf16.mxu0 %v2125_v63  ;;  %v2072_v46 = vmax.f32 %v2008_v0, 0.0  ;;  %v1945_v3 = vmul.f32 %v11710_v14, %v1880_v36  ;;  %v2009_v4 = vadd.f32 %v11722_v25, %v1944_v31 }
 0x2b6   :  { %v1687_v5 = vpop.permute.xlu0 %1686  ;;  %v1881_v6 = vld [vmem:[#allocation2 + $0x1b0] sm:$0xff] }
 0x2b7   :  { %1821 = vst.msk [vmem:[#allocation2 + $0x1d0] sm:$0xff] %vm1762_vm1, %v1687_v5  ;;  %v2126_v8 = vpack.c.bf16 %v2072_v46, %v2071_v44  ;;  %v2010_v10 = vadd.f32 %v11722_v25, %v1945_v3  ;;  %v2073_v11 = vmax.f32 %v2009_v4, 0.0  ;;  %v1946_v12 = vmul.f32 %v11710_v14, %v1881_v6 }
 0x2b8   :  { %v1689_v13 = vpop.permute.xlu1 %1688  ;;  %v1882_v15 = vld [vmem:[#allocation2 + $0x1b8] sm:$0xff] }
 0x2b9   :  { %1822 = vst.msk [vmem:[#allocation2 + $0x1d8] sm:$0xff] %vm1762_vm1, %v1689_v13  ;;  %10011 = vmatmul.mubr.bf16.gmra.mrb[128].mxu0 %v2126_v8  ;;  %v2074_v16 = vmax.f32 %v2010_v10, 0.0  ;;  %v1947_v18 = vmul.f32 %v11710_v14, %v1882_v15  ;;  %v2011_v19 = vadd.f32 %v11722_v25, %v1946_v12  ;;  %v10551_v15 = vld [vmem:[%s13789_s4 + $0x40] sm:$0xff]  }
 0x2ba   :  { %v1691_v20 = vpop.permute.xlu0 %1690  ;;  %v1883_v21 = vld [vmem:[#allocation2 + $0x1c0] sm:$0xff] }
 0x2bb   :  { %1823 = vst.msk [vmem:[#allocation2 + $0x1e0] sm:$0xff] %vm1762_vm1, %v1691_v20  ;;  %v2127_v22 = vpack.c.bf16 %v2074_v16, %v2073_v11  ;;  %v2012_v23 = vadd.f32 %v11722_v25, %v1947_v18  ;;  %v2075_v24 = vmax.f32 %v2011_v19, 0.0  ;;  %v1948_v26 = vmul.f32 %v11710_v14, %v1883_v21  ;;  %v10552_v16 = vld [vmem:[%s13789_s4 + $0x48] sm:$0xff]  }
 0x2bc   :  { %v1693_v27 = vpop.permute.xlu1 %1692  ;;  %v1884_v61 = vld [vmem:[#allocation2 + $0x1c8] sm:$0xff] }
 0x2bd   :  { %1824 = vst.msk [vmem:[#allocation2 + $0x1e8] sm:$0xff] %vm1762_vm1, %v1693_v27  ;;  %10014 = vmatprep.mubr.bf16.mxu0 %v2127_v22  ;;  %v2076_v28 = vmax.f32 %v2012_v23, 0.0  ;;  %v1949_v29 = vmul.f32 %v11710_v14, %v1884_v61  ;;  %v2013_v30 = vadd.f32 %v11722_v25, %v1948_v26 }
 0x2be   :  { %v1695_v32 = vpop.permute.xlu0 %1694  ;;  %v1885_v1 = vld [vmem:[#allocation2 + $0x1d0] sm:$0xff] }
 0x2bf   :  { %1825 = vst.msk [vmem:[#allocation2 + $0x1f0] sm:$0xff] %vm1762_vm1, %v1695_v32  ;;  %v2128_v33 = vpack.c.bf16 %v2076_v28, %v2075_v24  ;;  %v2014_v34 = vadd.f32 %v11722_v25, %v1949_v29  ;;  %v2077_v9 = vmax.f32 %v2013_v30, 0.0  ;;  %v1950_v35 = vmul.f32 %v11710_v14, %v1885_v1 }
 0x2c0   :  { %v1697_v37 = vpop.permute.xlu1 %1696  ;;  %v1886_v38 = vld [vmem:[#allocation2 + $0x1d8] sm:$0xff] }
 0x2c1   :  { %1826 = vst.msk [vmem:[#allocation2 + $0x1f8] sm:$0xff] %vm1762_vm1, %v1697_v37  ;;  %10015 = vmatmul.mubr.bf16.gmra.mrb[132].mxu0 %v2128_v33  ;;  %v2078_v39 = vmax.f32 %v2014_v34, 0.0  ;;  %v1951_v40 = vmul.f32 %v11710_v14, %v1886_v38  ;;  %v2015_v17 = vadd.f32 %v11722_v25, %v1950_v35 }
 0x2c2   :  { %v1887_v41 = vld [vmem:[#allocation2 + $0x1e0] sm:$0xff]  ;;  %v3154_v2 = vpop.permute.xlu0 %3153 }
 0x2c3   :  { %v2129_v42 = vpack.c.bf16 %v2078_v39, %v2077_v9  ;;  %v2016_v43 = vadd.f32 %v11722_v25, %v1951_v40  ;;  %v2079_v45 = vmax.f32 %v2015_v17, 0.0  ;;  %v1952_v47 = vmul.f32 %v11710_v14, %v1887_v41  ;;  %10026 = vmatprep.subr.bf16.mxu1 %v3154_v2 }
 0x2c4   :  { %v1888_v48 = vld [vmem:[#allocation2 + $0x1e8] sm:$0xff]  ;;  %10027 = vmatpush3.bf16.msra.mxu1 %v3154_v2  ;;  %v3156_v36 = vpop.permute.xlu1 %3155 }
 0x2c5   :  { %10018 = vmatprep.mubr.bf16.mxu0 %v2129_v42  ;;  %v2080_v49 = vmax.f32 %v2016_v43, 0.0  ;;  %v1953_v50 = vmul.f32 %v11710_v14, %v1888_v48  ;;  %v2017_v51 = vadd.f32 %v11722_v25, %v1952_v47  ;;  %10028 = vmatprep.subr.bf16.mxu1 %v3156_v36 }
 0x2c6   :  { %v1889_v52 = vld [vmem:[#allocation2 + $0x1f0] sm:$0xff]  ;;  %v3158_v46 = vpop.permute.xlu0 %3157 }
 0x2c7   :  { %v2130_v53 = vpack.c.bf16 %v2080_v49, %v2079_v45  ;;  %v2018_v54 = vadd.f32 %v11722_v25, %v1953_v50  ;;  %v2081_v55 = vmax.f32 %v2017_v51, 0.0  ;;  %v1954_v56 = vmul.f32 %v11710_v14, %v1889_v52 }
 0x2c8   :  { %v1890_v57 = vld [vmem:[#allocation2 + $0x1f8] sm:$0xff]  ;;  %10029 = vmatpush3.bf16.msra.mxu1 %v3156_v36 }
 0x2c9   :  { %10019 = vmatmul.mubr.bf16.gmra.mrb[136].mxu0 %v2130_v53  ;;  %v2082_v58 = vmax.f32 %v2018_v54, 0.0  ;;  %v1955_v59 = vmul.f32 %v11710_v14, %v1890_v57  ;;  %v2019_v60 = vadd.f32 %v11722_v25, %v1954_v56  ;;  %10030 = vmatprep.subr.bf16.mxu1 %v3158_v46  ;;  %v3160_v14 = vpop.permute.xlu1 %3159 }
 0x2ca   :  { %v3162_v3 = vpop.permute.xlu0 %3161 }
 0x2cb   :  { %v2131_v62 = vpack.c.bf16 %v2082_v58, %v2081_v55  ;;  %v2020_v63 = vadd.f32 %v11722_v25, %v1955_v59  ;;  %v2083_v0 = vmax.f32 %v2019_v60, 0.0 }
 0x2cc   :  { %10031 = vmatpush3.bf16.msra.mxu1 %v3158_v46 }
 0x2cd   :  { %10022 = vmatprep.mubr.bf16.mxu0 %v2131_v62  ;;  %v2084_v44 = vmax.f32 %v2020_v63, 0.0  ;;  %10032 = vmatprep.subr.bf16.mxu1 %v3160_v14  ;;  %v3164_v25 = vpop.permute.xlu1 %3163 }
 0x2cf   :  { %v2132_v31 = vpack.c.bf16 %v2084_v44, %v2083_v0 }
 0x2d0   :  { %10033 = vmatpush3.bf16.msra.mxu1 %v3160_v14 }
 0x2d1   :  { %10023 = vmatmul.mubr.bf16.gmra.mrb[140].mxu0 %v2132_v31  ;;  %10034 = vmatprep.subr.bf16.mxu1 %v3162_v3 }
 0x2d4   :  { %10035 = vmatpush3.bf16.msra.mxu1 %v3162_v3 }
 0x2d5   :  { %10036 = vmatprep.subr.bf16.mxu1 %v3164_v25 }
 0x2d8   :  { %10037 = vmatpush3.bf16.msra.mxu1 %v3164_v25 }
 0x32a   :  { %v9964_v4 = vpop.f32.mrb[80].mxu0 }
 0x32b   :  { %v2231_v5 = vpop.f32.mrb[81].mxu0  ;;  %2554 = vrot.lane.b32.xlu0 %v9964_v4, %s10847_s0 }
 0x32c   :  { %v9965_v6 = vpop.f32.mrb[82].mxu0 }
 0x32d   :  { %v2234_v8 = vpop.f32.mrb[83].mxu0  ;;  %2556 = vrot.lane.b32.xlu1 %v9965_v6, %s10847_s0 }
 0x32f   :  { %2550 = vrot.lane.b32.xlu0 %v2231_v5, %s10847_s0 }
 0x331   :  { %2552 = vrot.lane.b32.xlu1 %v2234_v8, %s10847_s0 }
 0x332   :  { %v9968_v10 = vpop.f32.mrb[84].mxu0 }
 0x333   :  { %v2247_v11 = vpop.f32.mrb[85].mxu0  ;;  %2562 = vrot.lane.b32.xlu0 %v9968_v10, %s10847_s0 }
 0x334   :  { %v9969_v12 = vpop.f32.mrb[86].mxu0 }
 0x335   :  { %v2250_v13 = vpop.f32.mrb[87].mxu0  ;;  %2564 = vrot.lane.b32.xlu1 %v9969_v12, %s10847_s0 }
 0x337   :  { %2558 = vrot.lane.b32.xlu0 %v2247_v11, %s10847_s0 }
 0x339   :  { %2560 = vrot.lane.b32.xlu1 %v2250_v13, %s10847_s0 }
 0x33b   :  { %3165 = vrot.lane.b32.xlu0 %v10551_v15, %s10846_s29  ;;  %v12008_v15 = vld [vmem:[%s13791_s3 + $0x6] ss:$0 sm:$0xff] }
 0x33c   :  { %v9972_v18 = vpop.f32.mrb[88].mxu0 }
 0x33d   :  { %v2263_v19 = vpop.f32.mrb[89].mxu0  ;;  %3167 = vrot.lane.b32.xlu1 %v10552_v16, %s10846_s29 }
 0x33e   :  { %v9973_v20 = vpop.f32.mrb[90].mxu0 }
 0x33f   :  { %v2266_v21 = vpop.f32.mrb[91].mxu0  ;;  %2566 = vrot.lane.b32.xlu0 %v2263_v19, %s10847_s0 }
 0x341   :  { %2568 = vrot.lane.b32.xlu1 %v2266_v21, %s10847_s0 }
 0x343   :  { %2570 = vrot.lane.b32.xlu0 %v9972_v18, %s10847_s0 }
 0x344   :  { %v9976_v22 = vpop.f32.mrb[92].mxu0 }
 0x345   :  { %v2279_v23 = vpop.f32.mrb[93].mxu0  ;;  %2572 = vrot.lane.b32.xlu1 %v9973_v20, %s10847_s0 }
 0x346   :  { %v9977_v24 = vpop.f32.mrb[94].mxu0 }
 0x347   :  { %v2282_v26 = vpop.f32.mrb[95].mxu0  ;;  %2574 = vrot.lane.b32.xlu0 %v2279_v23, %s10847_s0 }
 0x349   :  { %2576 = vrot.lane.b32.xlu1 %v2282_v26, %s10847_s0 }
 0x34b   :  { %2578 = vrot.lane.b32.xlu0 %v9976_v22, %s10847_s0 }
 0x34c   :  { %v9980_v27 = vpop.f32.mrb[96].mxu0 }
 0x34d   :  { %v2295_v61 = vpop.f32.mrb[97].mxu0  ;;  %2580 = vrot.lane.b32.xlu1 %v9977_v24, %s10847_s0 }
 0x34e   :  { %v9981_v28 = vpop.f32.mrb[98].mxu0 }
 0x34f   :  { %v2298_v29 = vpop.f32.mrb[99].mxu0  ;;  %2582 = vrot.lane.b32.xlu0 %v2295_v61, %s10847_s0  ;;  %v12020_v61 = vld [vmem:[%s13791_s3 + $0x7] ss:$0 sm:$0xff] }
 0x351   :  { %2584 = vrot.lane.b32.xlu1 %v2298_v29, %s10847_s0 }
 0x353   :  { %2586 = vrot.lane.b32.xlu0 %v9980_v27, %s10847_s0 }
 0x354   :  { %v9984_v30 = vpop.f32.mrb[100].mxu0 }
 0x355   :  { %2588 = vrot.lane.b32.xlu1 %v9981_v28, %s10847_s0  ;;  %v2311_v32 = vpop.f32.mrb[101].mxu0 }
 0x356   :  { %v9985_v1 = vpop.f32.mrb[102].mxu0 }
 0x357   :  { %v2314_v33 = vpop.f32.mrb[103].mxu0  ;;  %2590 = vrot.lane.b32.xlu0 %v2311_v32, %s10847_s0 }
 0x359   :  { %2592 = vrot.lane.b32.xlu1 %v2314_v33, %s10847_s0 }
 0x35b   :  { %2594 = vrot.lane.b32.xlu0 %v9984_v30, %s10847_s0 }
 0x35c   :  { %v9988_v34 = vpop.f32.mrb[104].mxu0 }
 0x35d   :  { %2596 = vrot.lane.b32.xlu1 %v9985_v1, %s10847_s0  ;;  %v2327_v9 = vpop.f32.mrb[105].mxu0 }
 0x35e   :  { %v9989_v35 = vpop.f32.mrb[106].mxu0 }
 0x35f   :  { %v2330_v37 = vpop.f32.mrb[107].mxu0  ;;  %2598 = vrot.lane.b32.xlu0 %v2327_v9, %s10847_s0 }
 0x361   :  { %2600 = vrot.lane.b32.xlu1 %v2330_v37, %s10847_s0 }
 0x363   :  { %2602 = vrot.lane.b32.xlu0 %v9988_v34, %s10847_s0 }
 0x364   :  { %v9992_v38 = vpop.f32.mrb[108].mxu0 }
 0x365   :  { %2604 = vrot.lane.b32.xlu1 %v9989_v35, %s10847_s0  ;;  %v2343_v39 = vpop.f32.mrb[109].mxu0 }
 0x366   :  { %v9993_v40 = vpop.f32.mrb[110].mxu0 }
 0x367   :  { %v2346_v17 = vpop.f32.mrb[111].mxu0  ;;  %2606 = vrot.lane.b32.xlu0 %v2343_v39, %s10847_s0 }
 0x369   :  { %2608 = vrot.lane.b32.xlu1 %v2346_v17, %s10847_s0 }
 0x36b   :  { %2610 = vrot.lane.b32.xlu0 %v9992_v38, %s10847_s0 }
 0x36c   :  { %v9996_v41 = vpop.f32.mrb[112].mxu0 }
 0x36d   :  { %2612 = vrot.lane.b32.xlu1 %v9993_v40, %s10847_s0  ;;  %v2359_v42 = vpop.f32.mrb[113].mxu0 }
 0x36e   :  { %v9997_v43 = vpop.f32.mrb[114].mxu0 }
 0x36f   :  { %v2362_v45 = vpop.f32.mrb[115].mxu0  ;;  %2614 = vrot.lane.b32.xlu0 %v2359_v42, %s10847_s0 }
 0x371   :  { %2616 = vrot.lane.b32.xlu1 %v2362_v45, %s10847_s0 }
 0x373   :  { %2618 = vrot.lane.b32.xlu0 %v9996_v41, %s10847_s0 }
 0x374   :  { %v10000_v47 = vpop.f32.mrb[116].mxu0 }
 0x375   :  { %2620 = vrot.lane.b32.xlu1 %v9997_v43, %s10847_s0  ;;  %v2375_v48 = vpop.f32.mrb[117].mxu0 }
 0x376   :  { %v10001_v49 = vpop.f32.mrb[118].mxu0 }
 0x377   :  { %v2378_v50 = vpop.f32.mrb[119].mxu0  ;;  %2622 = vrot.lane.b32.xlu0 %v2375_v48, %s10847_s0 }
 0x379   :  { %2624 = vrot.lane.b32.xlu1 %v2378_v50, %s10847_s0 }
 0x37b   :  { %2626 = vrot.lane.b32.xlu0 %v10000_v47, %s10847_s0 }
 0x37c   :  { %v10004_v51 = vpop.f32.mrb[120].mxu0 }
 0x37d   :  { %2628 = vrot.lane.b32.xlu1 %v10001_v49, %s10847_s0  ;;  %v2391_v52 = vpop.f32.mrb[121].mxu0 }
 0x37e   :  { %v10005_v53 = vpop.f32.mrb[122].mxu0 }
 0x37f   :  { %v2394_v54 = vpop.f32.mrb[123].mxu0  ;;  %2630 = vrot.lane.b32.xlu0 %v2391_v52, %s10847_s0 }
 0x381   :  { %2632 = vrot.lane.b32.xlu1 %v2394_v54, %s10847_s0 }
 0x383   :  { %2634 = vrot.lane.b32.xlu0 %v10004_v51, %s10847_s0 }
 0x384   :  { %v10008_v55 = vpop.f32.mrb[124].mxu0 }
 0x385   :  { %2636 = vrot.lane.b32.xlu1 %v10005_v53, %s10847_s0  ;;  %v2407_v56 = vpop.f32.mrb[125].mxu0 }
 0x386   :  { %v10009_v57 = vpop.f32.mrb[126].mxu0 }
 0x387   :  { %v2410_v58 = vpop.f32.mrb[127].mxu0  ;;  %2638 = vrot.lane.b32.xlu0 %v2407_v56, %s10847_s0 }
 0x389   :  { %2640 = vrot.lane.b32.xlu1 %v2410_v58, %s10847_s0 }
 0x38b   :  { %2642 = vrot.lane.b32.xlu0 %v10008_v55, %s10847_s0 }
 0x38c   :  { %v10012_v59 = vpop.f32.mrb[128].mxu0 }
 0x38d   :  { %2644 = vrot.lane.b32.xlu1 %v10009_v57, %s10847_s0  ;;  %v2423_v60 = vpop.f32.mrb[129].mxu0 }
 0x38e   :  { %v10013_v62 = vpop.f32.mrb[130].mxu0 }
 0x38f   :  { %v2426_v63 = vpop.f32.mrb[131].mxu0  ;;  %2646 = vrot.lane.b32.xlu0 %v2423_v60, %s10847_s0 }
 0x391   :  { %2648 = vrot.lane.b32.xlu1 %v2426_v63, %s10847_s0 }
 0x393   :  { %2650 = vrot.lane.b32.xlu0 %v10012_v59, %s10847_s0 }
 0x394   :  { %v10016_v0 = vpop.f32.mrb[132].mxu0 }
 0x395   :  { %2652 = vrot.lane.b32.xlu1 %v10013_v62, %s10847_s0  ;;  %v2439_v44 = vpop.f32.mrb[133].mxu0 }
 0x396   :  { %v10017_v31 = vpop.f32.mrb[134].mxu0 }
 0x397   :  { %v2442_v2 = vpop.f32.mrb[135].mxu0  ;;  %2654 = vrot.lane.b32.xlu0 %v2439_v44, %s10847_s0 }
 0x399   :  { %2656 = vrot.lane.b32.xlu1 %v2442_v2, %s10847_s0 }
 0x39b   :  { %2658 = vrot.lane.b32.xlu0 %v10016_v0, %s10847_s0 }
 0x39c   :  { %v10020_v36 = vpop.f32.mrb[136].mxu0 }
 0x39d   :  { %v2555_v46 = vpop.permute.xlu0 %2554  ;;  %2660 = vrot.lane.b32.xlu1 %v10017_v31, %s10847_s0  ;;  %v2455_v14 = vpop.f32.mrb[137].mxu0 }
 0x39e   :  { %2745 = vst.msk [vmem:[#allocation2 + $0x10] sm:$0xff] %vm2742_vm2, %v2555_v46  ;;  %v10021_v3 = vpop.f32.mrb[138].mxu0 }
 0x39f   :  { %v2557_v25 = vpop.permute.xlu1 %2556  ;;  %v2458_v4 = vpop.f32.mrb[139].mxu0  ;;  %2662 = vrot.lane.b32.xlu0 %v2455_v14, %s10847_s0 }
 0x3a0   :  { %2746 = vst.msk [vmem:[#allocation2 + $0x18] sm:$0xff] %vm2742_vm2, %v2557_v25 }
 0x3a1   :  { %v2551_v5 = vpop.permute.xlu0 %2550  ;;  %2664 = vrot.lane.b32.xlu1 %v2458_v4, %s10847_s0 }
 0x3a2   :  { %2743 = vst.msk [vmem:[#allocation2] sm:$0xff] %vm2742_vm2, %v2551_v5 }
 0x3a3   :  { %v2553_v6 = vpop.permute.xlu1 %2552  ;;  %2666 = vrot.lane.b32.xlu0 %v10020_v36, %s10847_s0 }
 0x3a4   :  { %2744 = vst.msk [vmem:[#allocation2 + $0x8] sm:$0xff] %vm2742_vm2, %v2553_v6  ;;  %v10024_v8 = vpop.f32.mrb[140].mxu0 }
 0x3a5   :  { %v2563_v10 = vpop.permute.xlu0 %2562  ;;  %2668 = vrot.lane.b32.xlu1 %v10021_v3, %s10847_s0  ;;  %v2471_v11 = vpop.f32.mrb[141].mxu0  ;;  %v2809_v16 = vld [vmem:[#allocation2 + $0x10] sm:$0xff] }
 0x3a6   :  { %2749 = vst.msk [vmem:[#allocation2 + $0x30] sm:$0xff] %vm2742_vm2, %v2563_v10  ;;  %v10025_v12 = vpop.f32.mrb[142].mxu0  ;;  %v2874_v24 = vmul.f32 %v12008_v15, %v2809_v16 }
 0x3a7   :  { %v2565_v13 = vpop.permute.xlu1 %2564  ;;  %v2810_v18 = vld [vmem:[#allocation2 + $0x18] sm:$0xff]  ;;  %v2474_v19 = vpop.f32.mrb[143].mxu0  ;;  %2670 = vrot.lane.b32.xlu0 %v2471_v11, %s10847_s0 }
 0x3a8   :  { %2750 = vst.msk [vmem:[#allocation2 + $0x38] sm:$0xff] %vm2742_vm2, %v2565_v13  ;;  %v2875_v20 = vmul.f32 %v12008_v15, %v2810_v18  ;;  %v2939_v33 = vadd.f32 %v12020_v61, %v2874_v24 }
 0x3a9   :  { %v2559_v21 = vpop.permute.xlu0 %2558  ;;  %v2807_v22 = vld [vmem:[#allocation2] sm:$0xff]  ;;  %2672 = vrot.lane.b32.xlu1 %v2474_v19, %s10847_s0 }
 0x3aa   :  { %2747 = vst.msk [vmem:[#allocation2 + $0x20] sm:$0xff] %vm2742_vm2, %v2559_v21  ;;  %v2872_v23 = vmul.f32 %v12008_v15, %v2807_v22  ;;  %v2940_v30 = vadd.f32 %v12020_v61, %v2875_v20  ;;  %v3003_v43 = vmax.f32 %v2939_v33, 0.0 }
 0x3ab   :  { %v2561_v26 = vpop.permute.xlu1 %2560  ;;  %v2808_v27 = vld [vmem:[#allocation2 + $0x8] sm:$0xff]  ;;  %2674 = vrot.lane.b32.xlu0 %v10024_v8, %s10847_s0 }
 0x3ac   :  { %2748 = vst.msk [vmem:[#allocation2 + $0x28] sm:$0xff] %vm2742_vm2, %v2561_v26  ;;  %v2873_v28 = vmul.f32 %v12008_v15, %v2808_v27  ;;  %v2937_v29 = vadd.f32 %v12020_v61, %v2872_v23  ;;  %v3004_v39 = vmax.f32 %v2940_v30, 0.0 }
 0x3ad   :  { %v3166_v32 = vpop.permute.xlu0 %3165  ;;  %2676 = vrot.lane.b32.xlu1 %v10025_v12, %s10847_s0  ;;  %v2813_v9 = vld [vmem:[#allocation2 + $0x30] sm:$0xff] }
 0x3ae   :  { %10038 = vmatprep.subr.bf16.mxu1 %v3166_v32  ;;  %v2938_v1 = vadd.f32 %v12020_v61, %v2873_v28  ;;  %v3001_v37 = vmax.f32 %v2937_v29, 0.0  ;;  %v2878_v47 = vmul.f32 %v12008_v15, %v2813_v9  ;;  %v3082_v50 = vpack.c.bf16 %v3004_v39, %v3003_v43 }
 0x3af   :  { %10039 = vmatpush3.bf16.msra.mxu1 %v3166_v32  ;;  %v3168_v34 = vpop.permute.xlu1 %3167  ;;  %v2814_v35 = vld [vmem:[#allocation2 + $0x38] sm:$0xff] }
 0x3b0   :  { %10040 = vmatprep.subr.bf16.mxu1 %v3168_v34  ;;  %v3002_v38 = vmax.f32 %v2938_v1, 0.0  ;;  %v2879_v40 = vmul.f32 %v12008_v15, %v2814_v35  ;;  %v2943_v56 = vadd.f32 %v12020_v61, %v2878_v47 }
 0x3b1   :  { %v2567_v17 = vpop.permute.xlu0 %2566  ;;  %v2811_v41 = vld [vmem:[#allocation2 + $0x20] sm:$0xff] }
 0x3b2   :  { %2751 = vst.msk [vmem:[#allocation2 + $0x40] sm:$0xff] %vm2742_vm2, %v2567_v17  ;;  %v3081_v42 = vpack.c.bf16 %v3002_v38, %v3001_v37  ;;  %v2876_v45 = vmul.f32 %v12008_v15, %v2811_v41  ;;  %v2944_v53 = vadd.f32 %v12020_v61, %v2879_v40  ;;  %v3007_v44 = vmax.f32 %v2943_v56, 0.0 }
 0x3b3   :  { %10041 = vmatpush3.bf16.msra.mxu1 %v3168_v34  ;;  %v2569_v48 = vpop.permute.xlu1 %2568  ;;  %v2812_v49 = vld [vmem:[#allocation2 + $0x28] sm:$0xff] }
 0x3b4   :  { %2752 = vst.msk [vmem:[#allocation2 + $0x48] sm:$0xff] %vm2742_vm2, %v2569_v48  ;;  %10042 = vmatprep.mubr.bf16.mxu1 %v3081_v42  ;;  %v2877_v51 = vmul.f32 %v12008_v15, %v2812_v49  ;;  %v2941_v52 = vadd.f32 %v12020_v61, %v2876_v45  ;;  %v3008_v60 = vmax.f32 %v2944_v53, 0.0 }
 0x3b5   :  { %v2571_v54 = vpop.permute.xlu0 %2570 }
 0x3b6   :  { %2753 = vst.msk [vmem:[#allocation2 + $0x50] sm:$0xff] %vm2742_vm2, %v2571_v54  ;;  %10043 = vmatmul.mubr.bf16.vlgmr.msra.gmra.mrb[48].mxu1 %v3082_v50  ;;  %v2942_v55 = vadd.f32 %v12020_v61, %v2877_v51  ;;  %v3005_v58 = vmax.f32 %v2941_v52, 0.0  ;;  %v3084_v46 = vpack.c.bf16 %v3008_v60, %v3007_v44 }
 0x3b7   :  { %v2573_v57 = vpop.permute.xlu1 %2572 }
 0x3b8   :  { %2754 = vst.msk [vmem:[#allocation2 + $0x58] sm:$0xff] %vm2742_vm2, %v2573_v57  ;;  %v3006_v59 = vmax.f32 %v2942_v55, 0.0 }
 0x3b9   :  { %v2575_v62 = vpop.permute.xlu0 %2574  ;;  %v2815_v63 = vld [vmem:[#allocation2 + $0x40] sm:$0xff] }
 0x3ba   :  { %2755 = vst.msk [vmem:[#allocation2 + $0x60] sm:$0xff] %vm2742_vm2, %v2575_v62  ;;  %v3083_v0 = vpack.c.bf16 %v3006_v59, %v3005_v58  ;;  %v2880_v31 = vmul.f32 %v12008_v15, %v2815_v63 }
 0x3bb   :  { %v2577_v2 = vpop.permute.xlu1 %2576  ;;  %v2816_v36 = vld [vmem:[#allocation2 + $0x48] sm:$0xff] }
 0x3bc   :  { %2756 = vst.msk [vmem:[#allocation2 + $0x68] sm:$0xff] %vm2742_vm2, %v2577_v2  ;;  %10046 = vmatprep.mubr.bf16.mxu1 %v3083_v0  ;;  %v2881_v14 = vmul.f32 %v12008_v15, %v2816_v36  ;;  %v2945_v3 = vadd.f32 %v12020_v61, %v2880_v31 }
 0x3bd   :  { %v2579_v25 = vpop.permute.xlu0 %2578  ;;  %v2817_v4 = vld [vmem:[#allocation2 + $0x50] sm:$0xff] }
 0x3be   :  { %2757 = vst.msk [vmem:[#allocation2 + $0x70] sm:$0xff] %vm2742_vm2, %v2579_v25  ;;  %10047 = vmatmul.mubr.bf16.gmra.mrb[52].mxu1 %v3084_v46  ;;  %v2946_v5 = vadd.f32 %v12020_v61, %v2881_v14  ;;  %v2882_v6 = vmul.f32 %v12008_v15, %v2817_v4  ;;  %v3009_v11 = vmax.f32 %v2945_v3, 0.0 }
 0x3bf   :  { %v2581_v8 = vpop.permute.xlu1 %2580  ;;  %v2818_v10 = vld [vmem:[#allocation2 + $0x58] sm:$0xff] }
 0x3c0   :  { %2758 = vst.msk [vmem:[#allocation2 + $0x78] sm:$0xff] %vm2742_vm2, %v2581_v8  ;;  %v3010_v12 = vmax.f32 %v2946_v5, 0.0  ;;  %v2883_v13 = vmul.f32 %v12008_v15, %v2818_v10  ;;  %v2947_v16 = vadd.f32 %v12020_v61, %v2882_v6 }
 0x3c1   :  { %v2583_v18 = vpop.permute.xlu0 %2582  ;;  %v2819_v19 = vld [vmem:[#allocation2 + $0x60] sm:$0xff] }
 0x3c2   :  { %2759 = vst.msk [vmem:[#allocation2 + $0x80] sm:$0xff] %vm2742_vm2, %v2583_v18  ;;  %v3085_v20 = vpack.c.bf16 %v3010_v12, %v3009_v11  ;;  %v2948_v21 = vadd.f32 %v12020_v61, %v2883_v13  ;;  %v2884_v22 = vmul.f32 %v12008_v15, %v2819_v19  ;;  %v3011_v26 = vmax.f32 %v2947_v16, 0.0 }
 0x3c3   :  { %v2585_v23 = vpop.permute.xlu1 %2584  ;;  %v2820_v24 = vld [vmem:[#allocation2 + $0x68] sm:$0xff] }
 0x3c4   :  { %2760 = vst.msk [vmem:[#allocation2 + $0x88] sm:$0xff] %vm2742_vm2, %v2585_v23  ;;  %10050 = vmatprep.mubr.bf16.mxu1 %v3085_v20  ;;  %v3012_v27 = vmax.f32 %v2948_v21, 0.0  ;;  %v2885_v28 = vmul.f32 %v12008_v15, %v2820_v24  ;;  %v2949_v29 = vadd.f32 %v12020_v61, %v2884_v22 }
 0x3c5   :  { %v2587_v30 = vpop.permute.xlu0 %2586  ;;  %v2821_v32 = vld [vmem:[#allocation2 + $0x70] sm:$0xff] }
 0x3c6   :  { %2761 = vst.msk [vmem:[#allocation2 + $0x90] sm:$0xff] %vm2742_vm2, %v2587_v30  ;;  %v3086_v1 = vpack.c.bf16 %v3012_v27, %v3011_v26  ;;  %v2950_v33 = vadd.f32 %v12020_v61, %v2885_v28  ;;  %v2886_v34 = vmul.f32 %v12008_v15, %v2821_v32  ;;  %v3013_v37 = vmax.f32 %v2949_v29, 0.0 }
 0x3c7   :  { %v2589_v9 = vpop.permute.xlu1 %2588  ;;  %v2822_v35 = vld [vmem:[#allocation2 + $0x78] sm:$0xff] }
 0x3c8   :  { %2762 = vst.msk [vmem:[#allocation2 + $0x98] sm:$0xff] %vm2742_vm2, %v2589_v9  ;;  %10051 = vmatmul.mubr.bf16.gmra.mrb[56].mxu1 %v3086_v1  ;;  %v3014_v38 = vmax.f32 %v2950_v33, 0.0  ;;  %v2887_v39 = vmul.f32 %v12008_v15, %v2822_v35  ;;  %v2951_v40 = vadd.f32 %v12020_v61, %v2886_v34 }
 0x3c9   :  { %v2591_v17 = vpop.permute.xlu0 %2590  ;;  %v2823_v41 = vld [vmem:[#allocation2 + $0x80] sm:$0xff] }
 0x3ca   :  { %2763 = vst.msk [vmem:[#allocation2 + $0xa0] sm:$0xff] %vm2742_vm2, %v2591_v17  ;;  %v3087_v42 = vpack.c.bf16 %v3014_v38, %v3013_v37  ;;  %v2952_v43 = vadd.f32 %v12020_v61, %v2887_v39  ;;  %v2888_v45 = vmul.f32 %v12008_v15, %v2823_v41  ;;  %v3015_v49 = vmax.f32 %v2951_v40, 0.0 }
 0x3cb   :  { %v2593_v47 = vpop.permute.xlu1 %2592  ;;  %v2824_v48 = vld [vmem:[#allocation2 + $0x88] sm:$0xff] }
 0x3cc   :  { %2764 = vst.msk [vmem:[#allocation2 + $0xa8] sm:$0xff] %vm2742_vm2, %v2593_v47  ;;  %10054 = vmatprep.mubr.bf16.mxu1 %v3087_v42  ;;  %v3016_v50 = vmax.f32 %v2952_v43, 0.0  ;;  %v2889_v51 = vmul.f32 %v12008_v15, %v2824_v48  ;;  %v2953_v52 = vadd.f32 %v12020_v61, %v2888_v45 }
 0x3cd   :  { %v2595_v53 = vpop.permute.xlu0 %2594  ;;  %v2825_v54 = vld [vmem:[#allocation2 + $0x90] sm:$0xff] }
 0x3ce   :  { %2765 = vst.msk [vmem:[#allocation2 + $0xb0] sm:$0xff] %vm2742_vm2, %v2595_v53  ;;  %v3088_v55 = vpack.c.bf16 %v3016_v50, %v3015_v49  ;;  %v2954_v56 = vadd.f32 %v12020_v61, %v2889_v51  ;;  %v2890_v57 = vmul.f32 %v12008_v15, %v2825_v54  ;;  %v3017_v60 = vmax.f32 %v2953_v52, 0.0 }
 0x3cf   :  { %v2597_v58 = vpop.permute.xlu1 %2596  ;;  %v2826_v59 = vld [vmem:[#allocation2 + $0x98] sm:$0xff] }
 0x3d0   :  { %2766 = vst.msk [vmem:[#allocation2 + $0xb8] sm:$0xff] %vm2742_vm2, %v2597_v58  ;;  %10055 = vmatmul.mubr.bf16.gmra.mrb[60].mxu1 %v3088_v55  ;;  %v3018_v62 = vmax.f32 %v2954_v56, 0.0  ;;  %v2891_v63 = vmul.f32 %v12008_v15, %v2826_v59  ;;  %v2955_v0 = vadd.f32 %v12020_v61, %v2890_v57 }
 0x3d1   :  { %v2599_v44 = vpop.permute.xlu0 %2598  ;;  %v2827_v31 = vld [vmem:[#allocation2 + $0xa0] sm:$0xff] }
 0x3d2   :  { %2767 = vst.msk [vmem:[#allocation2 + $0xc0] sm:$0xff] %vm2742_vm2, %v2599_v44  ;;  %v3089_v2 = vpack.c.bf16 %v3018_v62, %v3017_v60  ;;  %v2956_v36 = vadd.f32 %v12020_v61, %v2891_v63  ;;  %v2892_v46 = vmul.f32 %v12008_v15, %v2827_v31  ;;  %v3019_v25 = vmax.f32 %v2955_v0, 0.0 }
 0x3d3   :  { %v2601_v14 = vpop.permute.xlu1 %2600  ;;  %v2828_v3 = vld [vmem:[#allocation2 + $0xa8] sm:$0xff] }
 0x3d4   :  { %2768 = vst.msk [vmem:[#allocation2 + $0xc8] sm:$0xff] %vm2742_vm2, %v2601_v14  ;;  %10058 = vmatprep.mubr.bf16.mxu1 %v3089_v2  ;;  %v3020_v4 = vmax.f32 %v2956_v36, 0.0  ;;  %v2893_v5 = vmul.f32 %v12008_v15, %v2828_v3  ;;  %v2957_v6 = vadd.f32 %v12020_v61, %v2892_v46 }
 0x3d5   :  { %v2603_v8 = vpop.permute.xlu0 %2602  ;;  %v2829_v10 = vld [vmem:[#allocation2 + $0xb0] sm:$0xff] }
 0x3d6   :  { %2769 = vst.msk [vmem:[#allocation2 + $0xd0] sm:$0xff] %vm2742_vm2, %v2603_v8  ;;  %v3090_v11 = vpack.c.bf16 %v3020_v4, %v3019_v25  ;;  %v2958_v12 = vadd.f32 %v12020_v61, %v2893_v5  ;;  %v2894_v13 = vmul.f32 %v12008_v15, %v2829_v10  ;;  %v3021_v19 = vmax.f32 %v2957_v6, 0.0 }
 0x3d7   :  { %v2605_v16 = vpop.permute.xlu1 %2604  ;;  %v2830_v18 = vld [vmem:[#allocation2 + $0xb8] sm:$0xff] }
 0x3d8   :  { %2770 = vst.msk [vmem:[#allocation2 + $0xd8] sm:$0xff] %vm2742_vm2, %v2605_v16  ;;  %10059 = vmatmul.mubr.bf16.gmra.mrb[64].mxu1 %v3090_v11  ;;  %v3022_v20 = vmax.f32 %v2958_v12, 0.0  ;;  %v2895_v21 = vmul.f32 %v12008_v15, %v2830_v18  ;;  %v2959_v22 = vadd.f32 %v12020_v61, %v2894_v13 }
 0x3d9   :  { %v2607_v23 = vpop.permute.xlu0 %2606  ;;  %v2831_v24 = vld [vmem:[#allocation2 + $0xc0] sm:$0xff] }
 0x3da   :  { %2771 = vst.msk [vmem:[#allocation2 + $0xe0] sm:$0xff] %vm2742_vm2, %v2607_v23  ;;  %v3091_v26 = vpack.c.bf16 %v3022_v20, %v3021_v19  ;;  %v2960_v27 = vadd.f32 %v12020_v61, %v2895_v21  ;;  %v2896_v28 = vmul.f32 %v12008_v15, %v2831_v24  ;;  %v3023_v32 = vmax.f32 %v2959_v22, 0.0 }
 0x3db   :  { %v2609_v29 = vpop.permute.xlu1 %2608  ;;  %v2832_v30 = vld [vmem:[#allocation2 + $0xc8] sm:$0xff] }
 0x3dc   :  { %2772 = vst.msk [vmem:[#allocation2 + $0xe8] sm:$0xff] %vm2742_vm2, %v2609_v29  ;;  %10062 = vmatprep.mubr.bf16.mxu1 %v3091_v26  ;;  %v3024_v1 = vmax.f32 %v2960_v27, 0.0  ;;  %v2897_v33 = vmul.f32 %v12008_v15, %v2832_v30  ;;  %v2961_v34 = vadd.f32 %v12020_v61, %v2896_v28 }
 0x3dd   :  { %v2611_v9 = vpop.permute.xlu0 %2610  ;;  %v2833_v35 = vld [vmem:[#allocation2 + $0xd0] sm:$0xff] }
 0x3de   :  { %2773 = vst.msk [vmem:[#allocation2 + $0xf0] sm:$0xff] %vm2742_vm2, %v2611_v9  ;;  %v3092_v37 = vpack.c.bf16 %v3024_v1, %v3023_v32  ;;  %v2962_v38 = vadd.f32 %v12020_v61, %v2897_v33  ;;  %v2898_v39 = vmul.f32 %v12008_v15, %v2833_v35  ;;  %v3025_v41 = vmax.f32 %v2961_v34, 0.0 }
 0x3df   :  { %v2613_v40 = vpop.permute.xlu1 %2612  ;;  %v2834_v17 = vld [vmem:[#allocation2 + $0xd8] sm:$0xff] }
 0x3e0   :  { %2774 = vst.msk [vmem:[#allocation2 + $0xf8] sm:$0xff] %vm2742_vm2, %v2613_v40  ;;  %10063 = vmatmul.mubr.bf16.gmra.mrb[68].mxu1 %v3092_v37  ;;  %v3026_v42 = vmax.f32 %v2962_v38, 0.0  ;;  %v2899_v43 = vmul.f32 %v12008_v15, %v2834_v17  ;;  %v2963_v45 = vadd.f32 %v12020_v61, %v2898_v39 }
 0x3e1   :  { %v2835_v47 = vld [vmem:[#allocation2 + $0xe0] sm:$0xff]  ;;  %v2615_v48 = vpop.permute.xlu0 %2614 }
 0x3e2   :  { %v3093_v49 = vpack.c.bf16 %v3026_v42, %v3025_v41  ;;  %v2964_v50 = vadd.f32 %v12020_v61, %v2899_v43  ;;  %v2900_v51 = vmul.f32 %v12008_v15, %v2835_v47  ;;  %2775 = vst.msk [vmem:[#allocation2 + $0x100] sm:$0xff] %vm2742_vm2, %v2615_v48  ;;  %v3027_v54 = vmax.f32 %v2963_v45, 0.0 }
 0x3e3   :  { %v2836_v52 = vld [vmem:[#allocation2 + $0xe8] sm:$0xff]  ;;  %v2617_v53 = vpop.permute.xlu1 %2616 }
 0x3e4   :  { %10066 = vmatprep.mubr.bf16.mxu1 %v3093_v49  ;;  %v3028_v55 = vmax.f32 %v2964_v50, 0.0  ;;  %v2901_v56 = vmul.f32 %v12008_v15, %v2836_v52  ;;  %v2965_v57 = vadd.f32 %v12020_v61, %v2900_v51  ;;  %2776 = vst.msk [vmem:[#allocation2 + $0x108] sm:$0xff] %vm2742_vm2, %v2617_v53 }
 0x3e5   :  { %v2837_v58 = vld [vmem:[#allocation2 + $0xf0] sm:$0xff]  ;;  %v2619_v59 = vpop.permute.xlu0 %2618 }
 0x3e6   :  { %v3094_v60 = vpack.c.bf16 %v3028_v55, %v3027_v54  ;;  %v2966_v62 = vadd.f32 %v12020_v61, %v2901_v56  ;;  %v2902_v63 = vmul.f32 %v12008_v15, %v2837_v58  ;;  %2777 = vst.msk [vmem:[#allocation2 + $0x110] sm:$0xff] %vm2742_vm2, %v2619_v59  ;;  %v3029_v31 = vmax.f32 %v2965_v57, 0.0 }
 0x3e7   :  { %v2838_v0 = vld [vmem:[#allocation2 + $0xf8] sm:$0xff]  ;;  %v2621_v44 = vpop.permute.xlu1 %2620 }
 0x3e8   :  { %10067 = vmatmul.mubr.bf16.gmra.mrb[72].mxu1 %v3094_v60  ;;  %v3030_v2 = vmax.f32 %v2966_v62, 0.0  ;;  %v2903_v36 = vmul.f32 %v12008_v15, %v2838_v0  ;;  %v2967_v46 = vadd.f32 %v12020_v61, %v2902_v63  ;;  %2778 = vst.msk [vmem:[#allocation2 + $0x118] sm:$0xff] %vm2742_vm2, %v2621_v44 }
 0x3e9   :  { %v2623_v14 = vpop.permute.xlu0 %2622  ;;  %v2839_v3 = vld [vmem:[#allocation2 + $0x100] sm:$0xff] }
 0x3ea   :  { %v3095_v25 = vpack.c.bf16 %v3030_v2, %v3029_v31  ;;  %v2968_v4 = vadd.f32 %v12020_v61, %v2903_v36  ;;  %2779 = vst.msk [vmem:[#allocation2 + $0x120] sm:$0xff] %vm2742_vm2, %v2623_v14  ;;  %v2904_v5 = vmul.f32 %v12008_v15, %v2839_v3  ;;  %v3031_v10 = vmax.f32 %v2967_v46, 0.0 }
 0x3eb   :  { %v2625_v6 = vpop.permute.xlu1 %2624  ;;  %v2840_v8 = vld [vmem:[#allocation2 + $0x108] sm:$0xff] }
 0x3ec   :  { %10070 = vmatprep.mubr.bf16.mxu1 %v3095_v25  ;;  %v3032_v11 = vmax.f32 %v2968_v4, 0.0  ;;  %2780 = vst.msk [vmem:[#allocation2 + $0x128] sm:$0xff] %vm2742_vm2, %v2625_v6  ;;  %v2905_v12 = vmul.f32 %v12008_v15, %v2840_v8  ;;  %v2969_v13 = vadd.f32 %v12020_v61, %v2904_v5 }
 0x3ed   :  { %v2627_v16 = vpop.permute.xlu0 %2626  ;;  %v2841_v18 = vld [vmem:[#allocation2 + $0x110] sm:$0xff] }
 0x3ee   :  { %v3096_v19 = vpack.c.bf16 %v3032_v11, %v3031_v10  ;;  %2781 = vst.msk [vmem:[#allocation2 + $0x130] sm:$0xff] %vm2742_vm2, %v2627_v16  ;;  %v2970_v20 = vadd.f32 %v12020_v61, %v2905_v12  ;;  %v3033_v21 = vmax.f32 %v2969_v13, 0.0  ;;  %v2906_v22 = vmul.f32 %v12008_v15, %v2841_v18 }
 0x3ef   :  { %v2629_v23 = vpop.permute.xlu1 %2628  ;;  %v2842_v24 = vld [vmem:[#allocation2 + $0x118] sm:$0xff] }
 0x3f0   :  { %10071 = vmatmul.mubr.bf16.gmra.mrb[76].mxu1 %v3096_v19  ;;  %2782 = vst.msk [vmem:[#allocation2 + $0x138] sm:$0xff] %vm2742_vm2, %v2629_v23  ;;  %v3034_v26 = vmax.f32 %v2970_v20, 0.0  ;;  %v2907_v27 = vmul.f32 %v12008_v15, %v2842_v24  ;;  %v2971_v28 = vadd.f32 %v12020_v61, %v2906_v22 }
 0x3f1   :  { %v2631_v29 = vpop.permute.xlu0 %2630  ;;  %v2843_v30 = vld [vmem:[#allocation2 + $0x120] sm:$0xff] }
 0x3f2   :  { %2783 = vst.msk [vmem:[#allocation2 + $0x140] sm:$0xff] %vm2742_vm2, %v2631_v29  ;;  %v3097_v32 = vpack.c.bf16 %v3034_v26, %v3033_v21  ;;  %v2972_v1 = vadd.f32 %v12020_v61, %v2907_v27  ;;  %v3035_v33 = vmax.f32 %v2971_v28, 0.0  ;;  %v2908_v34 = vmul.f32 %v12008_v15, %v2843_v30 }
 0x3f3   :  { %v2633_v9 = vpop.permute.xlu1 %2632  ;;  %v2844_v35 = vld [vmem:[#allocation2 + $0x128] sm:$0xff] }
 0x3f4   :  { %2784 = vst.msk [vmem:[#allocation2 + $0x148] sm:$0xff] %vm2742_vm2, %v2633_v9  ;;  %10074 = vmatprep.mubr.bf16.mxu1 %v3097_v32  ;;  %v3036_v37 = vmax.f32 %v2972_v1, 0.0  ;;  %v2909_v38 = vmul.f32 %v12008_v15, %v2844_v35  ;;  %v2973_v39 = vadd.f32 %v12020_v61, %v2908_v34 }
 0x3f5   :  { %v2635_v40 = vpop.permute.xlu0 %2634  ;;  %v2845_v17 = vld [vmem:[#allocation2 + $0x130] sm:$0xff] }
 0x3f6   :  { %2785 = vst.msk [vmem:[#allocation2 + $0x150] sm:$0xff] %vm2742_vm2, %v2635_v40  ;;  %v3098_v41 = vpack.c.bf16 %v3036_v37, %v3035_v33  ;;  %v2974_v42 = vadd.f32 %v12020_v61, %v2909_v38  ;;  %v3037_v43 = vmax.f32 %v2973_v39, 0.0  ;;  %v2910_v45 = vmul.f32 %v12008_v15, %v2845_v17 }
 0x3f7   :  { %v2637_v47 = vpop.permute.xlu1 %2636  ;;  %v2846_v48 = vld [vmem:[#allocation2 + $0x138] sm:$0xff] }
 0x3f8   :  { %2786 = vst.msk [vmem:[#allocation2 + $0x158] sm:$0xff] %vm2742_vm2, %v2637_v47  ;;  %10075 = vmatmul.mubr.bf16.gmra.mrb[80].mxu1 %v3098_v41  ;;  %v3038_v49 = vmax.f32 %v2974_v42, 0.0  ;;  %v2911_v50 = vmul.f32 %v12008_v15, %v2846_v48  ;;  %v2975_v51 = vadd.f32 %v12020_v61, %v2910_v45 }
 0x3f9   :  { %v2639_v52 = vpop.permute.xlu0 %2638  ;;  %v2847_v53 = vld [vmem:[#allocation2 + $0x140] sm:$0xff] }
 0x3fa   :  { %2787 = vst.msk [vmem:[#allocation2 + $0x160] sm:$0xff] %vm2742_vm2, %v2639_v52  ;;  %v3099_v54 = vpack.c.bf16 %v3038_v49, %v3037_v43  ;;  %v2976_v55 = vadd.f32 %v12020_v61, %v2911_v50  ;;  %v3039_v56 = vmax.f32 %v2975_v51, 0.0  ;;  %v2912_v57 = vmul.f32 %v12008_v15, %v2847_v53 }
 0x3fb   :  { %v2641_v58 = vpop.permute.xlu1 %2640  ;;  %v2848_v59 = vld [vmem:[#allocation2 + $0x148] sm:$0xff] }
 0x3fc   :  { %2788 = vst.msk [vmem:[#allocation2 + $0x168] sm:$0xff] %vm2742_vm2, %v2641_v58  ;;  %10078 = vmatprep.mubr.bf16.mxu1 %v3099_v54  ;;  %v3040_v60 = vmax.f32 %v2976_v55, 0.0  ;;  %v2913_v62 = vmul.f32 %v12008_v15, %v2848_v59  ;;  %v2977_v63 = vadd.f32 %v12020_v61, %v2912_v57 }
 0x3fd   :  { %v2643_v0 = vpop.permute.xlu0 %2642  ;;  %v2849_v44 = vld [vmem:[#allocation2 + $0x150] sm:$0xff] }
 0x3fe   :  { %2789 = vst.msk [vmem:[#allocation2 + $0x170] sm:$0xff] %vm2742_vm2, %v2643_v0  ;;  %v3100_v31 = vpack.c.bf16 %v3040_v60, %v3039_v56  ;;  %v2978_v2 = vadd.f32 %v12020_v61, %v2913_v62  ;;  %v3041_v36 = vmax.f32 %v2977_v63, 0.0  ;;  %v2914_v46 = vmul.f32 %v12008_v15, %v2849_v44 }
 0x3ff   :  { %v2645_v14 = vpop.permute.xlu1 %2644  ;;  %v2850_v3 = vld [vmem:[#allocation2 + $0x158] sm:$0xff] }
 0x400   :  { %2790 = vst.msk [vmem:[#allocation2 + $0x178] sm:$0xff] %vm2742_vm2, %v2645_v14  ;;  %10079 = vmatmul.mubr.bf16.gmra.mrb[84].mxu1 %v3100_v31  ;;  %v3042_v25 = vmax.f32 %v2978_v2, 0.0  ;;  %v2915_v4 = vmul.f32 %v12008_v15, %v2850_v3  ;;  %v2979_v5 = vadd.f32 %v12020_v61, %v2914_v46 }
 0x401   :  { %v2647_v6 = vpop.permute.xlu0 %2646  ;;  %v2851_v8 = vld [vmem:[#allocation2 + $0x160] sm:$0xff] }
 0x402   :  { %2791 = vst.msk [vmem:[#allocation2 + $0x180] sm:$0xff] %vm2742_vm2, %v2647_v6  ;;  %v3101_v10 = vpack.c.bf16 %v3042_v25, %v3041_v36  ;;  %v2980_v11 = vadd.f32 %v12020_v61, %v2915_v4  ;;  %v3043_v12 = vmax.f32 %v2979_v5, 0.0  ;;  %v2916_v13 = vmul.f32 %v12008_v15, %v2851_v8 }
 0x403   :  { %v2649_v16 = vpop.permute.xlu1 %2648  ;;  %v2852_v18 = vld [vmem:[#allocation2 + $0x168] sm:$0xff] }
 0x404   :  { %2792 = vst.msk [vmem:[#allocation2 + $0x188] sm:$0xff] %vm2742_vm2, %v2649_v16  ;;  %10082 = vmatprep.mubr.bf16.mxu1 %v3101_v10  ;;  %v3044_v19 = vmax.f32 %v2980_v11, 0.0  ;;  %v2917_v20 = vmul.f32 %v12008_v15, %v2852_v18  ;;  %v2981_v21 = vadd.f32 %v12020_v61, %v2916_v13 }
 0x405   :  { %v2651_v22 = vpop.permute.xlu0 %2650  ;;  %v2853_v23 = vld [vmem:[#allocation2 + $0x170] sm:$0xff] }
 0x406   :  { %2793 = vst.msk [vmem:[#allocation2 + $0x190] sm:$0xff] %vm2742_vm2, %v2651_v22  ;;  %v3102_v24 = vpack.c.bf16 %v3044_v19, %v3043_v12  ;;  %v2982_v26 = vadd.f32 %v12020_v61, %v2917_v20  ;;  %v3045_v27 = vmax.f32 %v2981_v21, 0.0  ;;  %v2918_v28 = vmul.f32 %v12008_v15, %v2853_v23 }
 0x407   :  { %v2653_v29 = vpop.permute.xlu1 %2652  ;;  %v2854_v30 = vld [vmem:[#allocation2 + $0x178] sm:$0xff] }
 0x408   :  { %2794 = vst.msk [vmem:[#allocation2 + $0x198] sm:$0xff] %vm2742_vm2, %v2653_v29  ;;  %10083 = vmatmul.mubr.bf16.gmra.mrb[88].mxu1 %v3102_v24  ;;  %v3046_v32 = vmax.f32 %v2982_v26, 0.0  ;;  %v2919_v1 = vmul.f32 %v12008_v15, %v2854_v30  ;;  %v2983_v33 = vadd.f32 %v12020_v61, %v2918_v28 }
 0x409   :  { %v2655_v34 = vpop.permute.xlu0 %2654  ;;  %v2855_v9 = vld [vmem:[#allocation2 + $0x180] sm:$0xff] }
 0x40a   :  { %2795 = vst.msk [vmem:[#allocation2 + $0x1a0] sm:$0xff] %vm2742_vm2, %v2655_v34  ;;  %v3103_v35 = vpack.c.bf16 %v3046_v32, %v3045_v27  ;;  %v2984_v37 = vadd.f32 %v12020_v61, %v2919_v1  ;;  %v3047_v38 = vmax.f32 %v2983_v33, 0.0  ;;  %v2920_v39 = vmul.f32 %v12008_v15, %v2855_v9 }
 0x40b   :  { %v2657_v40 = vpop.permute.xlu1 %2656  ;;  %v2856_v17 = vld [vmem:[#allocation2 + $0x188] sm:$0xff] }
 0x40c   :  { %2796 = vst.msk [vmem:[#allocation2 + $0x1a8] sm:$0xff] %vm2742_vm2, %v2657_v40  ;;  %10086 = vmatprep.mubr.bf16.mxu1 %v3103_v35  ;;  %v3048_v41 = vmax.f32 %v2984_v37, 0.0  ;;  %v2921_v42 = vmul.f32 %v12008_v15, %v2856_v17  ;;  %v2985_v43 = vadd.f32 %v12020_v61, %v2920_v39 }
 0x40d   :  { %v2659_v45 = vpop.permute.xlu0 %2658  ;;  %v2857_v47 = vld [vmem:[#allocation2 + $0x190] sm:$0xff] }
 0x40e   :  { %2797 = vst.msk [vmem:[#allocation2 + $0x1b0] sm:$0xff] %vm2742_vm2, %v2659_v45  ;;  %v3104_v48 = vpack.c.bf16 %v3048_v41, %v3047_v38  ;;  %v2986_v49 = vadd.f32 %v12020_v61, %v2921_v42  ;;  %v3049_v50 = vmax.f32 %v2985_v43, 0.0  ;;  %v2922_v51 = vmul.f32 %v12008_v15, %v2857_v47 }
 0x40f   :  { %v2661_v52 = vpop.permute.xlu1 %2660  ;;  %v2858_v53 = vld [vmem:[#allocation2 + $0x198] sm:$0xff] }
 0x410   :  { %2798 = vst.msk [vmem:[#allocation2 + $0x1b8] sm:$0xff] %vm2742_vm2, %v2661_v52  ;;  %10087 = vmatmul.mubr.bf16.gmra.mrb[92].mxu1 %v3104_v48  ;;  %v3050_v54 = vmax.f32 %v2986_v49, 0.0  ;;  %v2923_v55 = vmul.f32 %v12008_v15, %v2858_v53  ;;  %v2987_v56 = vadd.f32 %v12020_v61, %v2922_v51 }
 0x411   :  { %v2663_v57 = vpop.permute.xlu0 %2662  ;;  %v2859_v58 = vld [vmem:[#allocation2 + $0x1a0] sm:$0xff] }
 0x412   :  { %2799 = vst.msk [vmem:[#allocation2 + $0x1c0] sm:$0xff] %vm2742_vm2, %v2663_v57  ;;  %v3105_v59 = vpack.c.bf16 %v3050_v54, %v3049_v50  ;;  %v2988_v60 = vadd.f32 %v12020_v61, %v2923_v55  ;;  %v3051_v62 = vmax.f32 %v2987_v56, 0.0  ;;  %v2924_v63 = vmul.f32 %v12008_v15, %v2859_v58 }
 0x413   :  { %v2665_v0 = vpop.permute.xlu1 %2664  ;;  %v2860_v44 = vld [vmem:[#allocation2 + $0x1a8] sm:$0xff] }
 0x414   :  { %2800 = vst.msk [vmem:[#allocation2 + $0x1c8] sm:$0xff] %vm2742_vm2, %v2665_v0  ;;  %10090 = vmatprep.mubr.bf16.mxu1 %v3105_v59  ;;  %v3052_v31 = vmax.f32 %v2988_v60, 0.0  ;;  %v2925_v2 = vmul.f32 %v12008_v15, %v2860_v44  ;;  %v2989_v36 = vadd.f32 %v12020_v61, %v2924_v63  ;;  %v10553_v0 = vld [vmem:[%s13789_s4 + $0x50] sm:$0xff]   ;;  %v10555_v44 = vld [vmem:[%s13789_s4 + $0x60] sm:$0xff]  }
 0x415   :  { %v2667_v46 = vpop.permute.xlu0 %2666  ;;  %v2861_v14 = vld [vmem:[#allocation2 + $0x1b0] sm:$0xff]  ;;  %10106 = vmatprep.subr.bf16.mxu0 %v10553_v0 }
 0x416   :  { %2801 = vst.msk [vmem:[#allocation2 + $0x1d0] sm:$0xff] %vm2742_vm2, %v2667_v46  ;;  %v3106_v3 = vpack.c.bf16 %v3052_v31, %v3051_v62  ;;  %v2990_v25 = vadd.f32 %v12020_v61, %v2925_v2  ;;  %v3053_v4 = vmax.f32 %v2989_v36, 0.0  ;;  %v2926_v5 = vmul.f32 %v12008_v15, %v2861_v14  ;;  %10107 = vmatpush3.bf16.msra.mxu0 %v10553_v0  ;;  %v10557_v31 = vld [vmem:[%s13789_s4 + $0x70] sm:$0xff]   ;;  %v10558_v2 = vld [vmem:[%s13789_s4 + $0x78] sm:$0xff]   ;;  %v10559_v14 = vld [vmem:[%s13789_s4 + $0x80] sm:$0xff]  }
 0x417   :  { %v2669_v6 = vpop.permute.xlu1 %2668  ;;  %v2862_v8 = vld [vmem:[#allocation2 + $0x1b8] sm:$0xff] }
 0x418   :  { %2802 = vst.msk [vmem:[#allocation2 + $0x1d8] sm:$0xff] %vm2742_vm2, %v2669_v6  ;;  %10091 = vmatmul.mubr.bf16.gmra.mrb[96].mxu1 %v3106_v3  ;;  %v3054_v10 = vmax.f32 %v2990_v25, 0.0  ;;  %v2927_v11 = vmul.f32 %v12008_v15, %v2862_v8  ;;  %v2991_v12 = vadd.f32 %v12020_v61, %v2926_v5 }
 0x419   :  { %v2671_v13 = vpop.permute.xlu0 %2670  ;;  %v2863_v16 = vld [vmem:[#allocation2 + $0x1c0] sm:$0xff] }
 0x41a   :  { %2803 = vst.msk [vmem:[#allocation2 + $0x1e0] sm:$0xff] %vm2742_vm2, %v2671_v13  ;;  %v3107_v18 = vpack.c.bf16 %v3054_v10, %v3053_v4  ;;  %v2992_v19 = vadd.f32 %v12020_v61, %v2927_v11  ;;  %v3055_v20 = vmax.f32 %v2991_v12, 0.0  ;;  %v2928_v21 = vmul.f32 %v12008_v15, %v2863_v16  ;;  %v10560_v4 = vld [vmem:[%s13789_s4 + $0x88] sm:$0xff]  }
 0x41b   :  { %v2673_v22 = vpop.permute.xlu1 %2672  ;;  %v2864_v23 = vld [vmem:[#allocation2 + $0x1c8] sm:$0xff] }
 0x41c   :  { %2804 = vst.msk [vmem:[#allocation2 + $0x1e8] sm:$0xff] %vm2742_vm2, %v2673_v22  ;;  %10094 = vmatprep.mubr.bf16.mxu1 %v3107_v18  ;;  %v3056_v24 = vmax.f32 %v2992_v19, 0.0  ;;  %v2929_v26 = vmul.f32 %v12008_v15, %v2864_v23  ;;  %v2993_v27 = vadd.f32 %v12020_v61, %v2928_v21 }
 0x41d   :  { %v2675_v28 = vpop.permute.xlu0 %2674  ;;  %v2865_v29 = vld [vmem:[#allocation2 + $0x1d0] sm:$0xff] }
 0x41e   :  { %2805 = vst.msk [vmem:[#allocation2 + $0x1f0] sm:$0xff] %vm2742_vm2, %v2675_v28  ;;  %v3108_v30 = vpack.c.bf16 %v3056_v24, %v3055_v20  ;;  %v2994_v32 = vadd.f32 %v12020_v61, %v2929_v26  ;;  %v3057_v1 = vmax.f32 %v2993_v27, 0.0  ;;  %v2930_v33 = vmul.f32 %v12008_v15, %v2865_v29 }
 0x41f   :  { %v2677_v34 = vpop.permute.xlu1 %2676  ;;  %v2866_v9 = vld [vmem:[#allocation2 + $0x1d8] sm:$0xff] }
 0x420   :  { %2806 = vst.msk [vmem:[#allocation2 + $0x1f8] sm:$0xff] %vm2742_vm2, %v2677_v34  ;;  %10095 = vmatmul.mubr.bf16.gmra.mrb[100].mxu1 %v3108_v30  ;;  %v3058_v35 = vmax.f32 %v2994_v32, 0.0  ;;  %v2931_v37 = vmul.f32 %v12008_v15, %v2866_v9  ;;  %v2995_v38 = vadd.f32 %v12020_v61, %v2930_v33 }
 0x421   :  { %v2867_v39 = vld [vmem:[#allocation2 + $0x1e0] sm:$0xff] }
 0x422   :  { %v3109_v40 = vpack.c.bf16 %v3058_v35, %v3057_v1  ;;  %v2996_v17 = vadd.f32 %v12020_v61, %v2931_v37  ;;  %v3059_v41 = vmax.f32 %v2995_v38, 0.0  ;;  %v2932_v42 = vmul.f32 %v12008_v15, %v2867_v39 }
 0x423   :  { %v2868_v43 = vld [vmem:[#allocation2 + $0x1e8] sm:$0xff] }
 0x424   :  { %10098 = vmatprep.mubr.bf16.mxu1 %v3109_v40  ;;  %v3060_v45 = vmax.f32 %v2996_v17, 0.0  ;;  %v2933_v47 = vmul.f32 %v12008_v15, %v2868_v43  ;;  %v2997_v48 = vadd.f32 %v12020_v61, %v2932_v42 }
 0x425   :  { %v2869_v49 = vld [vmem:[#allocation2 + $0x1f0] sm:$0xff] }
 0x426   :  { %v3110_v50 = vpack.c.bf16 %v3060_v45, %v3059_v41  ;;  %v2998_v51 = vadd.f32 %v12020_v61, %v2933_v47  ;;  %v3061_v52 = vmax.f32 %v2997_v48, 0.0  ;;  %v2934_v53 = vmul.f32 %v12008_v15, %v2869_v49 }
 0x427   :  { %v2870_v54 = vld [vmem:[#allocation2 + $0x1f8] sm:$0xff] }
 0x428   :  { %10099 = vmatmul.mubr.bf16.gmra.mrb[104].mxu1 %v3110_v50  ;;  %v3062_v55 = vmax.f32 %v2998_v51, 0.0  ;;  %v2935_v56 = vmul.f32 %v12008_v15, %v2870_v54  ;;  %v2999_v57 = vadd.f32 %v12020_v61, %v2934_v53  ;;  %v10554_v15 = vld [vmem:[%s13789_s4 + $0x58] sm:$0xff]  }
 0x429   :  { %10108 = vmatprep.subr.bf16.mxu0 %v10554_v15 }
 0x42a   :  { %v3111_v58 = vpack.c.bf16 %v3062_v55, %v3061_v52  ;;  %v3000_v59 = vadd.f32 %v12020_v61, %v2935_v56  ;;  %v3063_v60 = vmax.f32 %v2999_v57, 0.0  ;;  %10109 = vmatpush3.bf16.msra.mxu0 %v10554_v15  ;;  %v10556_v61 = vld [vmem:[%s13789_s4 + $0x68] sm:$0xff]  }
 0x42b   :  { %10110 = vmatprep.subr.bf16.mxu0 %v10555_v44 }
 0x42c   :  { %10102 = vmatprep.mubr.bf16.mxu1 %v3111_v58  ;;  %v3064_v62 = vmax.f32 %v3000_v59, 0.0 }
 0x42e   :  { %v3112_v63 = vpack.c.bf16 %v3064_v62, %v3063_v60  ;;  %10111 = vmatpush3.bf16.msra.mxu0 %v10555_v44 }
 0x42f   :  { %10112 = vmatprep.subr.bf16.mxu0 %v10556_v61 }
 0x430   :  { %10103 = vmatmul.mubr.bf16.gmra.mrb[108].mxu1 %v3112_v63 }
 0x432   :  { %10113 = vmatpush3.bf16.msra.mxu0 %v10556_v61 }
 0x433   :  { %10114 = vmatprep.subr.bf16.mxu0 %v10557_v31 }
 0x436   :  { %10115 = vmatpush3.bf16.msra.mxu0 %v10557_v31 }
 0x437   :  { %10116 = vmatprep.subr.bf16.mxu0 %v10558_v2 }
 0x43a   :  { %10117 = vmatpush3.bf16.msra.mxu0 %v10558_v2 }
 0x43b   :  { %10118 = vmatprep.subr.bf16.mxu0 %v10559_v14 }
 0x43e   :  { %10119 = vmatpush3.bf16.msra.mxu0 %v10559_v14 }
 0x43f   :  { %10120 = vmatprep.subr.bf16.mxu0 %v10560_v4 }
 0x442   :  { %10121 = vmatpush3.bf16.msra.mxu0 %v10560_v4 }
 0x489   :  { %v10044_v36 = vpop.f32.mrb[48].mxu1 }
 0x48a   :  { %v3211_v46 = vpop.f32.mrb[49].mxu1 }
 0x48b   :  { %3530 = vrot.lane.b32.xlu0 %v3211_v46, %s10848_s18  ;;  %v10045_v3 = vpop.f32.mrb[50].mxu1 }
 0x48c   :  { %v3214_v25 = vpop.f32.mrb[51].mxu1 }
 0x48d   :  { %3532 = vrot.lane.b32.xlu1 %v3214_v25, %s10848_s18 }
 0x48f   :  { %3534 = vrot.lane.b32.xlu0 %v10044_v36, %s10848_s18 }
 0x491   :  { %3536 = vrot.lane.b32.xlu1 %v10045_v3, %s10848_s18  ;;  %v10048_v5 = vpop.f32.mrb[52].mxu1  ;;  %v12295_v3 = vld [vmem:[%s13791_s3 + $0x20] ss:$0 sm:$0xff] }
 0x492   :  { %v3227_v6 = vpop.f32.mrb[53].mxu1 }
 0x493   :  { %3538 = vrot.lane.b32.xlu0 %v3227_v6, %s10848_s18  ;;  %v10049_v8 = vpop.f32.mrb[54].mxu1 }
 0x494   :  { %v3230_v10 = vpop.f32.mrb[55].mxu1 }
 0x495   :  { %3540 = vrot.lane.b32.xlu1 %v3230_v10, %s10848_s18 }
 0x497   :  { %3542 = vrot.lane.b32.xlu0 %v10048_v5, %s10848_s18 }
 0x499   :  { %3544 = vrot.lane.b32.xlu1 %v10049_v8, %s10848_s18  ;;  %v12302_v8 = vld [vmem:[%s13791_s3 + $0x21] ss:$0 sm:$0xff] }
 0x49b   :  { %v10052_v11 = vpop.f32.mrb[56].mxu1 }
 0x49c   :  { %v3243_v12 = vpop.f32.mrb[57].mxu1 }
 0x49d   :  { %3546 = vrot.lane.b32.xlu0 %v3243_v12, %s10848_s18  ;;  %v10053_v13 = vpop.f32.mrb[58].mxu1 }
 0x49e   :  { %v3246_v16 = vpop.f32.mrb[59].mxu1 }
 0x49f   :  { %3548 = vrot.lane.b32.xlu1 %v3246_v16, %s10848_s18 }
 0x4a1   :  { %3550 = vrot.lane.b32.xlu0 %v10052_v11, %s10848_s18 }
 0x4a3   :  { %3552 = vrot.lane.b32.xlu1 %v10053_v13, %s10848_s18  ;;  %v10056_v18 = vpop.f32.mrb[60].mxu1 }
 0x4a4   :  { %v3259_v19 = vpop.f32.mrb[61].mxu1 }
 0x4a5   :  { %3554 = vrot.lane.b32.xlu0 %v3259_v19, %s10848_s18  ;;  %v10057_v20 = vpop.f32.mrb[62].mxu1 }
 0x4a6   :  { %v3262_v21 = vpop.f32.mrb[63].mxu1 }
 0x4a7   :  { %3556 = vrot.lane.b32.xlu1 %v3262_v21, %s10848_s18 }
 0x4a9   :  { %3558 = vrot.lane.b32.xlu0 %v10056_v18, %s10848_s18 }
 0x4ab   :  { %3560 = vrot.lane.b32.xlu1 %v10057_v20, %s10848_s18  ;;  %v10060_v22 = vpop.f32.mrb[64].mxu1 }
 0x4ac   :  { %v3275_v23 = vpop.f32.mrb[65].mxu1 }
 0x4ad   :  { %3562 = vrot.lane.b32.xlu0 %v3275_v23, %s10848_s18  ;;  %v10061_v24 = vpop.f32.mrb[66].mxu1 }
 0x4ae   :  { %v3278_v26 = vpop.f32.mrb[67].mxu1 }
 0x4af   :  { %3564 = vrot.lane.b32.xlu1 %v3278_v26, %s10848_s18 }
 0x4b1   :  { %3566 = vrot.lane.b32.xlu0 %v10060_v22, %s10848_s18 }
 0x4b3   :  { %3568 = vrot.lane.b32.xlu1 %v10061_v24, %s10848_s18  ;;  %v10064_v27 = vpop.f32.mrb[68].mxu1 }
 0x4b4   :  { %v3291_v28 = vpop.f32.mrb[69].mxu1 }
 0x4b5   :  { %v10065_v29 = vpop.f32.mrb[70].mxu1  ;;  %3570 = vrot.lane.b32.xlu0 %v3291_v28, %s10848_s18 }
 0x4b6   :  { %v3294_v30 = vpop.f32.mrb[71].mxu1 }
 0x4b7   :  { %3572 = vrot.lane.b32.xlu1 %v3294_v30, %s10848_s18 }
 0x4b9   :  { %3574 = vrot.lane.b32.xlu0 %v10064_v27, %s10848_s18 }
 0x4bb   :  { %3576 = vrot.lane.b32.xlu1 %v10065_v29, %s10848_s18  ;;  %v10068_v32 = vpop.f32.mrb[72].mxu1 }
 0x4bc   :  { %v3307_v1 = vpop.f32.mrb[73].mxu1 }
 0x4bd   :  { %v10069_v33 = vpop.f32.mrb[74].mxu1  ;;  %3578 = vrot.lane.b32.xlu0 %v3307_v1, %s10848_s18 }
 0x4be   :  { %v3310_v34 = vpop.f32.mrb[75].mxu1 }
 0x4bf   :  { %3580 = vrot.lane.b32.xlu1 %v3310_v34, %s10848_s18 }
 0x4c1   :  { %3582 = vrot.lane.b32.xlu0 %v10068_v32, %s10848_s18 }
 0x4c3   :  { %3584 = vrot.lane.b32.xlu1 %v10069_v33, %s10848_s18  ;;  %v10072_v9 = vpop.f32.mrb[76].mxu1 }
 0x4c4   :  { %v3323_v35 = vpop.f32.mrb[77].mxu1 }
 0x4c5   :  { %v10073_v37 = vpop.f32.mrb[78].mxu1  ;;  %3586 = vrot.lane.b32.xlu0 %v3323_v35, %s10848_s18 }
 0x4c6   :  { %v3326_v38 = vpop.f32.mrb[79].mxu1 }
 0x4c7   :  { %3588 = vrot.lane.b32.xlu1 %v3326_v38, %s10848_s18 }
 0x4c9   :  { %3590 = vrot.lane.b32.xlu0 %v10072_v9, %s10848_s18 }
 0x4cb   :  { %3592 = vrot.lane.b32.xlu1 %v10073_v37, %s10848_s18  ;;  %v10076_v39 = vpop.f32.mrb[80].mxu1 }
 0x4cc   :  { %v3339_v40 = vpop.f32.mrb[81].mxu1 }
 0x4cd   :  { %v10077_v17 = vpop.f32.mrb[82].mxu1  ;;  %3594 = vrot.lane.b32.xlu0 %v3339_v40, %s10848_s18 }
 0x4ce   :  { %v3342_v41 = vpop.f32.mrb[83].mxu1 }
 0x4cf   :  { %3596 = vrot.lane.b32.xlu1 %v3342_v41, %s10848_s18 }
 0x4d1   :  { %3598 = vrot.lane.b32.xlu0 %v10076_v39, %s10848_s18 }
 0x4d3   :  { %3600 = vrot.lane.b32.xlu1 %v10077_v17, %s10848_s18  ;;  %v10080_v42 = vpop.f32.mrb[84].mxu1 }
 0x4d4   :  { %v3355_v43 = vpop.f32.mrb[85].mxu1 }
 0x4d5   :  { %v10081_v45 = vpop.f32.mrb[86].mxu1  ;;  %3602 = vrot.lane.b32.xlu0 %v3355_v43, %s10848_s18 }
 0x4d6   :  { %v3358_v47 = vpop.f32.mrb[87].mxu1 }
 0x4d7   :  { %3604 = vrot.lane.b32.xlu1 %v3358_v47, %s10848_s18 }
 0x4d9   :  { %3606 = vrot.lane.b32.xlu0 %v10080_v42, %s10848_s18 }
 0x4db   :  { %3608 = vrot.lane.b32.xlu1 %v10081_v45, %s10848_s18  ;;  %v10084_v48 = vpop.f32.mrb[88].mxu1 }
 0x4dc   :  { %v3371_v49 = vpop.f32.mrb[89].mxu1 }
 0x4dd   :  { %v10085_v50 = vpop.f32.mrb[90].mxu1  ;;  %3610 = vrot.lane.b32.xlu0 %v3371_v49, %s10848_s18 }
 0x4de   :  { %v3374_v51 = vpop.f32.mrb[91].mxu1 }
 0x4df   :  { %3612 = vrot.lane.b32.xlu1 %v3374_v51, %s10848_s18 }
 0x4e1   :  { %3614 = vrot.lane.b32.xlu0 %v10084_v48, %s10848_s18 }
 0x4e3   :  { %3616 = vrot.lane.b32.xlu1 %v10085_v50, %s10848_s18  ;;  %v10088_v52 = vpop.f32.mrb[92].mxu1 }
 0x4e4   :  { %v3387_v53 = vpop.f32.mrb[93].mxu1 }
 0x4e5   :  { %v10089_v54 = vpop.f32.mrb[94].mxu1  ;;  %3618 = vrot.lane.b32.xlu0 %v3387_v53, %s10848_s18 }
 0x4e6   :  { %v3390_v55 = vpop.f32.mrb[95].mxu1 }
 0x4e7   :  { %3620 = vrot.lane.b32.xlu1 %v3390_v55, %s10848_s18 }
 0x4e9   :  { %3622 = vrot.lane.b32.xlu0 %v10088_v52, %s10848_s18 }
 0x4eb   :  { %3624 = vrot.lane.b32.xlu1 %v10089_v54, %s10848_s18  ;;  %v10092_v56 = vpop.f32.mrb[96].mxu1 }
 0x4ec   :  { %v3403_v57 = vpop.f32.mrb[97].mxu1 }
 0x4ed   :  { %v10093_v58 = vpop.f32.mrb[98].mxu1  ;;  %3626 = vrot.lane.b32.xlu0 %v3403_v57, %s10848_s18 }
 0x4ee   :  { %v3406_v59 = vpop.f32.mrb[99].mxu1 }
 0x4ef   :  { %3628 = vrot.lane.b32.xlu1 %v3406_v59, %s10848_s18 }
 0x4f1   :  { %3630 = vrot.lane.b32.xlu0 %v10092_v56, %s10848_s18 }
 0x4f3   :  { %3632 = vrot.lane.b32.xlu1 %v10093_v58, %s10848_s18  ;;  %v10096_v60 = vpop.f32.mrb[100].mxu1 }
 0x4f4   :  { %v3419_v62 = vpop.f32.mrb[101].mxu1 }
 0x4f5   :  { %v10097_v63 = vpop.f32.mrb[102].mxu1  ;;  %3634 = vrot.lane.b32.xlu0 %v3419_v62, %s10848_s18 }
 0x4f6   :  { %v3422_v0 = vpop.f32.mrb[103].mxu1 }
 0x4f7   :  { %3636 = vrot.lane.b32.xlu1 %v3422_v0, %s10848_s18 }
 0x4f9   :  { %3638 = vrot.lane.b32.xlu0 %v10096_v60, %s10848_s18 }
 0x4fb   :  { %3640 = vrot.lane.b32.xlu1 %v10097_v63, %s10848_s18  ;;  %v10100_v15 = vpop.f32.mrb[104].mxu1 }
 0x4fc   :  { %v3435_v44 = vpop.f32.mrb[105].mxu1 }
 0x4fd   :  { %v3531_v61 = vpop.permute.xlu0 %3530  ;;  %v10101_v31 = vpop.f32.mrb[106].mxu1  ;;  %3642 = vrot.lane.b32.xlu0 %v3435_v44, %s10848_s18 }
 0x4fe   :  { %3723 = vst.msk [vmem:[#allocation2] sm:$0xff] %vm3722_vm3, %v3531_v61  ;;  %v3438_v2 = vpop.f32.mrb[107].mxu1 }
 0x4ff   :  { %v3533_v36 = vpop.permute.xlu1 %3532  ;;  %3644 = vrot.lane.b32.xlu1 %v3438_v2, %s10848_s18 }
 0x500   :  { %3724 = vst.msk [vmem:[#allocation2 + $0x8] sm:$0xff] %vm3722_vm3, %v3533_v36 }
 0x501   :  { %v3535_v46 = vpop.permute.xlu0 %3534  ;;  %3646 = vrot.lane.b32.xlu0 %v10100_v15, %s10848_s18 }
 0x502   :  { %3725 = vst.msk [vmem:[#allocation2 + $0x10] sm:$0xff] %vm3722_vm3, %v3535_v46 }
 0x503   :  { %v3537_v14 = vpop.permute.xlu1 %3536  ;;  %3648 = vrot.lane.b32.xlu1 %v10101_v31, %s10848_s18  ;;  %v10104_v25 = vpop.f32.mrb[108].mxu1 }
 0x504   :  { %3726 = vst.msk [vmem:[#allocation2 + $0x18] sm:$0xff] %vm3722_vm3, %v3537_v14  ;;  %v3451_v4 = vpop.f32.mrb[109].mxu1 }
 0x505   :  { %v3539_v5 = vpop.permute.xlu0 %3538  ;;  %v3787_v6 = vld [vmem:[#allocation2] sm:$0xff]  ;;  %v10105_v10 = vpop.f32.mrb[110].mxu1  ;;  %3650 = vrot.lane.b32.xlu0 %v3451_v4, %s10848_s18 }
 0x506   :  { %3727 = vst.msk [vmem:[#allocation2 + $0x20] sm:$0xff] %vm3722_vm3, %v3539_v5  ;;  %v3852_v11 = vmul.f32 %v12295_v3, %v3787_v6  ;;  %v3454_v12 = vpop.f32.mrb[111].mxu1 }
 0x507   :  { %v3541_v13 = vpop.permute.xlu1 %3540  ;;  %v3788_v16 = vld [vmem:[#allocation2 + $0x8] sm:$0xff]  ;;  %3652 = vrot.lane.b32.xlu1 %v3454_v12, %s10848_s18 }
 0x508   :  { %3728 = vst.msk [vmem:[#allocation2 + $0x28] sm:$0xff] %vm3722_vm3, %v3541_v13  ;;  %v3853_v18 = vmul.f32 %v12295_v3, %v3788_v16  ;;  %v3917_v19 = vadd.f32 %v12302_v8, %v3852_v11 }
 0x509   :  { %v3543_v20 = vpop.permute.xlu0 %3542  ;;  %v3789_v21 = vld [vmem:[#allocation2 + $0x10] sm:$0xff]  ;;  %3654 = vrot.lane.b32.xlu0 %v10104_v25, %s10848_s18 }
 0x50a   :  { %3729 = vst.msk [vmem:[#allocation2 + $0x30] sm:$0xff] %vm3722_vm3, %v3543_v20  ;;  %v3918_v22 = vadd.f32 %v12302_v8, %v3853_v18  ;;  %v3854_v23 = vmul.f32 %v12295_v3, %v3789_v21  ;;  %v3981_v27 = vmax.f32 %v3917_v19, 0.0 }
 0x50b   :  { %v3545_v24 = vpop.permute.xlu1 %3544  ;;  %v3790_v26 = vld [vmem:[#allocation2 + $0x18] sm:$0xff]  ;;  %3656 = vrot.lane.b32.xlu1 %v10105_v10, %s10848_s18 }
 0x50c   :  { %3730 = vst.msk [vmem:[#allocation2 + $0x38] sm:$0xff] %vm3722_vm3, %v3545_v24  ;;  %v3982_v28 = vmax.f32 %v3918_v22, 0.0  ;;  %v3855_v29 = vmul.f32 %v12295_v3, %v3790_v26  ;;  %v3919_v30 = vadd.f32 %v12302_v8, %v3854_v23 }
 0x50d   :  { %v3791_v32 = vld [vmem:[#allocation2 + $0x20] sm:$0xff] }
 0x50e   :  { %v4061_v1 = vpack.c.bf16 %v3982_v28, %v3981_v27  ;;  %v3920_v33 = vadd.f32 %v12302_v8, %v3855_v29  ;;  %v3856_v34 = vmul.f32 %v12295_v3, %v3791_v32  ;;  %v3983_v37 = vmax.f32 %v3919_v30, 0.0 }
 0x50f   :  { %v3547_v9 = vpop.permute.xlu0 %3546  ;;  %v3792_v35 = vld [vmem:[#allocation2 + $0x28] sm:$0xff] }
 0x510   :  { %3731 = vst.msk [vmem:[#allocation2 + $0x40] sm:$0xff] %vm3722_vm3, %v3547_v9  ;;  %10122 = vmatprep.mubr.bf16.mxu0 %v4061_v1  ;;  %v3984_v38 = vmax.f32 %v3920_v33, 0.0  ;;  %v3857_v39 = vmul.f32 %v12295_v3, %v3792_v35  ;;  %v3921_v40 = vadd.f32 %v12302_v8, %v3856_v34 }
 0x511   :  { %v3549_v17 = vpop.permute.xlu1 %3548  ;;  %v3793_v41 = vld [vmem:[#allocation2 + $0x30] sm:$0xff] }
 0x512   :  { %3732 = vst.msk [vmem:[#allocation2 + $0x48] sm:$0xff] %vm3722_vm3, %v3549_v17  ;;  %v4062_v42 = vpack.c.bf16 %v3984_v38, %v3983_v37  ;;  %v3922_v43 = vadd.f32 %v12302_v8, %v3857_v39  ;;  %v3858_v45 = vmul.f32 %v12295_v3, %v3793_v41  ;;  %v3985_v49 = vmax.f32 %v3921_v40, 0.0 }
 0x513   :  { %v3551_v47 = vpop.permute.xlu0 %3550  ;;  %v3794_v48 = vld [vmem:[#allocation2 + $0x38] sm:$0xff] }
 0x514   :  { %3733 = vst.msk [vmem:[#allocation2 + $0x50] sm:$0xff] %vm3722_vm3, %v3551_v47  ;;  %10123 = vmatmul.mubr.bf16.vlgmr.msra.gmra.mrb[144].mxu0 %v4062_v42  ;;  %v3986_v50 = vmax.f32 %v3922_v43, 0.0  ;;  %v3859_v51 = vmul.f32 %v12295_v3, %v3794_v48  ;;  %v3923_v52 = vadd.f32 %v12302_v8, %v3858_v45 }
 0x515   :  { %v3553_v53 = vpop.permute.xlu1 %3552 }
 0x516   :  { %3734 = vst.msk [vmem:[#allocation2 + $0x58] sm:$0xff] %vm3722_vm3, %v3553_v53  ;;  %v4063_v54 = vpack.c.bf16 %v3986_v50, %v3985_v49  ;;  %v3924_v55 = vadd.f32 %v12302_v8, %v3859_v51  ;;  %v3987_v58 = vmax.f32 %v3923_v52, 0.0 }
 0x517   :  { %v3555_v56 = vpop.permute.xlu0 %3554  ;;  %v3795_v57 = vld [vmem:[#allocation2 + $0x40] sm:$0xff] }
 0x518   :  { %3735 = vst.msk [vmem:[#allocation2 + $0x60] sm:$0xff] %vm3722_vm3, %v3555_v56  ;;  %10126 = vmatprep.mubr.bf16.mxu0 %v4063_v54  ;;  %v3988_v59 = vmax.f32 %v3924_v55, 0.0  ;;  %v3860_v60 = vmul.f32 %v12295_v3, %v3795_v57 }
 0x519   :  { %v3557_v62 = vpop.permute.xlu1 %3556  ;;  %v3796_v63 = vld [vmem:[#allocation2 + $0x48] sm:$0xff] }
 0x51a   :  { %3736 = vst.msk [vmem:[#allocation2 + $0x68] sm:$0xff] %vm3722_vm3, %v3557_v62  ;;  %v4064_v0 = vpack.c.bf16 %v3988_v59, %v3987_v58  ;;  %v3861_v15 = vmul.f32 %v12295_v3, %v3796_v63  ;;  %v3925_v44 = vadd.f32 %v12302_v8, %v3860_v60 }
 0x51b   :  { %v3559_v61 = vpop.permute.xlu0 %3558  ;;  %v3797_v31 = vld [vmem:[#allocation2 + $0x50] sm:$0xff] }
 0x51c   :  { %3737 = vst.msk [vmem:[#allocation2 + $0x70] sm:$0xff] %vm3722_vm3, %v3559_v61  ;;  %10127 = vmatmul.mubr.bf16.gmra.mrb[148].mxu0 %v4064_v0  ;;  %v3926_v2 = vadd.f32 %v12302_v8, %v3861_v15  ;;  %v3862_v36 = vmul.f32 %v12295_v3, %v3797_v31  ;;  %v3989_v25 = vmax.f32 %v3925_v44, 0.0 }
 0x51d   :  { %v3561_v46 = vpop.permute.xlu1 %3560  ;;  %v3798_v14 = vld [vmem:[#allocation2 + $0x58] sm:$0xff] }
 0x51e   :  { %3738 = vst.msk [vmem:[#allocation2 + $0x78] sm:$0xff] %vm3722_vm3, %v3561_v46  ;;  %v3990_v4 = vmax.f32 %v3926_v2, 0.0  ;;  %v3863_v5 = vmul.f32 %v12295_v3, %v3798_v14  ;;  %v3927_v6 = vadd.f32 %v12302_v8, %v3862_v36 }
 0x51f   :  { %v3563_v10 = vpop.permute.xlu0 %3562  ;;  %v3799_v11 = vld [vmem:[#allocation2 + $0x60] sm:$0xff] }
 0x520   :  { %3739 = vst.msk [vmem:[#allocation2 + $0x80] sm:$0xff] %vm3722_vm3, %v3563_v10  ;;  %v4065_v12 = vpack.c.bf16 %v3990_v4, %v3989_v25  ;;  %v3928_v13 = vadd.f32 %v12302_v8, %v3863_v5  ;;  %v3864_v16 = vmul.f32 %v12295_v3, %v3799_v11  ;;  %v3991_v20 = vmax.f32 %v3927_v6, 0.0 }
 0x521   :  { %v3565_v18 = vpop.permute.xlu1 %3564  ;;  %v3800_v19 = vld [vmem:[#allocation2 + $0x68] sm:$0xff] }
 0x522   :  { %3740 = vst.msk [vmem:[#allocation2 + $0x88] sm:$0xff] %vm3722_vm3, %v3565_v18  ;;  %10130 = vmatprep.mubr.bf16.mxu0 %v4065_v12  ;;  %v3992_v21 = vmax.f32 %v3928_v13, 0.0  ;;  %v3865_v22 = vmul.f32 %v12295_v3, %v3800_v19  ;;  %v3929_v23 = vadd.f32 %v12302_v8, %v3864_v16 }
 0x523   :  { %v3567_v24 = vpop.permute.xlu0 %3566  ;;  %v3801_v26 = vld [vmem:[#allocation2 + $0x70] sm:$0xff] }
 0x524   :  { %3741 = vst.msk [vmem:[#allocation2 + $0x90] sm:$0xff] %vm3722_vm3, %v3567_v24  ;;  %v4066_v27 = vpack.c.bf16 %v3992_v21, %v3991_v20  ;;  %v3930_v28 = vadd.f32 %v12302_v8, %v3865_v22  ;;  %v3866_v29 = vmul.f32 %v12295_v3, %v3801_v26  ;;  %v3993_v1 = vmax.f32 %v3929_v23, 0.0 }
 0x525   :  { %v3569_v30 = vpop.permute.xlu1 %3568  ;;  %v3802_v32 = vld [vmem:[#allocation2 + $0x78] sm:$0xff] }
 0x526   :  { %3742 = vst.msk [vmem:[#allocation2 + $0x98] sm:$0xff] %vm3722_vm3, %v3569_v30  ;;  %10131 = vmatmul.mubr.bf16.gmra.mrb[152].mxu0 %v4066_v27  ;;  %v3994_v33 = vmax.f32 %v3930_v28, 0.0  ;;  %v3867_v34 = vmul.f32 %v12295_v3, %v3802_v32  ;;  %v3931_v9 = vadd.f32 %v12302_v8, %v3866_v29 }
 0x527   :  { %v3571_v35 = vpop.permute.xlu0 %3570  ;;  %v3803_v37 = vld [vmem:[#allocation2 + $0x80] sm:$0xff] }
 0x528   :  { %3743 = vst.msk [vmem:[#allocation2 + $0xa0] sm:$0xff] %vm3722_vm3, %v3571_v35  ;;  %v4067_v38 = vpack.c.bf16 %v3994_v33, %v3993_v1  ;;  %v3932_v39 = vadd.f32 %v12302_v8, %v3867_v34  ;;  %v3868_v40 = vmul.f32 %v12295_v3, %v3803_v37  ;;  %v3995_v42 = vmax.f32 %v3931_v9, 0.0 }
 0x529   :  { %v3573_v17 = vpop.permute.xlu1 %3572  ;;  %v3804_v41 = vld [vmem:[#allocation2 + $0x88] sm:$0xff] }
 0x52a   :  { %3744 = vst.msk [vmem:[#allocation2 + $0xa8] sm:$0xff] %vm3722_vm3, %v3573_v17  ;;  %10134 = vmatprep.mubr.bf16.mxu0 %v4067_v38  ;;  %v3996_v43 = vmax.f32 %v3932_v39, 0.0  ;;  %v3869_v45 = vmul.f32 %v12295_v3, %v3804_v41  ;;  %v3933_v47 = vadd.f32 %v12302_v8, %v3868_v40 }
 0x52b   :  { %v3575_v48 = vpop.permute.xlu0 %3574  ;;  %v3805_v49 = vld [vmem:[#allocation2 + $0x90] sm:$0xff] }
 0x52c   :  { %3745 = vst.msk [vmem:[#allocation2 + $0xb0] sm:$0xff] %vm3722_vm3, %v3575_v48  ;;  %v4068_v50 = vpack.c.bf16 %v3996_v43, %v3995_v42  ;;  %v3934_v51 = vadd.f32 %v12302_v8, %v3869_v45  ;;  %v3870_v52 = vmul.f32 %v12295_v3, %v3805_v49  ;;  %v3997_v55 = vmax.f32 %v3933_v47, 0.0 }
 0x52d   :  { %v3577_v53 = vpop.permute.xlu1 %3576  ;;  %v3806_v54 = vld [vmem:[#allocation2 + $0x98] sm:$0xff] }
 0x52e   :  { %3746 = vst.msk [vmem:[#allocation2 + $0xb8] sm:$0xff] %vm3722_vm3, %v3577_v53  ;;  %10135 = vmatmul.mubr.bf16.gmra.mrb[156].mxu0 %v4068_v50  ;;  %v3998_v56 = vmax.f32 %v3934_v51, 0.0  ;;  %v3871_v57 = vmul.f32 %v12295_v3, %v3806_v54  ;;  %v3935_v58 = vadd.f32 %v12302_v8, %v3870_v52 }
 0x52f   :  { %v3579_v59 = vpop.permute.xlu0 %3578  ;;  %v3807_v60 = vld [vmem:[#allocation2 + $0xa0] sm:$0xff] }
 0x530   :  { %3747 = vst.msk [vmem:[#allocation2 + $0xc0] sm:$0xff] %vm3722_vm3, %v3579_v59  ;;  %v4069_v62 = vpack.c.bf16 %v3998_v56, %v3997_v55  ;;  %v3936_v63 = vadd.f32 %v12302_v8, %v3871_v57  ;;  %v3872_v0 = vmul.f32 %v12295_v3, %v3807_v60  ;;  %v3999_v61 = vmax.f32 %v3935_v58, 0.0 }
 0x531   :  { %v3581_v15 = vpop.permute.xlu1 %3580  ;;  %v3808_v44 = vld [vmem:[#allocation2 + $0xa8] sm:$0xff] }
 0x532   :  { %3748 = vst.msk [vmem:[#allocation2 + $0xc8] sm:$0xff] %vm3722_vm3, %v3581_v15  ;;  %10138 = vmatprep.mubr.bf16.mxu0 %v4069_v62  ;;  %v4000_v31 = vmax.f32 %v3936_v63, 0.0  ;;  %v3873_v2 = vmul.f32 %v12295_v3, %v3808_v44  ;;  %v3937_v36 = vadd.f32 %v12302_v8, %v3872_v0 }
 0x533   :  { %v3583_v46 = vpop.permute.xlu0 %3582  ;;  %v3809_v14 = vld [vmem:[#allocation2 + $0xb0] sm:$0xff] }
 0x534   :  { %3749 = vst.msk [vmem:[#allocation2 + $0xd0] sm:$0xff] %vm3722_vm3, %v3583_v46  ;;  %v4070_v25 = vpack.c.bf16 %v4000_v31, %v3999_v61  ;;  %v3938_v4 = vadd.f32 %v12302_v8, %v3873_v2  ;;  %v3874_v5 = vmul.f32 %v12295_v3, %v3809_v14  ;;  %v4001_v11 = vmax.f32 %v3937_v36, 0.0 }
 0x535   :  { %v3585_v6 = vpop.permute.xlu1 %3584  ;;  %v3810_v10 = vld [vmem:[#allocation2 + $0xb8] sm:$0xff] }
 0x536   :  { %3750 = vst.msk [vmem:[#allocation2 + $0xd8] sm:$0xff] %vm3722_vm3, %v3585_v6  ;;  %10139 = vmatmul.mubr.bf16.gmra.mrb[160].mxu0 %v4070_v25  ;;  %v4002_v12 = vmax.f32 %v3938_v4, 0.0  ;;  %v3875_v13 = vmul.f32 %v12295_v3, %v3810_v10  ;;  %v3939_v16 = vadd.f32 %v12302_v8, %v3874_v5 }
 0x537   :  { %v3587_v18 = vpop.permute.xlu0 %3586  ;;  %v3811_v19 = vld [vmem:[#allocation2 + $0xc0] sm:$0xff] }
 0x538   :  { %3751 = vst.msk [vmem:[#allocation2 + $0xe0] sm:$0xff] %vm3722_vm3, %v3587_v18  ;;  %v4071_v20 = vpack.c.bf16 %v4002_v12, %v4001_v11  ;;  %v3940_v21 = vadd.f32 %v12302_v8, %v3875_v13  ;;  %v3876_v22 = vmul.f32 %v12295_v3, %v3811_v19  ;;  %v4003_v26 = vmax.f32 %v3939_v16, 0.0 }
 0x539   :  { %v3589_v23 = vpop.permute.xlu1 %3588  ;;  %v3812_v24 = vld [vmem:[#allocation2 + $0xc8] sm:$0xff] }
 0x53a   :  { %3752 = vst.msk [vmem:[#allocation2 + $0xe8] sm:$0xff] %vm3722_vm3, %v3589_v23  ;;  %10142 = vmatprep.mubr.bf16.mxu0 %v4071_v20  ;;  %v4004_v27 = vmax.f32 %v3940_v21, 0.0  ;;  %v3877_v28 = vmul.f32 %v12295_v3, %v3812_v24  ;;  %v3941_v29 = vadd.f32 %v12302_v8, %v3876_v22 }
 0x53b   :  { %v3591_v30 = vpop.permute.xlu0 %3590  ;;  %v3813_v32 = vld [vmem:[#allocation2 + $0xd0] sm:$0xff] }
 0x53c   :  { %3753 = vst.msk [vmem:[#allocation2 + $0xf0] sm:$0xff] %vm3722_vm3, %v3591_v30  ;;  %v4072_v1 = vpack.c.bf16 %v4004_v27, %v4003_v26  ;;  %v3942_v33 = vadd.f32 %v12302_v8, %v3877_v28  ;;  %v3878_v34 = vmul.f32 %v12295_v3, %v3813_v32  ;;  %v4005_v37 = vmax.f32 %v3941_v29, 0.0 }
 0x53d   :  { %v3593_v9 = vpop.permute.xlu1 %3592  ;;  %v3814_v35 = vld [vmem:[#allocation2 + $0xd8] sm:$0xff] }
 0x53e   :  { %3754 = vst.msk [vmem:[#allocation2 + $0xf8] sm:$0xff] %vm3722_vm3, %v3593_v9  ;;  %10143 = vmatmul.mubr.bf16.gmra.mrb[164].mxu0 %v4072_v1  ;;  %v4006_v38 = vmax.f32 %v3942_v33, 0.0  ;;  %v3879_v39 = vmul.f32 %v12295_v3, %v3814_v35  ;;  %v3943_v40 = vadd.f32 %v12302_v8, %v3878_v34 }
 0x53f   :  { %v3815_v17 = vld [vmem:[#allocation2 + $0xe0] sm:$0xff]  ;;  %v3595_v41 = vpop.permute.xlu0 %3594 }
 0x540   :  { %v4073_v42 = vpack.c.bf16 %v4006_v38, %v4005_v37  ;;  %v3944_v43 = vadd.f32 %v12302_v8, %v3879_v39  ;;  %v3880_v45 = vmul.f32 %v12295_v3, %v3815_v17  ;;  %3755 = vst.msk [vmem:[#allocation2 + $0x100] sm:$0xff] %vm3722_vm3, %v3595_v41  ;;  %v4007_v49 = vmax.f32 %v3943_v40, 0.0 }
 0x541   :  { %v3816_v47 = vld [vmem:[#allocation2 + $0xe8] sm:$0xff]  ;;  %v3597_v48 = vpop.permute.xlu1 %3596 }
 0x542   :  { %10146 = vmatprep.mubr.bf16.mxu0 %v4073_v42  ;;  %v4008_v50 = vmax.f32 %v3944_v43, 0.0  ;;  %v3881_v51 = vmul.f32 %v12295_v3, %v3816_v47  ;;  %v3945_v52 = vadd.f32 %v12302_v8, %v3880_v45  ;;  %3756 = vst.msk [vmem:[#allocation2 + $0x108] sm:$0xff] %vm3722_vm3, %v3597_v48 }
 0x543   :  { %v3817_v53 = vld [vmem:[#allocation2 + $0xf0] sm:$0xff]  ;;  %v3599_v54 = vpop.permute.xlu0 %3598 }
 0x544   :  { %v4074_v55 = vpack.c.bf16 %v4008_v50, %v4007_v49  ;;  %v3946_v56 = vadd.f32 %v12302_v8, %v3881_v51  ;;  %v3882_v57 = vmul.f32 %v12295_v3, %v3817_v53  ;;  %3757 = vst.msk [vmem:[#allocation2 + $0x110] sm:$0xff] %vm3722_vm3, %v3599_v54  ;;  %v4009_v60 = vmax.f32 %v3945_v52, 0.0 }
 0x545   :  { %v3818_v58 = vld [vmem:[#allocation2 + $0xf8] sm:$0xff]  ;;  %v3601_v59 = vpop.permute.xlu1 %3600 }
 0x546   :  { %10147 = vmatmul.mubr.bf16.gmra.mrb[168].mxu0 %v4074_v55  ;;  %v4010_v62 = vmax.f32 %v3946_v56, 0.0  ;;  %v3883_v63 = vmul.f32 %v12295_v3, %v3818_v58  ;;  %v3947_v0 = vadd.f32 %v12302_v8, %v3882_v57  ;;  %3758 = vst.msk [vmem:[#allocation2 + $0x118] sm:$0xff] %vm3722_vm3, %v3601_v59 }
 0x547   :  { %v3603_v15 = vpop.permute.xlu0 %3602  ;;  %v3819_v44 = vld [vmem:[#allocation2 + $0x100] sm:$0xff] }
 0x548   :  { %v4075_v61 = vpack.c.bf16 %v4010_v62, %v4009_v60  ;;  %v3948_v31 = vadd.f32 %v12302_v8, %v3883_v63  ;;  %3759 = vst.msk [vmem:[#allocation2 + $0x120] sm:$0xff] %vm3722_vm3, %v3603_v15  ;;  %v3884_v2 = vmul.f32 %v12295_v3, %v3819_v44  ;;  %v4011_v14 = vmax.f32 %v3947_v0, 0.0 }
 0x549   :  { %v3605_v36 = vpop.permute.xlu1 %3604  ;;  %v3820_v46 = vld [vmem:[#allocation2 + $0x108] sm:$0xff] }
 0x54a   :  { %10150 = vmatprep.mubr.bf16.mxu0 %v4075_v61  ;;  %v4012_v25 = vmax.f32 %v3948_v31, 0.0  ;;  %3760 = vst.msk [vmem:[#allocation2 + $0x128] sm:$0xff] %vm3722_vm3, %v3605_v36  ;;  %v3885_v4 = vmul.f32 %v12295_v3, %v3820_v46  ;;  %v3949_v5 = vadd.f32 %v12302_v8, %v3884_v2 }
 0x54b   :  { %v3607_v6 = vpop.permute.xlu0 %3606  ;;  %v3821_v10 = vld [vmem:[#allocation2 + $0x110] sm:$0xff] }
 0x54c   :  { %v4076_v11 = vpack.c.bf16 %v4012_v25, %v4011_v14  ;;  %3761 = vst.msk [vmem:[#allocation2 + $0x130] sm:$0xff] %vm3722_vm3, %v3607_v6  ;;  %v3950_v12 = vadd.f32 %v12302_v8, %v3885_v4  ;;  %v3886_v13 = vmul.f32 %v12295_v3, %v3821_v10  ;;  %v4013_v19 = vmax.f32 %v3949_v5, 0.0 }
 0x54d   :  { %v3609_v16 = vpop.permute.xlu1 %3608  ;;  %v3822_v18 = vld [vmem:[#allocation2 + $0x118] sm:$0xff] }
 0x54e   :  { %10151 = vmatmul.mubr.bf16.gmra.mrb[172].mxu0 %v4076_v11  ;;  %3762 = vst.msk [vmem:[#allocation2 + $0x138] sm:$0xff] %vm3722_vm3, %v3609_v16  ;;  %v4014_v20 = vmax.f32 %v3950_v12, 0.0  ;;  %v3887_v21 = vmul.f32 %v12295_v3, %v3822_v18  ;;  %v3951_v22 = vadd.f32 %v12302_v8, %v3886_v13 }
 0x54f   :  { %v3611_v23 = vpop.permute.xlu0 %3610  ;;  %v3823_v24 = vld [vmem:[#allocation2 + $0x120] sm:$0xff] }
 0x550   :  { %3763 = vst.msk [vmem:[#allocation2 + $0x140] sm:$0xff] %vm3722_vm3, %v3611_v23  ;;  %v4077_v26 = vpack.c.bf16 %v4014_v20, %v4013_v19  ;;  %v3952_v27 = vadd.f32 %v12302_v8, %v3887_v21  ;;  %v3888_v28 = vmul.f32 %v12295_v3, %v3823_v24  ;;  %v4015_v32 = vmax.f32 %v3951_v22, 0.0 }
 0x551   :  { %v3613_v29 = vpop.permute.xlu1 %3612  ;;  %v3824_v30 = vld [vmem:[#allocation2 + $0x128] sm:$0xff] }
 0x552   :  { %3764 = vst.msk [vmem:[#allocation2 + $0x148] sm:$0xff] %vm3722_vm3, %v3613_v29  ;;  %10154 = vmatprep.mubr.bf16.mxu0 %v4077_v26  ;;  %v4016_v1 = vmax.f32 %v3952_v27, 0.0  ;;  %v3889_v33 = vmul.f32 %v12295_v3, %v3824_v30  ;;  %v3953_v34 = vadd.f32 %v12302_v8, %v3888_v28 }
 0x553   :  { %v3615_v9 = vpop.permute.xlu0 %3614  ;;  %v3825_v35 = vld [vmem:[#allocation2 + $0x130] sm:$0xff] }
 0x554   :  { %3765 = vst.msk [vmem:[#allocation2 + $0x150] sm:$0xff] %vm3722_vm3, %v3615_v9  ;;  %v4078_v37 = vpack.c.bf16 %v4016_v1, %v4015_v32  ;;  %v3954_v38 = vadd.f32 %v12302_v8, %v3889_v33  ;;  %v3890_v39 = vmul.f32 %v12295_v3, %v3825_v35  ;;  %v4017_v41 = vmax.f32 %v3953_v34, 0.0 }
 0x555   :  { %v3617_v40 = vpop.permute.xlu1 %3616  ;;  %v3826_v17 = vld [vmem:[#allocation2 + $0x138] sm:$0xff] }
 0x556   :  { %3766 = vst.msk [vmem:[#allocation2 + $0x158] sm:$0xff] %vm3722_vm3, %v3617_v40  ;;  %10155 = vmatmul.mubr.bf16.gmra.mrb[176].mxu0 %v4078_v37  ;;  %v4018_v42 = vmax.f32 %v3954_v38, 0.0  ;;  %v3891_v43 = vmul.f32 %v12295_v3, %v3826_v17  ;;  %v3955_v45 = vadd.f32 %v12302_v8, %v3890_v39 }
 0x557   :  { %v3619_v47 = vpop.permute.xlu0 %3618  ;;  %v3827_v48 = vld [vmem:[#allocation2 + $0x140] sm:$0xff] }
 0x558   :  { %3767 = vst.msk [vmem:[#allocation2 + $0x160] sm:$0xff] %vm3722_vm3, %v3619_v47  ;;  %v4079_v49 = vpack.c.bf16 %v4018_v42, %v4017_v41  ;;  %v3956_v50 = vadd.f32 %v12302_v8, %v3891_v43  ;;  %v3892_v51 = vmul.f32 %v12295_v3, %v3827_v48  ;;  %v4019_v54 = vmax.f32 %v3955_v45, 0.0 }
 0x559   :  { %v3621_v52 = vpop.permute.xlu1 %3620  ;;  %v3828_v53 = vld [vmem:[#allocation2 + $0x148] sm:$0xff] }
 0x55a   :  { %3768 = vst.msk [vmem:[#allocation2 + $0x168] sm:$0xff] %vm3722_vm3, %v3621_v52  ;;  %10158 = vmatprep.mubr.bf16.mxu0 %v4079_v49  ;;  %v4020_v55 = vmax.f32 %v3956_v50, 0.0  ;;  %v3893_v56 = vmul.f32 %v12295_v3, %v3828_v53  ;;  %v3957_v57 = vadd.f32 %v12302_v8, %v3892_v51 }
 0x55b   :  { %v3623_v58 = vpop.permute.xlu0 %3622  ;;  %v3829_v59 = vld [vmem:[#allocation2 + $0x150] sm:$0xff] }
 0x55c   :  { %3769 = vst.msk [vmem:[#allocation2 + $0x170] sm:$0xff] %vm3722_vm3, %v3623_v58  ;;  %v4080_v60 = vpack.c.bf16 %v4020_v55, %v4019_v54  ;;  %v3958_v62 = vadd.f32 %v12302_v8, %v3893_v56  ;;  %v3894_v63 = vmul.f32 %v12295_v3, %v3829_v59  ;;  %v4021_v44 = vmax.f32 %v3957_v57, 0.0 }
 0x55d   :  { %v3625_v0 = vpop.permute.xlu1 %3624  ;;  %v3830_v15 = vld [vmem:[#allocation2 + $0x158] sm:$0xff] }
 0x55e   :  { %3770 = vst.msk [vmem:[#allocation2 + $0x178] sm:$0xff] %vm3722_vm3, %v3625_v0  ;;  %10159 = vmatmul.mubr.bf16.gmra.mrb[180].mxu0 %v4080_v60  ;;  %v4022_v61 = vmax.f32 %v3958_v62, 0.0  ;;  %v3895_v31 = vmul.f32 %v12295_v3, %v3830_v15  ;;  %v3959_v2 = vadd.f32 %v12302_v8, %v3894_v63 }
 0x55f   :  { %v3627_v36 = vpop.permute.xlu0 %3626  ;;  %v3831_v46 = vld [vmem:[#allocation2 + $0x160] sm:$0xff] }
 0x560   :  { %3771 = vst.msk [vmem:[#allocation2 + $0x180] sm:$0xff] %vm3722_vm3, %v3627_v36  ;;  %v4081_v14 = vpack.c.bf16 %v4022_v61, %v4021_v44  ;;  %v3960_v25 = vadd.f32 %v12302_v8, %v3895_v31  ;;  %v3896_v4 = vmul.f32 %v12295_v3, %v3831_v46  ;;  %v4023_v10 = vmax.f32 %v3959_v2, 0.0 }
 0x561   :  { %v3629_v5 = vpop.permute.xlu1 %3628  ;;  %v3832_v6 = vld [vmem:[#allocation2 + $0x168] sm:$0xff] }
 0x562   :  { %3772 = vst.msk [vmem:[#allocation2 + $0x188] sm:$0xff] %vm3722_vm3, %v3629_v5  ;;  %10162 = vmatprep.mubr.bf16.mxu0 %v4081_v14  ;;  %v4024_v11 = vmax.f32 %v3960_v25, 0.0  ;;  %v3897_v12 = vmul.f32 %v12295_v3, %v3832_v6  ;;  %v3961_v13 = vadd.f32 %v12302_v8, %v3896_v4 }
 0x563   :  { %v3631_v16 = vpop.permute.xlu0 %3630  ;;  %v3833_v18 = vld [vmem:[#allocation2 + $0x170] sm:$0xff] }
 0x564   :  { %3773 = vst.msk [vmem:[#allocation2 + $0x190] sm:$0xff] %vm3722_vm3, %v3631_v16  ;;  %v4082_v19 = vpack.c.bf16 %v4024_v11, %v4023_v10  ;;  %v3962_v20 = vadd.f32 %v12302_v8, %v3897_v12  ;;  %v3898_v21 = vmul.f32 %v12295_v3, %v3833_v18  ;;  %v4025_v24 = vmax.f32 %v3961_v13, 0.0 }
 0x565   :  { %v3633_v22 = vpop.permute.xlu1 %3632  ;;  %v3834_v23 = vld [vmem:[#allocation2 + $0x178] sm:$0xff] }
 0x566   :  { %3774 = vst.msk [vmem:[#allocation2 + $0x198] sm:$0xff] %vm3722_vm3, %v3633_v22  ;;  %10163 = vmatmul.mubr.bf16.gmra.mrb[184].mxu0 %v4082_v19  ;;  %v4026_v26 = vmax.f32 %v3962_v20, 0.0  ;;  %v3899_v27 = vmul.f32 %v12295_v3, %v3834_v23  ;;  %v3963_v28 = vadd.f32 %v12302_v8, %v3898_v21 }
 0x567   :  { %v3635_v29 = vpop.permute.xlu0 %3634  ;;  %v3835_v30 = vld [vmem:[#allocation2 + $0x180] sm:$0xff] }
 0x568   :  { %3775 = vst.msk [vmem:[#allocation2 + $0x1a0] sm:$0xff] %vm3722_vm3, %v3635_v29  ;;  %v4083_v32 = vpack.c.bf16 %v4026_v26, %v4025_v24  ;;  %v3964_v1 = vadd.f32 %v12302_v8, %v3899_v27  ;;  %v3900_v33 = vmul.f32 %v12295_v3, %v3835_v30  ;;  %v4027_v35 = vmax.f32 %v3963_v28, 0.0 }
 0x569   :  { %v3637_v34 = vpop.permute.xlu1 %3636  ;;  %v3836_v9 = vld [vmem:[#allocation2 + $0x188] sm:$0xff] }
 0x56a   :  { %3776 = vst.msk [vmem:[#allocation2 + $0x1a8] sm:$0xff] %vm3722_vm3, %v3637_v34  ;;  %10166 = vmatprep.mubr.bf16.mxu0 %v4083_v32  ;;  %v4028_v37 = vmax.f32 %v3964_v1, 0.0  ;;  %v3901_v38 = vmul.f32 %v12295_v3, %v3836_v9  ;;  %v3965_v39 = vadd.f32 %v12302_v8, %v3900_v33 }
 0x56b   :  { %v3639_v40 = vpop.permute.xlu0 %3638  ;;  %v3837_v17 = vld [vmem:[#allocation2 + $0x190] sm:$0xff] }
 0x56c   :  { %3777 = vst.msk [vmem:[#allocation2 + $0x1b0] sm:$0xff] %vm3722_vm3, %v3639_v40  ;;  %v4084_v41 = vpack.c.bf16 %v4028_v37, %v4027_v35  ;;  %v3966_v42 = vadd.f32 %v12302_v8, %v3901_v38  ;;  %v3902_v43 = vmul.f32 %v12295_v3, %v3837_v17  ;;  %v4029_v48 = vmax.f32 %v3965_v39, 0.0 }
 0x56d   :  { %v3641_v45 = vpop.permute.xlu1 %3640  ;;  %v3838_v47 = vld [vmem:[#allocation2 + $0x198] sm:$0xff] }
 0x56e   :  { %3778 = vst.msk [vmem:[#allocation2 + $0x1b8] sm:$0xff] %vm3722_vm3, %v3641_v45  ;;  %10167 = vmatmul.mubr.bf16.gmra.mrb[188].mxu0 %v4084_v41  ;;  %v4030_v49 = vmax.f32 %v3966_v42, 0.0  ;;  %v3903_v50 = vmul.f32 %v12295_v3, %v3838_v47  ;;  %v3967_v51 = vadd.f32 %v12302_v8, %v3902_v43 }
 0x56f   :  { %v3643_v52 = vpop.permute.xlu0 %3642  ;;  %v3839_v53 = vld [vmem:[#allocation2 + $0x1a0] sm:$0xff] }
 0x570   :  { %3779 = vst.msk [vmem:[#allocation2 + $0x1c0] sm:$0xff] %vm3722_vm3, %v3643_v52  ;;  %v4085_v54 = vpack.c.bf16 %v4030_v49, %v4029_v48  ;;  %v3968_v55 = vadd.f32 %v12302_v8, %v3903_v50  ;;  %v3904_v56 = vmul.f32 %v12295_v3, %v3839_v53  ;;  %v4031_v59 = vmax.f32 %v3967_v51, 0.0 }
 0x571   :  { %v3645_v57 = vpop.permute.xlu1 %3644  ;;  %v3840_v58 = vld [vmem:[#allocation2 + $0x1a8] sm:$0xff] }
 0x572   :  { %3780 = vst.msk [vmem:[#allocation2 + $0x1c8] sm:$0xff] %vm3722_vm3, %v3645_v57  ;;  %10170 = vmatprep.mubr.bf16.mxu0 %v4085_v54  ;;  %v4032_v60 = vmax.f32 %v3968_v55, 0.0  ;;  %v3905_v62 = vmul.f32 %v12295_v3, %v3840_v58  ;;  %v3969_v63 = vadd.f32 %v12302_v8, %v3904_v56  ;;  %v12499_v58 = vld [vmem:[%s13792_s5 + $0x4] ss:$8 sps:$4 sm:$0xff]  }
 0x573   :  { %v3647_v0 = vpop.permute.xlu0 %3646  ;;  %v3841_v15 = vld [vmem:[#allocation2 + $0x1b0] sm:$0xff]  ;;  %4526 = vmatprep.mubr.bf16.mxu1 %v12499_v58 }
 0x574   :  { %3781 = vst.msk [vmem:[#allocation2 + $0x1d0] sm:$0xff] %vm3722_vm3, %v3647_v0  ;;  %v4086_v44 = vpack.c.bf16 %v4032_v60, %v4031_v59  ;;  %v3970_v61 = vadd.f32 %v12302_v8, %v3905_v62  ;;  %v3906_v31 = vmul.f32 %v12295_v3, %v3841_v15  ;;  %v4033_v46 = vmax.f32 %v3969_v63, 0.0 }
 0x575   :  { %v3649_v2 = vpop.permute.xlu1 %3648  ;;  %v3842_v36 = vld [vmem:[#allocation2 + $0x1b8] sm:$0xff] }
 0x576   :  { %3782 = vst.msk [vmem:[#allocation2 + $0x1d8] sm:$0xff] %vm3722_vm3, %v3649_v2  ;;  %10171 = vmatmul.mubr.bf16.gmra.mrb[192].mxu0 %v4086_v44  ;;  %v4034_v14 = vmax.f32 %v3970_v61, 0.0  ;;  %v3907_v25 = vmul.f32 %v12295_v3, %v3842_v36  ;;  %v3971_v4 = vadd.f32 %v12302_v8, %v3906_v31 }
 0x577   :  { %v3651_v5 = vpop.permute.xlu0 %3650  ;;  %v3843_v6 = vld [vmem:[#allocation2 + $0x1c0] sm:$0xff] }
 0x578   :  { %3783 = vst.msk [vmem:[#allocation2 + $0x1e0] sm:$0xff] %vm3722_vm3, %v3651_v5  ;;  %v4087_v10 = vpack.c.bf16 %v4034_v14, %v4033_v46  ;;  %v3972_v11 = vadd.f32 %v12302_v8, %v3907_v25  ;;  %v3908_v12 = vmul.f32 %v12295_v3, %v3843_v6  ;;  %v4035_v18 = vmax.f32 %v3971_v4, 0.0  ;;  %v10573_v6 = vld [vmem:[%s13789_s4 + $0x10] sm:$0xff]  }
 0x579   :  { %v3653_v13 = vpop.permute.xlu1 %3652  ;;  %v3844_v16 = vld [vmem:[#allocation2 + $0x1c8] sm:$0xff]  ;;  %4787 = vrot.lane.b32.xlu0 %v10573_v6, %s10849_s8 }
 0x57a   :  { %3784 = vst.msk [vmem:[#allocation2 + $0x1e8] sm:$0xff] %vm3722_vm3, %v3653_v13  ;;  %10174 = vmatprep.mubr.bf16.mxu0 %v4087_v10  ;;  %v4036_v19 = vmax.f32 %v3972_v11, 0.0  ;;  %v3909_v20 = vmul.f32 %v12295_v3, %v3844_v16  ;;  %v3973_v21 = vadd.f32 %v12302_v8, %v3908_v12 }
 0x57b   :  { %v3655_v22 = vpop.permute.xlu0 %3654  ;;  %v3845_v23 = vld [vmem:[#allocation2 + $0x1d0] sm:$0xff] }
 0x57c   :  { %3785 = vst.msk [vmem:[#allocation2 + $0x1f0] sm:$0xff] %vm3722_vm3, %v3655_v22  ;;  %v4088_v24 = vpack.c.bf16 %v4036_v19, %v4035_v18  ;;  %v3974_v26 = vadd.f32 %v12302_v8, %v3909_v20  ;;  %v3910_v27 = vmul.f32 %v12295_v3, %v3845_v23  ;;  %v4037_v30 = vmax.f32 %v3973_v21, 0.0  ;;  %v10574_v19 = vld [vmem:[%s13789_s4 + $0x18] sm:$0xff]   ;;  %v10575_v20 = vld [vmem:[%s13789_s4 + $0x20] sm:$0xff]   ;;  %v10576_v22 = vld [vmem:[%s13789_s4 + $0x28] sm:$0xff]  }
 0x57d   :  { %v3657_v28 = vpop.permute.xlu1 %3656  ;;  %v3846_v29 = vld [vmem:[#allocation2 + $0x1d8] sm:$0xff]  ;;  %4789 = vrot.lane.b32.xlu1 %v10574_v19, %s10849_s8  ;;  %4791 = vrot.lane.b32.xlu0 %v10575_v20, %s10849_s8  ;;  %v10577_v23 = vld [vmem:[%s13789_s4 + $0x30] sm:$0xff]  }
 0x57e   :  { %3786 = vst.msk [vmem:[#allocation2 + $0x1f8] sm:$0xff] %vm3722_vm3, %v3657_v28  ;;  %10175 = vmatmul.mubr.bf16.gmra.mrb[196].mxu0 %v4088_v24  ;;  %v4038_v32 = vmax.f32 %v3974_v26, 0.0  ;;  %v3911_v1 = vmul.f32 %v12295_v3, %v3846_v29  ;;  %v3975_v33 = vadd.f32 %v12302_v8, %v3910_v27 }
 0x57f   :  { %v3847_v34 = vld [vmem:[#allocation2 + $0x1e0] sm:$0xff] }
 0x580   :  { %v4089_v9 = vpack.c.bf16 %v4038_v32, %v4037_v30  ;;  %v3976_v35 = vadd.f32 %v12302_v8, %v3911_v1  ;;  %v3912_v37 = vmul.f32 %v12295_v3, %v3847_v34  ;;  %v4039_v39 = vmax.f32 %v3975_v33, 0.0  ;;  %v10578_v30 = vld [vmem:[%s13789_s4 + $0x38] sm:$0xff]   ;;  %v10579_v32 = vld [vmem:[%s13789_s4 + $0x40] sm:$0xff]   ;;  %v10580_v33 = vld [vmem:[%s13789_s4 + $0x48] sm:$0xff]  }
 0x581   :  { %v3848_v38 = vld [vmem:[#allocation2 + $0x1e8] sm:$0xff]  ;;  %4793 = vrot.lane.b32.xlu1 %v10576_v22, %s10849_s8  ;;  %4795 = vrot.lane.b32.xlu0 %v10577_v23, %s10849_s8 }
 0x582   :  { %10178 = vmatprep.mubr.bf16.mxu0 %v4089_v9  ;;  %v4040_v40 = vmax.f32 %v3976_v35, 0.0  ;;  %v3913_v17 = vmul.f32 %v12295_v3, %v3848_v38  ;;  %v3977_v41 = vadd.f32 %v12302_v8, %v3912_v37 }
 0x583   :  { %v3849_v42 = vld [vmem:[#allocation2 + $0x1f0] sm:$0xff] }
 0x584   :  { %v4090_v43 = vpack.c.bf16 %v4040_v40, %v4039_v39  ;;  %v3978_v45 = vadd.f32 %v12302_v8, %v3913_v17  ;;  %v3914_v47 = vmul.f32 %v12295_v3, %v3849_v42  ;;  %v4041_v49 = vmax.f32 %v3977_v41, 0.0 }
 0x585   :  { %v3850_v48 = vld [vmem:[#allocation2 + $0x1f8] sm:$0xff]  ;;  %4797 = vrot.lane.b32.xlu1 %v10578_v30, %s10849_s8  ;;  %4799 = vrot.lane.b32.xlu0 %v10579_v32, %s10849_s8 }
 0x586   :  { %10179 = vmatmul.mubr.bf16.gmra.mrb[200].mxu0 %v4090_v43  ;;  %v4042_v50 = vmax.f32 %v3978_v45, 0.0  ;;  %v3915_v51 = vmul.f32 %v12295_v3, %v3850_v48  ;;  %v3979_v52 = vadd.f32 %v12302_v8, %v3914_v47 }
 0x588   :  { %v4091_v53 = vpack.c.bf16 %v4042_v50, %v4041_v49  ;;  %v3980_v54 = vadd.f32 %v12302_v8, %v3915_v51  ;;  %v4043_v55 = vmax.f32 %v3979_v52, 0.0 }
 0x589   :  { %4801 = vrot.lane.b32.xlu1 %v10580_v33, %s10849_s8 }
 0x58a   :  { %10182 = vmatprep.mubr.bf16.mxu0 %v4091_v53  ;;  %v4044_v56 = vmax.f32 %v3980_v54, 0.0  ;;  %v12543_v54 = vld [vmem:[%s13792_s5] ss:$8 sps:$4 sm:$0xff]  }
 0x58c   :  { %v4092_v57 = vpack.c.bf16 %v4044_v56, %v4043_v55  ;;  %v12548_v56 = vld [vmem:[%s13792_s5 + $0x14] ss:$8 sps:$4 sm:$0xff]  }
 0x58e   :  { %10183 = vmatmul.mubr.bf16.gmra.mrb[204].mxu0 %v4092_v57 }
 0x5e7   :  { %v10124_v59 = vpop.f32.mrb[144].mxu0 }
 0x5e8   :  { %v4175_v60 = vpop.f32.mrb[145].mxu0 }
 0x5e9   :  { %v10125_v3 = vpop.f32.mrb[146].mxu0 }
 0x5ea   :  { %v4439_v62 = vpack.c.bf16 %v10125_v3, %v10124_v59  ;;  %v4178_v63 = vpop.f32.mrb[147].mxu0 }
 0x5eb   :  { %v4438_v0 = vpack.c.bf16 %v4178_v63, %v4175_v60  ;;  %v12555_v63 = vld [vmem:[%s13792_s5 + $0x10] ss:$8 sps:$4 sm:$0xff]  }
 0x5ef   :  { %v10128_v15 = vpop.f32.mrb[148].mxu0 }
 0x5f0   :  { %v4191_v8 = vpop.f32.mrb[149].mxu0 }
 0x5f1   :  { %v10129_v44 = vpop.f32.mrb[150].mxu0 }
 0x5f2   :  { %v4441_v61 = vpack.c.bf16 %v10129_v44, %v10128_v15  ;;  %v4194_v31 = vpop.f32.mrb[151].mxu0  ;;  %v12560_v15 = vld [vmem:[%s13792_s5 + $0x24] ss:$8 sps:$4 sm:$0xff]  }
 0x5f3   :  { %v4440_v2 = vpack.c.bf16 %v4194_v31, %v4191_v8 }
 0x5f9   :  { %v12502_v36 = vpop.f32.mrb[152].mxu0 }
 0x5fa   :  { %v4207_v46 = vpop.f32.mrb[153].mxu0 }
 0x5fb   :  { %v10133_v14 = vpop.f32.mrb[154].mxu0 }
 0x5fc   :  { %v4443_v25 = vpack.c.bf16 %v10133_v14, %v12502_v36  ;;  %v4210_v4 = vpop.f32.mrb[155].mxu0  ;;  %v12567_v36 = vld [vmem:[%s13792_s5 + $0x20] ss:$8 sps:$4 sm:$0xff]   ;;  %v12572_v14 = vld [vmem:[%s13792_s5 + $0x34] ss:$8 sps:$4 sm:$0xff]  }
 0x5fd   :  { %v4442_v5 = vpack.c.bf16 %v4210_v4, %v4207_v46 }
 0x601   :  { %v12508_v10 = vpop.f32.mrb[156].mxu0 }
 0x602   :  { %v4223_v11 = vpop.f32.mrb[157].mxu0 }
 0x603   :  { %v10137_v12 = vpop.f32.mrb[158].mxu0 }
 0x604   :  { %v4445_v13 = vpack.c.bf16 %v10137_v12, %v12508_v10  ;;  %v4226_v16 = vpop.f32.mrb[159].mxu0 }
 0x605   :  { %v4444_v18 = vpack.c.bf16 %v4226_v16, %v4223_v11  ;;  %v10572_v11 = vld [vmem:[%s13792_s5 + $0x30] ss:$8 sps:$4 sm:$0xff]  }
 0x609   :  { %v10140_v21 = vpop.f32.mrb[160].mxu0 }
 0x60a   :  { %v4239_v24 = vpop.f32.mrb[161].mxu0 }
 0x60b   :  { %v10141_v26 = vpop.f32.mrb[162].mxu0 }
 0x60c   :  { %v4447_v27 = vpack.c.bf16 %v10141_v26, %v10140_v21  ;;  %v4242_v28 = vpop.f32.mrb[163].mxu0 }
 0x60d   :  { %v4446_v29 = vpack.c.bf16 %v4242_v28, %v4239_v24 }
 0x60f   :  { %9571 = vmatprep.subr.bf16.mxu1 %v4446_v29 }
 0x610   :  { %9572 = vmatpush3.bf16.msra.mxu1 %v4438_v0 }
 0x611   :  { %v10144_v1 = vpop.f32.mrb[164].mxu0  ;;  %9573 = vmatprep.subr.bf16.mxu1 %v4447_v27 }
 0x612   :  { %v4255_v34 = vpop.f32.mrb[165].mxu0 }
 0x613   :  { %v10145_v9 = vpop.f32.mrb[166].mxu0 }
 0x614   :  { %v4449_v35 = vpack.c.bf16 %v10145_v9, %v10144_v1  ;;  %v4258_v37 = vpop.f32.mrb[167].mxu0  ;;  %9574 = vmatpush3.bf16.msra.mxu1 %v4439_v62 }
 0x615   :  { %v4448_v38 = vpack.c.bf16 %v4258_v37, %v4255_v34 }
 0x617   :  { %9575 = vmatprep.subr.bf16.mxu1 %v4448_v38 }
 0x618   :  { %9576 = vmatpush3.bf16.msra.mxu1 %v4440_v2 }
 0x619   :  { %v10148_v39 = vpop.f32.mrb[168].mxu0  ;;  %9577 = vmatprep.subr.bf16.mxu1 %v4449_v35 }
 0x61a   :  { %v4271_v40 = vpop.f32.mrb[169].mxu0 }
 0x61b   :  { %v10149_v17 = vpop.f32.mrb[170].mxu0 }
 0x61c   :  { %v4451_v41 = vpack.c.bf16 %v10149_v17, %v10148_v39  ;;  %v4274_v42 = vpop.f32.mrb[171].mxu0  ;;  %9578 = vmatpush3.bf16.msra.mxu1 %v4441_v61 }
 0x61d   :  { %v4450_v43 = vpack.c.bf16 %v4274_v42, %v4271_v40  ;;  %v4788_v42 = vpop.permute.xlu0 %4787 }
 0x61f   :  { %9579 = vmatprep.subr.bf16.mxu1 %v4450_v43  ;;  %v4790_v43 = vpop.permute.xlu1 %4789 }
 0x620   :  { %9580 = vmatpush3.bf16.msra.mxu1 %v4442_v5 }
 0x621   :  { %v10152_v45 = vpop.f32.mrb[172].mxu0  ;;  %9581 = vmatprep.subr.bf16.mxu1 %v4451_v41 }
 0x622   :  { %v4287_v47 = vpop.f32.mrb[173].mxu0 }
 0x623   :  { %v10153_v48 = vpop.f32.mrb[174].mxu0 }
 0x624   :  { %v4453_v49 = vpack.c.bf16 %v10153_v48, %v10152_v45  ;;  %v4290_v50 = vpop.f32.mrb[175].mxu0  ;;  %9582 = vmatpush3.bf16.msra.mxu1 %v4443_v25  ;;  %v4792_v45 = vpop.permute.xlu0 %4791 }
 0x625   :  { %v4452_v51 = vpack.c.bf16 %v4290_v50, %v4287_v47  ;;  %v4794_v47 = vpop.permute.xlu1 %4793 }
 0x627   :  { %9583 = vmatprep.subr.bf16.mxu1 %v4452_v51 }
 0x628   :  { %9584 = vmatpush3.bf16.msra.mxu1 %v4444_v18  ;;  %v4796_v48 = vpop.permute.xlu0 %4795 }
 0x629   :  { %9585 = vmatprep.subr.bf16.mxu1 %v4453_v49  ;;  %v10156_v52 = vpop.f32.mrb[176].mxu0  ;;  %v4798_v49 = vpop.permute.xlu1 %4797 }
 0x62a   :  { %v4303_v53 = vpop.f32.mrb[177].mxu0 }
 0x62b   :  { %v10157_v55 = vpop.f32.mrb[178].mxu0 }
 0x62c   :  { %9586 = vmatpush3.bf16.msra.mxu1 %v4445_v13  ;;  %v4569_v57 = vpack.c.bf16 %v10157_v55, %v10156_v52  ;;  %v4306_v59 = vpop.f32.mrb[179].mxu0  ;;  %v4800_v50 = vpop.permute.xlu0 %4799  ;;  %v10581_v52 = vld [vmem:[%s13789_s4 + $0x10] sm:$0xff]   ;;  %v10584_v55 = vld [vmem:[%s13789_s4 + $0x28] sm:$0xff]  }
 0x62d   :  { %v4568_v60 = vpack.c.bf16 %v4306_v59, %v4303_v53  ;;  %v4802_v51 = vpop.permute.xlu1 %4801  ;;  %v10582_v53 = vld [vmem:[%s13789_s4 + $0x18] sm:$0xff]   ;;  %5118 = vrot.lane.b32.xlu0 %v10581_v52, %s10848_s18 }
 0x62e   :  { %5120 = vrot.lane.b32.xlu1 %v10582_v53, %s10848_s18 }
 0x62f   :  { %4527 = vmatmul.mubr.bf16.vlgmr.msra.gmra.mrb[112].mxu1 %v12543_v54 }
 0x630   :  { %4534 = vmatprep.mubr.bf16.mxu1 %v12548_v56 }
 0x631   :  { %v10160_v3 = vpop.f32.mrb[180].mxu0 }
 0x632   :  { %v4319_v62 = vpop.f32.mrb[181].mxu0  ;;  %5124 = vrot.lane.b32.xlu1 %v10584_v55, %s10848_s18 }
 0x633   :  { %v10161_v0 = vpop.f32.mrb[182].mxu0 }
 0x634   :  { %v4571_v8 = vpack.c.bf16 %v10161_v0, %v10160_v3  ;;  %v4322_v44 = vpop.f32.mrb[183].mxu0 }
 0x635   :  { %v4570_v61 = vpack.c.bf16 %v4322_v44, %v4319_v62  ;;  %v12615_v44 = vld [vmem:[%s13791_s3 + $0x22] ss:$0 sm:$0xff] }
 0x637   :  { %4535 = vmatmul.mubr.bf16.gmra.mrb[116].mxu1 %v12555_v63 }
 0x638   :  { %4542 = vmatprep.mubr.bf16.mxu1 %v12560_v15 }
 0x639   :  { %v10164_v31 = vpop.f32.mrb[184].mxu0 }
 0x63a   :  { %v4335_v2 = vpop.f32.mrb[185].mxu0 }
 0x63b   :  { %v10165_v46 = vpop.f32.mrb[186].mxu0 }
 0x63c   :  { %v4573_v25 = vpack.c.bf16 %v10165_v46, %v10164_v31  ;;  %v4338_v4 = vpop.f32.mrb[187].mxu0  ;;  %v12620_v46 = vld [vmem:[%s13791_s3 + $0x23] ss:$0 sm:$0xff] }
 0x63d   :  { %v4572_v5 = vpack.c.bf16 %v4338_v4, %v4335_v2 }
 0x63f   :  { %4543 = vmatmul.mubr.bf16.gmra.mrb[120].mxu1 %v12567_v36 }
 0x640   :  { %4550 = vmatprep.mubr.bf16.mxu1 %v12572_v14 }
 0x641   :  { %v10168_v6 = vpop.f32.mrb[188].mxu0 }
 0x642   :  { %v4351_v10 = vpop.f32.mrb[189].mxu0 }
 0x643   :  { %v10169_v12 = vpop.f32.mrb[190].mxu0 }
 0x644   :  { %v4575_v13 = vpack.c.bf16 %v10169_v12, %v10168_v6  ;;  %v4354_v16 = vpop.f32.mrb[191].mxu0 }
 0x645   :  { %v4574_v18 = vpack.c.bf16 %v4354_v16, %v4351_v10 }
 0x647   :  { %4551 = vmatmul.mubr.bf16.gmra.mrb[124].mxu1 %v10572_v11 }
 0x648   :  { %4616 = vmatprep.mubr.bf16.mxu1 %v12499_v58 }
 0x649   :  { %v10172_v19 = vpop.f32.mrb[192].mxu0 }
 0x64a   :  { %v4367_v20 = vpop.f32.mrb[193].mxu0 }
 0x64b   :  { %v10173_v21 = vpop.f32.mrb[194].mxu0 }
 0x64c   :  { %v4577_v22 = vpack.c.bf16 %v10173_v21, %v10172_v19  ;;  %v4370_v23 = vpop.f32.mrb[195].mxu0 }
 0x64d   :  { %v4576_v24 = vpack.c.bf16 %v4370_v23, %v4367_v20 }
 0x64f   :  { %9611 = vmatprep.subr.bf16.mxu1 %v4576_v24 }
 0x650   :  { %9612 = vmatpush3.bf16.msra.mxu1 %v4568_v60 }
 0x651   :  { %v10176_v26 = vpop.f32.mrb[196].mxu0  ;;  %9613 = vmatprep.subr.bf16.mxu1 %v4577_v22 }
 0x652   :  { %v4383_v27 = vpop.f32.mrb[197].mxu0 }
 0x653   :  { %v10177_v28 = vpop.f32.mrb[198].mxu0 }
 0x654   :  { %v4579_v29 = vpack.c.bf16 %v10177_v28, %v10176_v26  ;;  %v4386_v30 = vpop.f32.mrb[199].mxu0  ;;  %9614 = vmatpush3.bf16.msra.mxu1 %v4569_v57  ;;  %v10586_v57 = vld [vmem:[%s13789_s4 + $0x38] sm:$0xff]  }
 0x655   :  { %v4578_v32 = vpack.c.bf16 %v4386_v30, %v4383_v27  ;;  %5128 = vrot.lane.b32.xlu1 %v10586_v57, %s10848_s18 }
 0x657   :  { %9615 = vmatprep.subr.bf16.mxu1 %v4578_v32 }
 0x658   :  { %9616 = vmatpush3.bf16.msra.mxu1 %v4570_v61 }
 0x659   :  { %v10180_v1 = vpop.f32.mrb[200].mxu0  ;;  %9617 = vmatprep.subr.bf16.mxu1 %v4579_v29 }
 0x65a   :  { %v4399_v58 = vpop.f32.mrb[201].mxu0 }
 0x65b   :  { %v10181_v33 = vpop.f32.mrb[202].mxu0 }
 0x65c   :  { %v4581_v34 = vpack.c.bf16 %v10181_v33, %v10180_v1  ;;  %v4402_v9 = vpop.f32.mrb[203].mxu0  ;;  %9618 = vmatpush3.bf16.msra.mxu1 %v4571_v8 }
 0x65d   :  { %v4580_v35 = vpack.c.bf16 %v4402_v9, %v4399_v58 }
 0x65f   :  { %9619 = vmatprep.subr.bf16.mxu1 %v4580_v35 }
 0x660   :  { %9620 = vmatpush3.bf16.msra.mxu1 %v4572_v5 }
 0x661   :  { %v10184_v37 = vpop.f32.mrb[204].mxu0  ;;  %9621 = vmatprep.subr.bf16.mxu1 %v4581_v34 }
 0x662   :  { %v4415_v38 = vpop.f32.mrb[205].mxu0 }
 0x663   :  { %v10185_v39 = vpop.f32.mrb[206].mxu0 }
 0x664   :  { %v4583_v40 = vpack.c.bf16 %v10185_v39, %v10184_v37  ;;  %v4418_v17 = vpop.f32.mrb[207].mxu0  ;;  %9622 = vmatpush3.bf16.msra.mxu1 %v4573_v25 }
 0x665   :  { %v4582_v41 = vpack.c.bf16 %v4418_v17, %v4415_v38 }
 0x667   :  { %9623 = vmatprep.subr.bf16.mxu1 %v4582_v41 }
 0x668   :  { %9624 = vmatpush3.bf16.msra.mxu1 %v4574_v18 }
 0x669   :  { %9625 = vmatprep.subr.bf16.mxu1 %v4583_v40 }
 0x66c   :  { %9626 = vmatpush3.bf16.msra.mxu1 %v4575_v13 }
 0x66d   :  { %10186 = vmatprep.subr.bf16.mxu1 %v4788_v42 }
 0x66f   :  { %4617 = vmatmul.mubr.bf16.vlgmr.msra.gmra.mrb[128].mxu1 %v12543_v54  ;;  %v10583_v54 = vld [vmem:[%s13789_s4 + $0x20] sm:$0xff]  }
 0x670   :  { %4624 = vmatprep.mubr.bf16.mxu1 %v12548_v56  ;;  %10187 = vmatpush3.bf16.msra.mxu1 %v4788_v42  ;;  %v10585_v56 = vld [vmem:[%s13789_s4 + $0x30] sm:$0xff]  }
 0x671   :  { %10188 = vmatprep.subr.bf16.mxu1 %v4790_v43  ;;  %5122 = vrot.lane.b32.xlu0 %v10583_v54, %s10848_s18 }
 0x674   :  { %10189 = vmatpush3.bf16.msra.mxu1 %v4790_v43 }
 0x675   :  { %10190 = vmatprep.subr.bf16.mxu1 %v4792_v45  ;;  %5126 = vrot.lane.b32.xlu0 %v10585_v56, %s10848_s18 }
 0x677   :  { %4625 = vmatmul.mubr.bf16.gmra.mrb[132].mxu1 %v12555_v63 }
 0x678   :  { %4632 = vmatprep.mubr.bf16.mxu1 %v12560_v15  ;;  %10191 = vmatpush3.bf16.msra.mxu1 %v4792_v45 }
 0x679   :  { %10192 = vmatprep.subr.bf16.mxu1 %v4794_v47 }
 0x67c   :  { %10193 = vmatpush3.bf16.msra.mxu1 %v4794_v47 }
 0x67d   :  { %10194 = vmatprep.subr.bf16.mxu1 %v4796_v48 }
 0x67f   :  { %4633 = vmatmul.mubr.bf16.gmra.mrb[136].mxu1 %v12567_v36 }
 0x680   :  { %4640 = vmatprep.mubr.bf16.mxu1 %v12572_v14  ;;  %10195 = vmatpush3.bf16.msra.mxu1 %v4796_v48 }
 0x681   :  { %10196 = vmatprep.subr.bf16.mxu1 %v4798_v49 }
 0x684   :  { %10197 = vmatpush3.bf16.msra.mxu1 %v4798_v49 }
 0x685   :  { %10198 = vmatprep.subr.bf16.mxu1 %v4800_v50 }
 0x687   :  { %4641 = vmatmul.mubr.bf16.gmra.mrb[140].mxu1 %v10572_v11 }
 0x688   :  { %10199 = vmatpush3.bf16.msra.mxu1 %v4800_v50 }
 0x689   :  { %10200 = vmatprep.subr.bf16.mxu1 %v4802_v51 }
 0x68c   :  { %10201 = vmatpush3.bf16.msra.mxu1 %v4802_v51 }
 0x702   :  { %v9587_v59 = vpop.f32.mrb[112].mxu1 }
 0x703   :  { %v9588_v60 = vpop.f32.mrb[113].mxu1 }
 0x704   :  { %v9589_v3 = vadd.f32 %v9588_v60, %v9587_v59  ;;  %v9590_v62 = vpop.f32.mrb[114].mxu1 }
 0x705   :  { %v9591_v63 = vpop.f32.mrb[115].mxu1 }
 0x706   :  { %4560 = vst.msk [vmem:[#allocation3] sm:$0xff] %vm4559_vm4, %v9589_v3  ;;  %v9592_v0 = vadd.f32 %v9591_v63, %v9590_v62 }
 0x708   :  { %4561 = vst.msk [vmem:[#allocation3 + $0x8] sm:$0xff] %vm4559_vm4, %v9592_v0 }
 0x70a   :  { %v9593_v15 = vpop.f32.mrb[116].mxu1 }
 0x70b   :  { %v9594_v8 = vpop.f32.mrb[117].mxu1 }
 0x70c   :  { %v9595_v61 = vadd.f32 %v9594_v8, %v9593_v15  ;;  %v9596_v31 = vpop.f32.mrb[118].mxu1 }
 0x70d   :  { %v9597_v2 = vpop.f32.mrb[119].mxu1  ;;  %v4657_v36 = vld [vmem:[#allocation3] sm:$0xff] }
 0x70e   :  { %4562 = vst.msk [vmem:[#allocation3 + $0x10] sm:$0xff] %vm4559_vm4, %v9595_v61  ;;  %v9598_v14 = vadd.f32 %v9597_v2, %v9596_v31  ;;  %v4674_v25 = vmul.f32 %v12615_v44, %v4657_v36 }
 0x70f   :  { %v4658_v4 = vld [vmem:[#allocation3 + $0x8] sm:$0xff] }
 0x710   :  { %4563 = vst.msk [vmem:[#allocation3 + $0x18] sm:$0xff] %vm4559_vm4, %v9598_v14  ;;  %v4675_v5 = vmul.f32 %v12615_v44, %v4658_v4  ;;  %v4691_v6 = vadd.f32 %v12620_v46, %v4674_v25 }
 0x712   :  { %v9599_v10 = vpop.f32.mrb[120].mxu1  ;;  %v4692_v11 = vadd.f32 %v12620_v46, %v4675_v5  ;;  %v4707_v18 = vmax.f32 %v4691_v6, 0.0 }
 0x713   :  { %v9600_v12 = vpop.f32.mrb[121].mxu1 }
 0x714   :  { %v9601_v13 = vadd.f32 %v9600_v12, %v9599_v10  ;;  %v9602_v16 = vpop.f32.mrb[122].mxu1  ;;  %v4708_v19 = vmax.f32 %v4692_v11, 0.0 }
 0x715   :  { %v9603_v20 = vpop.f32.mrb[123].mxu1  ;;  %v4659_v21 = vld [vmem:[#allocation3 + $0x10] sm:$0xff] }
 0x716   :  { %4564 = vst.msk [vmem:[#allocation3 + $0x20] sm:$0xff] %vm4559_vm4, %v9601_v13  ;;  %v9604_v22 = vadd.f32 %v9603_v20, %v9602_v16  ;;  %v4739_v23 = vpack.c.bf16 %v4708_v19, %v4707_v18  ;;  %v4676_v24 = vmul.f32 %v12615_v44, %v4659_v21 }
 0x717   :  { %v4660_v26 = vld [vmem:[#allocation3 + $0x18] sm:$0xff] }
 0x718   :  { %4565 = vst.msk [vmem:[#allocation3 + $0x28] sm:$0xff] %vm4559_vm4, %v9604_v22  ;;  %10202 = vmatprep.mubr.bf16.mxu1 %v4739_v23  ;;  %v4677_v27 = vmul.f32 %v12615_v44, %v4660_v26  ;;  %v4693_v28 = vadd.f32 %v12620_v46, %v4676_v24 }
 0x71a   :  { %v9605_v29 = vpop.f32.mrb[124].mxu1  ;;  %v4694_v30 = vadd.f32 %v12620_v46, %v4677_v27  ;;  %v4709_v33 = vmax.f32 %v4693_v28, 0.0 }
 0x71b   :  { %v9606_v32 = vpop.f32.mrb[125].mxu1 }
 0x71c   :  { %v9607_v1 = vadd.f32 %v9606_v32, %v9605_v29  ;;  %v9608_v58 = vpop.f32.mrb[126].mxu1  ;;  %v4710_v34 = vmax.f32 %v4694_v30, 0.0 }
 0x71d   :  { %v9609_v9 = vpop.f32.mrb[127].mxu1  ;;  %v4661_v35 = vld [vmem:[#allocation3 + $0x20] sm:$0xff] }
 0x71e   :  { %4566 = vst.msk [vmem:[#allocation3 + $0x30] sm:$0xff] %vm4559_vm4, %v9607_v1  ;;  %v9610_v37 = vadd.f32 %v9609_v9, %v9608_v58  ;;  %v4740_v38 = vpack.c.bf16 %v4710_v34, %v4709_v33  ;;  %v4678_v39 = vmul.f32 %v12615_v44, %v4661_v35 }
 0x71f   :  { %v4662_v40 = vld [vmem:[#allocation3 + $0x28] sm:$0xff] }
 0x720   :  { %4567 = vst.msk [vmem:[#allocation3 + $0x38] sm:$0xff] %vm4559_vm4, %v9610_v37  ;;  %10203 = vmatmul.mubr.bf16.vlgmr.msra.gmra.mrb[144].mxu1 %v4740_v38  ;;  %v4679_v17 = vmul.f32 %v12615_v44, %v4662_v40  ;;  %v4695_v41 = vadd.f32 %v12620_v46, %v4678_v39 }
 0x722   :  { %v4696_v42 = vadd.f32 %v12620_v46, %v4679_v17  ;;  %v4711_v43 = vmax.f32 %v4695_v41, 0.0 }
 0x724   :  { %v4712_v45 = vmax.f32 %v4696_v42, 0.0 }
 0x725   :  { %v4663_v47 = vld [vmem:[#allocation3 + $0x30] sm:$0xff] }
 0x726   :  { %v4741_v48 = vpack.c.bf16 %v4712_v45, %v4711_v43  ;;  %v4680_v49 = vmul.f32 %v12615_v44, %v4663_v47 }
 0x727   :  { %v4664_v50 = vld [vmem:[#allocation3 + $0x38] sm:$0xff] }
 0x728   :  { %10206 = vmatprep.mubr.bf16.mxu1 %v4741_v48  ;;  %v4681_v51 = vmul.f32 %v12615_v44, %v4664_v50  ;;  %v4697_v52 = vadd.f32 %v12620_v46, %v4680_v49 }
 0x72a   :  { %v4698_v53 = vadd.f32 %v12620_v46, %v4681_v51  ;;  %v4713_v54 = vmax.f32 %v4697_v52, 0.0 }
 0x72c   :  { %v4714_v55 = vmax.f32 %v4698_v53, 0.0 }
 0x72e   :  { %v4742_v56 = vpack.c.bf16 %v4714_v55, %v4713_v54 }
 0x730   :  { %10207 = vmatmul.mubr.bf16.gmra.mrb[148].mxu1 %v4742_v56  ;;  %v5119_v56 = vpop.permute.xlu0 %5118 }
 0x731   :  { %10218 = vmatprep.subr.bf16.mxu1 %v5119_v56 }
 0x732   :  { %10219 = vmatpush3.bf16.msra.mxu1 %v5119_v56 }
 0x742   :  { %v9627_v57 = vpop.f32.mrb[128].mxu1 }
 0x743   :  { %v9628_v59 = vpop.f32.mrb[129].mxu1 }
 0x744   :  { %v9629_v60 = vadd.f32 %v9628_v59, %v9627_v57  ;;  %v9630_v3 = vpop.f32.mrb[130].mxu1  ;;  %v5121_v57 = vpop.permute.xlu1 %5120 }
 0x745   :  { %v9631_v62 = vpop.f32.mrb[131].mxu1  ;;  %10220 = vmatprep.subr.bf16.mxu1 %v5121_v57  ;;  %v5123_v59 = vpop.permute.xlu0 %5122 }
 0x746   :  { %4649 = vst.msk [vmem:[#allocation3 + $0x40] sm:$0xff] %vm4559_vm4, %v9629_v60  ;;  %v9632_v63 = vadd.f32 %v9631_v62, %v9630_v3  ;;  %10221 = vmatpush3.bf16.msra.mxu1 %v5121_v57 }
 0x747   :  { %10222 = vmatprep.subr.bf16.mxu1 %v5123_v59 }
 0x748   :  { %4650 = vst.msk [vmem:[#allocation3 + $0x48] sm:$0xff] %vm4559_vm4, %v9632_v63  ;;  %v5125_v60 = vpop.permute.xlu1 %5124 }
 0x74a   :  { %v9633_v0 = vpop.f32.mrb[132].mxu1  ;;  %10223 = vmatpush3.bf16.msra.mxu1 %v5123_v59 }
 0x74b   :  { %v9634_v15 = vpop.f32.mrb[133].mxu1  ;;  %10224 = vmatprep.subr.bf16.mxu1 %v5125_v60 }
 0x74c   :  { %v9635_v8 = vadd.f32 %v9634_v15, %v9633_v0  ;;  %v9636_v61 = vpop.f32.mrb[134].mxu1  ;;  %v5129_v3 = vpop.permute.xlu1 %5128 }
 0x74d   :  { %v9637_v31 = vpop.f32.mrb[135].mxu1  ;;  %v4665_v2 = vld [vmem:[#allocation3 + $0x40] sm:$0xff] }
 0x74e   :  { %4651 = vst.msk [vmem:[#allocation3 + $0x50] sm:$0xff] %vm4559_vm4, %v9635_v8  ;;  %v9638_v36 = vadd.f32 %v9637_v31, %v9636_v61  ;;  %v4682_v14 = vmul.f32 %v12615_v44, %v4665_v2  ;;  %10225 = vmatpush3.bf16.msra.mxu1 %v5125_v60  ;;  %v10587_v2 = vld [vmem:[%s13789_s4 + $0x40] sm:$0xff]  }
 0x74f   :  { %v4666_v25 = vld [vmem:[#allocation3 + $0x48] sm:$0xff] }
 0x750   :  { %4652 = vst.msk [vmem:[#allocation3 + $0x58] sm:$0xff] %vm4559_vm4, %v9638_v36  ;;  %v4683_v4 = vmul.f32 %v12615_v44, %v4666_v25  ;;  %v4699_v5 = vadd.f32 %v12620_v46, %v4682_v14  ;;  %v10588_v36 = vld [vmem:[%s13789_s4 + $0x48] sm:$0xff]  }
 0x752   :  { %v9639_v6 = vpop.f32.mrb[136].mxu1  ;;  %v4700_v10 = vadd.f32 %v12620_v46, %v4683_v4  ;;  %v4715_v11 = vmax.f32 %v4699_v5, 0.0 }
 0x753   :  { %v9640_v12 = vpop.f32.mrb[137].mxu1 }
 0x754   :  { %v9641_v13 = vadd.f32 %v9640_v12, %v9639_v6  ;;  %v9642_v16 = vpop.f32.mrb[138].mxu1  ;;  %v4716_v18 = vmax.f32 %v4700_v10, 0.0 }
 0x755   :  { %v9643_v19 = vpop.f32.mrb[139].mxu1  ;;  %v4667_v20 = vld [vmem:[#allocation3 + $0x50] sm:$0xff] }
 0x756   :  { %4653 = vst.msk [vmem:[#allocation3 + $0x60] sm:$0xff] %vm4559_vm4, %v9641_v13  ;;  %v9644_v21 = vadd.f32 %v9643_v19, %v9642_v16  ;;  %v4743_v22 = vpack.c.bf16 %v4716_v18, %v4715_v11  ;;  %v4684_v23 = vmul.f32 %v12615_v44, %v4667_v20  ;;  %v10589_v13 = vld [vmem:[%s13789_s4 + $0x10] sm:$0xff]   ;;  %v10590_v16 = vld [vmem:[%s13789_s4 + $0x18] sm:$0xff]   ;;  %v10591_v18 = vld [vmem:[%s13789_s4 + $0x20] sm:$0xff]  }
 0x757   :  { %v4668_v24 = vld [vmem:[#allocation3 + $0x58] sm:$0xff]  ;;  %v10592_v19 = vld [vmem:[%s13789_s4 + $0x28] sm:$0xff]   ;;  %v10593_v20 = vld [vmem:[%s13789_s4 + $0x30] sm:$0xff]  }
 0x758   :  { %4654 = vst.msk [vmem:[#allocation3 + $0x68] sm:$0xff] %vm4559_vm4, %v9644_v21  ;;  %10210 = vmatprep.mubr.bf16.mxu1 %v4743_v22  ;;  %v4685_v26 = vmul.f32 %v12615_v44, %v4668_v24  ;;  %v4701_v27 = vadd.f32 %v12620_v46, %v4684_v23  ;;  %v10594_v21 = vld [vmem:[%s13789_s4 + $0x38] sm:$0xff]  }
 0x75a   :  { %v9645_v28 = vpop.f32.mrb[140].mxu1  ;;  %v4702_v29 = vadd.f32 %v12620_v46, %v4685_v26  ;;  %v4717_v30 = vmax.f32 %v4701_v27, 0.0 }
 0x75b   :  { %v9646_v32 = vpop.f32.mrb[141].mxu1 }
 0x75c   :  { %v9647_v1 = vadd.f32 %v9646_v32, %v9645_v28  ;;  %v9648_v58 = vpop.f32.mrb[142].mxu1  ;;  %v4718_v33 = vmax.f32 %v4702_v29, 0.0  ;;  %v12723_v28 = vld [vmem:[%s13791_s3 + $0x24] ss:$0 sm:$0xff]  ;;  %v12729_v32 = vld [vmem:[%s13791_s3 + $0x25] ss:$0 sm:$0xff] }
 0x75d   :  { %v9649_v34 = vpop.f32.mrb[143].mxu1  ;;  %v4669_v9 = vld [vmem:[#allocation3 + $0x60] sm:$0xff] }
 0x75e   :  { %4655 = vst.msk [vmem:[#allocation3 + $0x70] sm:$0xff] %vm4559_vm4, %v9647_v1  ;;  %v9650_v35 = vadd.f32 %v9649_v34, %v9648_v58  ;;  %v4744_v37 = vpack.c.bf16 %v4718_v33, %v4717_v30  ;;  %v4686_v38 = vmul.f32 %v12615_v44, %v4669_v9 }
 0x75f   :  { %v4670_v39 = vld [vmem:[#allocation3 + $0x68] sm:$0xff] }
 0x760   :  { %4656 = vst.msk [vmem:[#allocation3 + $0x78] sm:$0xff] %vm4559_vm4, %v9650_v35  ;;  %10211 = vmatmul.mubr.bf16.gmra.mrb[152].mxu1 %v4744_v37  ;;  %v4687_v40 = vmul.f32 %v12615_v44, %v4670_v39  ;;  %v4703_v17 = vadd.f32 %v12620_v46, %v4686_v38 }
 0x762   :  { %v4704_v41 = vadd.f32 %v12620_v46, %v4687_v40  ;;  %v4719_v42 = vmax.f32 %v4703_v17, 0.0 }
 0x764   :  { %v4720_v43 = vmax.f32 %v4704_v41, 0.0 }
 0x765   :  { %v4671_v45 = vld [vmem:[#allocation3 + $0x70] sm:$0xff] }
 0x766   :  { %v4745_v47 = vpack.c.bf16 %v4720_v43, %v4719_v42  ;;  %v4688_v48 = vmul.f32 %v12615_v44, %v4671_v45 }
 0x767   :  { %v4672_v49 = vld [vmem:[#allocation3 + $0x78] sm:$0xff] }
 0x768   :  { %10214 = vmatprep.mubr.bf16.mxu1 %v4745_v47  ;;  %v4689_v50 = vmul.f32 %v12615_v44, %v4672_v49  ;;  %v4705_v51 = vadd.f32 %v12620_v46, %v4688_v48  ;;  %v5127_v44 = vpop.permute.xlu0 %5126 }
 0x769   :  { %10226 = vmatprep.subr.bf16.mxu1 %v5127_v44 }
 0x76a   :  { %v4706_v52 = vadd.f32 %v12620_v46, %v4689_v50  ;;  %v4721_v53 = vmax.f32 %v4705_v51, 0.0  ;;  %10227 = vmatpush3.bf16.msra.mxu1 %v5127_v44 }
 0x76b   :  { %10228 = vmatprep.subr.bf16.mxu1 %v5129_v3 }
 0x76c   :  { %v4722_v54 = vmax.f32 %v4706_v52, 0.0 }
 0x76e   :  { %v4746_v55 = vpack.c.bf16 %v4722_v54, %v4721_v53  ;;  %10229 = vmatpush3.bf16.msra.mxu1 %v5129_v3 }
 0x770   :  { %10215 = vmatmul.mubr.bf16.gmra.mrb[156].mxu1 %v4746_v55 }
 0x7f3   :  { %v10204_v46 = vpop.f32.mrb[144].mxu1 }
 0x7f4   :  { %4928 = vrot.lane.b32.xlu0 %v10204_v46, %s10848_s18  ;;  %v4845_v62 = vpop.f32.mrb[145].mxu1 }
 0x7f5   :  { %v10205_v63 = vpop.f32.mrb[146].mxu1 }
 0x7f6   :  { %4930 = vrot.lane.b32.xlu1 %v10205_v63, %s10848_s18  ;;  %v4848_v0 = vpop.f32.mrb[147].mxu1 }
 0x7f8   :  { %4924 = vrot.lane.b32.xlu0 %v4845_v62, %s10848_s18 }
 0x7fa   :  { %4926 = vrot.lane.b32.xlu1 %v4848_v0, %s10848_s18 }
 0x803   :  { %v10208_v15 = vpop.f32.mrb[148].mxu1 }
 0x804   :  { %4936 = vrot.lane.b32.xlu0 %v10208_v15, %s10848_s18  ;;  %v4861_v8 = vpop.f32.mrb[149].mxu1 }
 0x805   :  { %v10209_v61 = vpop.f32.mrb[150].mxu1 }
 0x806   :  { %4938 = vrot.lane.b32.xlu1 %v10209_v61, %s10848_s18  ;;  %v4864_v31 = vpop.f32.mrb[151].mxu1 }
 0x808   :  { %4932 = vrot.lane.b32.xlu0 %v4861_v8, %s10848_s18 }
 0x80a   :  { %4934 = vrot.lane.b32.xlu1 %v4864_v31, %s10848_s18 }
 0x80c   :  { %5130 = vrot.lane.b32.xlu0 %v10587_v2, %s10848_s18 }
 0x80e   :  { %5132 = vrot.lane.b32.xlu1 %v10588_v36, %s10848_s18 }
 0x833   :  { %v10212_v14 = vpop.f32.mrb[152].mxu1 }
 0x834   :  { %v4877_v25 = vpop.f32.mrb[153].mxu1 }
 0x835   :  { %v10213_v4 = vpop.f32.mrb[154].mxu1  ;;  %4940 = vrot.lane.b32.xlu0 %v4877_v25, %s10848_s18 }
 0x836   :  { %v4880_v5 = vpop.f32.mrb[155].mxu1 }
 0x837   :  { %4942 = vrot.lane.b32.xlu1 %v4880_v5, %s10848_s18 }
 0x839   :  { %4944 = vrot.lane.b32.xlu0 %v10212_v14, %s10848_s18 }
 0x83b   :  { %4946 = vrot.lane.b32.xlu1 %v10213_v4, %s10848_s18 }
 0x843   :  { %v10216_v6 = vpop.f32.mrb[156].mxu1 }
 0x844   :  { %v4893_v10 = vpop.f32.mrb[157].mxu1 }
 0x845   :  { %v10217_v11 = vpop.f32.mrb[158].mxu1  ;;  %4948 = vrot.lane.b32.xlu0 %v4893_v10, %s10848_s18 }
 0x846   :  { %v4896_v12 = vpop.f32.mrb[159].mxu1 }
 0x847   :  { %4950 = vrot.lane.b32.xlu1 %v4896_v12, %s10848_s18 }
 0x849   :  { %4952 = vrot.lane.b32.xlu0 %v10216_v6, %s10848_s18 }
 0x84b   :  { %4954 = vrot.lane.b32.xlu1 %v10217_v11, %s10848_s18 }
 0x84d   :  { %5450 = vrot.lane.b32.xlu0 %v10589_v13, %s10847_s0 }
 0x84f   :  { %5452 = vrot.lane.b32.xlu1 %v10590_v16, %s10847_s0 }
 0x851   :  { %5454 = vrot.lane.b32.xlu0 %v10591_v18, %s10847_s0 }
 0x853   :  { %5456 = vrot.lane.b32.xlu1 %v10592_v19, %s10847_s0 }
 0x855   :  { %5458 = vrot.lane.b32.xlu0 %v10593_v20, %s10847_s0 }
 0x857   :  { %5460 = vrot.lane.b32.xlu1 %v10594_v21, %s10847_s0 }
 0x866   :  { %v4929_v22 = vpop.permute.xlu0 %4928 }
 0x867   :  { %4974 = vst.msk [vmem:[#allocation3 + $0x10] sm:$0xff] %vm3722_vm3, %v4929_v22 }
 0x868   :  { %v4931_v23 = vpop.permute.xlu1 %4930 }
 0x869   :  { %4975 = vst.msk [vmem:[#allocation3 + $0x18] sm:$0xff] %vm3722_vm3, %v4931_v23 }
 0x86a   :  { %v4925_v24 = vpop.permute.xlu0 %4924 }
 0x86b   :  { %4972 = vst.msk [vmem:[#allocation3] sm:$0xff] %vm3722_vm3, %v4925_v24 }
 0x86c   :  { %v4927_v26 = vpop.permute.xlu1 %4926 }
 0x86d   :  { %4973 = vst.msk [vmem:[#allocation3 + $0x8] sm:$0xff] %vm3722_vm3, %v4927_v26 }
 0x86e   :  { %v4990_v37 = vld [vmem:[#allocation3 + $0x10] sm:$0xff] }
 0x86f   :  { %v5007_v42 = vmul.f32 %v12723_v28, %v4990_v37 }
 0x870   :  { %v4991_v34 = vld [vmem:[#allocation3 + $0x18] sm:$0xff] }
 0x871   :  { %v5008_v40 = vmul.f32 %v12723_v28, %v4991_v34  ;;  %v5024_v48 = vadd.f32 %v12729_v32, %v5007_v42 }
 0x872   :  { %v4988_v27 = vld [vmem:[#allocation3] sm:$0xff] }
 0x873   :  { %v5005_v29 = vmul.f32 %v12723_v28, %v4988_v27  ;;  %v5025_v45 = vadd.f32 %v12729_v32, %v5008_v40  ;;  %v5040_v55 = vmax.f32 %v5024_v48, 0.0 }
 0x874   :  { %v4989_v30 = vld [vmem:[#allocation3 + $0x8] sm:$0xff] }
 0x875   :  { %v5006_v1 = vmul.f32 %v12723_v28, %v4989_v30  ;;  %v5022_v58 = vadd.f32 %v12729_v32, %v5005_v29  ;;  %v5041_v52 = vmax.f32 %v5025_v45, 0.0 }
 0x876   :  { %v4937_v33 = vpop.permute.xlu0 %4936 }
 0x877   :  { %4978 = vst.msk [vmem:[#allocation3 + $0x30] sm:$0xff] %vm3722_vm3, %v4937_v33  ;;  %v5023_v9 = vadd.f32 %v12729_v32, %v5006_v1  ;;  %v5038_v38 = vmax.f32 %v5022_v58, 0.0  ;;  %v5071_v60 = vpack.c.bf16 %v5041_v52, %v5040_v55 }
 0x878   :  { %v4939_v35 = vpop.permute.xlu1 %4938 }
 0x879   :  { %4979 = vst.msk [vmem:[#allocation3 + $0x38] sm:$0xff] %vm3722_vm3, %v4939_v35  ;;  %v5039_v39 = vmax.f32 %v5023_v9, 0.0 }
 0x87a   :  { %v4933_v17 = vpop.permute.xlu0 %4932 }
 0x87b   :  { %4976 = vst.msk [vmem:[#allocation3 + $0x20] sm:$0xff] %vm3722_vm3, %v4933_v17  ;;  %v5070_v41 = vpack.c.bf16 %v5039_v39, %v5038_v38 }
 0x87c   :  { %v4935_v43 = vpop.permute.xlu1 %4934 }
 0x87d   :  { %4977 = vst.msk [vmem:[#allocation3 + $0x28] sm:$0xff] %vm3722_vm3, %v4935_v43  ;;  %10234 = vmatprep.mubr.bf16.mxu1 %v5070_v41 }
 0x87e   :  { %v5131_v47 = vpop.permute.xlu0 %5130  ;;  %v4994_v50 = vld [vmem:[#allocation3 + $0x30] sm:$0xff] }
 0x87f   :  { %10230 = vmatprep.subr.bf16.mxu1 %v5131_v47  ;;  %v5011_v57 = vmul.f32 %v12723_v28, %v4994_v50 }
 0x880   :  { %10231 = vmatpush3.bf16.msra.mxu1 %v5131_v47  ;;  %v5133_v49 = vpop.permute.xlu1 %5132  ;;  %v4995_v51 = vld [vmem:[#allocation3 + $0x38] sm:$0xff] }
 0x881   :  { %10232 = vmatprep.subr.bf16.mxu1 %v5133_v49  ;;  %v5012_v53 = vmul.f32 %v12723_v28, %v4995_v51  ;;  %v5028_v63 = vadd.f32 %v12729_v32, %v5011_v57 }
 0x882   :  { %v4992_v54 = vld [vmem:[#allocation3 + $0x20] sm:$0xff] }
 0x883   :  { %v5009_v56 = vmul.f32 %v12723_v28, %v4992_v54  ;;  %v5029_v46 = vadd.f32 %v12729_v32, %v5012_v53  ;;  %v5044_v31 = vmax.f32 %v5028_v63, 0.0 }
 0x884   :  { %10233 = vmatpush3.bf16.msra.mxu1 %v5133_v49  ;;  %v4993_v59 = vld [vmem:[#allocation3 + $0x28] sm:$0xff] }
 0x885   :  { %v5010_v44 = vmul.f32 %v12723_v28, %v4993_v59  ;;  %v5026_v3 = vadd.f32 %v12729_v32, %v5009_v56  ;;  %v5045_v8 = vmax.f32 %v5029_v46, 0.0 }
 0x887   :  { %10235 = vmatmul.mubr.bf16.vlgmr.msra.gmra.mrb[160].mxu1 %v5071_v60  ;;  %v5027_v62 = vadd.f32 %v12729_v32, %v5010_v44  ;;  %v5042_v0 = vmax.f32 %v5026_v3, 0.0  ;;  %v5073_v2 = vpack.c.bf16 %v5045_v8, %v5044_v31  ;;  %v10596_v8 = vld [vmem:[%s13789_s4 + $0x48] sm:$0xff]  }
 0x889   :  { %v5043_v15 = vmax.f32 %v5027_v62, 0.0 }
 0x88b   :  { %v5072_v61 = vpack.c.bf16 %v5043_v15, %v5042_v0  ;;  %v10595_v15 = vld [vmem:[%s13789_s4 + $0x40] sm:$0xff]  }
 0x88d   :  { %10238 = vmatprep.mubr.bf16.mxu1 %v5072_v61 }
 0x88f   :  { %10239 = vmatmul.mubr.bf16.gmra.mrb[164].mxu1 %v5073_v2 }
 0x8a7   :  { %v4941_v36 = vpop.permute.xlu0 %4940 }
 0x8a8   :  { %4980 = vst.msk [vmem:[#allocation3 + $0x40] sm:$0xff] %vm3722_vm3, %v4941_v36 }
 0x8a9   :  { %v4943_v14 = vpop.permute.xlu1 %4942 }
 0x8aa   :  { %4981 = vst.msk [vmem:[#allocation3 + $0x48] sm:$0xff] %vm3722_vm3, %v4943_v14 }
 0x8ab   :  { %v4945_v25 = vpop.permute.xlu0 %4944 }
 0x8ac   :  { %4982 = vst.msk [vmem:[#allocation3 + $0x50] sm:$0xff] %vm3722_vm3, %v4945_v25 }
 0x8ad   :  { %v4947_v4 = vpop.permute.xlu1 %4946 }
 0x8ae   :  { %4983 = vst.msk [vmem:[#allocation3 + $0x58] sm:$0xff] %vm3722_vm3, %v4947_v4 }
 0x8af   :  { %v4996_v5 = vld [vmem:[#allocation3 + $0x40] sm:$0xff] }
 0x8b0   :  { %v5013_v6 = vmul.f32 %v12723_v28, %v4996_v5 }
 0x8b1   :  { %v4997_v10 = vld [vmem:[#allocation3 + $0x48] sm:$0xff] }
 0x8b2   :  { %v5014_v11 = vmul.f32 %v12723_v28, %v4997_v10  ;;  %v5030_v12 = vadd.f32 %v12729_v32, %v5013_v6  ;;  %v10597_v6 = vld [vmem:[%s13789_s4 + $0x10] sm:$0xff]   ;;  %v10598_v10 = vld [vmem:[%s13789_s4 + $0x18] sm:$0xff]  }
 0x8b3   :  { %v4998_v13 = vld [vmem:[#allocation3 + $0x50] sm:$0xff] }
 0x8b4   :  { %v5031_v16 = vadd.f32 %v12729_v32, %v5014_v11  ;;  %v5046_v18 = vmax.f32 %v5030_v12, 0.0  ;;  %v5015_v19 = vmul.f32 %v12723_v28, %v4998_v13  ;;  %v10599_v11 = vld [vmem:[%s13789_s4 + $0x20] sm:$0xff]   ;;  %v10600_v12 = vld [vmem:[%s13789_s4 + $0x28] sm:$0xff]   ;;  %v10601_v13 = vld [vmem:[%s13789_s4 + $0x30] sm:$0xff]  }
 0x8b5   :  { %v4999_v20 = vld [vmem:[#allocation3 + $0x58] sm:$0xff] }
 0x8b6   :  { %v5047_v21 = vmax.f32 %v5031_v16, 0.0  ;;  %v5016_v22 = vmul.f32 %v12723_v28, %v4999_v20  ;;  %v5032_v23 = vadd.f32 %v12729_v32, %v5015_v19  ;;  %v10602_v16 = vld [vmem:[%s13789_s4 + $0x38] sm:$0xff]  }
 0x8b7   :  { %v4949_v24 = vpop.permute.xlu0 %4948 }
 0x8b8   :  { %4984 = vst.msk [vmem:[#allocation3 + $0x60] sm:$0xff] %vm3722_vm3, %v4949_v24  ;;  %v5074_v26 = vpack.c.bf16 %v5047_v21, %v5046_v18  ;;  %v5033_v27 = vadd.f32 %v12729_v32, %v5016_v22  ;;  %v5048_v29 = vmax.f32 %v5032_v23, 0.0  ;;  %v12830_v23 = vld [vmem:[%s13791_s3 + $0x26] ss:$0 sm:$0xff] }
 0x8b9   :  { %v4951_v30 = vpop.permute.xlu1 %4950 }
 0x8ba   :  { %4985 = vst.msk [vmem:[#allocation3 + $0x68] sm:$0xff] %vm3722_vm3, %v4951_v30  ;;  %10242 = vmatprep.mubr.bf16.mxu1 %v5074_v26  ;;  %v5049_v1 = vmax.f32 %v5033_v27, 0.0 }
 0x8bb   :  { %v4953_v58 = vpop.permute.xlu0 %4952 }
 0x8bc   :  { %4986 = vst.msk [vmem:[#allocation3 + $0x70] sm:$0xff] %vm3722_vm3, %v4953_v58  ;;  %v5075_v33 = vpack.c.bf16 %v5049_v1, %v5048_v29 }
 0x8bd   :  { %v4955_v34 = vpop.permute.xlu1 %4954 }
 0x8be   :  { %4987 = vst.msk [vmem:[#allocation3 + $0x78] sm:$0xff] %vm3722_vm3, %v4955_v34  ;;  %10243 = vmatmul.mubr.bf16.gmra.mrb[168].mxu1 %v5075_v33  ;;  %v12840_v34 = vld [vmem:[%s13791_s3 + $0x27] ss:$0 sm:$0xff] }
 0x8bf   :  { %v5000_v9 = vld [vmem:[#allocation3 + $0x60] sm:$0xff]  ;;  %v5451_v54 = vpop.permute.xlu0 %5450 }
 0x8c0   :  { %v5017_v35 = vmul.f32 %v12723_v28, %v5000_v9  ;;  %10250 = vmatprep.subr.bf16.mxu0 %v5451_v54 }
 0x8c1   :  { %v5001_v37 = vld [vmem:[#allocation3 + $0x68] sm:$0xff]  ;;  %v5453_v55 = vpop.permute.xlu1 %5452  ;;  %10251 = vmatpush3.bf16.msra.mxu0 %v5451_v54 }
 0x8c2   :  { %v5018_v38 = vmul.f32 %v12723_v28, %v5001_v37  ;;  %v5034_v39 = vadd.f32 %v12729_v32, %v5017_v35  ;;  %10252 = vmatprep.subr.bf16.mxu0 %v5453_v55 }
 0x8c3   :  { %v5002_v40 = vld [vmem:[#allocation3 + $0x70] sm:$0xff]  ;;  %v5455_v56 = vpop.permute.xlu0 %5454 }
 0x8c4   :  { %v5035_v17 = vadd.f32 %v12729_v32, %v5018_v38  ;;  %v5050_v41 = vmax.f32 %v5034_v39, 0.0  ;;  %v5019_v42 = vmul.f32 %v12723_v28, %v5002_v40 }
 0x8c5   :  { %v5003_v43 = vld [vmem:[#allocation3 + $0x78] sm:$0xff]  ;;  %10253 = vmatpush3.bf16.msra.mxu0 %v5453_v55  ;;  %v5457_v57 = vpop.permute.xlu1 %5456 }
 0x8c6   :  { %v5051_v45 = vmax.f32 %v5035_v17, 0.0  ;;  %v5020_v47 = vmul.f32 %v12723_v28, %v5003_v43  ;;  %v5036_v48 = vadd.f32 %v12729_v32, %v5019_v42  ;;  %10254 = vmatprep.subr.bf16.mxu0 %v5455_v56 }
 0x8c7   :  { %v5459_v28 = vpop.permute.xlu0 %5458 }
 0x8c8   :  { %v5076_v49 = vpack.c.bf16 %v5051_v45, %v5050_v41  ;;  %v5037_v50 = vadd.f32 %v12729_v32, %v5020_v47  ;;  %v5052_v51 = vmax.f32 %v5036_v48, 0.0 }
 0x8c9   :  { %10255 = vmatpush3.bf16.msra.mxu0 %v5455_v56  ;;  %v5461_v32 = vpop.permute.xlu1 %5460 }
 0x8ca   :  { %10246 = vmatprep.mubr.bf16.mxu1 %v5076_v49  ;;  %v5053_v52 = vmax.f32 %v5037_v50, 0.0  ;;  %10256 = vmatprep.subr.bf16.mxu0 %v5457_v57 }
 0x8cc   :  { %v5077_v53 = vpack.c.bf16 %v5053_v52, %v5052_v51 }
 0x8cd   :  { %10257 = vmatpush3.bf16.msra.mxu0 %v5457_v57 }
 0x8ce   :  { %10247 = vmatmul.mubr.bf16.gmra.mrb[172].mxu1 %v5077_v53  ;;  %10258 = vmatprep.subr.bf16.mxu0 %v5459_v28 }
 0x8d1   :  { %10259 = vmatpush3.bf16.msra.mxu0 %v5459_v28 }
 0x8d2   :  { %10260 = vmatprep.subr.bf16.mxu0 %v5461_v32 }
 0x8d5   :  { %10261 = vmatpush3.bf16.msra.mxu0 %v5461_v32 }
 0x95a   :  { %v10236_v59 = vpop.f32.mrb[160].mxu1 }
 0x95b   :  { %5259 = vrot.lane.b32.xlu0 %v10236_v59, %s10849_s8  ;;  %v5176_v60 = vpop.f32.mrb[161].mxu1 }
 0x95c   :  { %v10237_v44 = vpop.f32.mrb[162].mxu1 }
 0x95d   :  { %5261 = vrot.lane.b32.xlu1 %v10237_v44, %s10849_s8  ;;  %v5179_v3 = vpop.f32.mrb[163].mxu1 }
 0x95f   :  { %5255 = vrot.lane.b32.xlu0 %v5176_v60, %s10849_s8 }
 0x961   :  { %5257 = vrot.lane.b32.xlu1 %v5179_v3, %s10849_s8 }
 0x962   :  { %v10240_v46 = vpop.f32.mrb[164].mxu1 }
 0x963   :  { %5267 = vrot.lane.b32.xlu0 %v10240_v46, %s10849_s8  ;;  %v5192_v62 = vpop.f32.mrb[165].mxu1 }
 0x964   :  { %v10241_v63 = vpop.f32.mrb[166].mxu1 }
 0x965   :  { %5269 = vrot.lane.b32.xlu1 %v10241_v63, %s10849_s8  ;;  %v5195_v0 = vpop.f32.mrb[167].mxu1 }
 0x967   :  { %5263 = vrot.lane.b32.xlu0 %v5192_v62, %s10849_s8 }
 0x969   :  { %5265 = vrot.lane.b32.xlu1 %v5195_v0, %s10849_s8 }
 0x96b   :  { %5462 = vrot.lane.b32.xlu0 %v10595_v15, %s10847_s0 }
 0x96d   :  { %5464 = vrot.lane.b32.xlu1 %v10596_v8, %s10847_s0  ;;  %s10854_s0 = smov 24  }
 0x991   :  { %v10244_v61 = vpop.f32.mrb[168].mxu1 }
 0x992   :  { %v5208_v31 = vpop.f32.mrb[169].mxu1 }
 0x993   :  { %v10245_v2 = vpop.f32.mrb[170].mxu1  ;;  %5271 = vrot.lane.b32.xlu0 %v5208_v31, %s10849_s8 }
 0x994   :  { %v5211_v36 = vpop.f32.mrb[171].mxu1 }
 0x995   :  { %5273 = vrot.lane.b32.xlu1 %v5211_v36, %s10849_s8 }
 0x997   :  { %5275 = vrot.lane.b32.xlu0 %v10244_v61, %s10849_s8 }
 0x999   :  { %5277 = vrot.lane.b32.xlu1 %v10245_v2, %s10849_s8 }
 0x9a1   :  { %v10248_v14 = vpop.f32.mrb[172].mxu1 }
 0x9a2   :  { %v5224_v25 = vpop.f32.mrb[173].mxu1 }
 0x9a3   :  { %v10249_v4 = vpop.f32.mrb[174].mxu1  ;;  %5279 = vrot.lane.b32.xlu0 %v5224_v25, %s10849_s8 }
 0x9a4   :  { %v5227_v5 = vpop.f32.mrb[175].mxu1 }
 0x9a5   :  { %5281 = vrot.lane.b32.xlu1 %v5227_v5, %s10849_s8 }
 0x9a7   :  { %5283 = vrot.lane.b32.xlu0 %v10248_v14, %s10849_s8 }
 0x9a9   :  { %5285 = vrot.lane.b32.xlu1 %v10249_v4, %s10849_s8 }
 0x9ab   :  { %5782 = vrot.lane.b32.xlu0 %v10597_v6, %s10845_s15 }
 0x9ad   :  { %5784 = vrot.lane.b32.xlu1 %v10598_v10, %s10845_s15 }
 0x9af   :  { %5786 = vrot.lane.b32.xlu0 %v10599_v11, %s10845_s15 }
 0x9b1   :  { %5788 = vrot.lane.b32.xlu1 %v10600_v12, %s10845_s15 }
 0x9b3   :  { %5790 = vrot.lane.b32.xlu0 %v10601_v13, %s10845_s15 }
 0x9b5   :  { %5792 = vrot.lane.b32.xlu1 %v10602_v16, %s10845_s15 }
 0x9cd   :  { %v5260_v18 = vpop.permute.xlu0 %5259 }
 0x9ce   :  { %5306 = vst.msk [vmem:[#allocation3 + $0x10] sm:$0xff] %vm5303_vm5, %v5260_v18 }
 0x9cf   :  { %v5262_v19 = vpop.permute.xlu1 %5261 }
 0x9d0   :  { %5307 = vst.msk [vmem:[#allocation3 + $0x18] sm:$0xff] %vm5303_vm5, %v5262_v19 }
 0x9d1   :  { %v5256_v20 = vpop.permute.xlu0 %5255 }
 0x9d2   :  { %5304 = vst.msk [vmem:[#allocation3] sm:$0xff] %vm5303_vm5, %v5256_v20 }
 0x9d3   :  { %v5258_v21 = vpop.permute.xlu1 %5257 }
 0x9d4   :  { %5305 = vst.msk [vmem:[#allocation3 + $0x8] sm:$0xff] %vm5303_vm5, %v5258_v21 }
 0x9d5   :  { %v5268_v22 = vpop.permute.xlu0 %5267  ;;  %v5322_v24 = vld [vmem:[#allocation3 + $0x10] sm:$0xff] }
 0x9d6   :  { %5310 = vst.msk [vmem:[#allocation3 + $0x30] sm:$0xff] %vm5303_vm5, %v5268_v22  ;;  %v5339_v58 = vmul.f32 %v12830_v23, %v5322_v24 }
 0x9d7   :  { %v5270_v26 = vpop.permute.xlu1 %5269  ;;  %v5323_v27 = vld [vmem:[#allocation3 + $0x18] sm:$0xff] }
 0x9d8   :  { %5311 = vst.msk [vmem:[#allocation3 + $0x38] sm:$0xff] %vm5303_vm5, %v5270_v26  ;;  %v5340_v29 = vmul.f32 %v12830_v23, %v5323_v27  ;;  %v5356_v17 = vadd.f32 %v12840_v34, %v5339_v58 }
 0x9d9   :  { %v5264_v30 = vpop.permute.xlu0 %5263  ;;  %v5320_v1 = vld [vmem:[#allocation3] sm:$0xff] }
 0x9da   :  { %5308 = vst.msk [vmem:[#allocation3 + $0x20] sm:$0xff] %vm5303_vm5, %v5264_v30  ;;  %v5337_v33 = vmul.f32 %v12830_v23, %v5320_v1  ;;  %v5357_v37 = vadd.f32 %v12840_v34, %v5340_v29  ;;  %v5372_v51 = vmax.f32 %v5356_v17, 0.0 }
 0x9db   :  { %v5266_v9 = vpop.permute.xlu1 %5265  ;;  %v5321_v35 = vld [vmem:[#allocation3 + $0x8] sm:$0xff] }
 0x9dc   :  { %5309 = vst.msk [vmem:[#allocation3 + $0x28] sm:$0xff] %vm5303_vm5, %v5266_v9  ;;  %v5338_v38 = vmul.f32 %v12830_v23, %v5321_v35  ;;  %v5354_v39 = vadd.f32 %v12840_v34, %v5337_v33  ;;  %v5373_v43 = vmax.f32 %v5357_v37, 0.0 }
 0x9dd   :  { %v5463_v40 = vpop.permute.xlu0 %5462  ;;  %v5326_v45 = vld [vmem:[#allocation3 + $0x30] sm:$0xff] }
 0x9de   :  { %10262 = vmatprep.subr.bf16.mxu0 %v5463_v40  ;;  %v5355_v41 = vadd.f32 %v12840_v34, %v5338_v38  ;;  %v5370_v48 = vmax.f32 %v5354_v39, 0.0  ;;  %v5343_v55 = vmul.f32 %v12830_v23, %v5326_v45  ;;  %v5403_v56 = vpack.c.bf16 %v5373_v43, %v5372_v51 }
 0x9df   :  { %10263 = vmatpush3.bf16.msra.mxu0 %v5463_v40  ;;  %v5465_v42 = vpop.permute.xlu1 %5464  ;;  %v5327_v47 = vld [vmem:[#allocation3 + $0x38] sm:$0xff] }
 0x9e0   :  { %10264 = vmatprep.subr.bf16.mxu0 %v5465_v42  ;;  %v5371_v49 = vmax.f32 %v5355_v41, 0.0  ;;  %v5344_v50 = vmul.f32 %v12830_v23, %v5327_v47  ;;  %v5360_v44 = vadd.f32 %v12840_v34, %v5343_v55 }
 0x9e1   :  { %v5324_v52 = vld [vmem:[#allocation3 + $0x20] sm:$0xff] }
 0x9e2   :  { %v5402_v53 = vpack.c.bf16 %v5371_v49, %v5370_v48  ;;  %v5341_v54 = vmul.f32 %v12830_v23, %v5324_v52  ;;  %v5361_v59 = vadd.f32 %v12840_v34, %v5344_v50  ;;  %v5376_v0 = vmax.f32 %v5360_v44, 0.0 }
 0x9e3   :  { %10265 = vmatpush3.bf16.msra.mxu0 %v5465_v42  ;;  %v5325_v57 = vld [vmem:[#allocation3 + $0x28] sm:$0xff] }
 0x9e4   :  { %10266 = vmatprep.mubr.bf16.mxu0 %v5402_v53  ;;  %v5342_v28 = vmul.f32 %v12830_v23, %v5325_v57  ;;  %v5358_v32 = vadd.f32 %v12840_v34, %v5341_v54  ;;  %10314 = vmatprep.subr.bf16.mxu0 %v10843_v7  ;;  %v5377_v62 = vmax.f32 %v5361_v59, 0.0 }
 0x9e6   :  { %10267 = vmatmul.mubr.bf16.vlgmr.msra.gmra.mrb[208].mxu0 %v5403_v56  ;;  %v5359_v60 = vadd.f32 %v12840_v34, %v5342_v28  ;;  %v5374_v3 = vmax.f32 %v5358_v32, 0.0  ;;  %v5405_v15 = vpack.c.bf16 %v5377_v62, %v5376_v0  ;;  %v10604_v62 = vld [vmem:[%s13789_s4 + $0x48] sm:$0xff]  }
 0x9e8   :  { %v5375_v46 = vmax.f32 %v5359_v60, 0.0 }
 0x9ea   :  { %v5404_v63 = vpack.c.bf16 %v5375_v46, %v5374_v3  ;;  %v10603_v46 = vld [vmem:[%s13789_s4 + $0x40] sm:$0xff]  }
 0x9ec   :  { %10270 = vmatprep.mubr.bf16.mxu0 %v5404_v63 }
 0x9ee   :  { %10271 = vmatmul.mubr.bf16.gmra.mrb[212].mxu0 %v5405_v15 }
 0xa05   :  { %v5272_v8 = vpop.permute.xlu0 %5271 }
 0xa06   :  { %5312 = vst.msk [vmem:[#allocation3 + $0x40] sm:$0xff] %vm5303_vm5, %v5272_v8 }
 0xa07   :  { %v5274_v61 = vpop.permute.xlu1 %5273 }
 0xa08   :  { %5313 = vst.msk [vmem:[#allocation3 + $0x48] sm:$0xff] %vm5303_vm5, %v5274_v61 }
 0xa09   :  { %v5276_v31 = vpop.permute.xlu0 %5275 }
 0xa0a   :  { %5314 = vst.msk [vmem:[#allocation3 + $0x50] sm:$0xff] %vm5303_vm5, %v5276_v31 }
 0xa0b   :  { %v5278_v2 = vpop.permute.xlu1 %5277 }
 0xa0c   :  { %5315 = vst.msk [vmem:[#allocation3 + $0x58] sm:$0xff] %vm5303_vm5, %v5278_v2 }
 0xa0d   :  { %v5328_v36 = vld [vmem:[#allocation3 + $0x40] sm:$0xff] }
 0xa0e   :  { %v5345_v14 = vmul.f32 %v12830_v23, %v5328_v36 }
 0xa0f   :  { %v5329_v25 = vld [vmem:[#allocation3 + $0x48] sm:$0xff] }
 0xa10   :  { %v5346_v4 = vmul.f32 %v12830_v23, %v5329_v25  ;;  %v5362_v5 = vadd.f32 %v12840_v34, %v5345_v14  ;;  %v9376_v14 = vld [vmem:[%s13789_s4 + $0x98] sm:$0xff]  }
 0xa11   :  { %v5330_v6 = vld [vmem:[#allocation3 + $0x50] sm:$0xff]  ;;  %v9374_v25 = vunpack.c.l.bf16 %v9376_v14 }
 0xa12   :  { %v5363_v10 = vadd.f32 %v12840_v34, %v5346_v4  ;;  %v5378_v11 = vmax.f32 %v5362_v5, 0.0  ;;  %v5347_v12 = vmul.f32 %v12830_v23, %v5330_v6  ;;  %v6099_v4 = vld [vmem:[%s13793_s1] sm:$0xff]  ;;  %v9375_v6 = vunpack.c.h.bf16 %v9376_v14 }
 0xa13   :  { %v5331_v13 = vld [vmem:[#allocation3 + $0x58] sm:$0xff]  ;;  %v12911_v5 = vadd.f32 %v9374_v25, %v6099_v4 }
 0xa14   :  { %v5379_v16 = vmax.f32 %v5363_v10, 0.0  ;;  %v5348_v18 = vmul.f32 %v12830_v23, %v5331_v13  ;;  %v5364_v19 = vadd.f32 %v12840_v34, %v5347_v12 }
 0xa15   :  { %v5280_v20 = vpop.permute.xlu0 %5279  ;;  %v6109_v10 = vsel %vm219_vm0, %v12911_v5, 0.0 }
 0xa16   :  { %5316 = vst.msk [vmem:[#allocation3 + $0x60] sm:$0xff] %vm5303_vm5, %v5280_v20  ;;  %v5406_v21 = vpack.c.bf16 %v5379_v16, %v5378_v11  ;;  %v5365_v22 = vadd.f32 %v12840_v34, %v5348_v18  ;;  %v5380_v24 = vmax.f32 %v5364_v19, 0.0  ;;  %v6100_v11 = vld [vmem:[%s13793_s1 + $0x8] sm:$0xff] }
 0xa17   :  { %v5282_v26 = vpop.permute.xlu1 %5281  ;;  %v12918_v12 = vadd.f32 %v9375_v6, %v6100_v11 }
 0xa18   :  { %5317 = vst.msk [vmem:[#allocation3 + $0x68] sm:$0xff] %vm5303_vm5, %v5282_v26  ;;  %10274 = vmatprep.mubr.bf16.mxu0 %v5406_v21  ;;  %v5381_v27 = vmax.f32 %v5365_v22, 0.0  ;;  %v12930_v22 = vld [vmem:[%s13791_s3 + $0x40] ss:$0 sm:$0xff] }
 0xa19   :  { %v5284_v29 = vpop.permute.xlu0 %5283  ;;  %v6112_v13 = vsel %vm219_vm0, %v12918_v12, 0.0 }
 0xa1a   :  { %5318 = vst.msk [vmem:[#allocation3 + $0x70] sm:$0xff] %vm5303_vm5, %v5284_v29  ;;  %v5407_v30 = vpack.c.bf16 %v5381_v27, %v5380_v24 }
 0xa1b   :  { %v5286_v1 = vpop.permute.xlu1 %5285 }
 0xa1c   :  { %5319 = vst.msk [vmem:[#allocation3 + $0x78] sm:$0xff] %vm5303_vm5, %v5286_v1  ;;  %10275 = vmatmul.mubr.bf16.gmra.mrb[216].mxu0 %v5407_v30 }
 0xa1d   :  { %v5332_v58 = vld [vmem:[#allocation3 + $0x60] sm:$0xff]  ;;  %v5783_v52 = vpop.permute.xlu0 %5782 }
 0xa1e   :  { %v5349_v33 = vmul.f32 %v12830_v23, %v5332_v58  ;;  %10282 = vmatprep.subr.bf16.mxu1 %v5783_v52 }
 0xa1f   :  { %v5333_v9 = vld [vmem:[#allocation3 + $0x68] sm:$0xff]  ;;  %v5785_v53 = vpop.permute.xlu1 %5784  ;;  %10283 = vmatpush3.bf16.msra.mxu1 %v5783_v52 }
 0xa20   :  { %v5350_v35 = vmul.f32 %v12830_v23, %v5333_v9  ;;  %v5366_v37 = vadd.f32 %v12840_v34, %v5349_v33  ;;  %10284 = vmatprep.subr.bf16.mxu1 %v5785_v53  ;;  %v12940_v9 = vld [vmem:[%s13791_s3 + $0x41] ss:$0 sm:$0xff] }
 0xa21   :  { %v5334_v38 = vld [vmem:[#allocation3 + $0x70] sm:$0xff]  ;;  %v5787_v54 = vpop.permute.xlu0 %5786 }
 0xa22   :  { %v5367_v39 = vadd.f32 %v12840_v34, %v5350_v35  ;;  %v5382_v40 = vmax.f32 %v5366_v37, 0.0  ;;  %v5351_v17 = vmul.f32 %v12830_v23, %v5334_v38 }
 0xa23   :  { %v5335_v41 = vld [vmem:[#allocation3 + $0x78] sm:$0xff]  ;;  %10285 = vmatpush3.bf16.msra.mxu1 %v5785_v53  ;;  %v5789_v55 = vpop.permute.xlu1 %5788 }
 0xa24   :  { %v5383_v42 = vmax.f32 %v5367_v39, 0.0  ;;  %v5352_v43 = vmul.f32 %v12830_v23, %v5335_v41  ;;  %v5368_v45 = vadd.f32 %v12840_v34, %v5351_v17  ;;  %10286 = vmatprep.subr.bf16.mxu1 %v5787_v54 }
 0xa25   :  { %v5791_v23 = vpop.permute.xlu0 %5790 }
 0xa26   :  { %v5408_v47 = vpack.c.bf16 %v5383_v42, %v5382_v40  ;;  %v5369_v48 = vadd.f32 %v12840_v34, %v5352_v43  ;;  %v5384_v49 = vmax.f32 %v5368_v45, 0.0 }
 0xa27   :  { %10287 = vmatpush3.bf16.msra.mxu1 %v5787_v54  ;;  %v5793_v34 = vpop.permute.xlu1 %5792 }
 0xa28   :  { %10278 = vmatprep.mubr.bf16.mxu0 %v5408_v47  ;;  %v5385_v50 = vmax.f32 %v5369_v48, 0.0  ;;  %10288 = vmatprep.subr.bf16.mxu1 %v5789_v55 }
 0xa2a   :  { %v5409_v51 = vpack.c.bf16 %v5385_v50, %v5384_v49 }
 0xa2b   :  { %10289 = vmatpush3.bf16.msra.mxu1 %v5789_v55 }
 0xa2c   :  { %10279 = vmatmul.mubr.bf16.gmra.mrb[220].mxu0 %v5409_v51  ;;  %10290 = vmatprep.subr.bf16.mxu1 %v5791_v23 }
 0xa2d   :  { %10330 = vmatprep.mubr.msk.bf16.mxu0 %vm10850_vm7, %v10843_v7 }
 0xa2f   :  { %10291 = vmatpush3.bf16.msra.mxu1 %v5791_v23 }
 0xa30   :  { %10292 = vmatprep.subr.bf16.mxu1 %v5793_v34 }
 0xa33   :  { %10293 = vmatpush3.bf16.msra.mxu1 %v5793_v34 }
 0xab9   :  { %v10268_v56 = vpop.f32.mrb[208].mxu0 }
 0xaba   :  { %5591 = vrot.lane.b32.xlu0 %v10268_v56, %s10846_s29  ;;  %v5508_v57 = vpop.f32.mrb[209].mxu0 }
 0xabb   :  { %v10269_v28 = vpop.f32.mrb[210].mxu0 }
 0xabc   :  { %5593 = vrot.lane.b32.xlu1 %v10269_v28, %s10846_s29  ;;  %v5511_v32 = vpop.f32.mrb[211].mxu0 }
 0xabe   :  { %5587 = vrot.lane.b32.xlu0 %v5508_v57, %s10846_s29 }
 0xac0   :  { %5589 = vrot.lane.b32.xlu1 %v5511_v32, %s10846_s29 }
 0xac1   :  { %v10272_v59 = vpop.f32.mrb[212].mxu0 }
 0xac2   :  { %5599 = vrot.lane.b32.xlu0 %v10272_v59, %s10846_s29  ;;  %v5524_v60 = vpop.f32.mrb[213].mxu0 }
 0xac3   :  { %v10273_v44 = vpop.f32.mrb[214].mxu0 }
 0xac4   :  { %5601 = vrot.lane.b32.xlu1 %v10273_v44, %s10846_s29  ;;  %v5527_v3 = vpop.f32.mrb[215].mxu0 }
 0xac6   :  { %5595 = vrot.lane.b32.xlu0 %v5524_v60, %s10846_s29 }
 0xac8   :  { %5597 = vrot.lane.b32.xlu1 %v5527_v3, %s10846_s29 }
 0xaca   :  { %5794 = vrot.lane.b32.xlu0 %v10603_v46, %s10845_s15 }
 0xacc   :  { %5796 = vrot.lane.b32.xlu1 %v10604_v62, %s10845_s15 }
 0xaef   :  { %v10276_v63 = vpop.f32.mrb[216].mxu0 }
 0xaf0   :  { %v5540_v0 = vpop.f32.mrb[217].mxu0 }
 0xaf1   :  { %v10277_v15 = vpop.f32.mrb[218].mxu0  ;;  %5603 = vrot.lane.b32.xlu0 %v5540_v0, %s10846_s29 }
 0xaf2   :  { %v5543_v8 = vpop.f32.mrb[219].mxu0 }
 0xaf3   :  { %5605 = vrot.lane.b32.xlu1 %v5543_v8, %s10846_s29 }
 0xaf5   :  { %5607 = vrot.lane.b32.xlu0 %v10276_v63, %s10846_s29 }
 0xaf7   :  { %5609 = vrot.lane.b32.xlu1 %v10277_v15, %s10846_s29 }
 0xaff   :  { %v10280_v61 = vpop.f32.mrb[220].mxu0 }
 0xb00   :  { %v5556_v31 = vpop.f32.mrb[221].mxu0 }
 0xb01   :  { %v10281_v2 = vpop.f32.mrb[222].mxu0  ;;  %5611 = vrot.lane.b32.xlu0 %v5556_v31, %s10846_s29 }
 0xb02   :  { %v5559_v36 = vpop.f32.mrb[223].mxu0 }
 0xb03   :  { %5613 = vrot.lane.b32.xlu1 %v5559_v36, %s10846_s29 }
 0xb05   :  { %5615 = vrot.lane.b32.xlu0 %v10280_v61, %s10846_s29 }
 0xb07   :  { %5617 = vrot.lane.b32.xlu1 %v10281_v2, %s10846_s29 }
 0xb24   :  { %6110 = vadd.xlane.f32.xlu0 %v6109_v10 }
 0xb2b   :  { %6113 = vadd.xlane.f32.xlu1 %v6112_v13 }
 0xb2c   :  { %v5592_v16 = vpop.permute.xlu0 %5591 }
 0xb2d   :  { %5638 = vst.msk [vmem:[#allocation3 + $0x10] sm:$0xff] %vm5635_vm6, %v5592_v16 }
 0xb2e   :  { %v5594_v18 = vpop.permute.xlu1 %5593 }
 0xb2f   :  { %5639 = vst.msk [vmem:[#allocation3 + $0x18] sm:$0xff] %vm5635_vm6, %v5594_v18 }
 0xb30   :  { %v5588_v19 = vpop.permute.xlu0 %5587 }
 0xb31   :  { %5636 = vst.msk [vmem:[#allocation3] sm:$0xff] %vm5635_vm6, %v5588_v19 }
 0xb32   :  { %v5590_v20 = vpop.permute.xlu1 %5589 }
 0xb33   :  { %5637 = vst.msk [vmem:[#allocation3 + $0x8] sm:$0xff] %vm5635_vm6, %v5590_v20 }
 0xb34   :  { %v5600_v21 = vpop.permute.xlu0 %5599  ;;  %v5654_v24 = vld [vmem:[#allocation3 + $0x10] sm:$0xff] }
 0xb35   :  { %5642 = vst.msk [vmem:[#allocation3 + $0x30] sm:$0xff] %vm5635_vm6, %v5600_v21  ;;  %v5671_v58 = vmul.f32 %v12930_v22, %v5654_v24 }
 0xb36   :  { %v5602_v26 = vpop.permute.xlu1 %5601  ;;  %v5655_v27 = vld [vmem:[#allocation3 + $0x18] sm:$0xff] }
 0xb37   :  { %5643 = vst.msk [vmem:[#allocation3 + $0x38] sm:$0xff] %vm5635_vm6, %v5602_v26  ;;  %v5672_v29 = vmul.f32 %v12930_v22, %v5655_v27  ;;  %v5688_v41 = vadd.f32 %v12940_v9, %v5671_v58 }
 0xb38   :  { %v5596_v30 = vpop.permute.xlu0 %5595  ;;  %v5652_v1 = vld [vmem:[#allocation3] sm:$0xff] }
 0xb39   :  { %5640 = vst.msk [vmem:[#allocation3 + $0x20] sm:$0xff] %vm5635_vm6, %v5596_v30  ;;  %v5669_v33 = vmul.f32 %v12930_v22, %v5652_v1  ;;  %v5689_v38 = vadd.f32 %v12940_v9, %v5672_v29  ;;  %v5704_v52 = vmax.f32 %v5688_v41, 0.0 }
 0xb3a   :  { %v5598_v35 = vpop.permute.xlu1 %5597  ;;  %v5653_v37 = vld [vmem:[#allocation3 + $0x8] sm:$0xff] }
 0xb3b   :  { %5641 = vst.msk [vmem:[#allocation3 + $0x28] sm:$0xff] %vm5635_vm6, %v5598_v35  ;;  %v5670_v39 = vmul.f32 %v12930_v22, %v5653_v37  ;;  %v5686_v40 = vadd.f32 %v12940_v9, %v5669_v33  ;;  %v5705_v45 = vmax.f32 %v5689_v38, 0.0 }
 0xb3c   :  { %v5795_v17 = vpop.permute.xlu0 %5794  ;;  %v5658_v47 = vld [vmem:[#allocation3 + $0x30] sm:$0xff] }
 0xb3d   :  { %10294 = vmatprep.subr.bf16.mxu1 %v5795_v17  ;;  %v5687_v42 = vadd.f32 %v12940_v9, %v5670_v39  ;;  %v5702_v49 = vmax.f32 %v5686_v40, 0.0  ;;  %v5675_v23 = vmul.f32 %v12930_v22, %v5658_v47  ;;  %v5735_v34 = vpack.c.bf16 %v5705_v45, %v5704_v52 }
 0xb3e   :  { %10295 = vmatpush3.bf16.msra.mxu1 %v5795_v17  ;;  %v5797_v43 = vpop.permute.xlu1 %5796  ;;  %v5659_v48 = vld [vmem:[#allocation3 + $0x38] sm:$0xff] }
 0xb3f   :  { %10296 = vmatprep.subr.bf16.mxu1 %v5797_v43  ;;  %v5703_v50 = vmax.f32 %v5687_v42, 0.0  ;;  %v5676_v51 = vmul.f32 %v12930_v22, %v5659_v48  ;;  %v5692_v60 = vadd.f32 %v12940_v9, %v5675_v23 }
 0xb40   :  { %v5656_v53 = vld [vmem:[#allocation3 + $0x20] sm:$0xff] }
 0xb41   :  { %v5734_v54 = vpack.c.bf16 %v5703_v50, %v5702_v49  ;;  %v5673_v55 = vmul.f32 %v12930_v22, %v5656_v53  ;;  %v5693_v32 = vadd.f32 %v12940_v9, %v5676_v51  ;;  %v5708_v63 = vmax.f32 %v5692_v60, 0.0 }
 0xb42   :  { %10297 = vmatpush3.bf16.msra.mxu1 %v5797_v43  ;;  %v5657_v56 = vld [vmem:[#allocation3 + $0x28] sm:$0xff] }
 0xb43   :  { %10298 = vmatprep.mubr.bf16.mxu1 %v5734_v54  ;;  %v5674_v57 = vmul.f32 %v12930_v22, %v5657_v56  ;;  %v5690_v28 = vadd.f32 %v12940_v9, %v5673_v55  ;;  %10367 = vmatprep.subr.mxu1 %v10843_v7  ;;  %v5709_v46 = vmax.f32 %v5693_v32, 0.0 }
 0xb45   :  { %10299 = vmatmul.mubr.bf16.vlgmr.msra.gmra.mrb[176].mxu1 %v5735_v34  ;;  %v5691_v59 = vadd.f32 %v12940_v9, %v5674_v57  ;;  %v5706_v44 = vmax.f32 %v5690_v28, 0.0  ;;  %v5737_v0 = vpack.c.bf16 %v5709_v46, %v5708_v63 }
 0xb47   :  { %v5707_v3 = vmax.f32 %v5691_v59, 0.0 }
 0xb49   :  { %v5736_v62 = vpack.c.bf16 %v5707_v3, %v5706_v44 }
 0xb4b   :  { %10302 = vmatprep.mubr.bf16.mxu1 %v5736_v62 }
 0xb4d   :  { %10303 = vmatmul.mubr.bf16.gmra.mrb[180].mxu1 %v5737_v0 }
 0xb63   :  { %v5604_v15 = vpop.permute.xlu0 %5603 }
 0xb64   :  { %5644 = vst.msk [vmem:[#allocation3 + $0x40] sm:$0xff] %vm5635_vm6, %v5604_v15 }
 0xb65   :  { %v5606_v8 = vpop.permute.xlu1 %5605 }
 0xb66   :  { %5645 = vst.msk [vmem:[#allocation3 + $0x48] sm:$0xff] %vm5635_vm6, %v5606_v8 }
 0xb67   :  { %v5608_v61 = vpop.permute.xlu0 %5607 }
 0xb68   :  { %5646 = vst.msk [vmem:[#allocation3 + $0x50] sm:$0xff] %vm5635_vm6, %v5608_v61 }
 0xb69   :  { %v5610_v31 = vpop.permute.xlu1 %5609 }
 0xb6a   :  { %5647 = vst.msk [vmem:[#allocation3 + $0x58] sm:$0xff] %vm5635_vm6, %v5610_v31 }
 0xb6b   :  { %v5660_v2 = vld [vmem:[#allocation3 + $0x40] sm:$0xff] }
 0xb6c   :  { %v5677_v36 = vmul.f32 %v12930_v22, %v5660_v2 }
 0xb6d   :  { %v5661_v14 = vld [vmem:[#allocation3 + $0x48] sm:$0xff] }
 0xb6e   :  { %v5678_v25 = vmul.f32 %v12930_v22, %v5661_v14  ;;  %v5694_v4 = vadd.f32 %v12940_v9, %v5677_v36 }
 0xb6f   :  { %v5662_v6 = vld [vmem:[#allocation3 + $0x50] sm:$0xff] }
 0xb70   :  { %v5695_v10 = vadd.f32 %v12940_v9, %v5678_v25  ;;  %v5679_v11 = vmul.f32 %v12930_v22, %v5662_v6  ;;  %v5710_v16 = vmax.f32 %v5694_v4, 0.0 }
 0xb71   :  { %v5663_v13 = vld [vmem:[#allocation3 + $0x58] sm:$0xff] }
 0xb72   :  { %v5711_v18 = vmax.f32 %v5695_v10, 0.0  ;;  %v5680_v19 = vmul.f32 %v12930_v22, %v5663_v13  ;;  %v5696_v20 = vadd.f32 %v12940_v9, %v5679_v11 }
 0xb73   :  { %v5612_v21 = vpop.permute.xlu0 %5611 }
 0xb74   :  { %5648 = vst.msk [vmem:[#allocation3 + $0x60] sm:$0xff] %vm5635_vm6, %v5612_v21  ;;  %v5738_v24 = vpack.c.bf16 %v5711_v18, %v5710_v16  ;;  %v5697_v26 = vadd.f32 %v12940_v9, %v5680_v19  ;;  %v5712_v29 = vmax.f32 %v5696_v20, 0.0  ;;  %v13022_v20 = vld [vmem:[%s13791_s3 + $0x42] ss:$0 sm:$0xff] }
 0xb75   :  { %v5614_v27 = vpop.permute.xlu1 %5613 }
 0xb76   :  { %5649 = vst.msk [vmem:[#allocation3 + $0x68] sm:$0xff] %vm5635_vm6, %v5614_v27  ;;  %10306 = vmatprep.mubr.bf16.mxu1 %v5738_v24  ;;  %v5713_v30 = vmax.f32 %v5697_v26, 0.0 }
 0xb77   :  { %v5616_v1 = vpop.permute.xlu0 %5615 }
 0xb78   :  { %5650 = vst.msk [vmem:[#allocation3 + $0x70] sm:$0xff] %vm5635_vm6, %v5616_v1  ;;  %v5739_v58 = vpack.c.bf16 %v5713_v30, %v5712_v29  ;;  %v13030_v30 = vld [vmem:[%s13791_s3 + $0x43] ss:$0 sm:$0xff] }
 0xb79   :  { %v5618_v33 = vpop.permute.xlu1 %5617 }
 0xb7a   :  { %5651 = vst.msk [vmem:[#allocation3 + $0x78] sm:$0xff] %vm5635_vm6, %v5618_v33  ;;  %10307 = vmatmul.mubr.bf16.gmra.mrb[184].mxu1 %v5739_v58 }
 0xb7b   :  { %v5664_v35 = vld [vmem:[#allocation3 + $0x60] sm:$0xff] }
 0xb7c   :  { %v5681_v37 = vmul.f32 %v12930_v22, %v5664_v35 }
 0xb7d   :  { %v5665_v38 = vld [vmem:[#allocation3 + $0x68] sm:$0xff] }
 0xb7e   :  { %v5682_v39 = vmul.f32 %v12930_v22, %v5665_v38  ;;  %v5698_v40 = vadd.f32 %v12940_v9, %v5681_v37 }
 0xb7f   :  { %v5666_v17 = vld [vmem:[#allocation3 + $0x70] sm:$0xff] }
 0xb80   :  { %v5699_v41 = vadd.f32 %v12940_v9, %v5682_v39  ;;  %v5683_v42 = vmul.f32 %v12930_v22, %v5666_v17  ;;  %v5714_v45 = vmax.f32 %v5698_v40, 0.0 }
 0xb81   :  { %v5667_v43 = vld [vmem:[#allocation3 + $0x78] sm:$0xff] }
 0xb82   :  { %v5715_v47 = vmax.f32 %v5699_v41, 0.0  ;;  %v5684_v48 = vmul.f32 %v12930_v22, %v5667_v43  ;;  %v5700_v49 = vadd.f32 %v12940_v9, %v5683_v42 }
 0xb84   :  { %v5740_v50 = vpack.c.bf16 %v5715_v47, %v5714_v45  ;;  %v5701_v51 = vadd.f32 %v12940_v9, %v5684_v48  ;;  %v5716_v52 = vmax.f32 %v5700_v49, 0.0 }
 0xb86   :  { %10310 = vmatprep.mubr.bf16.mxu1 %v5740_v50  ;;  %v5717_v53 = vmax.f32 %v5701_v51, 0.0 }
 0xb88   :  { %v5741_v54 = vpack.c.bf16 %v5717_v53, %v5716_v52 }
 0xb8a   :  { %10311 = vmatmul.mubr.bf16.gmra.mrb[188].mxu1 %v5741_v54 }
 0xb8b   :  { %10369 = vmatprep.mubr.msk.f32.mxu1 %vm10850_vm7, %v10843_v7 }
 0xbb1   :  { %v6111_v32 = vpop.xlane.xlu0 %6110 }
 0xbb2   :  { %v6116_v59 = vmul.f32 0.03125, %v6111_v32 }
 0xbb4   :  { %v12990_v60 = vsub.f32 %v12911_v5, %v6116_v59 }
 0xbb6   :  { %v6120_v46 = vmul.f32 %v12990_v60, %v12990_v60 }
 0xbb8   :  { %v6114_v44 = vpop.xlane.xlu1 %6113  ;;  %v6122_v63 = vsel %vm219_vm0, %v6120_v46, 0.0 }
 0xbb9   :  { %v6117_v3 = vmul.f32 0.03125, %v6114_v44 }
 0xbbb   :  { %v12995_v62 = vsub.f32 %v12918_v12, %v6117_v3 }
 0xbbd   :  { %v6121_v0 = vmul.f32 %v12995_v62, %v12995_v62 }
 0xbbf   :  { %v6125_v15 = vsel %vm219_vm0, %v6121_v0, 0.0 }
 0xc18   :  { %v10300_v55 = vpop.f32.mrb[176].mxu1 }
 0xc19   :  { %5923 = vrot.lane.b32.xlu0 %v10300_v55, %s10844_s22  ;;  %v5840_v23 = vpop.f32.mrb[177].mxu1 }
 0xc1a   :  { %v10301_v34 = vpop.f32.mrb[178].mxu1 }
 0xc1b   :  { %5925 = vrot.lane.b32.xlu1 %v10301_v34, %s10844_s22  ;;  %v5843_v56 = vpop.f32.mrb[179].mxu1 }
 0xc1d   :  { %5919 = vrot.lane.b32.xlu0 %v5840_v23, %s10844_s22 }
 0xc1f   :  { %5921 = vrot.lane.b32.xlu1 %v5843_v56, %s10844_s22 }
 0xc20   :  { %v10304_v22 = vpop.f32.mrb[180].mxu1 }
 0xc21   :  { %5931 = vrot.lane.b32.xlu0 %v10304_v22, %s10844_s22  ;;  %v5856_v9 = vpop.f32.mrb[181].mxu1 }
 0xc22   :  { %v10305_v57 = vpop.f32.mrb[182].mxu1 }
 0xc23   :  { %5933 = vrot.lane.b32.xlu1 %v10305_v57, %s10844_s22  ;;  %v5859_v28 = vpop.f32.mrb[183].mxu1 }
 0xc25   :  { %5927 = vrot.lane.b32.xlu0 %v5856_v9, %s10844_s22 }
 0xc27   :  { %5929 = vrot.lane.b32.xlu1 %v5859_v28, %s10844_s22 }
 0xc44   :  { %6123 = vadd.xlane.f32.xlu0 %v6122_v63 }
 0xc4b   :  { %6126 = vadd.xlane.f32.xlu1 %v6125_v15 }
 0xc4d   :  { %v10308_v8 = vpop.f32.mrb[184].mxu1 }
 0xc4e   :  { %v5872_v5 = vpop.f32.mrb[185].mxu1 }
 0xc4f   :  { %v10309_v61 = vpop.f32.mrb[186].mxu1 }
 0xc50   :  { %v5875_v31 = vpop.f32.mrb[187].mxu1 }
 0xc5a   :  { %5935 = vrot.lane.b32.xlu0 %v5872_v5, %s10844_s22 }
 0xc5c   :  { %5937 = vrot.lane.b32.xlu1 %v5875_v31, %s10844_s22 }
 0xc5d   :  { %v10312_v2 = vpop.f32.mrb[188].mxu1 }
 0xc5e   :  { %5939 = vrot.lane.b32.xlu0 %v10308_v8, %s10844_s22  ;;  %v5888_v12 = vpop.f32.mrb[189].mxu1 }
 0xc5f   :  { %v10313_v36 = vpop.f32.mrb[190].mxu1 }
 0xc60   :  { %5941 = vrot.lane.b32.xlu1 %v10309_v61, %s10844_s22  ;;  %v5891_v14 = vpop.f32.mrb[191].mxu1 }
 0xc62   :  { %5943 = vrot.lane.b32.xlu0 %v5888_v12, %s10844_s22 }
 0xc64   :  { %5945 = vrot.lane.b32.xlu1 %v5891_v14, %s10844_s22 }
 0xc66   :  { %5947 = vrot.lane.b32.xlu0 %v10312_v2, %s10844_s22 }
 0xc68   :  { %5949 = vrot.lane.b32.xlu1 %v10313_v36, %s10844_s22 }
 0xc8b   :  { %v5924_v25 = vpop.permute.xlu0 %5923 }
 0xc8c   :  { %5970 = vst.msk [vmem:[#allocation3 + $0x10] sm:$0xff] %vm5967_vm8, %v5924_v25 }
 0xc8d   :  { %v5926_v4 = vpop.permute.xlu1 %5925 }
 0xc8e   :  { %5971 = vst.msk [vmem:[#allocation3 + $0x18] sm:$0xff] %vm5967_vm8, %v5926_v4 }
 0xc8f   :  { %v5920_v6 = vpop.permute.xlu0 %5919 }
 0xc90   :  { %5968 = vst.msk [vmem:[#allocation3] sm:$0xff] %vm5967_vm8, %v5920_v6 }
 0xc91   :  { %v5922_v10 = vpop.permute.xlu1 %5921 }
 0xc92   :  { %5969 = vst.msk [vmem:[#allocation3 + $0x8] sm:$0xff] %vm5967_vm8, %v5922_v10 }
 0xc93   :  { %v5932_v11 = vpop.permute.xlu0 %5931  ;;  %v5986_v21 = vld [vmem:[#allocation3 + $0x10] sm:$0xff] }
 0xc94   :  { %5974 = vst.msk [vmem:[#allocation3 + $0x30] sm:$0xff] %vm5967_vm8, %v5932_v11  ;;  %v6003_v33 = vmul.f32 %v13022_v20, %v5986_v21 }
 0xc95   :  { %v5934_v13 = vpop.permute.xlu1 %5933  ;;  %v5987_v16 = vld [vmem:[#allocation3 + $0x18] sm:$0xff] }
 0xc96   :  { %5975 = vst.msk [vmem:[#allocation3 + $0x38] sm:$0xff] %vm5967_vm8, %v5934_v13  ;;  %v6004_v26 = vmul.f32 %v13022_v20, %v5987_v16  ;;  %v6020_v17 = vadd.f32 %v13030_v30, %v6003_v33 }
 0xc97   :  { %v5928_v18 = vpop.permute.xlu0 %5927  ;;  %v5984_v19 = vld [vmem:[#allocation3] sm:$0xff] }
 0xc98   :  { %5972 = vst.msk [vmem:[#allocation3 + $0x20] sm:$0xff] %vm5967_vm8, %v5928_v18  ;;  %v6001_v24 = vmul.f32 %v13022_v20, %v5984_v19  ;;  %v6021_v37 = vadd.f32 %v13030_v30, %v6004_v26  ;;  %v6036_v50 = vmax.f32 %v6020_v17, 0.0 }
 0xc99   :  { %v5930_v27 = vpop.permute.xlu1 %5929  ;;  %v5985_v29 = vld [vmem:[#allocation3 + $0x8] sm:$0xff] }
 0xc9a   :  { %5973 = vst.msk [vmem:[#allocation3 + $0x28] sm:$0xff] %vm5967_vm8, %v5930_v27  ;;  %v6002_v1 = vmul.f32 %v13022_v20, %v5985_v29  ;;  %v6018_v58 = vadd.f32 %v13030_v30, %v6001_v24  ;;  %v6037_v45 = vmax.f32 %v6021_v37, 0.0 }
 0xc9b   :  { %v5990_v42 = vld [vmem:[#allocation3 + $0x30] sm:$0xff] }
 0xc9c   :  { %v6019_v35 = vadd.f32 %v13030_v30, %v6002_v1  ;;  %v6034_v39 = vmax.f32 %v6018_v58, 0.0  ;;  %v6007_v53 = vmul.f32 %v13022_v20, %v5990_v42  ;;  %v6052_v54 = vpack.c.bf16 %v6037_v45, %v6036_v50 }
 0xc9d   :  { %v5991_v38 = vld [vmem:[#allocation3 + $0x38] sm:$0xff] }
 0xc9e   :  { %v6035_v40 = vmax.f32 %v6019_v35, 0.0  ;;  %v6008_v48 = vmul.f32 %v13022_v20, %v5991_v38  ;;  %v6024_v22 = vadd.f32 %v13030_v30, %v6007_v53 }
 0xc9f   :  { %v5988_v41 = vld [vmem:[#allocation3 + $0x20] sm:$0xff] }
 0xca0   :  { %v6051_v43 = vpack.c.bf16 %v6035_v40, %v6034_v39  ;;  %v6005_v47 = vmul.f32 %v13022_v20, %v5988_v41  ;;  %v6025_v23 = vadd.f32 %v13030_v30, %v6008_v48  ;;  %v6040_v28 = vmax.f32 %v6024_v22, 0.0  ;;  %v10605_v22 = vld [vmem:[%s13789_s4 + $0xa0] sm:$0xff]  }
 0xca1   :  { %v5989_v49 = vld [vmem:[#allocation3 + $0x28] sm:$0xff] }
 0xca2   :  { %10315 = vmatpush3.bf16.msra.mxu0 %v6051_v43  ;;  %v6006_v51 = vmul.f32 %v13022_v20, %v5989_v49  ;;  %v6022_v52 = vadd.f32 %v13030_v30, %v6005_v47  ;;  %v6041_v57 = vmax.f32 %v6025_v23, 0.0 }
 0xca3   :  { %10316 = vmatprep.subr.bf16.mxu0 %v10843_v7 }
 0xca4   :  { %v6023_v55 = vadd.f32 %v13030_v30, %v6006_v51  ;;  %v6038_v34 = vmax.f32 %v6022_v52, 0.0  ;;  %v6054_v32 = vpack.c.bf16 %v6041_v57, %v6040_v28  ;;  %v6108_v57 = vld [vmem:[%s13791_s3 + $0x45] ss:$0 sm:$0xff] }
 0xca6   :  { %10317 = vmatpush3.bf16.msra.mxu0 %v6052_v54  ;;  %v6039_v56 = vmax.f32 %v6023_v55, 0.0 }
 0xca7   :  { %10318 = vmatprep.subr.bf16.mxu0 %v10843_v7 }
 0xca8   :  { %v6053_v9 = vpack.c.bf16 %v6039_v56, %v6038_v34 }
 0xcaa   :  { %10319 = vmatpush3.bf16.msra.mxu0 %v6053_v9 }
 0xcab   :  { %10320 = vmatprep.subr.bf16.mxu0 %v10843_v7 }
 0xcae   :  { %10321 = vmatpush3.bf16.msra.mxu0 %v6054_v32 }
 0xcaf   :  { %10322 = vmatprep.subr.bf16.mxu0 %v10843_v7 }
 0xcd1   :  { %v6124_v59 = vpop.xlane.xlu0 %6123 }
 0xcd2   :  { %v6128_v12 = vmul.f32 0.03125, %v6124_v59 }
 0xcd4   :  { %v6130_v13 = vadd.f32 1e-12, %v6128_v12 }
 0xcd5   :  { %v5936_v44 = vpop.permute.xlu0 %5935 }
 0xcd6   :  { %5976 = vst.msk [vmem:[#allocation3 + $0x40] sm:$0xff] %vm5967_vm8, %v5936_v44 }
 0xcd8   :  { %v6127_v3 = vpop.xlane.xlu1 %6126 }
 0xcd9   :  { %v5940_v46 = vpop.permute.xlu0 %5939  ;;  %v6129_v8 = vmul.f32 0.03125, %v6127_v3 }
 0xcda   :  { %5978 = vst.msk [vmem:[#allocation3 + $0x50] sm:$0xff] %vm5967_vm8, %v5940_v46 }
 0xcdb   :  { %v6131_v36 = vadd.f32 1e-12, %v6129_v8 }
 0xcdc   :  { %v5938_v63 = vpop.permute.xlu1 %5937 }
 0xcdd   :  { %5977 = vst.msk [vmem:[#allocation3 + $0x48] sm:$0xff] %vm5967_vm8, %v5938_v63  ;;  %v5944_v0 = vpop.permute.xlu0 %5943  ;;  %v5992_v15 = vld [vmem:[#allocation3 + $0x40] sm:$0xff]  ;;  %10791 = vrsqrt.f32 %v6131_v36 }
 0xcde   :  { %5980 = vst.msk [vmem:[#allocation3 + $0x60] sm:$0xff] %vm5967_vm8, %v5944_v0  ;;  %v6009_v31 = vmul.f32 %v13022_v20, %v5992_v15  ;;  %10793 = vrsqrt.f32 %v6130_v13  ;;  %v6145_v0 = vld [vmem:[%s13791_s3 + $0x46] ss:$0 sm:$0xff] }
 0xce0   :  { %v5942_v5 = vpop.permute.xlu1 %5941  ;;  %v6026_v10 = vadd.f32 %v13030_v30, %v6009_v31 }
 0xce1   :  { %5979 = vst.msk [vmem:[#allocation3 + $0x58] sm:$0xff] %vm5967_vm8, %v5942_v5  ;;  %v5948_v61 = vpop.permute.xlu0 %5947  ;;  %v5994_v2 = vld [vmem:[#allocation3 + $0x50] sm:$0xff] }
 0xce2   :  { %5982 = vst.msk [vmem:[#allocation3 + $0x70] sm:$0xff] %vm5967_vm8, %v5948_v61  ;;  %v6011_v4 = vmul.f32 %v13022_v20, %v5994_v2  ;;  %v6042_v24 = vmax.f32 %v6026_v10, 0.0 }
 0xce4   :  { %v5946_v14 = vpop.permute.xlu1 %5945  ;;  %v5993_v25 = vld [vmem:[#allocation3 + $0x48] sm:$0xff]  ;;  %v6028_v21 = vadd.f32 %v13030_v30, %v6011_v4 }
 0xce5   :  { %5981 = vst.msk [vmem:[#allocation3 + $0x68] sm:$0xff] %vm5967_vm8, %v5946_v14  ;;  %v6010_v6 = vmul.f32 %v13022_v20, %v5993_v25  ;;  %v5996_v11 = vld [vmem:[#allocation3 + $0x60] sm:$0xff] }
 0xce6   :  { %v6013_v29 = vmul.f32 %v13022_v20, %v5996_v11  ;;  %v6044_v35 = vmax.f32 %v6028_v21, 0.0 }
 0xce7   :  { %v6027_v16 = vadd.f32 %v13030_v30, %v6010_v6  ;;  %v10792_v50 = vpop.eup %10791 }
 0xce8   :  { %v5950_v18 = vpop.permute.xlu1 %5949  ;;  %v5995_v19 = vld [vmem:[#allocation3 + $0x58] sm:$0xff]  ;;  %v6030_v40 = vadd.f32 %v13030_v30, %v6013_v29  ;;  %v10794_v53 = vpop.eup %10793  ;;  %v6135_v23 = vmul.f32 %v10792_v50, %v12995_v62 }
 0xce9   :  { %5983 = vst.msk [vmem:[#allocation3 + $0x78] sm:$0xff] %vm5967_vm8, %v5950_v18  ;;  %v6043_v26 = vmax.f32 %v6027_v16, 0.0  ;;  %v6012_v27 = vmul.f32 %v13022_v20, %v5995_v19  ;;  %v5998_v1 = vld [vmem:[#allocation3 + $0x70] sm:$0xff]  ;;  %v6134_v56 = vmul.f32 %v10794_v53, %v12990_v60  ;;  %v10606_v60 = vld [vmem:[%s13789_s4 + $0xa8] sm:$0xff]  }
 0xcea   :  { %v6015_v17 = vmul.f32 %v13022_v20, %v5998_v1  ;;  %v6046_v45 = vmax.f32 %v6030_v40, 0.0  ;;  %v9217_v1 = vld [vmem:[%s13794_s2] ss:$0 sm:$0xff] }
 0xceb   :  { %v6055_v58 = vpack.c.bf16 %v6043_v26, %v6042_v24  ;;  %v6029_v33 = vadd.f32 %v13030_v30, %v6012_v27 }
 0xcec   :  { %v5997_v37 = vld [vmem:[#allocation3 + $0x68] sm:$0xff]  ;;  %v6032_v49 = vadd.f32 %v13030_v30, %v6015_v17 }
 0xced   :  { %10323 = vmatpush3.bf16.msra.mxu0 %v6055_v58  ;;  %v6045_v38 = vmax.f32 %v6029_v33, 0.0  ;;  %v6014_v39 = vmul.f32 %v13022_v20, %v5997_v37 }
 0xcee   :  { %10324 = vmatprep.subr.bf16.mxu0 %v10843_v7  ;;  %v6048_v54 = vmax.f32 %v6032_v49, 0.0  ;;  %v9222_v49 = vld [vmem:[%s13794_s2 + $0x5] ss:$0 sm:$0xff] }
 0xcef   :  { %v6056_v41 = vpack.c.bf16 %v6045_v38, %v6044_v35  ;;  %v6031_v42 = vadd.f32 %v13030_v30, %v6014_v39  ;;  %v9218_v39 = vld [vmem:[%s13794_s2 + $0x1] ss:$0 sm:$0xff] }
 0xcf0   :  { %v5999_v43 = vld [vmem:[#allocation3 + $0x78] sm:$0xff] }
 0xcf1   :  { %10325 = vmatpush3.bf16.msra.mxu0 %v6056_v41  ;;  %v6047_v47 = vmax.f32 %v6031_v42, 0.0  ;;  %v6016_v48 = vmul.f32 %v13022_v20, %v5999_v43  ;;  %v6107_v20 = vld [vmem:[%s13791_s3 + $0x44] ss:$0 sm:$0xff] }
 0xcf2   :  { %10326 = vmatprep.subr.bf16.mxu0 %v10843_v7  ;;  %v6137_v9 = vmul.f32 %v6135_v23, %v6107_v20  ;;  %v6136_v62 = vmul.f32 %v6134_v56, %v6107_v20 }
 0xcf3   :  { %v6057_v51 = vpack.c.bf16 %v6047_v47, %v6046_v45  ;;  %v6033_v52 = vadd.f32 %v13030_v30, %v6016_v48  ;;  %v6050_v30 = vld [vmem:[%s13789_s4 + $0x90] sm:$0xf] }
 0xcf4   :  { %v13099_v28 = vadd.f32 %v6137_v9, %v6108_v57  ;;  %v13101_v32 = vadd.f32 %v6136_v62, %v6108_v57  ;;  %v9224_v9 = vld [vmem:[%s13794_s2 + $0x7] ss:$0 sm:$0xff] }
 0xcf5   :  { %10327 = vmatpush3.bf16.msra.mxu0 %v6057_v51  ;;  %v6049_v55 = vmax.f32 %v6033_v52, 0.0 }
 0xcf6   :  { %10328 = vmatprep.subr.bf16.mxu0 %v10843_v7  ;;  %v6144_v59 = vpack.c.bf16 %v13099_v28, %v13101_v32 }
 0xcf7   :  { %v6058_v34 = vpack.c.bf16 %v6049_v55, %v6048_v54  ;;  %v9219_v54 = vld [vmem:[%s13794_s2 + $0x2] ss:$0 sm:$0xff] }
 0xcf9   :  { %10329 = vmatpush3.bf16.msra.mxu0 %v6058_v34 }
 0xcfa   :  { %10334 = vmatprep.subr.bf16.mxu0 %v10843_v7 }
 0xcfc   :  { %10331 = vmatmul.mubr.bf16.vlgmr.msra.gmra.mrb[224].mxu0 %v6050_v30 }
 0xcfd   :  { %10335 = vmatpush3.bf16.msra.mxu0 %v10605_v22  ;;  %10338 = vmatprep.mubr.msk.bf16.mxu0 %vm10850_vm7, %v10843_v7 }
 0xcfe   :  { %10336 = vmatprep.subr.bf16.mxu0 %v10843_v7 }
 0xd01   :  { %10337 = vmatpush3.bf16.msra.mxu0 %v10606_v60 }
 0xd02   :  { %10342 = vmatprep.subr.mxu0 %v10843_v7 }
 0xd04   :  { %10339 = vmatmul.mubr.msk.bf16.vlgmr.msra.gmra.mrb[228].mxu0 %vm219_vm0, %v6144_v59 }
 0xd05   :  { %10344 = vmatprep.mubr.msk.f32.mxu0 %vm10850_vm7, %v10843_v7 }
 0xdcf   :  { %v13109_v44 = vpop.f32.mrb[224].mxu0 }
 0xdd0   :  { %v10332_v3 = vpop.f32.mrb[225].mxu0 }
 0xdd1   :  { %v6096_v46 = vpop.f32.mrb[226].mxu0 }
 0xdd2   :  { %v10333_v63 = vpop.f32.mrb[227].mxu0 }
 0xdd3   :  { %v9220_v63 = vld [vmem:[%s13794_s2 + $0x3] ss:$0 sm:$0xff] }
 0xdd7   :  { %v6195_v15 = vpop.f32.mrb[228].mxu0 }
 0xdd8   :  { %v6196_v8 = vadd.f32 %v6195_v15, %v6145_v0  ;;  %v10340_v5 = vpop.f32.mrb[229].mxu0 }
 0xdd9   :  { %v6198_v61 = vpop.f32.mrb[230].mxu0 }
 0xdda   :  { %6205 = vrot.lane.b32.xlu1 %v6196_v8, %s10844_s22  ;;  %6203 = vrot.lane.b32.xlu0 %v6196_v8, %s10851_s28  ;;  %v10341_v31 = vpop.f32.mrb[231].mxu0  ;;  %v13115_v2 = vadd.f32 %v6198_v61, %v6145_v0 }
 0xdde   :  { %6207 = vrot.lane.b32.xlu0 %v6196_v8, %s10852_s30  ;;  %6210 = vrot.lane.b32.xlu1 %v13115_v2, %s10851_s28 }
 0xde2   :  { %6212 = vrot.lane.b32.xlu0 %v13115_v2, %s10844_s22  ;;  %6214 = vrot.lane.b32.xlu1 %v13115_v2, %s10852_s30 }
 0xde6   :  { %6216 = vrot.lane.b32.xlu0 %v6196_v8, %s10846_s29 }
 0xe4c   :  { %v6206_v12 = vpop.permute.xlu1 %6205  ;;  %v6204_v36 = vpop.permute.xlu0 %6203 }
 0xe4d   :  { %6369 = vrot.lane.b32.xlu0 %v6206_v12, %s10846_s29  ;;  %6293 = vrot.lane.b32.xlu1 %v6204_v36, %s10846_s29 }
 0xe50   :  { %v6208_v14 = vpop.permute.xlu0 %6207  ;;  %v13127_v25 = vpop.permute.xlu1 %6210 }
 0xe51   :  { %6521 = vrot.lane.b32.xlu0 %v13115_v2, %s10846_s29  ;;  %6445 = vrot.lane.b32.xlu1 %v6208_v14, %s10846_s29 }
 0xe54   :  { %v13129_v4 = vpop.permute.xlu0 %6212  ;;  %v13135_v10 = vpop.permute.xlu1 %6214 }
 0xe55   :  { %6673 = vrot.lane.b32.xlu0 %v13129_v4, %s10846_s29  ;;  %6597 = vrot.lane.b32.xlu1 %v13127_v25, %s10846_s29 }
 0xe58   :  { %v6217_v6 = vpop.permute.xlu0 %6216 }
 0xe59   :  { %7045 = vrot.lane.b32.xlu0 %v6204_v36, %s10848_s18  ;;  %10343 = vmatpush3.xpose.msk.msra.mxu0 %vm6218_vm9, %v6217_v6  ;;  %v9223_v6 = vld [vmem:[%s13794_s2 + $0x6] ss:$0 sm:$0xff] }
 0xe5a   :  { %6749 = vrot.lane.b32.xlu1 %v13135_v10, %s10846_s29  ;;  %10347 = vmatprep.subr.mxu0 %v10843_v7 }
 0xe5c   :  { %10345 = vmatmul.mubr.msk.f32.vlgmr.msra.gmra.mrb[232].mxu0 %vm6218_vm9, %v6196_v8 }
 0xe5d   :  { %10349 = vmatprep.mubr.msk.f32.mxu0 %vm10850_vm7, %v10843_v7 }
 0xe5e   :  { %6969 = vrot.lane.b32.xlu1 %v6196_v8, %s10848_s18 }
 0xe62   :  { %7121 = vrot.lane.b32.xlu1 %v6206_v12, %s10848_s18 }
 0xe66   :  { %7197 = vrot.lane.b32.xlu1 %v6208_v14, %s10848_s18 }
 0xebf   :  { %v6370_v11 = vpop.permute.xlu0 %6369  ;;  %v6294_v13 = vpop.permute.xlu1 %6293 }
 0xec0   :  { %10348 = vmatpush3.xpose.msk.msra.mxu0 %vm6218_vm9, %v6294_v13 }
 0xec1   :  { %10352 = vmatprep.subr.mxu0 %v10843_v7 }
 0xec3   :  { %10350 = vmatmul.mubr.msk.f32.vlgmr.msra.gmra.mrb[234].mxu0 %vm6218_vm9, %v6204_v36  ;;  %v6446_v16 = vpop.permute.xlu1 %6445  ;;  %v6522_v18 = vpop.permute.xlu0 %6521  ;;  %v9221_v36 = vld [vmem:[%s13794_s2 + $0x4] ss:$0 sm:$0xff]  ;;  %s10853_s2 = smov 8  }
 0xec4   :  { %10353 = vmatpush3.xpose.msk.msra.mxu0 %vm6218_vm9, %v6370_v11  ;;  %10354 = vmatprep.mubr.msk.f32.mxu0 %vm10850_vm7, %v10843_v7 }
 0xec5   :  { %10357 = vmatprep.subr.mxu0 %v10843_v7 }
 0xec7   :  { %10355 = vmatmul.mubr.msk.f32.vlgmr.msra.gmra.mrb[236].mxu0 %vm6218_vm9, %v6206_v12  ;;  %v6598_v19 = vpop.permute.xlu1 %6597  ;;  %v6674_v21 = vpop.permute.xlu0 %6673 }
 0xec8   :  { %10358 = vmatpush3.xpose.msk.msra.mxu0 %vm6218_vm9, %v6446_v16  ;;  %10368 = vmatpush3.xpose.msk.msra.mxu1 %vm6218_vm9, %v6598_v19 }
 0xec9   :  { %10359 = vmatprep.mubr.msk.f32.mxu0 %vm10850_vm7, %v10843_v7  ;;  %10362 = vmatprep.subr.mxu0 %v10843_v7 }
 0xeca   :  { %10377 = vmatprep.subr.mxu1 %v10843_v7 }
 0xecb   :  { %10360 = vmatmul.mubr.msk.f32.vlgmr.msra.gmra.mrb[238].mxu0 %vm6218_vm9, %v6208_v14  ;;  %10370 = vmatmul.mubr.msk.f32.vlgmr.msra.gmra.mrb[192].mxu1 %vm6218_vm9, %v13127_v25  ;;  %v7046_v26 = vpop.permute.xlu0 %7045 }
 0xecc   :  { %v6750_v24 = vpop.permute.xlu1 %6749  ;;  %10363 = vmatpush3.xpose.msk.msra.mxu0 %vm6218_vm9, %v6522_v18  ;;  %10364 = vmatprep.mubr.msk.f32.mxu0 %vm10850_vm7, %v10843_v7 }
 0xecd   :  { %10378 = vmatpush3.xpose.msk.msra.mxu1 %vm6218_vm9, %v6750_v24  ;;  %10379 = vmatprep.mubr.msk.f32.mxu1 %vm10850_vm7, %v10843_v7 }
 0xece   :  { %10372 = vmatprep.subr.mxu0 %v10843_v7  ;;  %10387 = vmatprep.subr.mxu1 %v10843_v7 }
 0xecf   :  { %10365 = vmatmul.mubr.msk.f32.vlgmr.msra.gmra.mrb[240].mxu0 %vm6218_vm9, %v13115_v2 }
 0xed0   :  { %10380 = vmatmul.mubr.msk.f32.vlgmr.msra.gmra.mrb[194].mxu1 %vm6218_vm9, %v13135_v10  ;;  %10373 = vmatpush3.xpose.msk.msra.mxu0 %vm6218_vm9, %v6674_v21  ;;  %v6970_v27 = vpop.permute.xlu1 %6969 }
 0xed1   :  { %10388 = vmatpush3.msra.mxu1 %v7046_v26  ;;  %10374 = vmatprep.mubr.msk.f32.mxu0 %vm10850_vm7, %v10843_v7 }
 0xed2   :  { %10382 = vmatprep.subr.mxu0 %v10843_v7  ;;  %10389 = vmatprep.mubr.msk.f32.mxu1 %vm10850_vm7, %v10843_v7 }
 0xed3   :  { %10375 = vmatmul.mubr.msk.f32.vlgmr.msra.gmra.mrb[242].mxu0 %vm6218_vm9, %v13129_v4  ;;  %10397 = vmatprep.subr.mxu1 %v10843_v7 }
 0xed4   :  { %10383 = vmatpush3.msra.mxu0 %v6970_v27  ;;  %10384 = vmatprep.mubr.msk.f32.mxu0 %vm10850_vm7, %v10843_v7  ;;  %v7122_v16 = vpop.permute.xlu1 %7121 }
 0xed5   :  { %10392 = vmatprep.subr.mxu0 %v10843_v7 }
 0xed8   :  { %v7198_v18 = vpop.permute.xlu1 %7197 }
 0xf2f   :  { %v6289_v29 = vpop.f32.mrb[232].mxu0 }
 0xf30   :  { %v6825_v58 = vmul.f32 0.35355338, %v6289_v29  ;;  %v10346_v33 = vpop.f32.mrb[233].mxu0 }
 0xf32   :  { %v6889_v35 = vadd.f32 %v9217_v1, %v6825_v58 }
 0xf34   :  { %v6897_v37 = vsel %vm6218_vm9, %v6889_v35, -inf }
 0xf35   :  { %6898 = vmax.xlane.f32.xlu0 %v6897_v37 }
 0xf96   :  { %v6365_v38 = vpop.f32.mrb[234].mxu0 }
 0xf97   :  { %v6826_v40 = vmul.f32 0.35355338, %v6365_v38  ;;  %v10351_v17 = vpop.f32.mrb[235].mxu0 }
 0xf99   :  { %v6890_v41 = vadd.f32 %v9218_v39, %v6826_v40 }
 0xf9a   :  { %v6441_v42 = vpop.f32.mrb[236].mxu0 }
 0xf9b   :  { %v10356_v43 = vpop.f32.mrb[237].mxu0  ;;  %v6900_v45 = vsel %vm6218_vm9, %v6890_v41, -inf  ;;  %v6827_v50 = vmul.f32 0.35355338, %v6441_v42 }
 0xf9c   :  { %6901 = vmax.xlane.f32.xlu1 %v6900_v45 }
 0xf9d   :  { %v6891_v34 = vadd.f32 %v9219_v54, %v6827_v50 }
 0xf9e   :  { %v6517_v47 = vpop.f32.mrb[238].mxu0  ;;  %v6669_v48 = vpop.f32.mrb[192].mxu1 }
 0xf9f   :  { %v6830_v51 = vmul.f32 0.35355338, %v6669_v48  ;;  %v10361_v52 = vpop.f32.mrb[239].mxu0  ;;  %v10371_v53 = vpop.f32.mrb[193].mxu1  ;;  %v6828_v57 = vmul.f32 0.35355338, %v6517_v47 }
 0xfa0   :  { %v6903_v46 = vsel %vm6218_vm9, %v6891_v34, -inf }
 0xfa1   :  { %v6894_v55 = vadd.f32 %v9222_v49, %v6830_v51  ;;  %v6892_v0 = vadd.f32 %v9220_v63, %v6828_v57 }
 0xfa2   :  { %v6593_v23 = vpop.f32.mrb[240].mxu0 }
 0xfa3   :  { %v6821_v56 = vpop.f32.mrb[194].mxu1  ;;  %v10366_v20 = vpop.f32.mrb[241].mxu0  ;;  %v6912_v30 = vsel %vm6218_vm9, %v6894_v55, -inf  ;;  %v6906_v8 = vsel %vm6218_vm9, %v6892_v0, -inf  ;;  %v6829_v12 = vmul.f32 0.35355338, %v6593_v23 }
 0xfa4   :  { %v6832_v22 = vmul.f32 0.35355338, %v6821_v56  ;;  %v10381_v62 = vpop.f32.mrb[195].mxu1  ;;  %6913 = vmax.xlane.f32.xlu0 %v6912_v30 }
 0xfa5   :  { %v13225_v14 = vadd.f32 %v9221_v36, %v6829_v12 }
 0xfa6   :  { %v6745_v60 = vpop.f32.mrb[242].mxu0  ;;  %v13207_v59 = vadd.f32 %v9224_v9, %v6832_v22 }
 0xfa7   :  { %v10376_v3 = vpop.f32.mrb[243].mxu0 }
 0xfa8   :  { %6904 = vmax.xlane.f32.xlu0 %v6903_v46  ;;  %v6918_v15 = vsel %vm6218_vm9, %v13207_v59, -inf }
 0xfac   :  { %6919 = vmax.xlane.f32.xlu0 %v6918_v15 }
 0xfad   :  { %7349 = vrot.lane.b32.xlu1 %v13127_v25, %s10848_s18  ;;  %v6831_v25 = vmul.f32 0.35355338, %v6745_v60 }
 0xfaf   :  { %v13230_v11 = vadd.f32 %v9223_v6, %v6831_v25 }
 0xfb0   :  { %6907 = vmax.xlane.f32.xlu0 %v6906_v8 }
 0xfc2   :  { %v6899_v5 = vpop.xlane.xlu0 %6898 }
 0xfc3   :  { %v6921_v61 = vsub.f32 %v6889_v35, %v6899_v5 }
 0xfc5   :  { %v6929_v31 = vmul.f32 1.442695, %v6921_v61 }
 0xfc6   :  { %7273 = vrot.lane.b32.xlu0 %v13115_v2, %s10848_s18  ;;  %v6909_v2 = vsel %vm6218_vm9, %v13225_v14, -inf }
 0xfc7   :  { %10795 = vpow2.f32 %v6929_v31 }
 0xfca   :  { %7425 = vrot.lane.b32.xlu0 %v13129_v4, %s10848_s18  ;;  %v6915_v4 = vsel %vm6218_vm9, %v13230_v11, -inf }
 0xfd1   :  { %v10796_v13 = vpop.eup %10795  ;;  %6910 = vmax.xlane.f32.xlu1 %v6909_v2 }
 0xfd2   :  { %10385 = vmatmul.mubr.msk.f32.vlgmr.msra.gmra.mrb[244].mxu0 %vm6218_vm9, %v10796_v13  ;;  %v6945_v50 = vsel %vm6218_vm9, %v10796_v13, 0.0 }
 0xfd3   :  { %10393 = vmatpush3.msra.mxu0 %v7122_v16  ;;  %10394 = vmatprep.mubr.msk.f32.mxu0 %vm10850_vm7, %v10843_v7 }
 0xfd4   :  { %10402 = vmatprep.subr.mxu0 %v10843_v7 }
 0xfd5   :  { %6916 = vmax.xlane.f32.xlu1 %v6915_v4 }
 0xfe6   :  { %7501 = vrot.lane.b32.xlu1 %v13135_v10, %s10848_s18 }
0x1029   :  { %v6902_v19 = vpop.xlane.xlu1 %6901 }
0x102a   :  { %v6922_v21 = vsub.f32 %v6890_v41, %v6902_v19 }
0x102c   :  { %v6931_v24 = vmul.f32 1.442695, %v6922_v21  ;;  %v10607_v21 = vld [vmem:[%s13789_s4 + $0xb0] sm:$0xff]  }
0x102d   :  { %v7350_v48 = vpop.permute.xlu1 %7349 }
0x102e   :  { %10797 = vpow2.f32 %v6931_v24 }
0x1031   :  { %v6914_v26 = vpop.xlane.xlu0 %6913 }
0x1032   :  { %v6926_v27 = vsub.f32 %v6894_v55, %v6914_v26 }
0x1034   :  { %v6939_v29 = vmul.f32 1.442695, %v6926_v27 }
0x1035   :  { %v6905_v1 = vpop.xlane.xlu0 %6904 }
0x1036   :  { %10799 = vpow2.f32 %v6939_v29  ;;  %v6923_v58 = vsub.f32 %v6891_v34, %v6905_v1 }
0x1038   :  { %v10798_v33 = vpop.eup %10797  ;;  %v6933_v35 = vmul.f32 1.442695, %v6923_v58 }
0x1039   :  { %10390 = vmatmul.mubr.msk.f32.vlgmr.msra.gmra.mrb[196].mxu1 %vm6218_vm9, %v10798_v33  ;;  %v6920_v37 = vpop.xlane.xlu0 %6919  ;;  %v6948_v38 = vsel %vm6218_vm9, %v10798_v33, 0.0 }
0x103a   :  { %10801 = vpow2.f32 %v6933_v35  ;;  %10398 = vmatpush3.msra.mxu1 %v7198_v18  ;;  %6949 = vadd.xlane.f32.xlu0 %v6948_v38  ;;  %v6928_v51 = vsub.f32 %v13207_v59, %v6920_v37  ;;  %v10608_v35 = vld [vmem:[%s13789_s4 + $0xb8] sm:$0xff]  }
0x103b   :  { %10399 = vmatprep.mubr.msk.f32.mxu1 %vm10850_vm7, %v10843_v7  ;;  %10407 = vmatprep.subr.mxu1 %v10843_v7 }
0x103c   :  { %v6943_v52 = vmul.f32 1.442695, %v6928_v51 }
0x103d   :  { %v6908_v10 = vpop.xlane.xlu0 %6907 }
0x103e   :  { %v6924_v39 = vsub.f32 %v6892_v0, %v6908_v10 }
0x1040   :  { %v10800_v40 = vpop.eup %10799  ;;  %v6935_v17 = vmul.f32 1.442695, %v6924_v39 }
0x1041   :  { %v6960_v41 = vsel %vm6218_vm9, %v10800_v40, 0.0  ;;  %v7274_v43 = vpop.permute.xlu0 %7273 }
0x1042   :  { %10803 = vpow2.f32 %v6935_v17  ;;  %6961 = vadd.xlane.f32.xlu1 %v6960_v41 }
0x1043   :  { %10805 = vpow2.f32 %v6943_v52 }
0x1044   :  { %v10802_v42 = vpop.eup %10801 }
0x1045   :  { %10395 = vmatmul.mubr.msk.f32.vlgmr.msra.gmra.mrb[246].mxu0 %vm6218_vm9, %v10802_v42  ;;  %v6951_v45 = vsel %vm6218_vm9, %v10802_v42, 0.0  ;;  %v7426_v9 = vpop.permute.xlu0 %7425 }
0x1046   :  { %10403 = vmatpush3.msra.mxu0 %v7274_v43  ;;  %6952 = vadd.xlane.f32.xlu0 %v6951_v45 }
0x1047   :  { %10404 = vmatprep.mubr.msk.f32.mxu0 %vm10850_vm7, %v10843_v7  ;;  %10412 = vmatprep.subr.mxu0 %v10843_v7 }
0x104c   :  { %v10804_v47 = vpop.eup %10803 }
0x104d   :  { %10400 = vmatmul.mubr.msk.f32.vlgmr.msra.gmra.mrb[198].mxu1 %vm6218_vm9, %v10804_v47  ;;  %v6954_v49 = vsel %vm6218_vm9, %v10804_v47, 0.0  ;;  %v10806_v30 = vpop.eup %10805 }
0x104e   :  { %10408 = vmatpush3.msra.mxu1 %v7350_v48  ;;  %6955 = vadd.xlane.f32.xlu1 %v6954_v49  ;;  %v6966_v57 = vsel %vm6218_vm9, %v10806_v30, 0.0 }
0x104f   :  { %10409 = vmatprep.mubr.msk.f32.mxu1 %vm10850_vm7, %v10843_v7  ;;  %10417 = vmatprep.subr.mxu1 %v10843_v7 }
0x1051   :  { %10410 = vmatmul.mubr.msk.f32.vlgmr.msra.gmra.mrb[200].mxu1 %vm6218_vm9, %v10800_v40 }
0x1052   :  { %6946 = vadd.xlane.f32.xlu1 %v6945_v50  ;;  %10419 = vmatprep.mubr.msk.f32.mxu1 %vm10850_vm7, %v10843_v7 }
0x105e   :  { %v6911_v53 = vpop.xlane.xlu1 %6910 }
0x105f   :  { %v6925_v54 = vsub.f32 %v13225_v14, %v6911_v53 }
0x1061   :  { %v6937_v55 = vmul.f32 1.442695, %v6925_v54 }
0x1062   :  { %v6917_v23 = vpop.xlane.xlu1 %6916 }
0x1063   :  { %10807 = vpow2.f32 %v6937_v55  ;;  %v6927_v34 = vsub.f32 %v13230_v11, %v6917_v23 }
0x1065   :  { %v6941_v56 = vmul.f32 1.442695, %v6927_v34 }
0x1066   :  { %v7502_v20 = vpop.permute.xlu1 %7501 }
0x1067   :  { %10809 = vpow2.f32 %v6941_v56  ;;  %10418 = vmatpush3.msra.mxu1 %v7502_v20 }
0x1068   :  { %10420 = vmatmul.mubr.msk.f32.vlgmr.msra.gmra.mrb[202].mxu1 %vm6218_vm9, %v10806_v30  ;;  %10430 = vmatprep.subr.bf16.mxu1 %v10843_v7 }
0x1069   :  { %10434 = vmatprep.mubr.msk.bf16.mxu1 %vm10850_vm7, %v10843_v7 }
0x106d   :  { %v10808_v22 = vpop.eup %10807 }
0x106e   :  { %10405 = vmatmul.mubr.msk.f32.vlgmr.msra.gmra.mrb[248].mxu0 %vm6218_vm9, %v10808_v22  ;;  %v6957_v59 = vsel %vm6218_vm9, %v10808_v22, 0.0 }
0x106f   :  { %10413 = vmatpush3.msra.mxu0 %v7426_v9  ;;  %10414 = vmatprep.mubr.msk.f32.mxu0 %vm10850_vm7, %v10843_v7 }
0x1070   :  { %10422 = vmatprep.subr.bf16.mxu0 %v10843_v7 }
0x1071   :  { %v10810_v62 = vpop.eup %10809 }
0x1072   :  { %10415 = vmatmul.mubr.msk.f32.vlgmr.msra.gmra.mrb[250].mxu0 %vm6218_vm9, %v10810_v62  ;;  %v6963_v60 = vsel %vm6218_vm9, %v10810_v62, 0.0 }
0x1073   :  { %6964 = vadd.xlane.f32.xlu0 %v6963_v60  ;;  %10426 = vmatprep.mubr.msk.bf16.mxu0 %vm10850_vm7, %v10843_v7 }
0x1074   :  { %10423 = vmatpush3.bf16.msra.mxu0 %v10607_v21  ;;  %v10610_v21 = vld [vmem:[%s13789_s4 + $0xc8] sm:$0xff]  }
0x1075   :  { %10424 = vmatprep.subr.bf16.mxu0 %v10843_v7 }
0x1077   :  { %6967 = vadd.xlane.f32.xlu0 %v6966_v57 }
0x1078   :  { %10425 = vmatpush3.bf16.msra.mxu0 %v10608_v35  ;;  %v7689_v35 = vld [vmem:[%s13791_s3 + $0x60] ss:$0 sm:$0xff] }
0x1079   :  { %10438 = vmatprep.subr.bf16.mxu0 %v10843_v7 }
0x107b   :  { %6958 = vadd.xlane.f32.xlu0 %v6957_v59 }
0x10a5   :  { %v13279_v3 = vpop.f32.mrb[244].mxu0 }
0x10a6   :  { %v10386_v46 = vpop.f32.mrb[245].mxu0 }
0x10c7   :  { %v6950_v15 = vpop.xlane.xlu0 %6949 }
0x10c8   :  { %10811 = vrcp.f32 %v6950_v15 }
0x10cf   :  { %v6962_v8 = vpop.xlane.xlu1 %6961 }
0x10d0   :  { %10813 = vrcp.f32 %v6962_v8 }
0x10d2   :  { %v10812_v36 = vpop.eup %10811 }
0x10d3   :  { %v6953_v25 = vpop.xlane.xlu0 %6952 }
0x10da   :  { %v10814_v14 = vpop.eup %10813 }
0x10db   :  { %v6956_v18 = vpop.xlane.xlu1 %6955 }
0x10dc   :  { %10815 = vrcp.f32 %v6956_v18 }
0x10df   :  { %v6947_v45 = vpop.xlane.xlu1 %6946 }
0x10e6   :  { %v10816_v24 = vpop.eup %10815 }
0x1100   :  { %v6965_v4 = vpop.xlane.xlu0 %6964 }
0x1104   :  { %v6968_v19 = vpop.xlane.xlu0 %6967 }
0x1105   :  { %10817 = vrcp.f32 %v6968_v19 }
0x1106   :  { %10819 = vrcp.f32 %v6953_v25 }
0x1107   :  { %10821 = vrcp.f32 %v6965_v4 }
0x1108   :  { %v6959_v47 = vpop.xlane.xlu0 %6958  ;;  %10823 = vrcp.f32 %v6947_v45  ;;  %v10611_v45 = vld [vmem:[%s13789_s4 + $0xd0] sm:$0xff]  }
0x1109   :  { %10825 = vrcp.f32 %v6959_v47  ;;  %v10612_v47 = vld [vmem:[%s13789_s4 + $0xd8] sm:$0xff]  }
0x110c   :  { %v7117_v63 = vpop.f32.mrb[196].mxu1 }
0x110d   :  { %v10391_v0 = vpop.f32.mrb[197].mxu1  ;;  %v7586_v11 = vmul.f32 %v10812_v36, %v7117_v63 }
0x110f   :  { %v10818_v26 = vpop.eup %10817 }
0x1110   :  { %v10820_v10 = vpop.eup %10819 }
0x1111   :  { %v10822_v39 = vpop.eup %10821 }
0x1112   :  { %v10824_v49 = vpop.eup %10823 }
0x1113   :  { %v10826_v52 = vpop.eup %10825  ;;  %v7585_v55 = vmul.f32 %v10824_v49, %v13279_v3  ;;  %v7630_v3 = vld [vmem:[%s13791_s3 + $0x47] ss:$0 sm:$0xff]  ;;  %v10614_v49 = vld [vmem:[%s13789_s4 + $0xe8] sm:$0xff]  }
0x1118   :  { %v7193_v5 = vpop.f32.mrb[246].mxu0 }
0x1119   :  { %v10396_v61 = vpop.f32.mrb[247].mxu0  ;;  %v7587_v17 = vmul.f32 %v10820_v10, %v7193_v5 }
0x1120   :  { %v7269_v31 = vpop.f32.mrb[198].mxu1 }
0x1121   :  { %v10401_v12 = vpop.f32.mrb[199].mxu1  ;;  %v7588_v29 = vmul.f32 %v10816_v24, %v7269_v31 }
0x1124   :  { %v7421_v6 = vpop.f32.mrb[200].mxu1 }
0x1125   :  { %v7590_v2 = vmul.f32 %v10814_v14, %v7421_v6  ;;  %v10411_v13 = vpop.f32.mrb[201].mxu1 }
0x1127   :  { %v10512_v16 = vpack.i.bf16 %v7590_v2, %v7586_v11 }
0x1129   :  { %10513 = vrot.lane.b32.xlu1 %v10512_v16, %s10853_s2 }
0x113b   :  { %v7573_v27 = vpop.f32.mrb[202].mxu1 }
0x113c   :  { %v7592_v1 = vmul.f32 %v10818_v26, %v7573_v27  ;;  %v10421_v58 = vpop.f32.mrb[203].mxu1 }
0x113e   :  { %v10522_v33 = vpack.i.bf16 %v7592_v1, %v7588_v29 }
0x1140   :  { %10523 = vrot.lane.b32.xlu1 %v10522_v33, %s10854_s0 }
0x1141   :  { %v7345_v37 = vpop.f32.mrb[248].mxu0 }
0x1142   :  { %v10406_v38 = vpop.f32.mrb[249].mxu0  ;;  %v7589_v54 = vmul.f32 %v10826_v52, %v7345_v37  ;;  %v10617_v52 = vld [vmem:[%s13789_s4 + $0x100] sm:$0xff]  }
0x1145   :  { %v7497_v40 = vpop.f32.mrb[250].mxu0 }
0x1146   :  { %v7591_v41 = vmul.f32 %v10822_v39, %v7497_v40  ;;  %v10416_v42 = vpop.f32.mrb[251].mxu0  ;;  %v7690_v40 = vld [vmem:[%s13791_s3 + $0x61] ss:$0 sm:$0xff] }
0x1148   :  { %v10517_v43 = vpack.i.bf16 %v7591_v41, %v7587_v17 }
0x114a   :  { %10518 = vrot.lane.b32.xlu0 %v10517_v43, %s10855_s26 }
0x119b   :  { %v10514_v48 = vpop.permute.xlu1 %10513 }
0x119c   :  { %v10516_v50 = vunpack.i.h.bf16 %v10514_v48  ;;  %v10515_v51 = vunpack.i.l.bf16 %v10514_v48  ;;  %v10613_v48 = vld [vmem:[%s13789_s4 + $0xe0] sm:$0xff]  }
0x119e   :  { %v7605_v20 = vsel %vm6218_vm9, %v7585_v55, %v10515_v51  ;;  %v7622_v30 = vsel %vm6218_vm9, %v7589_v54, %v10516_v50  ;;  %v10615_v50 = vld [vmem:[%s13789_s4 + $0xf0] sm:$0xff]   ;;  %v10616_v51 = vld [vmem:[%s13789_s4 + $0xf8] sm:$0xff]   ;;  %v7726_v55 = vld [vmem:[%s13791_s3 + $0x62] ss:$0 sm:$0xff] }
0x119f   :  { %v10621_v54 = vld [vmem:[%s13795_s6 + $0xc] ss:$16 sps:$4 sm:$0xff]  }
0x11b2   :  { %v10524_v53 = vpop.permute.xlu1 %10523 }
0x11b3   :  { %v10526_v22 = vunpack.i.h.bf16 %v10524_v53  ;;  %v10525_v9 = vunpack.i.l.bf16 %v10524_v53  ;;  %v10618_v53 = vld [vmem:[%s13789_s4 + $0x108] sm:$0xff]  }
0x11bc   :  { %v10519_v23 = vpop.permute.xlu0 %10518 }
0x11bd   :  { %v10521_v34 = vunpack.i.h.bf16 %v10519_v23  ;;  %v10520_v56 = vunpack.i.l.bf16 %v10519_v23 }
0x11bf   :  { %v7623_v62 = vsel %vm7606_vm10, %v7622_v30, %v10521_v34  ;;  %v7607_v60 = vsel %vm7606_vm10, %v7605_v20, %v10520_v56 }
0x11c0   :  { %v7624_v57 = vsel %vm7608_vm11, %v7623_v62, %v10526_v22  ;;  %v7609_v59 = vsel %vm7608_vm11, %v7607_v60, %v10525_v9 }
0x11c1   :  { %v7629_v46 = vpack.c.bf16 %v7624_v57, %v7609_v59 }
0x11c3   :  { %10427 = vmatmul.mubr.msk.bf16.vlgmr.msra.gmra.mrb[252].mxu0 %vm219_vm0, %v7629_v46 }
0x11c4   :  { %10454 = vmatprep.mubr.msk.bf16.mxu0 %vm10850_vm7, %v10843_v7  ;;  %10439 = vmatpush3.bf16.msra.mxu0 %v10611_v45 }
0x11c5   :  { %10440 = vmatprep.subr.bf16.mxu0 %v10843_v7 }
0x11c8   :  { %10441 = vmatpush3.bf16.msra.mxu0 %v10612_v47 }
0x11c9   :  { %10442 = vmatprep.subr.bf16.mxu0 %v10843_v7 }
0x11cc   :  { %10443 = vmatpush3.bf16.msra.mxu0 %v10613_v48 }
0x11cd   :  { %10444 = vmatprep.subr.bf16.mxu0 %v10843_v7 }
0x11d0   :  { %10445 = vmatpush3.bf16.msra.mxu0 %v10614_v49 }
0x11d1   :  { %10446 = vmatprep.subr.bf16.mxu0 %v10843_v7 }
0x11d4   :  { %10447 = vmatpush3.bf16.msra.mxu0 %v10615_v50 }
0x11d5   :  { %10448 = vmatprep.subr.bf16.mxu0 %v10843_v7 }
0x11d8   :  { %10449 = vmatpush3.bf16.msra.mxu0 %v10616_v51 }
0x11d9   :  { %10450 = vmatprep.subr.bf16.mxu0 %v10843_v7 }
0x11dc   :  { %10451 = vmatpush3.bf16.msra.mxu0 %v10617_v52 }
0x11dd   :  { %10452 = vmatprep.subr.bf16.mxu0 %v10843_v7 }
0x11e0   :  { %10453 = vmatpush3.bf16.msra.mxu0 %v10618_v53 }
0x11e1   :  { %8223 = vmatprep.subr.bf16.mxu0 %v10621_v54 }
0x1296   :  { %v7680_v63 = vpop.f32.mrb[252].mxu0 }
0x1297   :  { %v7681_v0 = vadd.f32 %v7680_v63, %v7630_v3  ;;  %v10428_v15 = vpop.f32.mrb[253].mxu0 }
0x1298   :  { %v7683_v8 = vpop.f32.mrb[254].mxu0 }
0x1299   :  { %v7687_v5 = vadd.f32 %v7681_v0, %v13101_v32  ;;  %v7684_v61 = vadd.f32 %v7683_v8, %v7630_v3  ;;  %v10429_v31 = vpop.f32.mrb[255].mxu0 }
0x129b   :  { %v7688_v12 = vadd.f32 %v7684_v61, %v13099_v28  ;;  %v7691_v36 = vsel %vm219_vm0, %v7687_v5, 0.0  ;;  %v10609_v28 = vld [vmem:[%s13789_s4 + $0xc0] sm:$0xff]  }
0x129c   :  { %7692 = vadd.xlane.f32.xlu1 %v7691_v36  ;;  %10431 = vmatpush3.bf16.msra.mxu1 %v10609_v28  ;;  %v10631_v28 = vld [vmem:[%s13795_s6 + $0x88] ss:$16 sps:$4 sm:$0xff]  }
0x129d   :  { %v7694_v14 = vsel %vm219_vm0, %v7688_v12, 0.0  ;;  %10432 = vmatprep.subr.bf16.mxu1 %v10843_v7 }
0x129e   :  { %7695 = vadd.xlane.f32.xlu0 %v7694_v14 }
0x12a0   :  { %10433 = vmatpush3.bf16.msra.mxu1 %v10610_v21  ;;  %v10636_v21 = vld [vmem:[%s13795_s6 + $0xac] ss:$16 sps:$4 sm:$0xff]  }
0x12a1   :  { %10458 = vmatprep.subr.bf16.mxu1 %v10843_v7 }
0x1329   :  { %v7693_v25 = vpop.xlane.xlu1 %7692 }
0x132a   :  { %v7697_v6 = vmul.f32 0.03125, %v7693_v25  ;;  %v10619_v25 = vld [vmem:[%s13795_s6 + $0x8] ss:$16 sps:$4 sm:$0xff]  }
0x132b   :  { %v7696_v11 = vpop.xlane.xlu0 %7695 }
0x132c   :  { %v7699_v2 = vsub.f32 %v7687_v5, %v7697_v6  ;;  %v7698_v13 = vmul.f32 0.03125, %v7696_v11  ;;  %v10624_v11 = vld [vmem:[%s13795_s6 + $0x2c] ss:$16 sps:$4 sm:$0xff]  }
0x132e   :  { %v7700_v16 = vsub.f32 %v7688_v12, %v7698_v13  ;;  %v7701_v4 = vmul.f32 %v7699_v2, %v7699_v2  ;;  %v10856_v13 = vmov 0  }
0x1330   :  { %v7703_v18 = vsel %vm219_vm0, %v7701_v4, 0.0  ;;  %v7702_v32 = vmul.f32 %v7700_v16, %v7700_v16  ;;  %v10625_v4 = vld [vmem:[%s13795_s6 + $0x48] ss:$16 sps:$4 sm:$0xff]  }
0x1331   :  { %7704 = vadd.xlane.f32.xlu0 %v7703_v18  ;;  %v10630_v18 = vld [vmem:[%s13795_s6 + $0x6c] ss:$16 sps:$4 sm:$0xff]  }
0x1332   :  { %v7706_v19 = vsel %vm219_vm0, %v7702_v32, 0.0  ;;  %v10628_v32 = vld [vmem:[%s13795_s6 + $0x68] ss:$16 sps:$4 sm:$0xff]  }
0x1333   :  { %7707 = vadd.xlane.f32.xlu1 %v7706_v19  ;;  %v10633_v19 = vld [vmem:[%s13795_s6 + $0x8c] ss:$16 sps:$4 sm:$0xff]  }
0x13be   :  { %v7705_v24 = vpop.xlane.xlu0 %7704 }
0x13bf   :  { %v7709_v26 = vmul.f32 0.03125, %v7705_v24  ;;  %v10634_v24 = vld [vmem:[%s13795_s6 + $0xa8] ss:$16 sps:$4 sm:$0xff]  }
0x13c0   :  { %v7708_v27 = vpop.xlane.xlu1 %7707 }
0x13c1   :  { %v7711_v29 = vadd.f32 1e-12, %v7709_v26  ;;  %v7710_v1 = vmul.f32 0.03125, %v7708_v27  ;;  %v10639_v26 = vld [vmem:[%s13795_s6 + $0xcc] ss:$16 sps:$4 sm:$0xff]  }
0x13c2   :  { %v10637_v27 = vld [vmem:[%s13795_s6 + $0xc8] ss:$16 sps:$4 sm:$0xff]  }
0x13c3   :  { %10827 = vrsqrt.f32 %v7711_v29  ;;  %v7712_v58 = vadd.f32 1e-12, %v7710_v1  ;;  %v10642_v29 = vld [vmem:[%s13795_s6 + $0xec] ss:$16 sps:$4 sm:$0xff]   ;;  %v10640_v1 = vld [vmem:[%s13795_s6 + $0xe8] ss:$16 sps:$4 sm:$0xff]  }
0x13c5   :  { %10829 = vrsqrt.f32 %v7712_v58  ;;  %v13414_v58 = vpack.c.bf16 %v13109_v44, %v13109_v44 }
0x13cd   :  { %v10828_v33 = vpop.eup %10827 }
0x13ce   :  { %v7715_v37 = vmul.f32 %v10828_v33, %v7699_v2  ;;  %v10622_v2 = vld [vmem:[%s13795_s6 + $0x28] ss:$16 sps:$4 sm:$0xff]   ;;  %v7818_v33 = vld [vmem:[%s13791_s3 + $0x63] ss:$0 sm:$0xff] }
0x13cf   :  { %v10830_v38 = vpop.eup %10829 }
0x13d0   :  { %v7717_v10 = vmul.f32 %v7715_v37, %v7689_v35  ;;  %v7716_v39 = vmul.f32 %v10830_v38, %v7700_v16  ;;  %v10627_v16 = vld [vmem:[%s13795_s6 + $0x4c] ss:$16 sps:$4 sm:$0xff]  }
0x13d2   :  { %v7718_v17 = vmul.f32 %v7716_v39, %v7689_v35  ;;  %v13320_v41 = vadd.f32 %v7717_v10, %v7690_v40 }
0x13d4   :  { %v13322_v42 = vadd.f32 %v7718_v17, %v7690_v40 }
0x13d6   :  { %v7725_v43 = vpack.c.bf16 %v13322_v42, %v13320_v41 }
0x13d8   :  { %10435 = vmatmul.mubr.msk.bf16.vlgmr.msra.gmra.mrb[204].mxu1 %vm219_vm0, %v7725_v43 }
0x13d9   :  { %10460 = vmatprep.mubr.msk.bf16.mxu1 %vm10850_vm7, %v10843_v7 }
0x14ab   :  { %v7776_v23 = vpop.f32.mrb[204].mxu1 }
0x14ac   :  { %v7777_v34 = vadd.f32 %v7776_v23, %v7726_v55  ;;  %v10436_v56 = vpop.f32.mrb[205].mxu1  ;;  %v10672_v23 = vld [vmem:[%s13795_s6 + $0x10c] ss:$16 sps:$4 sm:$0xff]  }
0x14ad   :  { %v7779_v20 = vpop.f32.mrb[206].mxu1  ;;  %v10676_v56 = vld [vmem:[%s13795_s6 + $0x128] ss:$16 sps:$4 sm:$0xff]  }
0x14ae   :  { %v7783_v30 = vmul.f32 %v7777_v34, %v7777_v34  ;;  %v7780_v7 = vadd.f32 %v7779_v20, %v7726_v55  ;;  %v10437_v22 = vpop.f32.mrb[207].mxu1 }
0x14b0   :  { %v7785_v9 = vmul.f32 %v7783_v30, %v7777_v34  ;;  %v7784_v62 = vmul.f32 %v7780_v7, %v7780_v7 }
0x14b2   :  { %v7787_v60 = vmul.f32 0.044715, %v7785_v9  ;;  %v7786_v57 = vmul.f32 %v7784_v62, %v7780_v7 }
0x14b4   :  { %v7789_v59 = vadd.f32 %v7787_v60, %v7777_v34  ;;  %v7788_v46 = vmul.f32 0.044715, %v7786_v57  ;;  %v7910_v57 = vld [vmem:[%s13791_s3 + $0x64] ss:$0 sm:$0xff] }
0x14b6   :  { %v7791_v3 = vmul.f32 0.7978846, %v7789_v59  ;;  %v7790_v63 = vadd.f32 %v7788_v46, %v7780_v7 }
0x14b8   :  { %10831 = vtanh.f32 %v7791_v3  ;;  %v7792_v0 = vmul.f32 0.7978846, %v7790_v63 }
0x14ba   :  { %10833 = vtanh.f32 %v7792_v0  ;;  %v7911_v0 = vld [vmem:[%s13791_s3 + $0x65] ss:$0 sm:$0xff] }
0x14c2   :  { %v10832_v15 = vpop.eup %10831 }
0x14c3   :  { %v7795_v8 = vadd.f32 1.0, %v10832_v15 }
0x14c4   :  { %v10834_v5 = vpop.eup %10833 }
0x14c5   :  { %v7797_v61 = vmul.f32 0.5, %v7795_v8  ;;  %v7796_v31 = vadd.f32 1.0, %v10834_v5 }
0x14c7   :  { %v7798_v12 = vmul.f32 0.5, %v7796_v31  ;;  %v7799_v36 = vmul.f32 %v7797_v61, %v7777_v34  ;;  %v10678_v34 = vld [vmem:[%s13795_s6 + $0x12c] ss:$16 sps:$4 sm:$0xff]   ;;  %v10645_v61 = vld [vmem:[%s13795_s6 + $0x4] ss:$16 sps:$4 sm:$0xff]  }
0x14c9   :  { %v7800_v14 = vmul.f32 %v7798_v12, %v7780_v7  ;;  %v7942_v12 = vld [vmem:[%s13789_s4 + $0x110] sm:$0xf] }
0x14cb   :  { %v7817_v6 = vpack.c.bf16 %v7800_v14, %v7799_v36  ;;  %v10643_v36 = vld [vmem:[%s13795_s6] ss:$16 sps:$4 sm:$0xff]   ;;  %v10648_v14 = vld [vmem:[%s13795_s6 + $0x24] ss:$16 sps:$4 sm:$0xff]  }
0x14cd   :  { %10455 = vmatmul.mubr.bf16.vlgmr.msra.gmra.mrb[0].mxu0 %v7817_v6  ;;  %v10651_v6 = vld [vmem:[%s13795_s6 + $0x44] ss:$16 sps:$4 sm:$0xff]  }
0x14ce   :  { %8224 = vmatpush1.bf16.msra.mxu0 %v10619_v25  ;;  %8255 = vmatprep.mubr.bf16.mxu0 %v10856_v13  ;;  %v10646_v25 = vld [vmem:[%s13795_s6 + $0x20] ss:$16 sps:$4 sm:$0xff]  }
0x14cf   :  { %8225 = vmatprep.subr.bf16.mxu0 %v10624_v11  ;;  %v10649_v11 = vld [vmem:[%s13795_s6 + $0x40] ss:$16 sps:$4 sm:$0xff]  }
0x14d2   :  { %8226 = vmatpush1.bf16.msra.mxu0 %v10622_v2  ;;  %v10654_v2 = vld [vmem:[%s13795_s6 + $0x64] ss:$16 sps:$4 sm:$0xff]  }
0x14d3   :  { %8227 = vmatprep.subr.bf16.mxu0 %v10627_v16  ;;  %v10652_v16 = vld [vmem:[%s13795_s6 + $0x60] ss:$16 sps:$4 sm:$0xff]  }
0x14d6   :  { %8228 = vmatpush1.bf16.msra.mxu0 %v10625_v4  ;;  %v10657_v4 = vld [vmem:[%s13795_s6 + $0x84] ss:$16 sps:$4 sm:$0xff]  }
0x14d7   :  { %8229 = vmatprep.subr.bf16.mxu0 %v10630_v18  ;;  %v10655_v18 = vld [vmem:[%s13795_s6 + $0x80] ss:$16 sps:$4 sm:$0xff]  }
0x14da   :  { %8230 = vmatpush1.bf16.msra.mxu0 %v10628_v32  ;;  %v10660_v32 = vld [vmem:[%s13795_s6 + $0xa4] ss:$16 sps:$4 sm:$0xff]  }
0x14db   :  { %8231 = vmatprep.subr.bf16.mxu0 %v10633_v19  ;;  %v10658_v19 = vld [vmem:[%s13795_s6 + $0xa0] ss:$16 sps:$4 sm:$0xff]  }
0x14de   :  { %8232 = vmatpush1.bf16.msra.mxu0 %v10631_v28  ;;  %v10663_v28 = vld [vmem:[%s13795_s6 + $0xc4] ss:$16 sps:$4 sm:$0xff]  }
0x14df   :  { %8233 = vmatprep.subr.bf16.mxu0 %v10636_v21  ;;  %v10661_v21 = vld [vmem:[%s13795_s6 + $0xc0] ss:$16 sps:$4 sm:$0xff]  }
0x14e2   :  { %8234 = vmatpush1.bf16.msra.mxu0 %v10634_v24  ;;  %v10666_v24 = vld [vmem:[%s13795_s6 + $0xe4] ss:$16 sps:$4 sm:$0xff]  }
0x14e3   :  { %8235 = vmatprep.subr.bf16.mxu0 %v10639_v26  ;;  %v10664_v26 = vld [vmem:[%s13795_s6 + $0xe0] ss:$16 sps:$4 sm:$0xff]  }
0x14e6   :  { %8236 = vmatpush1.bf16.msra.mxu0 %v10637_v27  ;;  %v10669_v27 = vld [vmem:[%s13795_s6 + $0x104] ss:$16 sps:$4 sm:$0xff]  }
0x14e7   :  { %8237 = vmatprep.subr.bf16.mxu0 %v10642_v29  ;;  %v10667_v29 = vld [vmem:[%s13795_s6 + $0x100] ss:$16 sps:$4 sm:$0xff]  }
0x14ea   :  { %8238 = vmatpush1.bf16.msra.mxu0 %v10640_v1  ;;  %v10675_v1 = vld [vmem:[%s13795_s6 + $0x124] ss:$16 sps:$4 sm:$0xff]  }
0x14eb   :  { %8382 = vmatprep.subr.bf16.mxu0 %v10672_v23  ;;  %v10708_v23 = vld [vmem:[%s13792_s5 + $0xd4] ss:$8 sps:$4 sm:$0xff]  }
0x14ed   :  { %8256 = vmatmul.mubr.bf16.vlgmr.msra.gmra.mrb[4].mxu0 %v13414_v58 }
0x14ee   :  { %8414 = vmatprep.mubr.bf16.mxu0 %v10856_v13 }
0x15a0   :  { %v7901_v35 = vpop.f32.mrb[0].mxu0 }
0x15a1   :  { %v7902_v37 = vadd.f32 %v7901_v35, %v7818_v33  ;;  %v10456_v38 = vpop.f32.mrb[1].mxu0  ;;  %v10681_v35 = vld [vmem:[%s13792_s5 + $0x44] ss:$8 sps:$4 sm:$0xff]  }
0x15a2   :  { %v7904_v10 = vpop.f32.mrb[2].mxu0  ;;  %v10679_v38 = vld [vmem:[%s13792_s5 + $0x40] ss:$8 sps:$4 sm:$0xff]  }
0x15a3   :  { %v7908_v39 = vadd.f32 %v7902_v37, %v13320_v41  ;;  %v7905_v40 = vadd.f32 %v7904_v10, %v7818_v33  ;;  %v10457_v17 = vpop.f32.mrb[3].mxu0  ;;  %v10673_v33 = vld [vmem:[%s13795_s6 + $0x120] ss:$16 sps:$4 sm:$0xff]  }
0x15a4   :  { %v10682_v17 = vld [vmem:[%s13792_s5 + $0x50] ss:$8 sps:$4 sm:$0xff]  }
0x15a5   :  { %v7909_v43 = vadd.f32 %v7905_v40, %v13322_v42  ;;  %v7912_v44 = vsel %vm219_vm0, %v7908_v39, 0.0  ;;  %v10670_v42 = vld [vmem:[%s13795_s6 + $0x108] ss:$16 sps:$4 sm:$0xff]  }
0x15a6   :  { %7913 = vadd.xlane.f32.xlu0 %v7912_v44  ;;  %8383 = vmatpush1.bf16.msra.mxu0 %v10670_v42  ;;  %v10685_v44 = vld [vmem:[%s13792_s5 + $0x60] ss:$8 sps:$4 sm:$0xff]  }
0x15a7   :  { %v7915_v45 = vsel %vm219_vm0, %v7909_v43, 0.0  ;;  %8384 = vmatprep.subr.bf16.mxu0 %v10678_v34  ;;  %v10703_v42 = vld [vmem:[%s13792_s5 + $0xc0] ss:$8 sps:$4 sm:$0xff]   ;;  %v10706_v34 = vld [vmem:[%s13792_s5 + $0xd0] ss:$8 sps:$4 sm:$0xff]  }
0x15a8   :  { %7916 = vadd.xlane.f32.xlu1 %v7915_v45  ;;  %v10690_v45 = vld [vmem:[%s13792_s5 + $0x74] ss:$8 sps:$4 sm:$0xff]  }
0x15aa   :  { %8385 = vmatpush1.bf16.msra.mxu0 %v10676_v56  ;;  %v10711_v56 = vld [vmem:[%s13792_s5 + $0xe4] ss:$8 sps:$4 sm:$0xff]  }
0x1633   :  { %v7914_v47 = vpop.xlane.xlu0 %7913 }
0x1634   :  { %v7918_v48 = vmul.f32 0.03125, %v7914_v47  ;;  %v10688_v47 = vld [vmem:[%s13792_s5 + $0x70] ss:$8 sps:$4 sm:$0xff]  }
0x1635   :  { %v7917_v49 = vpop.xlane.xlu1 %7916 }
0x1636   :  { %v7920_v50 = vsub.f32 %v7908_v39, %v7918_v48  ;;  %v7919_v51 = vmul.f32 0.03125, %v7917_v49  ;;  %v10684_v39 = vld [vmem:[%s13792_s5 + $0x54] ss:$8 sps:$4 sm:$0xff]   ;;  %v10693_v48 = vld [vmem:[%s13792_s5 + $0x84] ss:$8 sps:$4 sm:$0xff]  }
0x1637   :  { %v10691_v49 = vld [vmem:[%s13792_s5 + $0x80] ss:$8 sps:$4 sm:$0xff]  }
0x1638   :  { %v7921_v52 = vsub.f32 %v7909_v43, %v7919_v51  ;;  %v7922_v53 = vmul.f32 %v7920_v50, %v7920_v50  ;;  %v10687_v43 = vld [vmem:[%s13792_s5 + $0x64] ss:$8 sps:$4 sm:$0xff]   ;;  %v10694_v51 = vld [vmem:[%s13792_s5 + $0x90] ss:$8 sps:$4 sm:$0xff]  }
0x163a   :  { %v7924_v54 = vsel %vm219_vm0, %v7922_v53, 0.0  ;;  %v7923_v41 = vmul.f32 %v7921_v52, %v7921_v52  ;;  %v10697_v53 = vld [vmem:[%s13792_s5 + $0xa0] ss:$8 sps:$4 sm:$0xff]  }
0x163b   :  { %7925 = vadd.xlane.f32.xlu0 %v7924_v54  ;;  %v10702_v54 = vld [vmem:[%s13792_s5 + $0xb4] ss:$8 sps:$4 sm:$0xff]  }
0x163c   :  { %v7927_v55 = vsel %vm219_vm0, %v7923_v41, 0.0  ;;  %v10700_v41 = vld [vmem:[%s13792_s5 + $0xb0] ss:$8 sps:$4 sm:$0xff]  }
0x163d   :  { %7928 = vadd.xlane.f32.xlu1 %v7927_v55  ;;  %v10705_v55 = vld [vmem:[%s13792_s5 + $0xc4] ss:$8 sps:$4 sm:$0xff]  }
0x16c8   :  { %v7926_v20 = vpop.xlane.xlu0 %7925 }
0x16c9   :  { %v7930_v30 = vmul.f32 0.03125, %v7926_v20  ;;  %v10709_v20 = vld [vmem:[%s13792_s5 + $0xe0] ss:$8 sps:$4 sm:$0xff]  }
0x16ca   :  { %v7929_v7 = vpop.xlane.xlu1 %7928 }
0x16cb   :  { %v7932_v22 = vadd.f32 1e-12, %v7930_v30  ;;  %v7931_v9 = vmul.f32 0.03125, %v7929_v7  ;;  %v10714_v30 = vld [vmem:[%s13792_s5 + $0xf4] ss:$8 sps:$4 sm:$0xff]  }
0x16cc   :  { %v10712_v7 = vld [vmem:[%s13792_s5 + $0xf0] ss:$8 sps:$4 sm:$0xff]  }
0x16cd   :  { %10835 = vrsqrt.f32 %v7932_v22  ;;  %v7933_v62 = vadd.f32 1e-12, %v7931_v9  ;;  %v10717_v22 = vld [vmem:[%s13792_s5 + $0x104] ss:$8 sps:$4 sm:$0xff]   ;;  %v10715_v9 = vld [vmem:[%s13792_s5 + $0x100] ss:$8 sps:$4 sm:$0xff]  }
0x16cf   :  { %10837 = vrsqrt.f32 %v7933_v62  ;;  %v10720_v62 = vld [vmem:[%s13792_s5 + $0x114] ss:$8 sps:$4 sm:$0xff]  }
0x16d7   :  { %v10836_v60 = vpop.eup %10835 }
0x16d8   :  { %v7936_v59 = vmul.f32 %v10836_v60, %v7920_v50  ;;  %v10696_v50 = vld [vmem:[%s13792_s5 + $0x94] ss:$8 sps:$4 sm:$0xff]   ;;  %v10718_v60 = vld [vmem:[%s13792_s5 + $0x110] ss:$8 sps:$4 sm:$0xff]  }
0x16d9   :  { %v10838_v46 = vpop.eup %10837 }
0x16da   :  { %v7937_v3 = vmul.f32 %v10838_v46, %v7921_v52  ;;  %v7938_v63 = vmul.f32 %v7936_v59, %v7910_v57  ;;  %v10699_v52 = vld [vmem:[%s13792_s5 + $0xa4] ss:$8 sps:$4 sm:$0xff]   ;;  %v10721_v59 = vld [vmem:[%s13792_s5 + $0x120] ss:$8 sps:$4 sm:$0xff]   ;;  %v10726_v46 = vld [vmem:[%s13792_s5 + $0x134] ss:$8 sps:$4 sm:$0xff]  }
0x16dc   :  { %v7939_v15 = vmul.f32 %v7937_v3, %v7910_v57  ;;  %v7940_v8 = vadd.f32 %v7938_v63, %v7911_v0  ;;  %v10723_v57 = vld [vmem:[%s13792_s5 + $0x124] ss:$8 sps:$4 sm:$0xff]   ;;  %v10724_v3 = vld [vmem:[%s13792_s5 + $0x130] ss:$8 sps:$4 sm:$0xff]  }
0x16dd   :  { %v10729_v63 = vld [vmem:[%s13792_s5 + $0x144] ss:$8 sps:$4 sm:$0xff]  }
0x16de   :  { %v7941_v5 = vadd.f32 %v7939_v15, %v7911_v0  ;;  %v10775_v0 = vld [vmem:[%s13789_s4 + $0x158] sm:$0xff]  }
0x16df   :  { %v10776_v15 = vld [vmem:[%s13789_s4 + $0x118] sm:$0xff]   ;;  %9776 = vmatprep.subr.bf16.mxu0 %v10775_v0 }
0x16e0   :  { %v7943_v31 = vpack.c.bf16 %v7941_v5, %v7940_v8  ;;  %v10777_v8 = vld [vmem:[%s13789_s4 + $0x160] sm:$0xff]   ;;  %v10768_v0 = vld [vmem:[%s13792_s5 + $0x214] ss:$8 sps:$4 sm:$0xff]  }
0x16e1   :  { %v10778_v5 = vld [vmem:[%s13789_s4 + $0x120] sm:$0xff]  }
0x16e2   :  { %10459 = vmatpush3.bf16.msra.mxu1 %v7943_v31  ;;  %v10780_v31 = vld [vmem:[%s13789_s4 + $0x128] sm:$0xff]  }
0x16e3   :  { %8182 = vmatprep.subr.bf16.mxu1 %v10645_v61  ;;  %v10779_v61 = vld [vmem:[%s13789_s4 + $0x168] sm:$0xff]  }
0x16e5   :  { %10461 = vmatmul.mubr.msk.bf16.vlgmr.msra.gmra.mrb[208].mxu1 %vm7606_vm10, %v7942_v12  ;;  %v10781_v12 = vld [vmem:[%s13789_s4 + $0x170] sm:$0xff]  }
0x16e6   :  { %8183 = vmatpush1.bf16.msra.mxu1 %v10643_v36  ;;  %8214 = vmatprep.mubr.bf16.mxu1 %v10856_v13  ;;  %v10782_v36 = vld [vmem:[%s13789_s4 + $0x130] sm:$0xff]  }
0x16e7   :  { %8184 = vmatprep.subr.bf16.mxu1 %v10648_v14  ;;  %v10783_v14 = vld [vmem:[%s13789_s4 + $0x178] sm:$0xff]  }
0x16ea   :  { %8185 = vmatpush1.bf16.msra.mxu1 %v10646_v25  ;;  %v10784_v25 = vld [vmem:[%s13789_s4 + $0x138] sm:$0xff]  }
0x16eb   :  { %8186 = vmatprep.subr.bf16.mxu1 %v10651_v6  ;;  %v10785_v6 = vld [vmem:[%s13789_s4 + $0x180] sm:$0xff]  }
0x16ee   :  { %8187 = vmatpush1.bf16.msra.mxu1 %v10649_v11  ;;  %v10786_v11 = vld [vmem:[%s13789_s4 + $0x140] sm:$0xff]  }
0x16ef   :  { %8188 = vmatprep.subr.bf16.mxu1 %v10654_v2  ;;  %v8265_v2 = vlaneseq }
0x16f2   :  { %8189 = vmatpush1.bf16.msra.mxu1 %v10652_v16  ;;  %v13649_v16 = vshrl.u32 %v8265_v2, 7  ;;  %v10789_v2 = vld [vmem:[%s13789_s4 + $0x190] sm:$0xff]  }
0x16f3   :  { %8190 = vmatprep.subr.bf16.mxu1 %v10657_v4 }
0x16f4   :  { %v8267_v4 = vsub.s32 0, %v13649_v16 }
0x16f6   :  { %8191 = vmatpush1.bf16.msra.mxu1 %v10655_v18  ;;  %v13655_v18 = vld [vmem:[%s13791_s3 + $0x66] ss:$8 sm:$0xf] }
0x16f7   :  { %8192 = vmatprep.subr.bf16.mxu1 %v10660_v32  ;;  %v8271_v32 = vsub.s32 1, %v13649_v16 }
0x16fa   :  { %8193 = vmatpush1.bf16.msra.mxu1 %v10658_v19  ;;  %v8279_v19 = vsub.s32 3, %v13649_v16 }
0x16fb   :  { %8194 = vmatprep.subr.bf16.mxu1 %v10663_v28  ;;  %v8268_v28 = vrot.slane %v13655_v18, %v8267_v4 }
0x16fe   :  { %8195 = vmatpush1.bf16.msra.mxu1 %v10661_v21  ;;  %v8272_v21 = vrot.slane %v13655_v18, %v8271_v32 }
0x16ff   :  { %8196 = vmatprep.subr.bf16.mxu1 %v10666_v24  ;;  %v8280_v24 = vrot.slane %v13655_v18, %v8279_v19  ;;  %v9291_v19 = vld [vmem:[%s13791_s3 + $0x67] ss:$8 sm:$0x3] }
0x1702   :  { %8197 = vmatpush1.bf16.msra.mxu1 %v10664_v26 }
0x1703   :  { %8341 = vmatprep.subr.bf16.mxu1 %v10669_v27 }
0x1705   :  { %8215 = vmatmul.mubr.bf16.vlgmr.msra.gmra.mrb[212].mxu1 %v13414_v58 }
0x1706   :  { %8342 = vmatpush1.bf16.msra.mxu1 %v10667_v29  ;;  %8373 = vmatprep.mubr.bf16.mxu1 %v10856_v13 }
0x1707   :  { %8343 = vmatprep.subr.bf16.mxu1 %v10675_v1 }
0x170a   :  { %8344 = vmatpush1.bf16.msra.mxu1 %v10673_v33 }
0x170b   :  { %8832 = vmatprep.subr.bf16.mxu1 %v10681_v35 }
0x17b8   :  { %v7981_v37 = vpop.f32.mrb[208].mxu1 }
0x17b9   :  { %v8297_v58 = vpack.c.bf16 %v7981_v37, %v7981_v37  ;;  %v10462_v10 = vpop.f32.mrb[209].mxu1 }
0x17ba   :  { %v7984_v40 = vpop.f32.mrb[210].mxu1 }
0x17bb   :  { %9289 = vmatmul.mubr.msk.bf16.vlgmr.msra.gmra.mrb[212].mxu1 %vm219_vm0, %v8297_v58  ;;  %9290 = vmatmul.mubr.msk.bf16.vlgmr.msra.gmra.mrb[4].mxu0 %vm219_vm0, %v8297_v58  ;;  %v10463_v13 = vpop.f32.mrb[211].mxu1 }
0x17bc   :  { %8833 = vmatpush1.bf16.msra.mxu1 %v10679_v38  ;;  %9777 = vmatpush3.bf16.msra.mxu0 %v10776_v15  ;;  %v10766_v15 = vld [vmem:[%s13792_s5 + $0x210] ss:$8 sps:$4 sm:$0xff]  }
0x17bd   :  { %8834 = vmatprep.subr.bf16.mxu1 %v10684_v39  ;;  %9778 = vmatprep.subr.bf16.mxu0 %v10777_v8 }
0x17c0   :  { %8835 = vmatpush1.bf16.msra.mxu1 %v10682_v17  ;;  %9779 = vmatpush3.bf16.msra.mxu0 %v10778_v5  ;;  %v10771_v5 = vld [vmem:[%s13792_s5 + $0x224] ss:$8 sps:$4 sm:$0xff]  }
0x17c1   :  { %8836 = vmatprep.subr.bf16.mxu1 %v10687_v43  ;;  %9780 = vmatprep.subr.bf16.mxu0 %v10779_v61  ;;  %v10769_v61 = vld [vmem:[%s13792_s5 + $0x220] ss:$8 sps:$4 sm:$0xff]  }
0x17c4   :  { %8837 = vmatpush1.bf16.msra.mxu1 %v10685_v44  ;;  %9781 = vmatpush3.bf16.msra.mxu0 %v10780_v31  ;;  %v10727_v44 = vld [vmem:[%s13792_s5 + $0x140] ss:$8 sps:$4 sm:$0xff]  }
0x17c5   :  { %8838 = vmatprep.subr.bf16.mxu1 %v10690_v45  ;;  %9782 = vmatprep.subr.bf16.mxu0 %v10781_v12  ;;  %v10774_v12 = vld [vmem:[%s13792_s5 + $0x234] ss:$8 sps:$4 sm:$0xff]  }
0x17c8   :  { %8839 = vmatpush1.bf16.msra.mxu1 %v10688_v47  ;;  %9783 = vmatpush3.bf16.msra.mxu0 %v10782_v36  ;;  %v10732_v47 = vld [vmem:[%s13792_s5 + $0x154] ss:$8 sps:$4 sm:$0xff]   ;;  %v10772_v36 = vld [vmem:[%s13792_s5 + $0x230] ss:$8 sps:$4 sm:$0xff]  }
0x17c9   :  { %8840 = vmatprep.subr.bf16.mxu1 %v10693_v48  ;;  %9784 = vmatprep.subr.bf16.mxu0 %v10783_v14 }
0x17cc   :  { %8841 = vmatpush1.bf16.msra.mxu1 %v10691_v49  ;;  %9785 = vmatpush3.bf16.msra.mxu0 %v10784_v25  ;;  %v10730_v49 = vld [vmem:[%s13792_s5 + $0x150] ss:$8 sps:$4 sm:$0xff]  }
0x17cd   :  { %8842 = vmatprep.subr.bf16.mxu1 %v10696_v50  ;;  %9786 = vmatprep.subr.bf16.mxu0 %v10785_v6  ;;  %v10735_v50 = vld [vmem:[%s13792_s5 + $0x164] ss:$8 sps:$4 sm:$0xff]  }
0x17ce   :  { %v10787_v6 = vld [vmem:[%s13789_s4 + $0x188] sm:$0xff]  }
0x17d0   :  { %8843 = vmatpush1.bf16.msra.mxu1 %v10694_v51  ;;  %9787 = vmatpush3.bf16.msra.mxu0 %v10786_v11  ;;  %v10733_v51 = vld [vmem:[%s13792_s5 + $0x160] ss:$8 sps:$4 sm:$0xff]  }
0x17d1   :  { %8844 = vmatprep.subr.bf16.mxu1 %v10699_v52  ;;  %v10738_v52 = vld [vmem:[%s13792_s5 + $0x174] ss:$8 sps:$4 sm:$0xff]   ;;  %v10788_v11 = vld [vmem:[%s13789_s4 + $0x148] sm:$0xff]   ;;  %9788 = vmatprep.subr.bf16.mxu0 %v10787_v6 }
0x17d4   :  { %8845 = vmatpush1.bf16.msra.mxu1 %v10697_v53  ;;  %v10736_v53 = vld [vmem:[%s13792_s5 + $0x170] ss:$8 sps:$4 sm:$0xff]   ;;  %9789 = vmatpush3.bf16.msra.mxu0 %v10788_v11 }
0x17d5   :  { %8846 = vmatprep.subr.bf16.mxu1 %v10702_v54  ;;  %v10741_v54 = vld [vmem:[%s13792_s5 + $0x184] ss:$8 sps:$4 sm:$0xff]   ;;  %9790 = vmatprep.subr.bf16.mxu0 %v10789_v2 }
0x17d8   :  { %8847 = vmatpush1.bf16.msra.mxu1 %v10700_v41  ;;  %v10739_v41 = vld [vmem:[%s13792_s5 + $0x180] ss:$8 sps:$4 sm:$0xff]  }
0x17d9   :  { %8848 = vmatprep.subr.bf16.mxu1 %v10705_v55  ;;  %v10744_v55 = vld [vmem:[%s13792_s5 + $0x194] ss:$8 sps:$4 sm:$0xff]  }
0x17dc   :  { %8849 = vmatpush1.bf16.msra.mxu1 %v10703_v42  ;;  %v10742_v42 = vld [vmem:[%s13792_s5 + $0x190] ss:$8 sps:$4 sm:$0xff]  }
0x17dd   :  { %8850 = vmatprep.subr.bf16.mxu1 %v10708_v23  ;;  %v10747_v23 = vld [vmem:[%s13792_s5 + $0x1a4] ss:$8 sps:$4 sm:$0xff]  }
0x17e0   :  { %8851 = vmatpush1.bf16.msra.mxu1 %v10706_v34  ;;  %v10745_v34 = vld [vmem:[%s13792_s5 + $0x1a0] ss:$8 sps:$4 sm:$0xff]  }
0x17e1   :  { %8852 = vmatprep.subr.bf16.mxu1 %v10711_v56  ;;  %v10750_v56 = vld [vmem:[%s13792_s5 + $0x1b4] ss:$8 sps:$4 sm:$0xff]  }
0x17e4   :  { %8853 = vmatpush1.bf16.msra.mxu1 %v10709_v20  ;;  %v10748_v20 = vld [vmem:[%s13792_s5 + $0x1b0] ss:$8 sps:$4 sm:$0xff]  }
0x17e5   :  { %8854 = vmatprep.subr.bf16.mxu1 %v10714_v30  ;;  %v10753_v30 = vld [vmem:[%s13792_s5 + $0x1c4] ss:$8 sps:$4 sm:$0xff]  }
0x17e8   :  { %8855 = vmatpush1.bf16.msra.mxu1 %v10712_v7  ;;  %v10751_v7 = vld [vmem:[%s13792_s5 + $0x1c0] ss:$8 sps:$4 sm:$0xff]  }
0x17e9   :  { %8856 = vmatprep.subr.bf16.mxu1 %v10717_v22  ;;  %v10756_v22 = vld [vmem:[%s13792_s5 + $0x1d4] ss:$8 sps:$4 sm:$0xff]  }
0x17ec   :  { %8857 = vmatpush1.bf16.msra.mxu1 %v10715_v9  ;;  %v10754_v9 = vld [vmem:[%s13792_s5 + $0x1d0] ss:$8 sps:$4 sm:$0xff]  }
0x17ed   :  { %8858 = vmatprep.subr.bf16.mxu1 %v10720_v62  ;;  %v10759_v62 = vld [vmem:[%s13792_s5 + $0x1e4] ss:$8 sps:$4 sm:$0xff]  }
0x17f0   :  { %8859 = vmatpush1.bf16.msra.mxu1 %v10718_v60  ;;  %v10757_v60 = vld [vmem:[%s13792_s5 + $0x1e0] ss:$8 sps:$4 sm:$0xff]  }
0x17f1   :  { %8860 = vmatprep.subr.bf16.mxu1 %v10723_v57  ;;  %v10762_v57 = vld [vmem:[%s13792_s5 + $0x1f4] ss:$8 sps:$4 sm:$0xff]  }
0x17f4   :  { %8861 = vmatpush1.bf16.msra.mxu1 %v10721_v59  ;;  %v10760_v59 = vld [vmem:[%s13792_s5 + $0x1f0] ss:$8 sps:$4 sm:$0xff]  }
0x17f5   :  { %8862 = vmatprep.subr.bf16.mxu1 %v10726_v46  ;;  %v10765_v46 = vld [vmem:[%s13792_s5 + $0x204] ss:$8 sps:$4 sm:$0xff]  }
0x17f8   :  { %8863 = vmatpush1.bf16.msra.mxu1 %v10724_v3  ;;  %v10763_v3 = vld [vmem:[%s13792_s5 + $0x200] ss:$8 sps:$4 sm:$0xff]  }
0x17f9   :  { %8873 = vmatprep.subr.bf16.mxu1 %v10729_v63  ;;  %v8275_v63 = vsub.s32 2, %v13649_v16 }
0x17fb   :  { %v8276_v8 = vrot.slane %v13655_v18, %v8275_v63  ;;  %v10790_v18 = vld [vmem:[%s13789_s4 + $0x150] sm:$0xff]  }
0x17fc   :  { %9791 = vmatpush3.bf16.msra.mxu0 %v10790_v18 }
0x188e   :  { %v8375_v26 = vpop.f32.mrb[212].mxu1  ;;  %v13666_v27 = vpop.f32.mrb[4].mxu0 }
0x188f   :  { %v10480_v29 = vadd.f32 %v8375_v26, %v8268_v28  ;;  %v8377_v1 = vpop.f32.mrb[213].mxu1  ;;  %v8418_v33 = vpop.f32.mrb[5].mxu0  ;;  %v10482_v31 = vadd.f32 %v13666_v27, %v8276_v8  ;;  %v8505_v28 = vrot.slane %v9291_v19, %v8267_v4  ;;  %v8950_v4 = vld [vmem:[%s13791_s3 + $0x80] ss:$0 sm:$0xff] }
0x1890   :  { %v10481_v35 = vadd.f32 %v8377_v1, %v8272_v21  ;;  %v10483_v37 = vadd.f32 %v8418_v33, %v8280_v24  ;;  %v8379_v38 = vpop.f32.mrb[214].mxu1  ;;  %v8420_v58 = vpop.f32.mrb[6].mxu0  ;;  %v8509_v21 = vrot.slane %v9291_v19, %v8271_v32 }
0x1891   :  { %v8427_v10 = vmax.f32 %v10480_v29, 0.0  ;;  %v8380_v39 = vpop.f32.mrb[215].mxu1  ;;  %v8421_v40 = vpop.f32.mrb[7].mxu0  ;;  %v8429_v14 = vmax.f32 %v10482_v31, 0.0 }
0x1892   :  { %v8428_v13 = vmax.f32 %v10481_v35, 0.0  ;;  %v8430_v17 = vmax.f32 %v10483_v37, 0.0 }
0x1893   :  { %v8495_v45 = vpack.c.bf16 %v8427_v10, %v8427_v10  ;;  %v8497_v25 = vpack.c.bf16 %v8429_v14, %v8429_v14 }
0x1894   :  { %v8496_v43 = vpack.c.bf16 %v8428_v13, %v8428_v13  ;;  %v8498_v48 = vpack.c.bf16 %v8430_v17, %v8430_v17 }
0x1896   :  { %8864 = vmatprep.mubr.bf16.mxu1 %v8496_v43 }
0x1897   :  { %8865 = vmatmul.mubr.bf16.vlgmr.msra.gmra.mrb[216].mxu1 %v8495_v45 }
0x1898   :  { %8874 = vmatpush1.bf16.msra.mxu1 %v10727_v44  ;;  %8905 = vmatprep.mubr.bf16.mxu1 %v8498_v48 }
0x1899   :  { %8875 = vmatprep.subr.bf16.mxu1 %v10732_v47 }
0x189c   :  { %8876 = vmatpush1.bf16.msra.mxu1 %v10730_v49 }
0x189d   :  { %8877 = vmatprep.subr.bf16.mxu1 %v10735_v50 }
0x18a0   :  { %8878 = vmatpush1.bf16.msra.mxu1 %v10733_v51 }
0x18a1   :  { %8879 = vmatprep.subr.bf16.mxu1 %v10738_v52 }
0x18a4   :  { %8880 = vmatpush1.bf16.msra.mxu1 %v10736_v53 }
0x18a5   :  { %8881 = vmatprep.subr.bf16.mxu1 %v10741_v54 }
0x18a8   :  { %8882 = vmatpush1.bf16.msra.mxu1 %v10739_v41 }
0x18a9   :  { %8883 = vmatprep.subr.bf16.mxu1 %v10744_v55 }
0x18ac   :  { %8884 = vmatpush1.bf16.msra.mxu1 %v10742_v42 }
0x18ad   :  { %8885 = vmatprep.subr.bf16.mxu1 %v10747_v23 }
0x18b0   :  { %8886 = vmatpush1.bf16.msra.mxu1 %v10745_v34 }
0x18b1   :  { %8887 = vmatprep.subr.bf16.mxu1 %v10750_v56 }
0x18b4   :  { %8888 = vmatpush1.bf16.msra.mxu1 %v10748_v20 }
0x18b5   :  { %8889 = vmatprep.subr.bf16.mxu1 %v10753_v30 }
0x18b8   :  { %8890 = vmatpush1.bf16.msra.mxu1 %v10751_v7 }
0x18b9   :  { %8891 = vmatprep.subr.bf16.mxu1 %v10756_v22 }
0x18bc   :  { %8892 = vmatpush1.bf16.msra.mxu1 %v10754_v9 }
0x18bd   :  { %8893 = vmatprep.subr.bf16.mxu1 %v10759_v62 }
0x18c0   :  { %8894 = vmatpush1.bf16.msra.mxu1 %v10757_v60 }
0x18c1   :  { %8895 = vmatprep.subr.bf16.mxu1 %v10762_v57 }
0x18c4   :  { %8896 = vmatpush1.bf16.msra.mxu1 %v10760_v59 }
0x18c5   :  { %8897 = vmatprep.subr.bf16.mxu1 %v10765_v46 }
0x18c8   :  { %8898 = vmatpush1.bf16.msra.mxu1 %v10763_v3 }
0x18c9   :  { %8899 = vmatprep.subr.bf16.mxu1 %v10768_v0 }
0x18cc   :  { %8900 = vmatpush1.bf16.msra.mxu1 %v10766_v15 }
0x18cd   :  { %8901 = vmatprep.subr.bf16.mxu1 %v10771_v5 }
0x18d0   :  { %8902 = vmatpush1.bf16.msra.mxu1 %v10769_v61 }
0x18d1   :  { %8903 = vmatprep.subr.bf16.mxu1 %v10774_v12 }
0x18d4   :  { %8904 = vmatpush1.bf16.msra.mxu1 %v10772_v36 }
0x18d7   :  { %8906 = vmatmul.mubr.bf16.vlgmr.msra.gmra.mrb[216].mxu1 %v8497_v25 }
0x19aa   :  { %v8907_v24 = vpop.f32.mrb[216].mxu1 }
0x19ab   :  { %v10484_v26 = vadd.f32 %v8907_v24, %v8505_v28  ;;  %v8909_v27 = vpop.f32.mrb[217].mxu1 }
0x19ac   :  { %v10485_v29 = vadd.f32 %v8909_v27, %v8509_v21  ;;  %v8911_v1 = vpop.f32.mrb[218].mxu1 }
0x19ad   :  { %v8914_v33 = vmax.f32 %v10484_v26, 0.0  ;;  %v8912_v35 = vpop.f32.mrb[219].mxu1 }
0x19ae   :  { %v8915_v37 = vmax.f32 %v10485_v29, 0.0 }
0x19af   :  { %v8948_v58 = vpack.c.bf16 %v8914_v33, %v8914_v33 }
0x19b0   :  { %v8949_v38 = vpack.c.bf16 %v8915_v37, %v8915_v37 }
0x19b2   :  { %9079 = vmatprep.mubr.bf16.mxu0 %v8949_v38 }
0x19b3   :  { %9080 = vmatmul.mubr.bf16.vlgmr.msra.gmra.mrb[8].mxu0 %v8948_v58 }
0x1a86   :  { %v9792_v10 = vpop.f32.mrb[8].mxu0 }
0x1a87   :  { %v9793_v39 = vpop.f32.mrb[9].mxu0 }
0x1a88   :  { %v9794_v16 = vadd.f32 %v9793_v39, %v9792_v10  ;;  %v9795_v32 = vpop.f32.mrb[10].mxu0 }
0x1a89   :  { %v9796_v40 = vpop.f32.mrb[11].mxu0 }
0x1a8a   :  { %v9082_v13 = vadd.f32 %v9794_v16, %v8950_v4 }
0x1a8c   :  { %9087 = vst [vmem:[%s13796_s7] sm:$0xff] %v9082_v13 }

</bundles_post_ra>
